<compile_context>
chip_gen: v6e
topology: v6e:2x2x1
jax: 0.10.0
libtpu: 0.0.40
codegen_flags: <defaults>
</compile_context>

<pallas_src>
import functools

import jax
import jax.numpy as jnp
from jax.experimental import pallas as pl
from jax.experimental.pallas import tpu as pltpu


def _round_up(v, m):
    return (v + m - 1) // m * m


# ----------------------------------------------------------------------------
# Pallas kernel 1: lane-dense matmul + bias (+ ReLU)
#   out (Cout, M) = w (Cout, K) @ x (K, M) + b (Cout, 1)
# ----------------------------------------------------------------------------
def _matmul_t_kernel(w_ref, x_ref, b_ref, o_ref, *, relu):
    acc = jnp.dot(w_ref[...], x_ref[...], preferred_element_type=jnp.float32)
    acc = acc + b_ref[...]                       # (Cout, tm) + (Cout, 1)
    if relu:
        acc = jnp.maximum(acc, 0.0)
    o_ref[...] = acc


def matmul_t(w_mat, x, b_col, relu=False):
    """w_mat:(Cout,K) bf16, x:(K,M), b_col:(Cout,1) f32 -> (Cout,M) f32."""
    cout, kdim = w_mat.shape
    m = x.shape[1]
    mp = _round_up(m, 128)
    if mp <= 2048:
        tm = mp                                  # single lane-dense tile
    else:
        tm = 512
        mp = _round_up(m, tm)
    if x.dtype != jnp.bfloat16:
        x = x.astype(jnp.bfloat16)
    if mp != m:
        x = jnp.pad(x, ((0, 0), (0, mp - m)))
    out = pl.pallas_call(
        functools.partial(_matmul_t_kernel, relu=relu),
        grid=(mp // tm,),
        out_shape=jax.ShapeDtypeStruct((cout, mp), jnp.float32),
        in_specs=[
            pl.BlockSpec((cout, kdim), lambda i: (0, 0)),
            pl.BlockSpec((kdim, tm), lambda i: (0, i)),
            pl.BlockSpec((cout, 1), lambda i: (0, 0)),
        ],
        out_specs=pl.BlockSpec((cout, tm), lambda i: (0, i)),
        compiler_params=pltpu.CompilerParams(dimension_semantics=("parallel",)),
    )(w_mat, x, b_col)
    return out[:, :m] if mp != m else out


def conv3x3_cf(x_cf, nb, h, w, wb, relu=False):
    """3x3 conv, pad=1, channels-first flat layout.
    x_cf:(Cin, NB*H*W) -> (Cout, NB*H*W).  im2col built in bf16 (half traffic)."""
    w_mat, b_col = wb
    cin = x_cf.shape[0]
    x4 = x_cf.reshape(cin, nb, h, w).astype(jnp.bfloat16)
    xp = jnp.pad(x4, ((0, 0), (0, 0), (1, 1), (1, 1)))
    cols = [xp[:, :, dh:dh + h, dw:dw + w] for dh in range(3) for dw in range(3)]
    patches = jnp.stack(cols, axis=1).reshape(cin * 9, nb * h * w)   # (Cin*9, M)
    return matmul_t(w_mat, patches, b_col, relu=relu)


# ----------------------------------------------------------------------------
# Pallas kernel 2: memory module (L2-norm, sim, dual softmax, weighted read,
# optional fused m_items update).  Everything transposed: queries on lane axis.
# ----------------------------------------------------------------------------
def _memory_kernel(q_ref, m_ref, read_ref, sq_ref, sm_ref, *rest, nq, train):
    q = q_ref[...]                               # (F,  Nqp) f32
    m = m_ref[...]                               # (Ms, F)   f32
    qn = q * jax.lax.rsqrt(jnp.sum(q * q, axis=0, keepdims=True) + 1e-12)
    mn = m * jax.lax.rsqrt(jnp.sum(m * m, axis=1, keepdims=True) + 1e-12)
    sim = jnp.dot(mn, qn, preferred_element_type=jnp.float32)        # (Ms, Nqp)

    # softmax over memory slots (sublane axis) -- per query
    sq = jnp.exp(sim - jnp.max(sim, axis=0, keepdims=True))
    sq = sq * pl.reciprocal(jnp.sum(sq, axis=0, keepdims=True), approx=True)

    # softmax over queries (lane axis) -- per slot; mask padded lanes
    lane = jax.lax.broadcasted_iota(jnp.int32, sim.shape, 1)
    sim_m = jnp.where(lane < nq, sim, -jnp.inf)
    sm = jnp.exp(sim_m - jnp.max(sim_m, axis=1, keepdims=True))
    sm = sm * pl.reciprocal(jnp.sum(sm, axis=1, keepdims=True), approx=True)

    # weighted read: (F, Nqp) = m^T @ sq
    read_ref[...] = jax.lax.dot_general(
        m, sq, (((0,), (0,)), ((), ())), preferred_element_type=jnp.float32)
    sq_ref[...] = sq
    sm_ref[...] = sm

    if train:
        (mnew_ref,) = rest
        upd = jax.lax.dot_general(                               # (Ms, F)
            sm, q, (((1,), (1,)), ((), ())), preferred_element_type=jnp.float32)
        mnew = m + upd
        mnew_ref[...] = mnew * jax.lax.rsqrt(
            jnp.sum(mnew * mnew, axis=1, keepdims=True) + 1e-12)


def memory_attention(q_t, mem, train):
    """q_t:(F,Nq), mem:(Ms,F) -> read:(F,Nq), sq:(Ms,Nq), sm:(Ms,Nq), m_new:(Ms,F)."""
    f, nq = q_t.shape
    ms = mem.shape[0]
    nqp = _round_up(nq, 128)
    if nqp != nq:
        q_t = jnp.pad(q_t, ((0, 0), (0, nqp - nq)))
    out_shape = [
        jax.ShapeDtypeStruct((f, nqp), jnp.float32),
        jax.ShapeDtypeStruct((ms, nqp), jnp.float32),
        jax.ShapeDtypeStruct((ms, nqp), jnp.float32),
    ]
    out_specs = [
        pl.BlockSpec((f, nqp), lambda i: (0, 0)),
        pl.BlockSpec((ms, nqp), lambda i: (0, 0)),
        pl.BlockSpec((ms, nqp), lambda i: (0, 0)),
    ]
    if train:
        out_shape.append(jax.ShapeDtypeStruct((ms, f), jnp.float32))
        out_specs.append(pl.BlockSpec((ms, f), lambda i: (0, 0)))
    outs = pl.pallas_call(
        functools.partial(_memory_kernel, nq=nq, train=train),
        grid=(1,),
        out_shape=tuple(out_shape),
        in_specs=[
            pl.BlockSpec((f, nqp), lambda i: (0, 0)),
            pl.BlockSpec((ms, f), lambda i: (0, 0)),
        ],
        out_specs=tuple(out_specs),
        compiler_params=pltpu.CompilerParams(dimension_semantics=("arbitrary",)),
    )(q_t.astype(jnp.float32), mem.astype(jnp.float32))
    read, sq, sm = outs[0][:, :nq], outs[1][:, :nq], outs[2][:, :nq]
    m_new = outs[3] if train else mem
    return read, sq, sm, m_new


# ----------------------------------------------------------------------------
# Surrogate sub-models (channels-first flat layout internally)
# ----------------------------------------------------------------------------
def mem_losses(q_t, read_t, sq_t):
    comp = jnp.mean((q_t - read_t) ** 2)
    top2 = jax.lax.top_k(sq_t.T, 2)[0]                       # (Nq, 2) descending
    sep = jnp.mean(jnp.maximum(0.0, 0.1 - (top2[:, 0] - top2[:, 1])))
    return sep, comp


def _slot_softmax_over_queries(q_tail, mem):
    """Exact per-slot softmax over ONLY the given queries (matches the sequential
    per-call semantics when the stages were batched).  Tiny (Ms x n) glue."""
    qn = q_tail * jax.lax.rsqrt(jnp.sum(q_tail * q_tail, axis=0, keepdims=True) + 1e-12)
    mn = mem * jax.lax.rsqrt(jnp.sum(mem * mem, axis=1, keepdims=True) + 1e-12)
    sim = mn @ qn
    e = jnp.exp(sim - jnp.max(sim, axis=1, keepdims=True))
    return e / jnp.sum(e, axis=1, keepdims=True)


def model2_core(p, s1, s5, m_items, train):
    """Memory-augmented frame interpolation.  s1,s5:(NB,1,H,W)."""
    nb, _, h, w = s1.shape
    m = nb * h * w
    s1_cf = s1.transpose(1, 0, 2, 3).reshape(1, m)
    s5_cf = s5.transpose(1, 0, 2, 3).reshape(1, m)
    x_cf = jnp.concatenate([s1_cf, s5_cf], axis=0)                    # (2, M)
    fea_cf = conv3x3_cf(x_cf, nb, h, w, p["enc"], relu=True)          # (F, M)
    read_cf, sq_t, sm_t, m_new = memory_attention(fea_cf, m_items, train)
    upd_cf = jnp.concatenate([fea_cf, read_cf], axis=0)               # (2F, M)
    out_cf = conv3x3_cf(upd_cf, nb, h, w, p["dec"], relu=False)       # (1, M)
    out_img = out_cf.reshape(1, nb, h, w).transpose(1, 0, 2, 3)       # (NB,1,H,W)
    return out_img, fea_cf, read_cf, sq_t, sm_t, m_new


def model2(p, s1, s5, m_items, train):
    out_img, q_t, read_t, sq_t, sm_t, m_new = model2_core(p, s1, s5, m_items, train)
    sep, comp = mem_losses(q_t, read_t, sq_t)
    return out_img, m_new, sq_t.T, sm_t.T, sep, comp


def model1(p, x):
    """x2 super-resolution along width. x:(N,1,H,W) -> (N,1,H,2W)."""
    n, _, h, w = x.shape
    x_cf = x.transpose(1, 0, 2, 3).reshape(1, n * h * w)
    h_cf = conv3x3_cf(x_cf, n, h, w, p["sr1"], relu=True)             # (hid, M)
    y_cf = conv3x3_cf(h_cf, n, h, w, p["sr2"], relu=False)            # (2, M)
    y = y_cf.reshape(2, n, h, w)
    out = jnp.stack([y[0], y[1]], axis=-1).reshape(n, h, 2 * w)
    return out[:, None]                                               # (N,1,H,2W)


# ----------------------------------------------------------------------------
# parallel_model forward (mirrors the PyTorch code)
# ----------------------------------------------------------------------------
def parallel_model_forward(params, x, m_items, train):
    p = params
    yuan_volume = x.astype(jnp.float32)
    input_volume = yuan_volume[:, :, :, ::2]
    lr_volume = input_volume[:, :, :, ::2]
    b, c, k, g = lr_volume.shape
    nJ = g - 1

    if train:
        # Sequential: m_items updates are order-dependent (fused in-kernel).
        interp, interp24, interp05 = [], [], []
        sq = sm = sep = comp = None
        for j in range(nJ):
            s1 = lr_volume[:, :, :, j][:, None]
            s5 = lr_volume[:, :, :, j + 1][:, None]
            m3, m_items, sq, sm, sep, comp = model2(p, s1, s5, m_items, True)
            m2, m_items, sq, sm, sep, comp = model2(p, s1, m3, m_items, True)
            m4, m_items, sq, sm, sep, comp = model2(p, m3, s5, m_items, True)
            m05, m_items, sq, sm, sep, comp = model2(p, s1, m2, m_items, True)
            interp.append(m3[:, 0][..., None])
            interp24.append(m2[:, 0][..., None])
            interp24.append(m4[:, 0][..., None])
            interp05.append(m05[:, 0][..., None])
        interpolation_out = jnp.concatenate(interp, axis=3)
        interpolation_out_2_4 = jnp.concatenate(interp24, axis=3)
        interpolation_out_05 = jnp.concatenate(interp05, axis=3)
    else:
        # Eval: m_items is constant -> batch every j (and the m2/m4 pair) into one
        # conv/memory kernel chain per stage.
        npq = b * c * k
        s1_all = lr_volume[:, :, :, :nJ].transpose(3, 0, 1, 2).reshape(nJ * b, 1, c, k)
        s5_all = lr_volume[:, :, :, 1:].transpose(3, 0, 1, 2).reshape(nJ * b, 1, c, k)
        m3_all = model2_core(p, s1_all, s5_all, m_items, False)[0]
        m24_all = model2_core(p,
                              jnp.concatenate([s1_all, m3_all], axis=0),
                              jnp.concatenate([m3_all, s5_all], axis=0),
                              m_items, False)[0]
        m2_all, m4_all = m24_all[:nJ * b], m24_all[nJ * b:]
        m05_all, q_c, read_c, sq_c, _, _ = model2_core(p, s1_all, m2_all, m_items, False)

        # statistics of the last sequential call (m05 at j = g-2)
        q_tail, read_tail, sq_tail = q_c[:, -npq:], read_c[:, -npq:], sq_c[:, -npq:]
        sep, comp = mem_losses(q_tail, read_tail, sq_tail)
        sq = sq_tail.T
        sm = _slot_softmax_over_queries(q_tail, m_items.astype(jnp.float32)).T

        def to_bckg(m_all):
            return m_all[:, 0].reshape(nJ, b, c, k).transpose(1, 2, 3, 0)

        interpolation_out = to_bckg(m3_all)
        interpolation_out_05 = to_bckg(m05_all)
        m2r = m2_all[:, 0].reshape(nJ, b, c, k)
        m4r = m4_all[:, 0].reshape(nJ, b, c, k)
        interpolation_out_2_4 = jnp.stack([m2r, m4r], axis=1) \
            .transpose(2, 3, 4, 0, 1).reshape(b, c, k, 2 * nJ)

    # ---------------- super-resolution branch (model1) ----------------
    sr_lr_volume = lr_volume[:, None].transpose(0, 2, 1, 3, 4).reshape(-1, 1, k, g)
    sr_out = model1(p, sr_lr_volume)[:, :, :, :-1]

    b1, c1, k1, g1 = input_volume.shape
    sr_left_in = sr_out[:, None].transpose(0, 2, 1, 3, 4).reshape(-1, 1, k1, g1)
    sr_out_2_4_left = model1(p, sr_left_in)[:, :, :, :-1]

    sr_right_in = sr_out[:, None].transpose(0, 3, 1, 2, 4).reshape(-1, 1, c1, g1)
    sr_out_2_4_right = model1(p, sr_right_in).transpose(0, 2, 1, 3)[:, :, :, :-1]

    b2, c2, k2, g2 = sr_out_2_4_left.shape
    sr05l_in = sr_out_2_4_left[:, None].transpose(0, 2, 1, 3, 4).reshape(-1, 1, k2, g2)
    sr_out_05_left = model1(p, sr05l_in)[:, :, :, :-1]

    sr05r_in = sr_out_2_4_right[:, None].transpose(0, 3, 1, 2, 4).reshape(-1, 1, c2, g2)
    sr_out_05_right = model1(p, sr05r_in).transpose(0, 2, 1, 3)[:, :, :, :-1]

    sr_out_2_4_left = sr_out_2_4_left[:, :, :, 1:-1:2]
    sr_out_2_4_right = sr_out_2_4_right[:, :, :, 1:-1:2]
    N = interpolation_out_05.shape[-1]
    sr_out_05_left = sr_out_05_left[:, :, :, 1:-1:2][:, :, :, :N]
    sr_out_05_right = sr_out_05_right[:, :, :, 1:-1:2][:, :, :, :N]

    return (interpolation_out, sr_out, interpolation_out_2_4, sr_out_2_4_left,
            sr_out_2_4_right, m_items, interpolation_out_05, sr_out_05_left,
            sr_out_05_right, sq, sm, sep, comp)


# ----------------------------------------------------------------------------
# Parameters
# ----------------------------------------------------------------------------
def init_params(key, feat=16, sr_hidden=8):
    ks = jax.random.split(key, 4)
    s = 0.1
    return {
        # model2 (memory interpolator)
        "enc_w": s * jax.random.normal(ks[0], (feat, 2, 3, 3), jnp.float32),
        "enc_b": jnp.zeros((feat,), jnp.float32),
        "dec_w": s * jax.random.normal(ks[1], (1, 2 * feat, 3, 3), jnp.float32),
        "dec_b": jnp.zeros((1,), jnp.float32),
        # model1 (x2 SR along width)
        "sr_w1": s * jax.random.normal(ks[2], (sr_hidden, 1, 3, 3), jnp.float32),
        "sr_b1": jnp.zeros((sr_hidden,), jnp.float32),
        "sr_w2": s * jax.random.normal(ks[3], (2, sr_hidden, 3, 3), jnp.float32),
        "sr_b2": jnp.zeros((2,), jnp.float32),
    }


def prepare_params(raw):
    """Hoisted, one-time weight prep: (Cout, Cin*9) bf16 matrices + (Cout,1) f32 bias."""
    def prep(w, b):
        cout = w.shape[0]
        return (w.reshape(cout, -1).astype(jnp.bfloat16),
                b.reshape(cout, 1).astype(jnp.float32))
    return {
        "enc": prep(raw["enc_w"], raw["enc_b"]),
        "dec": prep(raw["dec_w"], raw["dec_b"]),
        "sr1": prep(raw["sr_w1"], raw["sr_b1"]),
        "sr2": prep(raw["sr_w2"], raw["sr_b2"]),
    }


class Args:
    def __init__(self, depth=4):
        self.depth = depth   # interface parity with the PyTorch module


if __name__ == "__main__":
    key = jax.random.PRNGKey(0)
    kx, km, kp = jax.random.split(key, 3)

    # x: (B=2, C=4, K=8, W=17) -> input_volume width 9 -> lr_volume width 5
    B, C, K, W = 2, 4, 8, 17
    FEAT, MEM = 16, 8
    x = jax.random.normal(kx, (B, C, K, W), dtype=jnp.float32)
    m_items = jax.random.normal(km, (MEM, FEAT), dtype=jnp.float32)
    m_items = m_items * jax.lax.rsqrt(jnp.sum(m_items ** 2, axis=1, keepdims=True) + 1e-12)
    params = prepare_params(init_params(kp, feat=FEAT, sr_hidden=8))

    _args = Args(depth=4)
    fwd = jax.jit(parallel_model_forward, static_argnames=("train",))

    outs = jax.block_until_ready(fwd(params, x, m_items, train=False))
    assert outs[0].shape == (B, C, K, 4)          # interpolation_out
    assert outs[1].shape == (B * C, 1, K, 9)      # sr_out
    assert outs[2].shape == (B, C, K, 8)          # interpolation_out_2_4
    assert outs[5].shape == (MEM, FEAT)           # m_items (unchanged in eval)

    # exercise the sequential train path (fused in-kernel memory update)
    outs_tr = jax.block_until_ready(fwd(params, x, m_items, train=True))
    assert outs_tr[0].shape == (B, C, K, 4)
    assert outs_tr[5].shape == (MEM, FEAT)

    print("KERNEL_OK")
</pallas_src>

<mosaic_0001>
module attributes {stable_mosaic.version = 11 : i64} {
  func.func @_matmul_t_kernel(%arg0: i32, %arg1: memref<16x18xbf16, #tpu.memory_space<vmem>>, %arg2: memref<18x256xbf16, #tpu.memory_space<vmem>>, %arg3: memref<16x1xf32, #tpu.memory_space<vmem>>, %arg4: memref<16x256xf32, #tpu.memory_space<vmem>>) attributes {dimension_semantics = [#tpu.dimension_semantics<parallel>], iteration_bounds = array<i64: 1>, scalar_prefetch = 0 : i64, scratch_operands = 0 : i64, tpu.core_type = #tpu.core_type<tc>, window_params = [{pipeline_mode = #tpu.pipeline_mode<synchronous>, transform_indices = @transform_0, window_bounds = array<i64: 16, 18>}, {transform_indices = @transform_1, window_bounds = array<i64: 18, 256>}, {pipeline_mode = #tpu.pipeline_mode<synchronous>, transform_indices = @transform_2, window_bounds = array<i64: 16, 1>}, {transform_indices = @transform_3, window_bounds = array<i64: 16, 256>}]} {
    %c0 = arith.constant 0 : index
    %c0_0 = arith.constant 0 : index
    %0 = vector.load %arg1[%c0, %c0_0] : memref<16x18xbf16, #tpu.memory_space<vmem>>, vector<16x18xbf16>
    %c0_1 = arith.constant 0 : index
    %c0_2 = arith.constant 0 : index
    %1 = vector.load %arg2[%c0_1, %c0_2] : memref<18x256xbf16, #tpu.memory_space<vmem>>, vector<18x256xbf16>
    %cst = arith.constant dense<0.000000e+00> : vector<16x256xf32>
    %2 = tpu.matmul %0, %1, %cst {dimension_numbers = #tpu.dot_dimension_numbers<[1], [0], [0], [1], [0, 0, 1, 1], [], []>} : vector<16x18xbf16>, vector<18x256xbf16>, vector<16x256xf32> -> vector<16x256xf32>
    %c0_3 = arith.constant 0 : index
    %c0_4 = arith.constant 0 : index
    %3 = vector.load %arg3[%c0_3, %c0_4] : memref<16x1xf32, #tpu.memory_space<vmem>>, vector<16x1xf32>
    %4 = vector.broadcast %3 : vector<16x1xf32> to vector<16x256xf32>
    %5 = arith.addf %2, %4 : vector<16x256xf32>
    %cst_5 = arith.constant 0.000000e+00 : f32
    %6 = vector.broadcast %cst_5 : f32 to vector<16x256xf32>
    %7 = arith.maximumf %5, %6 : vector<16x256xf32>
    %c0_6 = arith.constant 0 : index
    %c0_7 = arith.constant 0 : index
    %8 = vector.load %arg4[%c0_6, %c0_7] : memref<16x256xf32, #tpu.memory_space<vmem>>, vector<16x256xf32>
    tpu.vector_store %arg4[%c0_6, %c0_7], %7 {strides = array<i32>} : memref<16x256xf32, #tpu.memory_space<vmem>>, vector<16x256xf32>,
    return
  }
  func.func @transform_0(%arg0: i32) -> (i32, i32) {
    %c0_i32 = arith.constant 0 : i32
    %c0_i32_0 = arith.constant 0 : i32
    %c0_i32_1 = arith.constant 0 : i32
    return %c0_i32, %c0_i32_0 : i32, i32
  }
  func.func @transform_1(%arg0: i32) -> (i32, i32) {
    %c0_i32 = arith.constant 0 : i32
    %c0_i32_0 = arith.constant 0 : i32
    return %c0_i32, %arg0 : i32, i32
  }
  func.func @transform_2(%arg0: i32) -> (i32, i32) {
    %c0_i32 = arith.constant 0 : i32
    %c0_i32_0 = arith.constant 0 : i32
    %c0_i32_1 = arith.constant 0 : i32
    return %c0_i32, %c0_i32_0 : i32, i32
  }
  func.func @transform_3(%arg0: i32) -> (i32, i32) {
    %c0_i32 = arith.constant 0 : i32
    %c0_i32_0 = arith.constant 0 : i32
    return %c0_i32, %arg0 : i32, i32
  }
}

module attributes {stable_mosaic.version = 11 : i64} {
  func.func @_memory_kernel(%arg0: i32, %arg1: memref<16x256xf32, #tpu.memory_space<vmem>>, %arg2: memref<8x16xf32, #tpu.memory_space<vmem>>, %arg3: memref<16x256xf32, #tpu.memory_space<vmem>>, %arg4: memref<8x256xf32, #tpu.memory_space<vmem>>, %arg5: memref<8x256xf32, #tpu.memory_space<vmem>>) attributes {dimension_semantics = [#tpu.dimension_semantics<arbitrary>], iteration_bounds = array<i64: 1>, scalar_prefetch = 0 : i64, scratch_operands = 0 : i64, tpu.core_type = #tpu.core_type<tc>, window_params = [{pipeline_mode = #tpu.pipeline_mode<synchronous>, transform_indices = @transform_0, window_bounds = array<i64: 16, 256>}, {pipeline_mode = #tpu.pipeline_mode<synchronous>, transform_indices = @transform_1, window_bounds = array<i64: 8, 16>}, {pipeline_mode = #tpu.pipeline_mode<synchronous>, transform_indices = @transform_2, window_bounds = array<i64: 16, 256>}, {pipeline_mode = #tpu.pipeline_mode<synchronous>, transform_indices = @transform_3, window_bounds = array<i64: 8, 256>}, {pipeline_mode = #tpu.pipeline_mode<synchronous>, transform_indices = @transform_4, window_bounds = array<i64: 8, 256>}]} {
    %c0 = arith.constant 0 : index
    %c0_0 = arith.constant 0 : index
    %0 = vector.load %arg1[%c0, %c0_0] : memref<16x256xf32, #tpu.memory_space<vmem>>, vector<16x256xf32>
    %c0_1 = arith.constant 0 : index
    %c0_2 = arith.constant 0 : index
    %1 = vector.load %arg2[%c0_1, %c0_2] : memref<8x16xf32, #tpu.memory_space<vmem>>, vector<8x16xf32>
    %2 = arith.mulf %0, %0 : vector<16x256xf32>
    %cst = arith.constant dense<0.000000e+00> : vector<256xf32>
    %3 = vector.multi_reduction <add>, %2, %cst [0] : vector<16x256xf32> to vector<256xf32>
    %4 = vector.shape_cast %3 : vector<256xf32> to vector<1x256xf32>
    %cst_3 = arith.constant 9.99999996E-13 : f32
    %5 = vector.broadcast %cst_3 : f32 to vector<1x256xf32>
    %6 = arith.addf %4, %5 : vector<1x256xf32>
    %7 = math.rsqrt %6 : vector<1x256xf32>
    %8 = vector.broadcast %7 : vector<1x256xf32> to vector<16x256xf32>
    %9 = arith.mulf %0, %8 : vector<16x256xf32>
    %10 = arith.mulf %1, %1 : vector<8x16xf32>
    %cst_4 = arith.constant dense<0.000000e+00> : vector<8xf32>
    %11 = vector.multi_reduction <add>, %10, %cst_4 [1] : vector<8x16xf32> to vector<8xf32>
    %12 = vector.shape_cast %11 : vector<8xf32> to vector<8x1xf32>
    %cst_5 = arith.constant 9.99999996E-13 : f32
    %13 = vector.broadcast %cst_5 : f32 to vector<8x1xf32>
    %14 = arith.addf %12, %13 : vector<8x1xf32>
    %15 = math.rsqrt %14 : vector<8x1xf32>
    %16 = vector.broadcast %15 : vector<8x1xf32> to vector<8x16xf32>
    %17 = arith.mulf %1, %16 : vector<8x16xf32>
    %cst_6 = arith.constant dense<0.000000e+00> : vector<8x256xf32>
    %18 = tpu.matmul %17, %9, %cst_6 {dimension_numbers = #tpu.dot_dimension_numbers<[1], [0], [0], [1], [0, 0, 1, 1], [], []>} : vector<8x16xf32>, vector<16x256xf32>, vector<8x256xf32> -> vector<8x256xf32>
    %cst_7 = arith.constant dense<0xFF800000> : vector<256xf32>
    %19 = vector.multi_reduction <maximumf>, %18, %cst_7 [0] : vector<8x256xf32> to vector<256xf32>
    %20 = vector.shape_cast %19 : vector<256xf32> to vector<1x256xf32>
    %21 = vector.broadcast %20 : vector<1x256xf32> to vector<8x256xf32>
    %22 = arith.subf %18, %21 : vector<8x256xf32>
    %23 = math.exp %22 : vector<8x256xf32>
    %cst_8 = arith.constant dense<0.000000e+00> : vector<256xf32>
    %24 = vector.multi_reduction <add>, %23, %cst_8 [0] : vector<8x256xf32> to vector<256xf32>
    %25 = vector.shape_cast %24 : vector<256xf32> to vector<1x256xf32>
    %26 = tpu.reciprocal %25 {approx = true} : vector<1x256xf32> -> vector<1x256xf32>
    %27 = vector.broadcast %26 : vector<1x256xf32> to vector<8x256xf32>
    %28 = arith.mulf %23, %27 : vector<8x256xf32>
    %29 = tpu.iota {dimensions = array<i32: 1>} : vector<8x256xi32>
    %c256_i32 = arith.constant 256 : i32
    %30 = vector.broadcast %c256_i32 : i32 to vector<8x256xi32>
    %31 = arith.cmpi slt, %29, %30 : vector<8x256xi32>
    %cst_9 = arith.constant 0xFF800000 : f32
    %32 = vector.broadcast %cst_9 : f32 to vector<8x256xf32>
    %33 = arith.select %31, %18, %32 : vector<8x256xi1>, vector<8x256xf32>
    %cst_10 = arith.constant dense<0xFF800000> : vector<8xf32>
    %34 = vector.multi_reduction <maximumf>, %33, %cst_10 [1] : vector<8x256xf32> to vector<8xf32>
    %35 = vector.shape_cast %34 : vector<8xf32> to vector<8x1xf32>
    %36 = vector.broadcast %35 : vector<8x1xf32> to vector<8x256xf32>
    %37 = arith.subf %33, %36 : vector<8x256xf32>
    %38 = math.exp %37 : vector<8x256xf32>
    %cst_11 = arith.constant dense<0.000000e+00> : vector<8xf32>
    %39 = vector.multi_reduction <add>, %38, %cst_11 [1] : vector<8x256xf32> to vector<8xf32>
    %40 = vector.shape_cast %39 : vector<8xf32> to vector<8x1xf32>
    %41 = tpu.reciprocal %40 {approx = true} : vector<8x1xf32> -> vector<8x1xf32>
    %42 = vector.broadcast %41 : vector<8x1xf32> to vector<8x256xf32>
    %43 = arith.mulf %38, %42 : vector<8x256xf32>
    %cst_12 = arith.constant dense<0.000000e+00> : vector<16x256xf32>
    %44 = tpu.matmul %1, %28, %cst_12 {dimension_numbers = #tpu.dot_dimension_numbers<[0], [0], [1], [1], [0, 1, 1, 1], [], []>} : vector<8x16xf32>, vector<8x256xf32>, vector<16x256xf32> -> vector<16x256xf32>
    %c0_13 = arith.constant 0 : index
    %c0_14 = arith.constant 0 : index
    %45 = vector.load %arg3[%c0_13, %c0_14] : memref<16x256xf32, #tpu.memory_space<vmem>>, vector<16x256xf32>
    tpu.vector_store %arg3[%c0_13, %c0_14], %44 {strides = array<i32>} : memref<16x256xf32, #tpu.memory_space<vmem>>, vector<16x256xf32>,
    %c0_15 = arith.constant 0 : index
    %c0_16 = arith.constant 0 : index
    %46 = vector.load %arg4[%c0_15, %c0_16] : memref<8x256xf32, #tpu.memory_space<vmem>>, vector<8x256xf32>
    tpu.vector_store %arg4[%c0_15, %c0_16], %28 {strides = array<i32>} : memref<8x256xf32, #tpu.memory_space<vmem>>, vector<8x256xf32>,
    %c0_17 = arith.constant 0 : index
    %c0_18 = arith.constant 0 : index
    %47 = vector.load %arg5[%c0_17, %c0_18] : memref<8x256xf32, #tpu.memory_space<vmem>>, vector<8x256xf32>
    tpu.vector_store %arg5[%c0_17, %c0_18], %43 {strides = array<i32>} : memref<8x256xf32, #tpu.memory_space<vmem>>, vector<8x256xf32>,
    return
  }
  func.func @transform_0(%arg0: i32) -> (i32, i32) {
    %c0_i32 = arith.constant 0 : i32
    %c0_i32_0 = arith.constant 0 : i32
    %c0_i32_1 = arith.constant 0 : i32
    return %c0_i32, %c0_i32_0 : i32, i32
  }
  func.func @transform_1(%arg0: i32) -> (i32, i32) {
    %c0_i32 = arith.constant 0 : i32
    %c0_i32_0 = arith.constant 0 : i32
    %c0_i32_1 = arith.constant 0 : i32
    return %c0_i32, %c0_i32_0 : i32, i32
  }
  func.func @transform_2(%arg0: i32) -> (i32, i32) {
    %c0_i32 = arith.constant 0 : i32
    %c0_i32_0 = arith.constant 0 : i32
    %c0_i32_1 = arith.constant 0 : i32
    return %c0_i32, %c0_i32_0 : i32, i32
  }
  func.func @transform_3(%arg0: i32) -> (i32, i32) {
    %c0_i32 = arith.constant 0 : i32
    %c0_i32_0 = arith.constant 0 : i32
    %c0_i32_1 = arith.constant 0 : i32
    return %c0_i32, %c0_i32_0 : i32, i32
  }
  func.func @transform_4(%arg0: i32) -> (i32, i32) {
    %c0_i32 = arith.constant 0 : i32
    %c0_i32_0 = arith.constant 0 : i32
    %c0_i32_1 = arith.constant 0 : i32
    return %c0_i32, %c0_i32_0 : i32, i32
  }
}

module attributes {stable_mosaic.version = 11 : i64} {
  func.func @_matmul_t_kernel(%arg0: i32, %arg1: memref<1x288xbf16, #tpu.memory_space<vmem>>, %arg2: memref<288x256xbf16, #tpu.memory_space<vmem>>, %arg3: memref<1x1xf32, #tpu.memory_space<vmem>>, %arg4: memref<1x256xf32, #tpu.memory_space<vmem>>) attributes {dimension_semantics = [#tpu.dimension_semantics<parallel>], iteration_bounds = array<i64: 1>, scalar_prefetch = 0 : i64, scratch_operands = 0 : i64, tpu.core_type = #tpu.core_type<tc>, window_params = [{pipeline_mode = #tpu.pipeline_mode<synchronous>, transform_indices = @transform_0, window_bounds = array<i64: 1, 288>}, {transform_indices = @transform_1, window_bounds = array<i64: 288, 256>}, {pipeline_mode = #tpu.pipeline_mode<synchronous>, transform_indices = @transform_2, window_bounds = array<i64: 1, 1>}, {transform_indices = @transform_3, window_bounds = array<i64: 1, 256>}]} {
    %c0 = arith.constant 0 : index
    %c0_0 = arith.constant 0 : index
    %0 = vector.load %arg1[%c0, %c0_0] : memref<1x288xbf16, #tpu.memory_space<vmem>>, vector<1x288xbf16>
    %c0_1 = arith.constant 0 : index
    %c0_2 = arith.constant 0 : index
    %1 = vector.load %arg2[%c0_1, %c0_2] : memref<288x256xbf16, #tpu.memory_space<vmem>>, vector<288x256xbf16>
    %cst = arith.constant dense<0.000000e+00> : vector<1x256xf32>
    %2 = tpu.matmul %0, %1, %cst {dimension_numbers = #tpu.dot_dimension_numbers<[1], [0], [0], [1], [0, 0, 1, 1], [], []>} : vector<1x288xbf16>, vector<288x256xbf16>, vector<1x256xf32> -> vector<1x256xf32>
    %c0_3 = arith.constant 0 : index
    %c0_4 = arith.constant 0 : index
    %3 = vector.load %arg3[%c0_3, %c0_4] : memref<1x1xf32, #tpu.memory_space<vmem>>, vector<1x1xf32>
    %4 = vector.broadcast %3 : vector<1x1xf32> to vector<1x256xf32>
    %5 = arith.addf %2, %4 : vector<1x256xf32>
    %c0_5 = arith.constant 0 : index
    %c0_6 = arith.constant 0 : index
    %6 = vector.load %arg4[%c0_5, %c0_6] : memref<1x256xf32, #tpu.memory_space<vmem>>, vector<1x256xf32>
    tpu.vector_store %arg4[%c0_5, %c0_6], %5 {strides = array<i32>} : memref<1x256xf32, #tpu.memory_space<vmem>>, vector<1x256xf32>,
    return
  }
  func.func @transform_0(%arg0: i32) -> (i32, i32) {
    %c0_i32 = arith.constant 0 : i32
    %c0_i32_0 = arith.constant 0 : i32
    %c0_i32_1 = arith.constant 0 : i32
    return %c0_i32, %c0_i32_0 : i32, i32
  }
  func.func @transform_1(%arg0: i32) -> (i32, i32) {
    %c0_i32 = arith.constant 0 : i32
    %c0_i32_0 = arith.constant 0 : i32
    return %c0_i32, %arg0 : i32, i32
  }
  func.func @transform_2(%arg0: i32) -> (i32, i32) {
    %c0_i32 = arith.constant 0 : i32
    %c0_i32_0 = arith.constant 0 : i32
    %c0_i32_1 = arith.constant 0 : i32
    return %c0_i32, %c0_i32_0 : i32, i32
  }
  func.func @transform_3(%arg0: i32) -> (i32, i32) {
    %c0_i32 = arith.constant 0 : i32
    %c0_i32_0 = arith.constant 0 : i32
    return %c0_i32, %arg0 : i32, i32
  }
}

module attributes {stable_mosaic.version = 11 : i64} {
  func.func @_matmul_t_kernel(%arg0: i32, %arg1: memref<16x18xbf16, #tpu.memory_space<vmem>>, %arg2: memref<18x512xbf16, #tpu.memory_space<vmem>>, %arg3: memref<16x1xf32, #tpu.memory_space<vmem>>, %arg4: memref<16x512xf32, #tpu.memory_space<vmem>>) attributes {dimension_semantics = [#tpu.dimension_semantics<parallel>], iteration_bounds = array<i64: 1>, scalar_prefetch = 0 : i64, scratch_operands = 0 : i64, tpu.core_type = #tpu.core_type<tc>, window_params = [{pipeline_mode = #tpu.pipeline_mode<synchronous>, transform_indices = @transform_0, window_bounds = array<i64: 16, 18>}, {transform_indices = @transform_1, window_bounds = array<i64: 18, 512>}, {pipeline_mode = #tpu.pipeline_mode<synchronous>, transform_indices = @transform_2, window_bounds = array<i64: 16, 1>}, {transform_indices = @transform_3, window_bounds = array<i64: 16, 512>}]} {
    %c0 = arith.constant 0 : index
    %c0_0 = arith.constant 0 : index
    %0 = vector.load %arg1[%c0, %c0_0] : memref<16x18xbf16, #tpu.memory_space<vmem>>, vector<16x18xbf16>
    %c0_1 = arith.constant 0 : index
    %c0_2 = arith.constant 0 : index
    %1 = vector.load %arg2[%c0_1, %c0_2] : memref<18x512xbf16, #tpu.memory_space<vmem>>, vector<18x512xbf16>
    %cst = arith.constant dense<0.000000e+00> : vector<16x512xf32>
    %2 = tpu.matmul %0, %1, %cst {dimension_numbers = #tpu.dot_dimension_numbers<[1], [0], [0], [1], [0, 0, 1, 1], [], []>} : vector<16x18xbf16>, vector<18x512xbf16>, vector<16x512xf32> -> vector<16x512xf32>
    %c0_3 = arith.constant 0 : index
    %c0_4 = arith.constant 0 : index
    %3 = vector.load %arg3[%c0_3, %c0_4] : memref<16x1xf32, #tpu.memory_space<vmem>>, vector<16x1xf32>
    %4 = vector.broadcast %3 : vector<16x1xf32> to vector<16x512xf32>
    %5 = arith.addf %2, %4 : vector<16x512xf32>
    %cst_5 = arith.constant 0.000000e+00 : f32
    %6 = vector.broadcast %cst_5 : f32 to vector<16x512xf32>
    %7 = arith.maximumf %5, %6 : vector<16x512xf32>
    %c0_6 = arith.constant 0 : index
    %c0_7 = arith.constant 0 : index
    %8 = vector.load %arg4[%c0_6, %c0_7] : memref<16x512xf32, #tpu.memory_space<vmem>>, vector<16x512xf32>
    tpu.vector_store %arg4[%c0_6, %c0_7], %7 {strides = array<i32>} : memref<16x512xf32, #tpu.memory_space<vmem>>, vector<16x512xf32>,
    return
  }
  func.func @transform_0(%arg0: i32) -> (i32, i32) {
    %c0_i32 = arith.constant 0 : i32
    %c0_i32_0 = arith.constant 0 : i32
    %c0_i32_1 = arith.constant 0 : i32
    return %c0_i32, %c0_i32_0 : i32, i32
  }
  func.func @transform_1(%arg0: i32) -> (i32, i32) {
    %c0_i32 = arith.constant 0 : i32
    %c0_i32_0 = arith.constant 0 : i32
    return %c0_i32, %arg0 : i32, i32
  }
  func.func @transform_2(%arg0: i32) -> (i32, i32) {
    %c0_i32 = arith.constant 0 : i32
    %c0_i32_0 = arith.constant 0 : i32
    %c0_i32_1 = arith.constant 0 : i32
    return %c0_i32, %c0_i32_0 : i32, i32
  }
  func.func @transform_3(%arg0: i32) -> (i32, i32) {
    %c0_i32 = arith.constant 0 : i32
    %c0_i32_0 = arith.constant 0 : i32
    return %c0_i32, %arg0 : i32, i32
  }
}

module attributes {stable_mosaic.version = 11 : i64} {
  func.func @_memory_kernel(%arg0: i32, %arg1: memref<16x512xf32, #tpu.memory_space<vmem>>, %arg2: memref<8x16xf32, #tpu.memory_space<vmem>>, %arg3: memref<16x512xf32, #tpu.memory_space<vmem>>, %arg4: memref<8x512xf32, #tpu.memory_space<vmem>>, %arg5: memref<8x512xf32, #tpu.memory_space<vmem>>) attributes {dimension_semantics = [#tpu.dimension_semantics<arbitrary>], iteration_bounds = array<i64: 1>, scalar_prefetch = 0 : i64, scratch_operands = 0 : i64, tpu.core_type = #tpu.core_type<tc>, window_params = [{pipeline_mode = #tpu.pipeline_mode<synchronous>, transform_indices = @transform_0, window_bounds = array<i64: 16, 512>}, {pipeline_mode = #tpu.pipeline_mode<synchronous>, transform_indices = @transform_1, window_bounds = array<i64: 8, 16>}, {pipeline_mode = #tpu.pipeline_mode<synchronous>, transform_indices = @transform_2, window_bounds = array<i64: 16, 512>}, {pipeline_mode = #tpu.pipeline_mode<synchronous>, transform_indices = @transform_3, window_bounds = array<i64: 8, 512>}, {pipeline_mode = #tpu.pipeline_mode<synchronous>, transform_indices = @transform_4, window_bounds = array<i64: 8, 512>}]} {
    %c0 = arith.constant 0 : index
    %c0_0 = arith.constant 0 : index
    %0 = vector.load %arg1[%c0, %c0_0] : memref<16x512xf32, #tpu.memory_space<vmem>>, vector<16x512xf32>
    %c0_1 = arith.constant 0 : index
    %c0_2 = arith.constant 0 : index
    %1 = vector.load %arg2[%c0_1, %c0_2] : memref<8x16xf32, #tpu.memory_space<vmem>>, vector<8x16xf32>
    %2 = arith.mulf %0, %0 : vector<16x512xf32>
    %cst = arith.constant dense<0.000000e+00> : vector<512xf32>
    %3 = vector.multi_reduction <add>, %2, %cst [0] : vector<16x512xf32> to vector<512xf32>
    %4 = vector.shape_cast %3 : vector<512xf32> to vector<1x512xf32>
    %cst_3 = arith.constant 9.99999996E-13 : f32
    %5 = vector.broadcast %cst_3 : f32 to vector<1x512xf32>
    %6 = arith.addf %4, %5 : vector<1x512xf32>
    %7 = math.rsqrt %6 : vector<1x512xf32>
    %8 = vector.broadcast %7 : vector<1x512xf32> to vector<16x512xf32>
    %9 = arith.mulf %0, %8 : vector<16x512xf32>
    %10 = arith.mulf %1, %1 : vector<8x16xf32>
    %cst_4 = arith.constant dense<0.000000e+00> : vector<8xf32>
    %11 = vector.multi_reduction <add>, %10, %cst_4 [1] : vector<8x16xf32> to vector<8xf32>
    %12 = vector.shape_cast %11 : vector<8xf32> to vector<8x1xf32>
    %cst_5 = arith.constant 9.99999996E-13 : f32
    %13 = vector.broadcast %cst_5 : f32 to vector<8x1xf32>
    %14 = arith.addf %12, %13 : vector<8x1xf32>
    %15 = math.rsqrt %14 : vector<8x1xf32>
    %16 = vector.broadcast %15 : vector<8x1xf32> to vector<8x16xf32>
    %17 = arith.mulf %1, %16 : vector<8x16xf32>
    %cst_6 = arith.constant dense<0.000000e+00> : vector<8x512xf32>
    %18 = tpu.matmul %17, %9, %cst_6 {dimension_numbers = #tpu.dot_dimension_numbers<[1], [0], [0], [1], [0, 0, 1, 1], [], []>} : vector<8x16xf32>, vector<16x512xf32>, vector<8x512xf32> -> vector<8x512xf32>
    %cst_7 = arith.constant dense<0xFF800000> : vector<512xf32>
    %19 = vector.multi_reduction <maximumf>, %18, %cst_7 [0] : vector<8x512xf32> to vector<512xf32>
    %20 = vector.shape_cast %19 : vector<512xf32> to vector<1x512xf32>
    %21 = vector.broadcast %20 : vector<1x512xf32> to vector<8x512xf32>
    %22 = arith.subf %18, %21 : vector<8x512xf32>
    %23 = math.exp %22 : vector<8x512xf32>
    %cst_8 = arith.constant dense<0.000000e+00> : vector<512xf32>
    %24 = vector.multi_reduction <add>, %23, %cst_8 [0] : vector<8x512xf32> to vector<512xf32>
    %25 = vector.shape_cast %24 : vector<512xf32> to vector<1x512xf32>
    %26 = tpu.reciprocal %25 {approx = true} : vector<1x512xf32> -> vector<1x512xf32>
    %27 = vector.broadcast %26 : vector<1x512xf32> to vector<8x512xf32>
    %28 = arith.mulf %23, %27 : vector<8x512xf32>
    %29 = tpu.iota {dimensions = array<i32: 1>} : vector<8x512xi32>
    %c512_i32 = arith.constant 512 : i32
    %30 = vector.broadcast %c512_i32 : i32 to vector<8x512xi32>
    %31 = arith.cmpi slt, %29, %30 : vector<8x512xi32>
    %cst_9 = arith.constant 0xFF800000 : f32
    %32 = vector.broadcast %cst_9 : f32 to vector<8x512xf32>
    %33 = arith.select %31, %18, %32 : vector<8x512xi1>, vector<8x512xf32>
    %cst_10 = arith.constant dense<0xFF800000> : vector<8xf32>
    %34 = vector.multi_reduction <maximumf>, %33, %cst_10 [1] : vector<8x512xf32> to vector<8xf32>
    %35 = vector.shape_cast %34 : vector<8xf32> to vector<8x1xf32>
    %36 = vector.broadcast %35 : vector<8x1xf32> to vector<8x512xf32>
    %37 = arith.subf %33, %36 : vector<8x512xf32>
    %38 = math.exp %37 : vector<8x512xf32>
    %cst_11 = arith.constant dense<0.000000e+00> : vector<8xf32>
    %39 = vector.multi_reduction <add>, %38, %cst_11 [1] : vector<8x512xf32> to vector<8xf32>
    %40 = vector.shape_cast %39 : vector<8xf32> to vector<8x1xf32>
    %41 = tpu.reciprocal %40 {approx = true} : vector<8x1xf32> -> vector<8x1xf32>
    %42 = vector.broadcast %41 : vector<8x1xf32> to vector<8x512xf32>
    %43 = arith.mulf %38, %42 : vector<8x512xf32>
    %cst_12 = arith.constant dense<0.000000e+00> : vector<16x512xf32>
    %44 = tpu.matmul %1, %28, %cst_12 {dimension_numbers = #tpu.dot_dimension_numbers<[0], [0], [1], [1], [0, 1, 1, 1], [], []>} : vector<8x16xf32>, vector<8x512xf32>, vector<16x512xf32> -> vector<16x512xf32>
    %c0_13 = arith.constant 0 : index
    %c0_14 = arith.constant 0 : index
    %45 = vector.load %arg3[%c0_13, %c0_14] : memref<16x512xf32, #tpu.memory_space<vmem>>, vector<16x512xf32>
    tpu.vector_store %arg3[%c0_13, %c0_14], %44 {strides = array<i32>} : memref<16x512xf32, #tpu.memory_space<vmem>>, vector<16x512xf32>,
    %c0_15 = arith.constant 0 : index
    %c0_16 = arith.constant 0 : index
    %46 = vector.load %arg4[%c0_15, %c0_16] : memref<8x512xf32, #tpu.memory_space<vmem>>, vector<8x512xf32>
    tpu.vector_store %arg4[%c0_15, %c0_16], %28 {strides = array<i32>} : memref<8x512xf32, #tpu.memory_space<vmem>>, vector<8x512xf32>,
    %c0_17 = arith.constant 0 : index
    %c0_18 = arith.constant 0 : index
    %47 = vector.load %arg5[%c0_17, %c0_18] : memref<8x512xf32, #tpu.memory_space<vmem>>, vector<8x512xf32>
    tpu.vector_store %arg5[%c0_17, %c0_18], %43 {strides = array<i32>} : memref<8x512xf32, #tpu.memory_space<vmem>>, vector<8x512xf32>,
    return
  }
  func.func @transform_0(%arg0: i32) -> (i32, i32) {
    %c0_i32 = arith.constant 0 : i32
    %c0_i32_0 = arith.constant 0 : i32
    %c0_i32_1 = arith.constant 0 : i32
    return %c0_i32, %c0_i32_0 : i32, i32
  }
  func.func @transform_1(%arg0: i32) -> (i32, i32) {
    %c0_i32 = arith.constant 0 : i32
    %c0_i32_0 = arith.constant 0 : i32
    %c0_i32_1 = arith.constant 0 : i32
    return %c0_i32, %c0_i32_0 : i32, i32
  }
  func.func @transform_2(%arg0: i32) -> (i32, i32) {
    %c0_i32 = arith.constant 0 : i32
    %c0_i32_0 = arith.constant 0 : i32
    %c0_i32_1 = arith.constant 0 : i32
    return %c0_i32, %c0_i32_0 : i32, i32
  }
  func.func @transform_3(%arg0: i32) -> (i32, i32) {
    %c0_i32 = arith.constant 0 : i32
    %c0_i32_0 = arith.constant 0 : i32
    %c0_i32_1 = arith.constant 0 : i32
    return %c0_i32, %c0_i32_0 : i32, i32
  }
  func.func @transform_4(%arg0: i32) -> (i32, i32) {
    %c0_i32 = arith.constant 0 : i32
    %c0_i32_0 = arith.constant 0 : i32
    %c0_i32_1 = arith.constant 0 : i32
    return %c0_i32, %c0_i32_0 : i32, i32
  }
}

module attributes {stable_mosaic.version = 11 : i64} {
  func.func @_matmul_t_kernel(%arg0: i32, %arg1: memref<1x288xbf16, #tpu.memory_space<vmem>>, %arg2: memref<288x512xbf16, #tpu.memory_space<vmem>>, %arg3: memref<1x1xf32, #tpu.memory_space<vmem>>, %arg4: memref<1x512xf32, #tpu.memory_space<vmem>>) attributes {dimension_semantics = [#tpu.dimension_semantics<parallel>], iteration_bounds = array<i64: 1>, scalar_prefetch = 0 : i64, scratch_operands = 0 : i64, tpu.core_type = #tpu.core_type<tc>, window_params = [{pipeline_mode = #tpu.pipeline_mode<synchronous>, transform_indices = @transform_0, window_bounds = array<i64: 1, 288>}, {transform_indices = @transform_1, window_bounds = array<i64: 288, 512>}, {pipeline_mode = #tpu.pipeline_mode<synchronous>, transform_indices = @transform_2, window_bounds = array<i64: 1, 1>}, {transform_indices = @transform_3, window_bounds = array<i64: 1, 512>}]} {
    %c0 = arith.constant 0 : index
    %c0_0 = arith.constant 0 : index
    %0 = vector.load %arg1[%c0, %c0_0] : memref<1x288xbf16, #tpu.memory_space<vmem>>, vector<1x288xbf16>
    %c0_1 = arith.constant 0 : index
    %c0_2 = arith.constant 0 : index
    %1 = vector.load %arg2[%c0_1, %c0_2] : memref<288x512xbf16, #tpu.memory_space<vmem>>, vector<288x512xbf16>
    %cst = arith.constant dense<0.000000e+00> : vector<1x512xf32>
    %2 = tpu.matmul %0, %1, %cst {dimension_numbers = #tpu.dot_dimension_numbers<[1], [0], [0], [1], [0, 0, 1, 1], [], []>} : vector<1x288xbf16>, vector<288x512xbf16>, vector<1x512xf32> -> vector<1x512xf32>
    %c0_3 = arith.constant 0 : index
    %c0_4 = arith.constant 0 : index
    %3 = vector.load %arg3[%c0_3, %c0_4] : memref<1x1xf32, #tpu.memory_space<vmem>>, vector<1x1xf32>
    %4 = vector.broadcast %3 : vector<1x1xf32> to vector<1x512xf32>
    %5 = arith.addf %2, %4 : vector<1x512xf32>
    %c0_5 = arith.constant 0 : index
    %c0_6 = arith.constant 0 : index
    %6 = vector.load %arg4[%c0_5, %c0_6] : memref<1x512xf32, #tpu.memory_space<vmem>>, vector<1x512xf32>
    tpu.vector_store %arg4[%c0_5, %c0_6], %5 {strides = array<i32>} : memref<1x512xf32, #tpu.memory_space<vmem>>, vector<1x512xf32>,
    return
  }
  func.func @transform_0(%arg0: i32) -> (i32, i32) {
    %c0_i32 = arith.constant 0 : i32
    %c0_i32_0 = arith.constant 0 : i32
    %c0_i32_1 = arith.constant 0 : i32
    return %c0_i32, %c0_i32_0 : i32, i32
  }
  func.func @transform_1(%arg0: i32) -> (i32, i32) {
    %c0_i32 = arith.constant 0 : i32
    %c0_i32_0 = arith.constant 0 : i32
    return %c0_i32, %arg0 : i32, i32
  }
  func.func @transform_2(%arg0: i32) -> (i32, i32) {
    %c0_i32 = arith.constant 0 : i32
    %c0_i32_0 = arith.constant 0 : i32
    %c0_i32_1 = arith.constant 0 : i32
    return %c0_i32, %c0_i32_0 : i32, i32
  }
  func.func @transform_3(%arg0: i32) -> (i32, i32) {
    %c0_i32 = arith.constant 0 : i32
    %c0_i32_0 = arith.constant 0 : i32
    return %c0_i32, %arg0 : i32, i32
  }
}

module attributes {stable_mosaic.version = 11 : i64} {
  func.func @_matmul_t_kernel(%arg0: i32, %arg1: memref<16x18xbf16, #tpu.memory_space<vmem>>, %arg2: memref<18x256xbf16, #tpu.memory_space<vmem>>, %arg3: memref<16x1xf32, #tpu.memory_space<vmem>>, %arg4: memref<16x256xf32, #tpu.memory_space<vmem>>) attributes {dimension_semantics = [#tpu.dimension_semantics<parallel>], iteration_bounds = array<i64: 1>, scalar_prefetch = 0 : i64, scratch_operands = 0 : i64, tpu.core_type = #tpu.core_type<tc>, window_params = [{pipeline_mode = #tpu.pipeline_mode<synchronous>, transform_indices = @transform_0, window_bounds = array<i64: 16, 18>}, {transform_indices = @transform_1, window_bounds = array<i64: 18, 256>}, {pipeline_mode = #tpu.pipeline_mode<synchronous>, transform_indices = @transform_2, window_bounds = array<i64: 16, 1>}, {transform_indices = @transform_3, window_bounds = array<i64: 16, 256>}]} {
    %c0 = arith.constant 0 : index
    %c0_0 = arith.constant 0 : index
    %0 = vector.load %arg1[%c0, %c0_0] : memref<16x18xbf16, #tpu.memory_space<vmem>>, vector<16x18xbf16>
    %c0_1 = arith.constant 0 : index
    %c0_2 = arith.constant 0 : index
    %1 = vector.load %arg2[%c0_1, %c0_2] : memref<18x256xbf16, #tpu.memory_space<vmem>>, vector<18x256xbf16>
    %cst = arith.constant dense<0.000000e+00> : vector<16x256xf32>
    %2 = tpu.matmul %0, %1, %cst {dimension_numbers = #tpu.dot_dimension_numbers<[1], [0], [0], [1], [0, 0, 1, 1], [], []>} : vector<16x18xbf16>, vector<18x256xbf16>, vector<16x256xf32> -> vector<16x256xf32>
    %c0_3 = arith.constant 0 : index
    %c0_4 = arith.constant 0 : index
    %3 = vector.load %arg3[%c0_3, %c0_4] : memref<16x1xf32, #tpu.memory_space<vmem>>, vector<16x1xf32>
    %4 = vector.broadcast %3 : vector<16x1xf32> to vector<16x256xf32>
    %5 = arith.addf %2, %4 : vector<16x256xf32>
    %cst_5 = arith.constant 0.000000e+00 : f32
    %6 = vector.broadcast %cst_5 : f32 to vector<16x256xf32>
    %7 = arith.maximumf %5, %6 : vector<16x256xf32>
    %c0_6 = arith.constant 0 : index
    %c0_7 = arith.constant 0 : index
    %8 = vector.load %arg4[%c0_6, %c0_7] : memref<16x256xf32, #tpu.memory_space<vmem>>, vector<16x256xf32>
    tpu.vector_store %arg4[%c0_6, %c0_7], %7 {strides = array<i32>} : memref<16x256xf32, #tpu.memory_space<vmem>>, vector<16x256xf32>,
    return
  }
  func.func @transform_0(%arg0: i32) -> (i32, i32) {
    %c0_i32 = arith.constant 0 : i32
    %c0_i32_0 = arith.constant 0 : i32
    %c0_i32_1 = arith.constant 0 : i32
    return %c0_i32, %c0_i32_0 : i32, i32
  }
  func.func @transform_1(%arg0: i32) -> (i32, i32) {
    %c0_i32 = arith.constant 0 : i32
    %c0_i32_0 = arith.constant 0 : i32
    return %c0_i32, %arg0 : i32, i32
  }
  func.func @transform_2(%arg0: i32) -> (i32, i32) {
    %c0_i32 = arith.constant 0 : i32
    %c0_i32_0 = arith.constant 0 : i32
    %c0_i32_1 = arith.constant 0 : i32
    return %c0_i32, %c0_i32_0 : i32, i32
  }
  func.func @transform_3(%arg0: i32) -> (i32, i32) {
    %c0_i32 = arith.constant 0 : i32
    %c0_i32_0 = arith.constant 0 : i32
    return %c0_i32, %arg0 : i32, i32
  }
}

module attributes {stable_mosaic.version = 11 : i64} {
  func.func @_memory_kernel(%arg0: i32, %arg1: memref<16x256xf32, #tpu.memory_space<vmem>>, %arg2: memref<8x16xf32, #tpu.memory_space<vmem>>, %arg3: memref<16x256xf32, #tpu.memory_space<vmem>>, %arg4: memref<8x256xf32, #tpu.memory_space<vmem>>, %arg5: memref<8x256xf32, #tpu.memory_space<vmem>>) attributes {dimension_semantics = [#tpu.dimension_semantics<arbitrary>], iteration_bounds = array<i64: 1>, scalar_prefetch = 0 : i64, scratch_operands = 0 : i64, tpu.core_type = #tpu.core_type<tc>, window_params = [{pipeline_mode = #tpu.pipeline_mode<synchronous>, transform_indices = @transform_0, window_bounds = array<i64: 16, 256>}, {pipeline_mode = #tpu.pipeline_mode<synchronous>, transform_indices = @transform_1, window_bounds = array<i64: 8, 16>}, {pipeline_mode = #tpu.pipeline_mode<synchronous>, transform_indices = @transform_2, window_bounds = array<i64: 16, 256>}, {pipeline_mode = #tpu.pipeline_mode<synchronous>, transform_indices = @transform_3, window_bounds = array<i64: 8, 256>}, {pipeline_mode = #tpu.pipeline_mode<synchronous>, transform_indices = @transform_4, window_bounds = array<i64: 8, 256>}]} {
    %c0 = arith.constant 0 : index
    %c0_0 = arith.constant 0 : index
    %0 = vector.load %arg1[%c0, %c0_0] : memref<16x256xf32, #tpu.memory_space<vmem>>, vector<16x256xf32>
    %c0_1 = arith.constant 0 : index
    %c0_2 = arith.constant 0 : index
    %1 = vector.load %arg2[%c0_1, %c0_2] : memref<8x16xf32, #tpu.memory_space<vmem>>, vector<8x16xf32>
    %2 = arith.mulf %0, %0 : vector<16x256xf32>
    %cst = arith.constant dense<0.000000e+00> : vector<256xf32>
    %3 = vector.multi_reduction <add>, %2, %cst [0] : vector<16x256xf32> to vector<256xf32>
    %4 = vector.shape_cast %3 : vector<256xf32> to vector<1x256xf32>
    %cst_3 = arith.constant 9.99999996E-13 : f32
    %5 = vector.broadcast %cst_3 : f32 to vector<1x256xf32>
    %6 = arith.addf %4, %5 : vector<1x256xf32>
    %7 = math.rsqrt %6 : vector<1x256xf32>
    %8 = vector.broadcast %7 : vector<1x256xf32> to vector<16x256xf32>
    %9 = arith.mulf %0, %8 : vector<16x256xf32>
    %10 = arith.mulf %1, %1 : vector<8x16xf32>
    %cst_4 = arith.constant dense<0.000000e+00> : vector<8xf32>
    %11 = vector.multi_reduction <add>, %10, %cst_4 [1] : vector<8x16xf32> to vector<8xf32>
    %12 = vector.shape_cast %11 : vector<8xf32> to vector<8x1xf32>
    %cst_5 = arith.constant 9.99999996E-13 : f32
    %13 = vector.broadcast %cst_5 : f32 to vector<8x1xf32>
    %14 = arith.addf %12, %13 : vector<8x1xf32>
    %15 = math.rsqrt %14 : vector<8x1xf32>
    %16 = vector.broadcast %15 : vector<8x1xf32> to vector<8x16xf32>
    %17 = arith.mulf %1, %16 : vector<8x16xf32>
    %cst_6 = arith.constant dense<0.000000e+00> : vector<8x256xf32>
    %18 = tpu.matmul %17, %9, %cst_6 {dimension_numbers = #tpu.dot_dimension_numbers<[1], [0], [0], [1], [0, 0, 1, 1], [], []>} : vector<8x16xf32>, vector<16x256xf32>, vector<8x256xf32> -> vector<8x256xf32>
    %cst_7 = arith.constant dense<0xFF800000> : vector<256xf32>
    %19 = vector.multi_reduction <maximumf>, %18, %cst_7 [0] : vector<8x256xf32> to vector<256xf32>
    %20 = vector.shape_cast %19 : vector<256xf32> to vector<1x256xf32>
    %21 = vector.broadcast %20 : vector<1x256xf32> to vector<8x256xf32>
    %22 = arith.subf %18, %21 : vector<8x256xf32>
    %23 = math.exp %22 : vector<8x256xf32>
    %cst_8 = arith.constant dense<0.000000e+00> : vector<256xf32>
    %24 = vector.multi_reduction <add>, %23, %cst_8 [0] : vector<8x256xf32> to vector<256xf32>
    %25 = vector.shape_cast %24 : vector<256xf32> to vector<1x256xf32>
    %26 = tpu.reciprocal %25 {approx = true} : vector<1x256xf32> -> vector<1x256xf32>
    %27 = vector.broadcast %26 : vector<1x256xf32> to vector<8x256xf32>
    %28 = arith.mulf %23, %27 : vector<8x256xf32>
    %29 = tpu.iota {dimensions = array<i32: 1>} : vector<8x256xi32>
    %c256_i32 = arith.constant 256 : i32
    %30 = vector.broadcast %c256_i32 : i32 to vector<8x256xi32>
    %31 = arith.cmpi slt, %29, %30 : vector<8x256xi32>
    %cst_9 = arith.constant 0xFF800000 : f32
    %32 = vector.broadcast %cst_9 : f32 to vector<8x256xf32>
    %33 = arith.select %31, %18, %32 : vector<8x256xi1>, vector<8x256xf32>
    %cst_10 = arith.constant dense<0xFF800000> : vector<8xf32>
    %34 = vector.multi_reduction <maximumf>, %33, %cst_10 [1] : vector<8x256xf32> to vector<8xf32>
    %35 = vector.shape_cast %34 : vector<8xf32> to vector<8x1xf32>
    %36 = vector.broadcast %35 : vector<8x1xf32> to vector<8x256xf32>
    %37 = arith.subf %33, %36 : vector<8x256xf32>
    %38 = math.exp %37 : vector<8x256xf32>
    %cst_11 = arith.constant dense<0.000000e+00> : vector<8xf32>
    %39 = vector.multi_reduction <add>, %38, %cst_11 [1] : vector<8x256xf32> to vector<8xf32>
    %40 = vector.shape_cast %39 : vector<8xf32> to vector<8x1xf32>
    %41 = tpu.reciprocal %40 {approx = true} : vector<8x1xf32> -> vector<8x1xf32>
    %42 = vector.broadcast %41 : vector<8x1xf32> to vector<8x256xf32>
    %43 = arith.mulf %38, %42 : vector<8x256xf32>
    %cst_12 = arith.constant dense<0.000000e+00> : vector<16x256xf32>
    %44 = tpu.matmul %1, %28, %cst_12 {dimension_numbers = #tpu.dot_dimension_numbers<[0], [0], [1], [1], [0, 1, 1, 1], [], []>} : vector<8x16xf32>, vector<8x256xf32>, vector<16x256xf32> -> vector<16x256xf32>
    %c0_13 = arith.constant 0 : index
    %c0_14 = arith.constant 0 : index
    %45 = vector.load %arg3[%c0_13, %c0_14] : memref<16x256xf32, #tpu.memory_space<vmem>>, vector<16x256xf32>
    tpu.vector_store %arg3[%c0_13, %c0_14], %44 {strides = array<i32>} : memref<16x256xf32, #tpu.memory_space<vmem>>, vector<16x256xf32>,
    %c0_15 = arith.constant 0 : index
    %c0_16 = arith.constant 0 : index
    %46 = vector.load %arg4[%c0_15, %c0_16] : memref<8x256xf32, #tpu.memory_space<vmem>>, vector<8x256xf32>
    tpu.vector_store %arg4[%c0_15, %c0_16], %28 {strides = array<i32>} : memref<8x256xf32, #tpu.memory_space<vmem>>, vector<8x256xf32>,
    %c0_17 = arith.constant 0 : index
    %c0_18 = arith.constant 0 : index
    %47 = vector.load %arg5[%c0_17, %c0_18] : memref<8x256xf32, #tpu.memory_space<vmem>>, vector<8x256xf32>
    tpu.vector_store %arg5[%c0_17, %c0_18], %43 {strides = array<i32>} : memref<8x256xf32, #tpu.memory_space<vmem>>, vector<8x256xf32>,
    return
  }
  func.func @transform_0(%arg0: i32) -> (i32, i32) {
    %c0_i32 = arith.constant 0 : i32
    %c0_i32_0 = arith.constant 0 : i32
    %c0_i32_1 = arith.constant 0 : i32
    return %c0_i32, %c0_i32_0 : i32, i32
  }
  func.func @transform_1(%arg0: i32) -> (i32, i32) {
    %c0_i32 = arith.constant 0 : i32
    %c0_i32_0 = arith.constant 0 : i32
    %c0_i32_1 = arith.constant 0 : i32
    return %c0_i32, %c0_i32_0 : i32, i32
  }
  func.func @transform_2(%arg0: i32) -> (i32, i32) {
    %c0_i32 = arith.constant 0 : i32
    %c0_i32_0 = arith.constant 0 : i32
    %c0_i32_1 = arith.constant 0 : i32
    return %c0_i32, %c0_i32_0 : i32, i32
  }
  func.func @transform_3(%arg0: i32) -> (i32, i32) {
    %c0_i32 = arith.constant 0 : i32
    %c0_i32_0 = arith.constant 0 : i32
    %c0_i32_1 = arith.constant 0 : i32
    return %c0_i32, %c0_i32_0 : i32, i32
  }
  func.func @transform_4(%arg0: i32) -> (i32, i32) {
    %c0_i32 = arith.constant 0 : i32
    %c0_i32_0 = arith.constant 0 : i32
    %c0_i32_1 = arith.constant 0 : i32
    return %c0_i32, %c0_i32_0 : i32, i32
  }
}

module attributes {stable_mosaic.version = 11 : i64} {
  func.func @_matmul_t_kernel(%arg0: i32, %arg1: memref<8x9xbf16, #tpu.memory_space<vmem>>, %arg2: memref<9x384xbf16, #tpu.memory_space<vmem>>, %arg3: memref<8x1xf32, #tpu.memory_space<vmem>>, %arg4: memref<8x384xf32, #tpu.memory_space<vmem>>) attributes {dimension_semantics = [#tpu.dimension_semantics<parallel>], iteration_bounds = array<i64: 1>, scalar_prefetch = 0 : i64, scratch_operands = 0 : i64, tpu.core_type = #tpu.core_type<tc>, window_params = [{pipeline_mode = #tpu.pipeline_mode<synchronous>, transform_indices = @transform_0, window_bounds = array<i64: 8, 9>}, {transform_indices = @transform_1, window_bounds = array<i64: 9, 384>}, {pipeline_mode = #tpu.pipeline_mode<synchronous>, transform_indices = @transform_2, window_bounds = array<i64: 8, 1>}, {transform_indices = @transform_3, window_bounds = array<i64: 8, 384>}]} {
    %c0 = arith.constant 0 : index
    %c0_0 = arith.constant 0 : index
    %0 = vector.load %arg1[%c0, %c0_0] : memref<8x9xbf16, #tpu.memory_space<vmem>>, vector<8x9xbf16>
    %c0_1 = arith.constant 0 : index
    %c0_2 = arith.constant 0 : index
    %1 = vector.load %arg2[%c0_1, %c0_2] : memref<9x384xbf16, #tpu.memory_space<vmem>>, vector<9x384xbf16>
    %cst = arith.constant dense<0.000000e+00> : vector<8x384xf32>
    %2 = tpu.matmul %0, %1, %cst {dimension_numbers = #tpu.dot_dimension_numbers<[1], [0], [0], [1], [0, 0, 1, 1], [], []>} : vector<8x9xbf16>, vector<9x384xbf16>, vector<8x384xf32> -> vector<8x384xf32>
    %c0_3 = arith.constant 0 : index
    %c0_4 = arith.constant 0 : index
    %3 = vector.load %arg3[%c0_3, %c0_4] : memref<8x1xf32, #tpu.memory_space<vmem>>, vector<8x1xf32>
    %4 = vector.broadcast %3 : vector<8x1xf32> to vector<8x384xf32>
    %5 = arith.addf %2, %4 : vector<8x384xf32>
    %cst_5 = arith.constant 0.000000e+00 : f32
    %6 = vector.broadcast %cst_5 : f32 to vector<8x384xf32>
    %7 = arith.maximumf %5, %6 : vector<8x384xf32>
    %c0_6 = arith.constant 0 : index
    %c0_7 = arith.constant 0 : index
    %8 = vector.load %arg4[%c0_6, %c0_7] : memref<8x384xf32, #tpu.memory_space<vmem>>, vector<8x384xf32>
    tpu.vector_store %arg4[%c0_6, %c0_7], %7 {strides = array<i32>} : memref<8x384xf32, #tpu.memory_space<vmem>>, vector<8x384xf32>,
    return
  }
  func.func @transform_0(%arg0: i32) -> (i32, i32) {
    %c0_i32 = arith.constant 0 : i32
    %c0_i32_0 = arith.constant 0 : i32
    %c0_i32_1 = arith.constant 0 : i32
    return %c0_i32, %c0_i32_0 : i32, i32
  }
  func.func @transform_1(%arg0: i32) -> (i32, i32) {
    %c0_i32 = arith.constant 0 : i32
    %c0_i32_0 = arith.constant 0 : i32
    return %c0_i32, %arg0 : i32, i32
  }
  func.func @transform_2(%arg0: i32) -> (i32, i32) {
    %c0_i32 = arith.constant 0 : i32
    %c0_i32_0 = arith.constant 0 : i32
    %c0_i32_1 = arith.constant 0 : i32
    return %c0_i32, %c0_i32_0 : i32, i32
  }
  func.func @transform_3(%arg0: i32) -> (i32, i32) {
    %c0_i32 = arith.constant 0 : i32
    %c0_i32_0 = arith.constant 0 : i32
    return %c0_i32, %arg0 : i32, i32
  }
}

module attributes {stable_mosaic.version = 11 : i64} {
  func.func @_matmul_t_kernel(%arg0: i32, %arg1: memref<2x72xbf16, #tpu.memory_space<vmem>>, %arg2: memref<72x384xbf16, #tpu.memory_space<vmem>>, %arg3: memref<2x1xf32, #tpu.memory_space<vmem>>, %arg4: memref<2x384xf32, #tpu.memory_space<vmem>>) attributes {dimension_semantics = [#tpu.dimension_semantics<parallel>], iteration_bounds = array<i64: 1>, scalar_prefetch = 0 : i64, scratch_operands = 0 : i64, tpu.core_type = #tpu.core_type<tc>, window_params = [{pipeline_mode = #tpu.pipeline_mode<synchronous>, transform_indices = @transform_0, window_bounds = array<i64: 2, 72>}, {transform_indices = @transform_1, window_bounds = array<i64: 72, 384>}, {pipeline_mode = #tpu.pipeline_mode<synchronous>, transform_indices = @transform_2, window_bounds = array<i64: 2, 1>}, {transform_indices = @transform_3, window_bounds = array<i64: 2, 384>}]} {
    %c0 = arith.constant 0 : index
    %c0_0 = arith.constant 0 : index
    %0 = vector.load %arg1[%c0, %c0_0] : memref<2x72xbf16, #tpu.memory_space<vmem>>, vector<2x72xbf16>
    %c0_1 = arith.constant 0 : index
    %c0_2 = arith.constant 0 : index
    %1 = vector.load %arg2[%c0_1, %c0_2] : memref<72x384xbf16, #tpu.memory_space<vmem>>, vector<72x384xbf16>
    %cst = arith.constant dense<0.000000e+00> : vector<2x384xf32>
    %2 = tpu.matmul %0, %1, %cst {dimension_numbers = #tpu.dot_dimension_numbers<[1], [0], [0], [1], [0, 0, 1, 1], [], []>} : vector<2x72xbf16>, vector<72x384xbf16>, vector<2x384xf32> -> vector<2x384xf32>
    %c0_3 = arith.constant 0 : index
    %c0_4 = arith.constant 0 : index
    %3 = vector.load %arg3[%c0_3, %c0_4] : memref<2x1xf32, #tpu.memory_space<vmem>>, vector<2x1xf32>
    %4 = vector.broadcast %3 : vector<2x1xf32> to vector<2x384xf32>
    %5 = arith.addf %2, %4 : vector<2x384xf32>
    %c0_5 = arith.constant 0 : index
    %c0_6 = arith.constant 0 : index
    %6 = vector.load %arg4[%c0_5, %c0_6] : memref<2x384xf32, #tpu.memory_space<vmem>>, vector<2x384xf32>
    tpu.vector_store %arg4[%c0_5, %c0_6], %5 {strides = array<i32>} : memref<2x384xf32, #tpu.memory_space<vmem>>, vector<2x384xf32>,
    return
  }
  func.func @transform_0(%arg0: i32) -> (i32, i32) {
    %c0_i32 = arith.constant 0 : i32
    %c0_i32_0 = arith.constant 0 : i32
    %c0_i32_1 = arith.constant 0 : i32
    return %c0_i32, %c0_i32_0 : i32, i32
  }
  func.func @transform_1(%arg0: i32) -> (i32, i32) {
    %c0_i32 = arith.constant 0 : i32
    %c0_i32_0 = arith.constant 0 : i32
    return %c0_i32, %arg0 : i32, i32
  }
  func.func @transform_2(%arg0: i32) -> (i32, i32) {
    %c0_i32 = arith.constant 0 : i32
    %c0_i32_0 = arith.constant 0 : i32
    %c0_i32_1 = arith.constant 0 : i32
    return %c0_i32, %c0_i32_0 : i32, i32
  }
  func.func @transform_3(%arg0: i32) -> (i32, i32) {
    %c0_i32 = arith.constant 0 : i32
    %c0_i32_0 = arith.constant 0 : i32
    return %c0_i32, %arg0 : i32, i32
  }
}

module attributes {stable_mosaic.version = 11 : i64} {
  func.func @_matmul_t_kernel(%arg0: i32, %arg1: memref<8x9xbf16, #tpu.memory_space<vmem>>, %arg2: memref<9x640xbf16, #tpu.memory_space<vmem>>, %arg3: memref<8x1xf32, #tpu.memory_space<vmem>>, %arg4: memref<8x640xf32, #tpu.memory_space<vmem>>) attributes {dimension_semantics = [#tpu.dimension_semantics<parallel>], iteration_bounds = array<i64: 1>, scalar_prefetch = 0 : i64, scratch_operands = 0 : i64, tpu.core_type = #tpu.core_type<tc>, window_params = [{pipeline_mode = #tpu.pipeline_mode<synchronous>, transform_indices = @transform_0, window_bounds = array<i64: 8, 9>}, {transform_indices = @transform_1, window_bounds = array<i64: 9, 640>}, {pipeline_mode = #tpu.pipeline_mode<synchronous>, transform_indices = @transform_2, window_bounds = array<i64: 8, 1>}, {transform_indices = @transform_3, window_bounds = array<i64: 8, 640>}]} {
    %c0 = arith.constant 0 : index
    %c0_0 = arith.constant 0 : index
    %0 = vector.load %arg1[%c0, %c0_0] : memref<8x9xbf16, #tpu.memory_space<vmem>>, vector<8x9xbf16>
    %c0_1 = arith.constant 0 : index
    %c0_2 = arith.constant 0 : index
    %1 = vector.load %arg2[%c0_1, %c0_2] : memref<9x640xbf16, #tpu.memory_space<vmem>>, vector<9x640xbf16>
    %cst = arith.constant dense<0.000000e+00> : vector<8x640xf32>
    %2 = tpu.matmul %0, %1, %cst {dimension_numbers = #tpu.dot_dimension_numbers<[1], [0], [0], [1], [0, 0, 1, 1], [], []>} : vector<8x9xbf16>, vector<9x640xbf16>, vector<8x640xf32> -> vector<8x640xf32>
    %c0_3 = arith.constant 0 : index
    %c0_4 = arith.constant 0 : index
    %3 = vector.load %arg3[%c0_3, %c0_4] : memref<8x1xf32, #tpu.memory_space<vmem>>, vector<8x1xf32>
    %4 = vector.broadcast %3 : vector<8x1xf32> to vector<8x640xf32>
    %5 = arith.addf %2, %4 : vector<8x640xf32>
    %cst_5 = arith.constant 0.000000e+00 : f32
    %6 = vector.broadcast %cst_5 : f32 to vector<8x640xf32>
    %7 = arith.maximumf %5, %6 : vector<8x640xf32>
    %c0_6 = arith.constant 0 : index
    %c0_7 = arith.constant 0 : index
    %8 = vector.load %arg4[%c0_6, %c0_7] : memref<8x640xf32, #tpu.memory_space<vmem>>, vector<8x640xf32>
    tpu.vector_store %arg4[%c0_6, %c0_7], %7 {strides = array<i32>} : memref<8x640xf32, #tpu.memory_space<vmem>>, vector<8x640xf32>,
    return
  }
  func.func @transform_0(%arg0: i32) -> (i32, i32) {
    %c0_i32 = arith.constant 0 : i32
    %c0_i32_0 = arith.constant 0 : i32
    %c0_i32_1 = arith.constant 0 : i32
    return %c0_i32, %c0_i32_0 : i32, i32
  }
  func.func @transform_1(%arg0: i32) -> (i32, i32) {
    %c0_i32 = arith.constant 0 : i32
    %c0_i32_0 = arith.constant 0 : i32
    return %c0_i32, %arg0 : i32, i32
  }
  func.func @transform_2(%arg0: i32) -> (i32, i32) {
    %c0_i32 = arith.constant 0 : i32
    %c0_i32_0 = arith.constant 0 : i32
    %c0_i32_1 = arith.constant 0 : i32
    return %c0_i32, %c0_i32_0 : i32, i32
  }
  func.func @transform_3(%arg0: i32) -> (i32, i32) {
    %c0_i32 = arith.constant 0 : i32
    %c0_i32_0 = arith.constant 0 : i32
    return %c0_i32, %arg0 : i32, i32
  }
}

module attributes {stable_mosaic.version = 11 : i64} {
  func.func @_matmul_t_kernel(%arg0: i32, %arg1: memref<2x72xbf16, #tpu.memory_space<vmem>>, %arg2: memref<72x640xbf16, #tpu.memory_space<vmem>>, %arg3: memref<2x1xf32, #tpu.memory_space<vmem>>, %arg4: memref<2x640xf32, #tpu.memory_space<vmem>>) attributes {dimension_semantics = [#tpu.dimension_semantics<parallel>], iteration_bounds = array<i64: 1>, scalar_prefetch = 0 : i64, scratch_operands = 0 : i64, tpu.core_type = #tpu.core_type<tc>, window_params = [{pipeline_mode = #tpu.pipeline_mode<synchronous>, transform_indices = @transform_0, window_bounds = array<i64: 2, 72>}, {transform_indices = @transform_1, window_bounds = array<i64: 72, 640>}, {pipeline_mode = #tpu.pipeline_mode<synchronous>, transform_indices = @transform_2, window_bounds = array<i64: 2, 1>}, {transform_indices = @transform_3, window_bounds = array<i64: 2, 640>}]} {
    %c0 = arith.constant 0 : index
    %c0_0 = arith.constant 0 : index
    %0 = vector.load %arg1[%c0, %c0_0] : memref<2x72xbf16, #tpu.memory_space<vmem>>, vector<2x72xbf16>
    %c0_1 = arith.constant 0 : index
    %c0_2 = arith.constant 0 : index
    %1 = vector.load %arg2[%c0_1, %c0_2] : memref<72x640xbf16, #tpu.memory_space<vmem>>, vector<72x640xbf16>
    %cst = arith.constant dense<0.000000e+00> : vector<2x640xf32>
    %2 = tpu.matmul %0, %1, %cst {dimension_numbers = #tpu.dot_dimension_numbers<[1], [0], [0], [1], [0, 0, 1, 1], [], []>} : vector<2x72xbf16>, vector<72x640xbf16>, vector<2x640xf32> -> vector<2x640xf32>
    %c0_3 = arith.constant 0 : index
    %c0_4 = arith.constant 0 : index
    %3 = vector.load %arg3[%c0_3, %c0_4] : memref<2x1xf32, #tpu.memory_space<vmem>>, vector<2x1xf32>
    %4 = vector.broadcast %3 : vector<2x1xf32> to vector<2x640xf32>
    %5 = arith.addf %2, %4 : vector<2x640xf32>
    %c0_5 = arith.constant 0 : index
    %c0_6 = arith.constant 0 : index
    %6 = vector.load %arg4[%c0_5, %c0_6] : memref<2x640xf32, #tpu.memory_space<vmem>>, vector<2x640xf32>
    tpu.vector_store %arg4[%c0_5, %c0_6], %5 {strides = array<i32>} : memref<2x640xf32, #tpu.memory_space<vmem>>, vector<2x640xf32>,
    return
  }
  func.func @transform_0(%arg0: i32) -> (i32, i32) {
    %c0_i32 = arith.constant 0 : i32
    %c0_i32_0 = arith.constant 0 : i32
    %c0_i32_1 = arith.constant 0 : i32
    return %c0_i32, %c0_i32_0 : i32, i32
  }
  func.func @transform_1(%arg0: i32) -> (i32, i32) {
    %c0_i32 = arith.constant 0 : i32
    %c0_i32_0 = arith.constant 0 : i32
    return %c0_i32, %arg0 : i32, i32
  }
  func.func @transform_2(%arg0: i32) -> (i32, i32) {
    %c0_i32 = arith.constant 0 : i32
    %c0_i32_0 = arith.constant 0 : i32
    %c0_i32_1 = arith.constant 0 : i32
    return %c0_i32, %c0_i32_0 : i32, i32
  }
  func.func @transform_3(%arg0: i32) -> (i32, i32) {
    %c0_i32 = arith.constant 0 : i32
    %c0_i32_0 = arith.constant 0 : i32
    return %c0_i32, %arg0 : i32, i32
  }
}

module attributes {stable_mosaic.version = 11 : i64} {
  func.func @_matmul_t_kernel(%arg0: i32, %arg1: memref<8x9xbf16, #tpu.memory_space<vmem>>, %arg2: memref<9x1152xbf16, #tpu.memory_space<vmem>>, %arg3: memref<8x1xf32, #tpu.memory_space<vmem>>, %arg4: memref<8x1152xf32, #tpu.memory_space<vmem>>) attributes {dimension_semantics = [#tpu.dimension_semantics<parallel>], iteration_bounds = array<i64: 1>, scalar_prefetch = 0 : i64, scratch_operands = 0 : i64, tpu.core_type = #tpu.core_type<tc>, window_params = [{pipeline_mode = #tpu.pipeline_mode<synchronous>, transform_indices = @transform_0, window_bounds = array<i64: 8, 9>}, {transform_indices = @transform_1, window_bounds = array<i64: 9, 1152>}, {pipeline_mode = #tpu.pipeline_mode<synchronous>, transform_indices = @transform_2, window_bounds = array<i64: 8, 1>}, {transform_indices = @transform_3, window_bounds = array<i64: 8, 1152>}]} {
    %c0 = arith.constant 0 : index
    %c0_0 = arith.constant 0 : index
    %0 = vector.load %arg1[%c0, %c0_0] : memref<8x9xbf16, #tpu.memory_space<vmem>>, vector<8x9xbf16>
    %c0_1 = arith.constant 0 : index
    %c0_2 = arith.constant 0 : index
    %1 = vector.load %arg2[%c0_1, %c0_2] : memref<9x1152xbf16, #tpu.memory_space<vmem>>, vector<9x1152xbf16>
    %cst = arith.constant dense<0.000000e+00> : vector<8x1152xf32>
    %2 = tpu.matmul %0, %1, %cst {dimension_numbers = #tpu.dot_dimension_numbers<[1], [0], [0], [1], [0, 0, 1, 1], [], []>} : vector<8x9xbf16>, vector<9x1152xbf16>, vector<8x1152xf32> -> vector<8x1152xf32>
    %c0_3 = arith.constant 0 : index
    %c0_4 = arith.constant 0 : index
    %3 = vector.load %arg3[%c0_3, %c0_4] : memref<8x1xf32, #tpu.memory_space<vmem>>, vector<8x1xf32>
    %4 = vector.broadcast %3 : vector<8x1xf32> to vector<8x1152xf32>
    %5 = arith.addf %2, %4 : vector<8x1152xf32>
    %cst_5 = arith.constant 0.000000e+00 : f32
    %6 = vector.broadcast %cst_5 : f32 to vector<8x1152xf32>
    %7 = arith.maximumf %5, %6 : vector<8x1152xf32>
    %c0_6 = arith.constant 0 : index
    %c0_7 = arith.constant 0 : index
    %8 = vector.load %arg4[%c0_6, %c0_7] : memref<8x1152xf32, #tpu.memory_space<vmem>>, vector<8x1152xf32>
    tpu.vector_store %arg4[%c0_6, %c0_7], %7 {strides = array<i32>} : memref<8x1152xf32, #tpu.memory_space<vmem>>, vector<8x1152xf32>,
    return
  }
  func.func @transform_0(%arg0: i32) -> (i32, i32) {
    %c0_i32 = arith.constant 0 : i32
    %c0_i32_0 = arith.constant 0 : i32
    %c0_i32_1 = arith.constant 0 : i32
    return %c0_i32, %c0_i32_0 : i32, i32
  }
  func.func @transform_1(%arg0: i32) -> (i32, i32) {
    %c0_i32 = arith.constant 0 : i32
    %c0_i32_0 = arith.constant 0 : i32
    return %c0_i32, %arg0 : i32, i32
  }
  func.func @transform_2(%arg0: i32) -> (i32, i32) {
    %c0_i32 = arith.constant 0 : i32
    %c0_i32_0 = arith.constant 0 : i32
    %c0_i32_1 = arith.constant 0 : i32
    return %c0_i32, %c0_i32_0 : i32, i32
  }
  func.func @transform_3(%arg0: i32) -> (i32, i32) {
    %c0_i32 = arith.constant 0 : i32
    %c0_i32_0 = arith.constant 0 : i32
    return %c0_i32, %arg0 : i32, i32
  }
}

module attributes {stable_mosaic.version = 11 : i64} {
  func.func @_matmul_t_kernel(%arg0: i32, %arg1: memref<2x72xbf16, #tpu.memory_space<vmem>>, %arg2: memref<72x1152xbf16, #tpu.memory_space<vmem>>, %arg3: memref<2x1xf32, #tpu.memory_space<vmem>>, %arg4: memref<2x1152xf32, #tpu.memory_space<vmem>>) attributes {dimension_semantics = [#tpu.dimension_semantics<parallel>], iteration_bounds = array<i64: 1>, scalar_prefetch = 0 : i64, scratch_operands = 0 : i64, tpu.core_type = #tpu.core_type<tc>, window_params = [{pipeline_mode = #tpu.pipeline_mode<synchronous>, transform_indices = @transform_0, window_bounds = array<i64: 2, 72>}, {transform_indices = @transform_1, window_bounds = array<i64: 72, 1152>}, {pipeline_mode = #tpu.pipeline_mode<synchronous>, transform_indices = @transform_2, window_bounds = array<i64: 2, 1>}, {transform_indices = @transform_3, window_bounds = array<i64: 2, 1152>}]} {
    %c0 = arith.constant 0 : index
    %c0_0 = arith.constant 0 : index
    %0 = vector.load %arg1[%c0, %c0_0] : memref<2x72xbf16, #tpu.memory_space<vmem>>, vector<2x72xbf16>
    %c0_1 = arith.constant 0 : index
    %c0_2 = arith.constant 0 : index
    %1 = vector.load %arg2[%c0_1, %c0_2] : memref<72x1152xbf16, #tpu.memory_space<vmem>>, vector<72x1152xbf16>
    %cst = arith.constant dense<0.000000e+00> : vector<2x1152xf32>
    %2 = tpu.matmul %0, %1, %cst {dimension_numbers = #tpu.dot_dimension_numbers<[1], [0], [0], [1], [0, 0, 1, 1], [], []>} : vector<2x72xbf16>, vector<72x1152xbf16>, vector<2x1152xf32> -> vector<2x1152xf32>
    %c0_3 = arith.constant 0 : index
    %c0_4 = arith.constant 0 : index
    %3 = vector.load %arg3[%c0_3, %c0_4] : memref<2x1xf32, #tpu.memory_space<vmem>>, vector<2x1xf32>
    %4 = vector.broadcast %3 : vector<2x1xf32> to vector<2x1152xf32>
    %5 = arith.addf %2, %4 : vector<2x1152xf32>
    %c0_5 = arith.constant 0 : index
    %c0_6 = arith.constant 0 : index
    %6 = vector.load %arg4[%c0_5, %c0_6] : memref<2x1152xf32, #tpu.memory_space<vmem>>, vector<2x1152xf32>
    tpu.vector_store %arg4[%c0_5, %c0_6], %5 {strides = array<i32>} : memref<2x1152xf32, #tpu.memory_space<vmem>>, vector<2x1152xf32>,
    return
  }
  func.func @transform_0(%arg0: i32) -> (i32, i32) {
    %c0_i32 = arith.constant 0 : i32
    %c0_i32_0 = arith.constant 0 : i32
    %c0_i32_1 = arith.constant 0 : i32
    return %c0_i32, %c0_i32_0 : i32, i32
  }
  func.func @transform_1(%arg0: i32) -> (i32, i32) {
    %c0_i32 = arith.constant 0 : i32
    %c0_i32_0 = arith.constant 0 : i32
    return %c0_i32, %arg0 : i32, i32
  }
  func.func @transform_2(%arg0: i32) -> (i32, i32) {
    %c0_i32 = arith.constant 0 : i32
    %c0_i32_0 = arith.constant 0 : i32
    %c0_i32_1 = arith.constant 0 : i32
    return %c0_i32, %c0_i32_0 : i32, i32
  }
  func.func @transform_3(%arg0: i32) -> (i32, i32) {
    %c0_i32 = arith.constant 0 : i32
    %c0_i32_0 = arith.constant 0 : i32
    return %c0_i32, %arg0 : i32, i32
  }
}

</mosaic_0001>

<bundles_post_ra>
// kernel: parallel_model_forward.19
= control target key start
LH: loop header
LB: loop body
LE: loop exit
PB: predicated region body
PF: predicated region fallthrough
CT: control target
= control target key end

     0   :  { %8 = vsyncpa [#allocation3], 0  ;;  %s173_s12 = smov [#allocation2]   ;;  %s227_s0 = inlined_call_operand.hbm [shape: bf16[16,18], index: 0, kind: input, shape index: {}]   ;;  %s228_s1 = inlined_call_operand.vmem [shape: bf16[18,256], index: 1, kind: input, shape index: {}]   ;;  %s229_s2 = inlined_call_operand.vmem [shape: f32[16,1], index: 2, kind: input, shape index: {}]   ;;  %s230_s3 = inlined_call_operand.vmem [shape: f32[16,256], index: 3, kind: output, shape index: {}]  }
   0x1   :  { %s14_s13 = sshll.u32 %s173_s12, 4  ;;  %s15_s13 = int_to_ptr.vmem [resolvable:$true] %s14_s13 }
   0x2   :  { %s159_s14 = scalar_lea.vmem %s15_s13, 128  ;;  %p164_p1 = scmp.lt.s32.totalorder %s15_s13, %s15_s13 }
   0x3   :  { %p160_p0 = scmp.ne.s32.totalorder %s15_s13, %s159_s14  ;;  %p165_p2 = scmp.lt.s32.totalorder %s159_s14, %s159_s14 }
   0x5   :  { %p166_p3 = por %p165_p2, %p164_p1 }
   0x7   :  { %p167_p4 = pnand %p166_p3, %p160_p0 }
   0x9   :  { %170 = shalt.err (!%p167_p4)
}
   0xa   :  { %s174_s15 = smov 64   ;;  %s175_s16 = smov 4  }
   0xb   :  { %20 = dma.hbm_to_vmem [thread:$0]  %s227_s0, 128, %s15_s13, [#allocation3], %s174_s15, %s174_s15, %s175_s16  }
   0xc   :  { %171 = dma.done.wait [#allocation3], 128  }
   0xd   :  { %172 = vsyncadd [#allocation3], 4294967168  ;;  %v176_v0 = vmov 0   ;;  %v33_v1 = vld [vmem:[%s228_s1 + $0x10] sm:$0x11]  ;;  %vm70_vm0 = vcmask 1040384  }
   0xe   :  { %109 = vmatprep.mubr.bf16.mxu0 %v176_v0  ;;  %144 = vset.pattern.permute.xlu0 %v176_v0  ;;  %v137_v2 = vcombine.high %v33_v1, %v33_v1  ;;  %v136_v3 = vcombine.low %v33_v1, %v33_v1  ;;  %v147_v4 = vld [vmem:[%s228_s1 + $0x4] ss:$8 sps:$4 sm:$0xff]   ;;  %v149_v7 = vld [vmem:[%s228_s1] ss:$8 sps:$4 sm:$0xff]   ;;  %vm66_vm1 = vcmask 146432  }
   0xf   :  { %v34_v5 = vld [vmem:[%s229_s2] sm:$0xff]  ;;  %v35_v8 = vld [vmem:[%s229_s2 + $0x8] sm:$0xff] }
  0x10   :  { %138 = vmatprep.subr.msk.bf16.mxu0 %vm70_vm0, %v137_v2  ;;  %v72_v6 = vsel %vm70_vm0, %v136_v3, 0  ;;  %38 = vperm.xlu0 %144, %v34_v5   ;;  %v150_v9 = vld [vmem:[#allocation2] sm:$0xff]  }
  0x11   :  { %90 = vmatpush1.bf16.msra.mxu0 %v72_v6 }
  0x12   :  { %91 = vmatprep.subr.bf16.mxu0 %v147_v4 }
  0x14   :  { %43 = vperm.xlu0 %144, %v35_v8  }
  0x15   :  { %92 = vmatpush1.bf16.msra.mxu0 %v149_v7 }
  0x18   :  { %139 = vmatmul.mubr.msk.bf16.vlgmr.msra.gmra.mxu0 %vm66_vm1, %v150_v9 }
  0x8b   :  { %v39_v10 = vpop.permute.xlu0 %38 }
  0x8f   :  { %v44_v16 = vpop.permute.xlu0 %43 }
  0xd8   :  { %v111_v11 = vpop.f32.mrf.mxu0 }
  0xd9   :  { %v112_v12 = vadd.f32 %v111_v11, %v39_v10 }
  0xda   :  { %v113_v13 = vpop.f32.mrf.mxu0 }
  0xdb   :  { %v120_v14 = vmax.f32 %v112_v12, 0.0  ;;  %v114_v15 = vadd.f32 %v113_v13, %v39_v10 }
  0xdc   :  { %v115_v17 = vpop.f32.mrf.mxu0 }
  0xdd   :  { %124 = vst [vmem:[%s230_s3] sm:$0xff] %v120_v14  ;;  %v121_v18 = vmax.f32 %v114_v15, 0.0  ;;  %v116_v19 = vadd.f32 %v115_v17, %v44_v16 }
  0xde   :  { %v117_v20 = vpop.f32.mrf.mxu0 }
  0xdf   :  { %125 = vst [vmem:[%s230_s3 + $0x8] sm:$0xff] %v121_v18  ;;  %v122_v21 = vmax.f32 %v116_v19, 0.0  ;;  %v118_v22 = vadd.f32 %v117_v20, %v44_v16 }
  0xe1   :  { %126 = vst [vmem:[%s230_s3 + $0x10] sm:$0xff] %v122_v21  ;;  %v123_v23 = vmax.f32 %v118_v22, 0.0 }
  0xe3   :  { %127 = vst [vmem:[%s230_s3 + $0x18] sm:$0xff] %v123_v23 }
  0xe4   :  { %132 = vsyncpa [#allocation3], 1 }

// kernel: parallel_model_forward.20
= control target key start
LH: loop header
LB: loop body
LE: loop exit
PB: predicated region body
PF: predicated region fallthrough
CT: control target
= control target key end

     0   :  { %10 = vsyncpa [#allocation3], 0  ;;  %s514_s0 = inlined_call_operand.vmem [shape: f32[16,256], index: 0, kind: input, shape index: {}]   ;;  %s515_s1 = inlined_call_operand.hbm [shape: f32[8,16], index: 1, kind: input, shape index: {}]   ;;  %s516_s2 = inlined_call_operand.vmem [shape: f32[16,256], index: 2, kind: output, shape index: {0}]   ;;  %s517_s3 = inlined_call_operand.hbm [shape: f32[8,256], index: 3, kind: output, shape index: {1}]   ;;  %s518_s4 = inlined_call_operand.hbm [shape: f32[8,256], index: 4, kind: output, shape index: {2}]  }
   0x1   :  { %11 = vsyncpa [#allocation4], 0 }
   0x2   :  { %12 = vsyncpa [#allocation7], 0  ;;  %s447_s15 = smov [#allocation2]  }
   0x3   :  { %s21_s16 = sshll.u32 %s447_s15, 4  ;;  %s22_s16 = int_to_ptr.vmem [resolvable:$true] %s21_s16 }
   0x4   :  { %s389_s17 = scalar_lea.vmem %s22_s16, 128  ;;  %p394_p1 = scmp.lt.s32.totalorder %s22_s16, %s22_s16 }
   0x5   :  { %p390_p0 = scmp.ne.s32.totalorder %s22_s16, %s389_s17  ;;  %p395_p2 = scmp.lt.s32.totalorder %s389_s17, %s389_s17 }
   0x7   :  { %p396_p3 = por %p395_p2, %p394_p1 }
   0x9   :  { %p397_p4 = pnand %p396_p3, %p390_p0 }
   0xb   :  { %400 = shalt.err (!%p397_p4)
}
   0xc   :  { %24 = dma.hbm_to_vmem [thread:$0]  %s515_s1, 128, %s22_s16, [#allocation3]  }
   0xd   :  { %441 = dma.done.wait [#allocation3], 128  }
   0xe   :  { %442 = vsyncadd [#allocation3], 4294967168  ;;  %v32_v0 = vld [vmem:[#allocation2] sm:$0xff]  ;;  %vm60_vm0 = vcmask 130048   ;;  %v29_v1 = vld [vmem:[%s514_s0 + $0x8] sm:$0xff]  ;;  %v448_v26 = vmov 0.0  }
   0xf   :  { %v31_v2 = vld [vmem:[%s514_s0 + $0x18] sm:$0xff]  ;;  %v59_v3 = vmul.f32 %v32_v0, %v32_v0  ;;  %v34_v4 = vmul.f32 %v29_v1, %v29_v1  ;;  %v28_v6 = vld [vmem:[%s514_s0] sm:$0xff]  ;;  %v30_v7 = vld [vmem:[%s514_s0 + $0x10] sm:$0xff]  ;;  %134 = vmatprep.mubr.f32.mxu0 %v448_v26  ;;  %300 = vmatprep.mubr.f32.mxu1 %v448_v26  ;;  %vm229_vm1 = vcmask 64512   ;;  %s449_s0 = smov [#allocation5]  }
  0x10   :  { %v36_v5 = vmul.f32 %v31_v2, %v31_v2  ;;  %v33_v8 = vmul.f32 %v28_v6, %v28_v6  ;;  %v35_v9 = vmul.f32 %v30_v7, %v30_v7  ;;  %s329_s27 = sshll.u32 %s449_s0, 4  ;;  %s330_s27 = int_to_ptr.vmem [resolvable:$true] %s329_s27 }
  0x11   :  { %v61_v10 = vsel %vm60_vm0, %v59_v3, 0.0  ;;  %s401_s28 = scalar_lea.vmem %s330_s27, 256  ;;  %p406_p6 = scmp.lt.s32.totalorder %s330_s27, %s330_s27 }
  0x12   :  { %v44_v11 = vadd.f32 %v36_v5, %v34_v4  ;;  %62 = vadd.xlane.f32.xlu0 %v61_v10  ;;  %v37_v12 = vadd.f32 %v35_v9, %v33_v8  ;;  %p402_p5 = scmp.ne.s32.totalorder %s330_s27, %s401_s28  ;;  %p407_p7 = scmp.lt.s32.totalorder %s401_s28, %s401_s28 }
  0x14   :  { %v45_v13 = vrot.slane %v44_v11, 4  ;;  %v38_v14 = vrot.slane %v37_v12, 4  ;;  %p408_p8 = por %p407_p7, %p406_p6 }
  0x16   :  { %v46_v15 = vadd.f32 %v45_v13, %v44_v11  ;;  %v39_v16 = vadd.f32 %v38_v14, %v37_v12  ;;  %p409_p9 = pnand %p408_p8, %p402_p5 }
  0x18   :  { %v47_v17 = vrot.slane %v46_v15, 2  ;;  %v40_v18 = vrot.slane %v39_v16, 2 }
  0x1a   :  { %v48_v19 = vadd.f32 %v47_v17, %v46_v15  ;;  %v41_v20 = vadd.f32 %v40_v18, %v39_v16 }
  0x1c   :  { %v49_v21 = vrot.slane %v48_v19, 1  ;;  %v42_v22 = vrot.slane %v41_v20, 1 }
  0x1e   :  { %v50_v23 = vadd.f32 %v49_v21, %v48_v19  ;;  %v43_v24 = vadd.f32 %v42_v22, %v41_v20 }
  0x20   :  { %v52_v25 = vadd.f32 1e-12, %v50_v23  ;;  %v51_v27 = vadd.f32 1e-12, %v43_v24 }
  0x22   :  { %361 = vrsqrt.f32 %v52_v25 }
  0x23   :  { %363 = vrsqrt.f32 %v51_v27 }
  0x2f   :  { %v362_v28 = vpop.eup %361 }
  0x30   :  { %v364_v29 = vpop.eup %363  ;;  %v58_v30 = vmul.f32 %v362_v28, %v31_v2  ;;  %v56_v31 = vmul.f32 %v362_v28, %v29_v1 }
  0x31   :  { %v57_v32 = vmul.f32 %v364_v29, %v30_v7  ;;  %v55_v33 = vmul.f32 %v364_v29, %v28_v6 }
  0x32   :  { %98 = vmatprep.subr.mxu0 %v58_v30 }
  0x33   :  { %99 = vmatpush1.msra.mxu0 %v57_v32 }
  0x34   :  { %100 = vmatprep.subr.mxu0 %v56_v31 }
  0x35   :  { %101 = vmatpush1.msra.mxu0 %v55_v33 }
  0x3f   :  { %197 = vxpose.xlu0.b32.start.end [1/1] (short) (narrow) %v32_v0, 16 }
  0x9b   :  { %v63_v34 = vpop.xlane.xlu0 %62 }
  0x9c   :  { %v64_v35 = vadd.f32 1e-12, %v63_v34 }
  0x9e   :  { %365 = vrsqrt.f32 %v64_v35 }
  0xab   :  { %v366_v36 = vpop.eup %365 }
  0xac   :  { %v66_v37 = vmul.f32 %v366_v36, %v32_v0 }
  0xae   :  { %354 = vmatmul.mubr.msk.f32.vlgmr.msra.gmra.mxu0 %vm60_vm0, %v66_v37 }
  0xbb   :  { %v213_v10 = vpop.trf.xlu0 }
  0xbf   :  { %v214_v12 = vpop.trf.xlu0 }
 0x16e   :  { %v136_v38 = vpop.f32.mrf.mxu0 }
 0x16f   :  { %v141_v39 = vrot.slane %v136_v38, 4 }
 0x170   :  { %v138_v40 = vpop.f32.mrf.mxu0 }
 0x171   :  { %v142_v41 = vmax.f32 %v136_v38, %v141_v39  ;;  %v147_v42 = vrot.slane %v138_v40, 4  ;;  %v182_v43 = vmax.f32 %v136_v38, %v138_v40 }
 0x173   :  { %v143_v44 = vrot.slane %v142_v41, 2  ;;  %v148_v45 = vmax.f32 %v138_v40, %v147_v42  ;;  %183 = vmax.xlane.f32.xlu1 %v182_v43 }
 0x175   :  { %v144_v46 = vmax.f32 %v142_v41, %v143_v44  ;;  %v149_v47 = vrot.slane %v148_v45, 2 }
 0x177   :  { %v145_v48 = vrot.slane %v144_v46, 1  ;;  %v150_v49 = vmax.f32 %v148_v45, %v149_v47 }
 0x179   :  { %v146_v50 = vmax.f32 %v144_v46, %v145_v48  ;;  %v151_v51 = vrot.slane %v150_v49, 1 }
 0x17b   :  { %v153_v52 = vsub.f32 %v136_v38, %v146_v50  ;;  %v152_v53 = vmax.f32 %v150_v49, %v151_v51 }
 0x17d   :  { %v155_v54 = vmul.f32 1.442695, %v153_v52  ;;  %v154_v55 = vsub.f32 %v138_v40, %v152_v53 }
 0x17f   :  { %367 = vpow2.f32 %v155_v54  ;;  %v157_v56 = vmul.f32 1.442695, %v154_v55 }
 0x181   :  { %369 = vpow2.f32 %v157_v56 }
 0x18c   :  { %v368_v57 = vpop.eup %367 }
 0x18d   :  { %v159_v58 = vrot.slane %v368_v57, 4 }
 0x18e   :  { %v370_v59 = vpop.eup %369 }
 0x18f   :  { %v165_v60 = vrot.slane %v370_v59, 4  ;;  %v160_v61 = vadd.f32 %v368_v57, %v159_v58 }
 0x191   :  { %v166_v62 = vadd.f32 %v370_v59, %v165_v60  ;;  %v161_v63 = vrot.slane %v160_v61, 2 }
 0x193   :  { %v167_v0 = vrot.slane %v166_v62, 2  ;;  %v162_v1 = vadd.f32 %v161_v63, %v160_v61 }
 0x195   :  { %v168_v2 = vadd.f32 %v167_v0, %v166_v62  ;;  %v163_v3 = vrot.slane %v162_v1, 1 }
 0x197   :  { %v169_v4 = vrot.slane %v168_v2, 1  ;;  %v164_v5 = vadd.f32 %v163_v3, %v162_v1 }
 0x199   :  { %v170_v6 = vadd.f32 %v169_v4, %v168_v2  ;;  %371 = vrcp.f32 %v164_v5 }
 0x19b   :  { %373 = vrcp.f32 %v170_v6 }
 0x1a6   :  { %v372_v7 = vpop.eup %371 }
 0x1a7   :  { %v173_v8 = vmul.f32 %v372_v7, %v368_v57 }
 0x1a8   :  { %v374_v9 = vpop.eup %373 }
 0x1a9   :  { %v174_v11 = vmul.f32 %v374_v9, %v370_v59  ;;  %317 = vst [vmem:[#allocation5] sm:$0xff] %v173_v8 }
 0x1ab   :  { %266 = vmatprep.subr.mxu1 %v174_v11  ;;  %318 = vst [vmem:[#allocation5 + $0x8] sm:$0xff] %v174_v11 }
 0x1ac   :  { %267 = vmatpush1.msra.mxu1 %v173_v8 }
 0x1ad   :  { %355 = vmatmul.mubr.msk.f32.vlgmr.msra.gmra.mxu1 %vm229_vm1, %v213_v10 }
 0x1ae   :  { %306 = vmatprep.mubr.f32.mxu1 %v448_v26 }
 0x1b1   :  { %356 = vmatmul.mubr.msk.f32.gmra.mxu1 %vm229_vm1, %v214_v12 }
 0x1fc   :  { %v184_v13 = vpop.xlane.xlu1 %183 }
 0x1fd   :  { %v185_v14 = vsub.f32 %v136_v38, %v184_v13  ;;  %v186_v15 = vsub.f32 %v138_v40, %v184_v13 }
 0x1ff   :  { %v187_v16 = vmul.f32 1.442695, %v185_v14  ;;  %v189_v17 = vmul.f32 1.442695, %v186_v15 }
 0x201   :  { %375 = vpow2.f32 %v187_v16 }
 0x202   :  { %377 = vpow2.f32 %v189_v17 }
 0x20e   :  { %v376_v18 = vpop.eup %375 }
 0x20f   :  { %v378_v19 = vpop.eup %377 }
 0x210   :  { %v191_v20 = vadd.f32 %v378_v19, %v376_v18 }
 0x212   :  { %192 = vadd.xlane.f32.xlu1 %v191_v20 }
 0x213   :  { %412 = shalt.err (!%p409_p9)
}
 0x214   :  { %332 = dma.vmem_to_hbm [thread:$0]  %s330_s27, 256, %s517_s3, [#allocation4]  }
 0x215   :  { %s450_s3 = smov [#allocation6]  }
 0x216   :  { %s339_s13 = sshll.u32 %s450_s3, 4  ;;  %s340_s13 = int_to_ptr.vmem [resolvable:$true] %s339_s13 }
 0x217   :  { %s421_s14 = scalar_lea.vmem %s340_s13, 256  ;;  %p426_p11 = scmp.lt.s32.totalorder %s340_s13, %s340_s13 }
 0x218   :  { %p422_p10 = scmp.ne.s32.totalorder %s340_s13, %s421_s14  ;;  %p427_p12 = scmp.lt.s32.totalorder %s421_s14, %s421_s14 }
 0x21a   :  { %p428_p13 = por %p427_p12, %p426_p11 }
 0x21c   :  { %p429_p0 = pnand %p428_p13, %p422_p10 }
 0x26d   :  { %v302_v21 = vpop.f32.mrf.mxu1 }
 0x26e   :  { %313 = vst [vmem:[%s516_s2] sm:$0xff] %v302_v21 }
 0x26f   :  { %v304_v22 = vpop.f32.mrf.mxu1 }
 0x270   :  { %314 = vst [vmem:[%s516_s2 + $0x8] sm:$0xff] %v304_v22 }
 0x271   :  { %v308_v23 = vpop.f32.mrf.mxu1 }
 0x272   :  { %315 = vst [vmem:[%s516_s2 + $0x10] sm:$0xff] %v308_v23 }
 0x273   :  { %v310_v24 = vpop.f32.mrf.mxu1 }
 0x274   :  { %316 = vst [vmem:[%s516_s2 + $0x18] sm:$0xff] %v310_v24 }
 0x29b   :  { %v193_v25 = vpop.xlane.xlu1 %192 }
 0x29c   :  { %379 = vrcp.f32 %v193_v25 }
 0x2a9   :  { %v380_v26 = vpop.eup %379 }
 0x2aa   :  { %v195_v27 = vmul.f32 %v380_v26, %v376_v18  ;;  %v196_v28 = vmul.f32 %v380_v26, %v378_v19 }
 0x2ac   :  { %319 = vst [vmem:[#allocation6] sm:$0xff] %v195_v27  ;;  %320 = vst [vmem:[#allocation6 + $0x8] sm:$0xff] %v196_v28 }
 0x2ad   :  { %432 = shalt.err (!%p429_p0)
}
 0x2ae   :  { %342 = dma.vmem_to_hbm [thread:$0]  %s340_s13, 256, %s518_s4, [#allocation7]  }
 0x2af   :  { %443 = dma.done.wait [#allocation4], 256  }
 0x2b0   :  { %444 = vsyncadd [#allocation4], 4294967040 }
 0x2b1   :  { %445 = dma.done.wait [#allocation7], 256  }
 0x2b2   :  { %446 = vsyncadd [#allocation7], 4294967040 }
 0x2b3   :  { %351 = vsyncpa [#allocation3], 1 }
 0x2b4   :  { %352 = vsyncpa [#allocation4], 1 }
 0x2b5   :  { %353 = vsyncpa [#allocation7], 1 }

// kernel: parallel_model_forward.21
= control target key start
LH: loop header
LB: loop body
LE: loop exit
PB: predicated region body
PF: predicated region fallthrough
CT: control target
= control target key end

     0   :  { %v478_v1 = vmov 0   ;;  %v60_v11 = vlaneseq  ;;  %v479_v12 = vmov 1966171168   ;;  %vm270_vm0 = vcmask 261120   ;;  %s629_s1 = inlined_call_operand.vmem [shape: bf16[288,256], index: 1, kind: input, shape index: {}]   ;;  %s630_s2 = inlined_call_operand.<no memory space> [shape: f32[1,1], index: 2, kind: input, shape index: {}]   ;;  %s631_s0 = inlined_call_operand.vmem [shape: bf16[1,288], index: 0, kind: input, shape index: {}]   ;;  %s632_s3 = inlined_call_operand.vmem [shape: f32[1,256], index: 3, kind: output, shape index: {}]  }
   0x1   :  { %v424_v0 = vld [vmem:[%s629_s1 + $0x74] ss:$8 sps:$4 sm:$0xff]   ;;  %347 = vmatprep.mubr.bf16.mxu1 %v478_v1  ;;  %423 = vset.pattern.permute.xlu0 %v478_v1  ;;  %v8_v2 = vstv %s630_s2  ;;  %v426_v3 = vld [vmem:[%s629_s1 + $0x70] ss:$8 sps:$4 sm:$0xff]   ;;  %v427_v4 = vld [vmem:[%s629_s1 + $0x64] ss:$8 sps:$4 sm:$0xff]   ;;  %v74_v13 = vunpack.c.l.s4 %v479_v12 }
   0x2   :  { %9 = vst [vmem:[#allocation2] sm:$0x1] %v8_v2  ;;  %274 = vmatprep.subr.bf16.mxu0 %v424_v0  ;;  %v429_v5 = vld [vmem:[%s629_s1 + $0x60] ss:$8 sps:$4 sm:$0xff]   ;;  %v430_v6 = vld [vmem:[%s629_s1 + $0x54] ss:$8 sps:$4 sm:$0xff]  }
   0x3   :  { %275 = vmatpush1.bf16.msra.mxu0 %v426_v3  ;;  %v432_v7 = vld [vmem:[%s629_s1 + $0x50] ss:$8 sps:$4 sm:$0xff]   ;;  %v433_v8 = vld [vmem:[%s629_s1 + $0x44] ss:$8 sps:$4 sm:$0xff]   ;;  %v435_v9 = vld [vmem:[%s629_s1 + $0x40] ss:$8 sps:$4 sm:$0xff]   ;;  %v75_v17 = vunpack.c.0.s8 %v74_v13 }
   0x4   :  { %276 = vmatprep.subr.bf16.mxu0 %v427_v4  ;;  %v436_v10 = vld [vmem:[%s629_s1 + $0x34] ss:$8 sps:$4 sm:$0xff]   ;;  %v438_v14 = vld [vmem:[%s629_s1 + $0x30] ss:$8 sps:$4 sm:$0xff]   ;;  %v439_v15 = vld [vmem:[%s629_s1 + $0x24] ss:$8 sps:$4 sm:$0xff]  }
   0x5   :  { %v537_v16 = vshrl.u32 %v60_v11, 7  ;;  %v441_v18 = vld [vmem:[%s629_s1 + $0x20] ss:$8 sps:$4 sm:$0xff]   ;;  %v465_v19 = vld [vmem:[%s629_s1 + $0x114] ss:$8 sps:$4 sm:$0xff]   ;;  %vm376_vm1 = vcmp.lt.s32.totalorder %v60_v11, 256 }
   0x6   :  { %v468_v20 = vld [vmem:[%s629_s1 + $0x110] ss:$8 sps:$4 sm:$0xff]   ;;  %v442_v21 = vld [vmem:[%s629_s1 + $0x14] ss:$8 sps:$4 sm:$0xff]   ;;  %327 = vmatprep.subr.bf16.mxu1 %v465_v19  ;;  %v471_v22 = vld [vmem:[%s629_s1 + $0x104] ss:$8 sps:$4 sm:$0xff]  }
   0x7   :  { %277 = vmatpush1.bf16.msra.mxu0 %v429_v5  ;;  %v555_v23 = vsub.s32 %v75_v17, %v537_v16  ;;  %328 = vmatpush1.bf16.msra.mxu1 %v468_v20  ;;  %v474_v24 = vld [vmem:[%s629_s1 + $0x100] ss:$8 sps:$4 sm:$0xff]   ;;  %v444_v25 = vld [vmem:[%s629_s1 + $0x10] ss:$8 sps:$4 sm:$0xff]   ;;  %v445_v26 = vld [vmem:[%s629_s1 + $0x4] ss:$8 sps:$4 sm:$0xff]  }
   0x8   :  { %278 = vmatprep.subr.bf16.mxu0 %v430_v6  ;;  %329 = vmatprep.subr.bf16.mxu1 %v471_v22  ;;  %v383_v27 = vld.sshfl [vmem:[%s631_s0] sm:$0x13 pattern:$0x75316420]  ;;  %v448_v34 = vld [vmem:[%s629_s1 + $0xf4] ss:$8 sps:$4 sm:$0xff]  }
   0x9   :  { %v54_v28 = vld [vmem:[#allocation2] sm:$0x1]  ;;  %v79_v29 = vrot.slane %v383_v27, %v555_v23  ;;  %v72_v30 = vcombine.high %v383_v27, %v383_v27  ;;  %v450_v35 = vld [vmem:[%s629_s1 + $0xf0] ss:$8 sps:$4 sm:$0xff]   ;;  %v451_v36 = vld [vmem:[%s629_s1 + $0xe4] ss:$8 sps:$4 sm:$0xff]  }
   0xa   :  { %57 = vperm.xlu0 %423, %v54_v28   ;;  %v447_v31 = vld [vmem:[%s629_s1] ss:$8 sps:$4 sm:$0xff]   ;;  %v454_v38 = vld [vmem:[%s629_s1 + $0xd4] ss:$8 sps:$4 sm:$0xff]   ;;  %v456_v39 = vld [vmem:[%s629_s1 + $0xd0] ss:$8 sps:$4 sm:$0xff]  }
   0xb   :  { %279 = vmatpush1.bf16.msra.mxu0 %v432_v7  ;;  %330 = vmatpush1.bf16.msra.mxu1 %v474_v24  ;;  %v87_v32 = vcombine.high %v79_v29, %v79_v29  ;;  %v86_v33 = vrot.slane %v72_v30, %v555_v23  ;;  %v453_v37 = vld [vmem:[%s629_s1 + $0xe0] ss:$8 sps:$4 sm:$0xff]   ;;  %v457_v40 = vld [vmem:[%s629_s1 + $0xc4] ss:$8 sps:$4 sm:$0xff]   ;;  %v460_v42 = vld [vmem:[%s629_s1 + $0xb4] ss:$8 sps:$4 sm:$0xff]  }
   0xc   :  { %280 = vmatprep.subr.bf16.mxu0 %v433_v8  ;;  %v459_v41 = vld [vmem:[%s629_s1 + $0xc0] ss:$8 sps:$4 sm:$0xff]   ;;  %v462_v43 = vld [vmem:[%s629_s1 + $0xb0] ss:$8 sps:$4 sm:$0xff]   ;;  %v463_v44 = vld [vmem:[%s629_s1 + $0xa4] ss:$8 sps:$4 sm:$0xff]  }
   0xd   :  { %306 = vmatprep.mubr.bf16.mxu0 %v86_v33  ;;  %v467_v45 = vld [vmem:[%s629_s1 + $0xa0] ss:$8 sps:$4 sm:$0xff]   ;;  %v469_v46 = vld [vmem:[%s629_s1 + $0x94] ss:$8 sps:$4 sm:$0xff]   ;;  %v473_v47 = vld [vmem:[%s629_s1 + $0x90] ss:$8 sps:$4 sm:$0xff]  }
   0xe   :  { %420 = vmatmul.mubr.msk.bf16.vlgmr.msra.gmra.mxu1 %vm270_vm0, %v87_v32  ;;  %v475_v48 = vld [vmem:[%s629_s1 + $0x84] ss:$8 sps:$4 sm:$0xff]   ;;  %v477_v49 = vld [vmem:[%s629_s1 + $0x80] ss:$8 sps:$4 sm:$0xff]   ;;  %v62_v54 = vsub.s32 0, %v537_v16 }
   0xf   :  { %281 = vmatpush1.bf16.msra.mxu0 %v435_v9 }
  0x10   :  { %282 = vmatprep.subr.bf16.mxu0 %v436_v10 }
  0x13   :  { %283 = vmatpush1.bf16.msra.mxu0 %v438_v14 }
  0x14   :  { %284 = vmatprep.subr.bf16.mxu0 %v439_v15 }
  0x17   :  { %285 = vmatpush1.bf16.msra.mxu0 %v441_v18 }
  0x18   :  { %286 = vmatprep.subr.bf16.mxu0 %v442_v21 }
  0x1b   :  { %287 = vmatpush1.bf16.msra.mxu0 %v444_v25 }
  0x1c   :  { %288 = vmatprep.subr.bf16.mxu0 %v445_v26 }
  0x1f   :  { %289 = vmatpush1.bf16.msra.mxu0 %v447_v31 }
  0x20   :  { %290 = vmatprep.subr.bf16.mxu0 %v448_v34 }
  0x23   :  { %291 = vmatpush2.bf16.msra.mxu0 %v450_v35 }
  0x24   :  { %292 = vmatprep.subr.bf16.mxu0 %v451_v36 }
  0x27   :  { %293 = vmatpush2.bf16.msra.mxu0 %v453_v37 }
  0x28   :  { %294 = vmatprep.subr.bf16.mxu0 %v454_v38 }
  0x2b   :  { %295 = vmatpush2.bf16.msra.mxu0 %v456_v39 }
  0x2c   :  { %296 = vmatprep.subr.bf16.mxu0 %v457_v40 }
  0x2f   :  { %297 = vmatpush2.bf16.msra.mxu0 %v459_v41 }
  0x30   :  { %298 = vmatprep.subr.bf16.mxu0 %v460_v42 }
  0x33   :  { %299 = vmatpush2.bf16.msra.mxu0 %v462_v43 }
  0x34   :  { %300 = vmatprep.subr.bf16.mxu0 %v463_v44 }
  0x37   :  { %301 = vmatpush2.bf16.msra.mxu0 %v467_v45 }
  0x38   :  { %302 = vmatprep.subr.bf16.mxu0 %v469_v46 }
  0x3b   :  { %303 = vmatpush2.bf16.msra.mxu0 %v473_v47 }
  0x3c   :  { %304 = vmatprep.subr.bf16.mxu0 %v475_v48 }
  0x3f   :  { %305 = vmatpush2.bf16.msra.mxu0 %v477_v49 }
  0x42   :  { %307 = vmatmul.mubr.bf16.vlgmr.msra.gmra.mxu0 %v79_v29 }
  0x85   :  { %v58_v55 = vpop.permute.xlu0 %57 }
  0x86   :  { %v63_v56 = vrot.slane %v58_v55, %v62_v54 }
  0xce   :  { %v349_v50 = vpop.f32.mrf.mxu1 }
  0xd0   :  { %v351_v51 = vpop.f32.mrf.mxu1 }
  0xd2   :  { %v353_v52 = vpop.f32.mrf.mxu1 }
  0xd4   :  { %v354_v53 = vpop.f32.mrf.mxu1 }
 0x102   :  { %v308_v57 = vpop.f32.mrf.mxu0 }
 0x103   :  { %v309_v58 = vadd.f32 %v308_v57, %v63_v56 }
 0x104   :  { %v310_v59 = vpop.f32.mrf.mxu0 }
 0x105   :  { %v311_v60 = vadd.f32 %v310_v59, %v63_v56  ;;  %v350_v62 = vadd.f32 %v349_v50, %v309_v58 }
 0x106   :  { %v312_v61 = vpop.f32.mrf.mxu0 }
 0x107   :  { %v352_v63 = vadd.f32 %v351_v51, %v311_v60 }
 0x108   :  { %v313_v0 = vpop.f32.mrf.mxu0 }
 0x109   :  { %v358_v1 = vcombine.low %v350_v62, %v352_v63 }
 0x10b   :  { %v365_v2 = vrot.slane %v358_v1, %v555_v23 }
 0x10d   :  { %v372_v3 = vrot.slane %v365_v2, %v555_v23 }
 0x10f   :  { %378 = vst.msk [vmem:[%s632_s3] sm:$0x3] %vm376_vm1, %v372_v3 }

// kernel: parallel_model_forward.22
= control target key start
LH: loop header
LB: loop body
LE: loop exit
PB: predicated region body
PF: predicated region fallthrough
CT: control target
= control target key end

     0   :  { %vm74_vm0 = vcmask 1040384   ;;  %v219_v2 = vmov 0   ;;  %vm70_vm1 = vcmask 146432   ;;  %s295_s1 = inlined_call_operand.vmem [shape: bf16[18,512], index: 1, kind: input, shape index: {}]   ;;  %s296_s2 = inlined_call_operand.vmem [shape: f32[16,1], index: 2, kind: input, shape index: {}]   ;;  %s297_s0 = inlined_call_operand.vmem [shape: bf16[16,18], index: 0, kind: input, shape index: {}]   ;;  %s298_s3 = inlined_call_operand.vmem [shape: f32[16,512], index: 3, kind: output, shape index: {}]  }
   0x1   :  { %v21_v0 = vld [vmem:[%s295_s1 + $0x20] sm:$0x11]  ;;  %v22_v1 = vld [vmem:[%s295_s1 + $0x28] sm:$0x11]  ;;  %119 = vmatprep.mubr.bf16.mxu0 %v219_v2  ;;  %162 = vmatprep.mubr.bf16.mxu1 %v219_v2 }
   0x2   :  { %v199_v3 = vcombine.high %v21_v0, %v21_v0  ;;  %v201_v4 = vcombine.high %v22_v1, %v22_v1  ;;  %v198_v5 = vcombine.low %v21_v0, %v21_v0  ;;  %v200_v6 = vcombine.low %v22_v1, %v22_v1  ;;  %v212_v7 = vld [vmem:[%s295_s1 + $0x4] ss:$16 sps:$4 sm:$0xff]   ;;  %207 = vset.pattern.permute.xlu0 %v219_v2  ;;  %v214_v8 = vld [vmem:[%s295_s1 + $0xc] ss:$16 sps:$4 sm:$0xff]   ;;  %v216_v11 = vld [vmem:[%s295_s1] ss:$16 sps:$4 sm:$0xff]  }
   0x3   :  { %v217_v12 = vld [vmem:[%s295_s1 + $0x8] ss:$16 sps:$4 sm:$0xff]   ;;  %v23_v13 = vld [vmem:[%s296_s2] sm:$0xff] }
   0x4   :  { %202 = vmatprep.subr.msk.bf16.mxu0 %vm74_vm0, %v199_v3  ;;  %204 = vmatprep.subr.msk.bf16.mxu1 %vm74_vm0, %v201_v4  ;;  %v76_v9 = vsel %vm74_vm0, %v198_v5, 0  ;;  %v82_v10 = vsel %vm74_vm0, %v200_v6, 0  ;;  %v218_v14 = vld [vmem:[%s297_s0] sm:$0xff]   ;;  %v24_v15 = vld [vmem:[%s296_s2 + $0x8] sm:$0xff] }
   0x5   :  { %100 = vmatpush1.bf16.msra.mxu0 %v76_v9  ;;  %143 = vmatpush1.bf16.msra.mxu1 %v82_v10 }
   0x6   :  { %101 = vmatprep.subr.bf16.mxu0 %v212_v7  ;;  %144 = vmatprep.subr.bf16.mxu1 %v214_v8 }
   0x7   :  { %27 = vperm.xlu0 %207, %v23_v13  }
   0x9   :  { %102 = vmatpush1.bf16.msra.mxu0 %v216_v11  ;;  %145 = vmatpush1.bf16.msra.mxu1 %v217_v12 }
   0xb   :  { %32 = vperm.xlu0 %207, %v24_v15  }
   0xc   :  { %203 = vmatmul.mubr.msk.bf16.vlgmr.msra.gmra.mxu0 %vm70_vm1, %v218_v14  ;;  %205 = vmatmul.mubr.msk.bf16.vlgmr.msra.gmra.mxu1 %vm70_vm1, %v218_v14 }
  0x82   :  { %v28_v16 = vpop.permute.xlu0 %27 }
  0x86   :  { %v33_v25 = vpop.permute.xlu0 %32 }
  0xcc   :  { %v121_v17 = vpop.f32.mrf.mxu0  ;;  %v164_v18 = vpop.f32.mrf.mxu1 }
  0xcd   :  { %v122_v19 = vadd.f32 %v121_v17, %v28_v16  ;;  %v165_v20 = vadd.f32 %v164_v18, %v28_v16 }
  0xce   :  { %v123_v21 = vpop.f32.mrf.mxu0  ;;  %v166_v22 = vpop.f32.mrf.mxu1 }
  0xcf   :  { %v173_v23 = vmax.f32 %v122_v19, 0.0  ;;  %v175_v24 = vmax.f32 %v165_v20, 0.0  ;;  %v124_v26 = vadd.f32 %v123_v21, %v28_v16  ;;  %v167_v27 = vadd.f32 %v166_v22, %v28_v16 }
  0xd0   :  { %v125_v28 = vpop.f32.mrf.mxu0  ;;  %v168_v29 = vpop.f32.mrf.mxu1 }
  0xd1   :  { %181 = vst [vmem:[%s298_s3] sm:$0xff] %v173_v23  ;;  %183 = vst [vmem:[%s298_s3 + $0x10] sm:$0xff] %v175_v24  ;;  %v174_v30 = vmax.f32 %v124_v26, 0.0  ;;  %v176_v31 = vmax.f32 %v167_v27, 0.0  ;;  %v126_v32 = vadd.f32 %v125_v28, %v33_v25  ;;  %v169_v33 = vadd.f32 %v168_v29, %v33_v25 }
  0xd2   :  { %v127_v34 = vpop.f32.mrf.mxu0  ;;  %v170_v35 = vpop.f32.mrf.mxu1 }
  0xd3   :  { %182 = vst [vmem:[%s298_s3 + $0x8] sm:$0xff] %v174_v30  ;;  %184 = vst [vmem:[%s298_s3 + $0x18] sm:$0xff] %v176_v31  ;;  %v177_v36 = vmax.f32 %v126_v32, 0.0  ;;  %v179_v37 = vmax.f32 %v169_v33, 0.0  ;;  %v128_v38 = vadd.f32 %v127_v34, %v33_v25  ;;  %v171_v39 = vadd.f32 %v170_v35, %v33_v25 }
  0xd5   :  { %185 = vst [vmem:[%s298_s3 + $0x20] sm:$0xff] %v177_v36  ;;  %187 = vst [vmem:[%s298_s3 + $0x30] sm:$0xff] %v179_v37  ;;  %v178_v40 = vmax.f32 %v128_v38, 0.0  ;;  %v180_v41 = vmax.f32 %v171_v39, 0.0 }
  0xd7   :  { %186 = vst [vmem:[%s298_s3 + $0x28] sm:$0xff] %v178_v40  ;;  %188 = vst [vmem:[%s298_s3 + $0x38] sm:$0xff] %v180_v41 }

// kernel: parallel_model_forward.23
= control target key start
LH: loop header
LB: loop body
LE: loop exit
PB: predicated region body
PF: predicated region fallthrough
CT: control target
= control target key end

     0   :  { %10 = vsyncpa [#allocation3], 0  ;;  %vm78_vm0 = vcmask 130048   ;;  %s806_s0 = inlined_call_operand.vmem [shape: f32[16,512], index: 0, kind: input, shape index: {}]   ;;  %s807_s1 = inlined_call_operand.vmem [shape: f32[8,16], index: 1, kind: input, shape index: {}]   ;;  %s808_s2 = inlined_call_operand.vmem [shape: f32[16,512], index: 2, kind: output, shape index: {0}]   ;;  %s809_s3 = inlined_call_operand.hbm [shape: f32[8,512], index: 3, kind: output, shape index: {1}]   ;;  %s810_s4 = inlined_call_operand.hbm [shape: f32[8,512], index: 4, kind: output, shape index: {2}]  }
   0x1   :  { %v699_v0 = vld [vmem:[%s807_s1] sm:$0xff]  ;;  %v704_v1 = vld [vmem:[%s806_s0 + $0x8] sm:$0xff]  ;;  %v716_v6 = vld [vmem:[%s806_s0 + $0x18] sm:$0xff] }
   0x2   :  { %v21_v2 = vld [vmem:[%s806_s0 + $0x28] sm:$0xff]  ;;  %v77_v3 = vmul.f32 %v699_v0, %v699_v0  ;;  %v26_v4 = vmul.f32 %v704_v1, %v704_v1  ;;  %v23_v7 = vld [vmem:[%s806_s0 + $0x38] sm:$0xff]  ;;  %v16_v8 = vld [vmem:[%s806_s0] sm:$0xff]  ;;  %v28_v9 = vmul.f32 %v716_v6, %v716_v6 }
   0x3   :  { %v30_v5 = vmul.f32 %v21_v2, %v21_v2  ;;  %v32_v10 = vmul.f32 %v23_v7, %v23_v7  ;;  %v20_v11 = vld [vmem:[%s806_s0 + $0x20] sm:$0xff]  ;;  %v25_v12 = vmul.f32 %v16_v8, %v16_v8  ;;  %v18_v13 = vld [vmem:[%s806_s0 + $0x10] sm:$0xff] }
   0x4   :  { %v22_v14 = vld [vmem:[%s806_s0 + $0x30] sm:$0xff]  ;;  %v79_v15 = vsel %vm78_vm0, %v77_v3, 0.0  ;;  %v29_v17 = vmul.f32 %v20_v11, %v20_v11  ;;  %v27_v18 = vmul.f32 %v18_v13, %v18_v13 }
   0x5   :  { %v40_v16 = vadd.f32 %v30_v5, %v26_v4 }
   0x6   :  { %11 = vsyncpa [#allocation5], 0  ;;  %80 = vadd.xlane.f32.xlu0 %v79_v15  ;;  %v54_v19 = vadd.f32 %v32_v10, %v28_v9  ;;  %v31_v20 = vmul.f32 %v22_v14, %v22_v14  ;;  %v33_v22 = vadd.f32 %v29_v17, %v25_v12  ;;  %v668_v47 = vmov 0.0   ;;  %s669_s0 = smov [#allocation2]  }
   0x7   :  { %v41_v21 = vrot.slane %v40_v16, 4  ;;  %152 = vmatprep.mubr.f32.mxu0 %v668_v47  ;;  %223 = vmatprep.mubr.f32.mxu1 %v668_v47  ;;  %vm370_vm1 = vcmask 64512   ;;  %s555_s6 = sshll.u32 %s669_s0, 4  ;;  %s556_s6 = int_to_ptr.vmem [resolvable:$true] %s555_s6 }
   0x8   :  { %v55_v23 = vrot.slane %v54_v19, 4  ;;  %v47_v24 = vadd.f32 %v31_v20, %v27_v18  ;;  %v34_v26 = vrot.slane %v33_v22, 4  ;;  %s624_s7 = scalar_lea.vmem %s556_s6, 512  ;;  %p629_p1 = scmp.lt.s32.totalorder %s556_s6, %s556_s6 }
   0x9   :  { %v42_v25 = vadd.f32 %v41_v21, %v40_v16  ;;  %p625_p0 = scmp.ne.s32.totalorder %s556_s6, %s624_s7  ;;  %p630_p2 = scmp.lt.s32.totalorder %s624_s7, %s624_s7 }
   0xa   :  { %v56_v27 = vadd.f32 %v55_v23, %v54_v19  ;;  %v48_v28 = vrot.slane %v47_v24, 4  ;;  %v35_v30 = vadd.f32 %v34_v26, %v33_v22 }
   0xb   :  { %v43_v29 = vrot.slane %v42_v25, 2  ;;  %p631_p3 = por %p630_p2, %p629_p1 }
   0xc   :  { %v57_v31 = vrot.slane %v56_v27, 2  ;;  %v49_v32 = vadd.f32 %v48_v28, %v47_v24  ;;  %v36_v34 = vrot.slane %v35_v30, 2 }
   0xd   :  { %v44_v33 = vadd.f32 %v43_v29, %v42_v25  ;;  %p632_p4 = pnand %p631_p3, %p625_p0 }
   0xe   :  { %v58_v35 = vadd.f32 %v57_v31, %v56_v27  ;;  %v50_v36 = vrot.slane %v49_v32, 2  ;;  %v37_v38 = vadd.f32 %v36_v34, %v35_v30 }
   0xf   :  { %v45_v37 = vrot.slane %v44_v33, 1 }
  0x10   :  { %v59_v39 = vrot.slane %v58_v35, 1  ;;  %v51_v40 = vadd.f32 %v50_v36, %v49_v32  ;;  %v38_v42 = vrot.slane %v37_v38, 1 }
  0x11   :  { %v46_v41 = vadd.f32 %v45_v37, %v44_v33 }
  0x12   :  { %v60_v43 = vadd.f32 %v59_v39, %v58_v35  ;;  %v52_v44 = vrot.slane %v51_v40, 1  ;;  %v39_v46 = vadd.f32 %v38_v42, %v37_v38 }
  0x13   :  { %v62_v45 = vadd.f32 1e-12, %v46_v41 }
  0x14   :  { %v64_v48 = vadd.f32 1e-12, %v60_v43  ;;  %v53_v49 = vadd.f32 %v52_v44, %v51_v40  ;;  %v61_v50 = vadd.f32 1e-12, %v39_v46 }
  0x15   :  { %588 = vrsqrt.f32 %v62_v45 }
  0x16   :  { %590 = vrsqrt.f32 %v64_v48  ;;  %v63_v51 = vadd.f32 1e-12, %v53_v49 }
  0x17   :  { %592 = vrsqrt.f32 %v61_v50 }
  0x18   :  { %594 = vrsqrt.f32 %v63_v51 }
  0x22   :  { %v589_v52 = vpop.eup %588 }
  0x23   :  { %v591_v53 = vpop.eup %590  ;;  %v74_v54 = vmul.f32 %v589_v52, %v21_v2  ;;  %v70_v57 = vmul.f32 %v589_v52, %v704_v1 }
  0x24   :  { %v593_v55 = vpop.eup %592  ;;  %v76_v56 = vmul.f32 %v591_v53, %v23_v7  ;;  %v72_v60 = vmul.f32 %v591_v53, %v716_v6 }
  0x25   :  { %v595_v58 = vpop.eup %594  ;;  %116 = vmatprep.subr.mxu0 %v74_v54  ;;  %v73_v59 = vmul.f32 %v593_v55, %v20_v11  ;;  %v69_v61 = vmul.f32 %v593_v55, %v16_v8 }
  0x26   :  { %187 = vmatprep.subr.mxu1 %v76_v56  ;;  %v75_v62 = vmul.f32 %v595_v58, %v22_v14  ;;  %v71_v63 = vmul.f32 %v595_v58, %v18_v13 }
  0x27   :  { %117 = vmatpush1.msra.mxu0 %v73_v59 }
  0x28   :  { %188 = vmatpush1.msra.mxu1 %v75_v62  ;;  %118 = vmatprep.subr.mxu0 %v70_v57 }
  0x29   :  { %189 = vmatprep.subr.mxu1 %v72_v60  ;;  %119 = vmatpush1.msra.mxu0 %v69_v61 }
  0x2a   :  { %190 = vmatpush1.msra.mxu1 %v71_v63 }
  0x33   :  { %338 = vxpose.xlu0.b32.start.end [1/1] (short) (narrow) %v699_v0, 16 }
  0x8f   :  { %v81_v2 = vpop.xlane.xlu0 %80 }
  0x90   :  { %v82_v3 = vadd.f32 1e-12, %v81_v2 }
  0x92   :  { %596 = vrsqrt.f32 %v82_v3 }
  0x9f   :  { %v597_v1 = vpop.eup %596 }
  0xa0   :  { %v84_v4 = vmul.f32 %v597_v1, %v699_v0 }
  0xa2   :  { %579 = vmatmul.mubr.msk.f32.vlgmr.msra.gmra.mxu0 %vm78_vm0, %v84_v4  ;;  %580 = vmatmul.mubr.msk.f32.vlgmr.msra.gmra.mxu1 %vm78_vm0, %v84_v4 }
  0xa3   :  { %441 = vmatprep.mubr.f32.mxu0 %v668_v47  ;;  %518 = vmatprep.mubr.f32.mxu1 %v668_v47 }
 0x162   :  { %v746_v5 = vpop.f32.mrf.mxu0  ;;  %v748_v6 = vpop.f32.mrf.mxu1 }
 0x163   :  { %v230_v7 = vrot.slane %v746_v5, 4  ;;  %v242_v8 = vrot.slane %v748_v6, 4 }
 0x164   :  { %v752_v9 = vpop.f32.mrf.mxu0  ;;  %v754_v10 = vpop.f32.mrf.mxu1 }
 0x165   :  { %v231_v0 = vmax.f32 %v746_v5, %v230_v7  ;;  %v243_v11 = vmax.f32 %v748_v6, %v242_v8  ;;  %v236_v12 = vrot.slane %v752_v9, 4  ;;  %v248_v13 = vrot.slane %v754_v10, 4 }
 0x166   :  { %v311_v14 = vmax.f32 %v746_v5, %v752_v9  ;;  %v312_v15 = vmax.f32 %v748_v6, %v754_v10 }
 0x167   :  { %v232_v16 = vrot.slane %v231_v0, 2  ;;  %v244_v17 = vrot.slane %v243_v11, 2  ;;  %v237_v18 = vmax.f32 %v752_v9, %v236_v12  ;;  %v249_v19 = vmax.f32 %v754_v10, %v248_v13 }
 0x168   :  { %v313_v20 = vmax.f32 %v311_v14, %v312_v15 }
 0x169   :  { %v233_v21 = vmax.f32 %v231_v0, %v232_v16  ;;  %v245_v22 = vmax.f32 %v243_v11, %v244_v17  ;;  %v238_v23 = vrot.slane %v237_v18, 2  ;;  %v250_v24 = vrot.slane %v249_v19, 2  ;;  %v354_v17 = vpop.trf.xlu0 }
 0x16a   :  { %314 = vmax.xlane.f32.xlu1 %v313_v20 }
 0x16b   :  { %v234_v25 = vrot.slane %v233_v21, 1  ;;  %v246_v26 = vrot.slane %v245_v22, 1  ;;  %v239_v27 = vmax.f32 %v237_v18, %v238_v23  ;;  %v251_v28 = vmax.f32 %v249_v19, %v250_v24 }
 0x16d   :  { %v235_v29 = vmax.f32 %v233_v21, %v234_v25  ;;  %v247_v30 = vmax.f32 %v245_v22, %v246_v26  ;;  %v240_v31 = vrot.slane %v239_v27, 1  ;;  %v252_v32 = vrot.slane %v251_v28, 1  ;;  %v355_v21 = vpop.trf.xlu0 }
 0x16f   :  { %v254_v33 = vsub.f32 %v746_v5, %v235_v29  ;;  %v256_v34 = vsub.f32 %v748_v6, %v247_v30  ;;  %v241_v35 = vmax.f32 %v239_v27, %v240_v31  ;;  %v253_v36 = vmax.f32 %v251_v28, %v252_v32 }
 0x171   :  { %v258_v37 = vmul.f32 1.442695, %v254_v33  ;;  %v262_v38 = vmul.f32 1.442695, %v256_v34  ;;  %v255_v39 = vsub.f32 %v752_v9, %v241_v35  ;;  %v257_v40 = vsub.f32 %v754_v10, %v253_v36 }
 0x173   :  { %598 = vpow2.f32 %v258_v37  ;;  %v260_v41 = vmul.f32 1.442695, %v255_v39  ;;  %v264_v42 = vmul.f32 1.442695, %v257_v40 }
 0x174   :  { %600 = vpow2.f32 %v262_v38 }
 0x175   :  { %602 = vpow2.f32 %v260_v41 }
 0x176   :  { %604 = vpow2.f32 %v264_v42 }
 0x180   :  { %v599_v43 = vpop.eup %598 }
 0x181   :  { %v601_v44 = vpop.eup %600  ;;  %v266_v45 = vrot.slane %v599_v43, 4 }
 0x182   :  { %v603_v46 = vpop.eup %602  ;;  %v278_v48 = vrot.slane %v601_v44, 4 }
 0x183   :  { %v605_v49 = vpop.eup %604  ;;  %v272_v50 = vrot.slane %v603_v46, 4  ;;  %v267_v51 = vadd.f32 %v599_v43, %v266_v45 }
 0x184   :  { %v284_v52 = vrot.slane %v605_v49, 4  ;;  %v279_v53 = vadd.f32 %v601_v44, %v278_v48 }
 0x185   :  { %v273_v54 = vadd.f32 %v603_v46, %v272_v50  ;;  %v268_v55 = vrot.slane %v267_v51, 2 }
 0x186   :  { %v285_v56 = vadd.f32 %v605_v49, %v284_v52  ;;  %v280_v57 = vrot.slane %v279_v53, 2 }
 0x187   :  { %v274_v58 = vrot.slane %v273_v54, 2  ;;  %v269_v59 = vadd.f32 %v268_v55, %v267_v51 }
 0x188   :  { %v286_v60 = vrot.slane %v285_v56, 2  ;;  %v281_v61 = vadd.f32 %v280_v57, %v279_v53 }
 0x189   :  { %v275_v62 = vadd.f32 %v274_v58, %v273_v54  ;;  %v270_v63 = vrot.slane %v269_v59, 1 }
 0x18a   :  { %v287_v2 = vadd.f32 %v286_v60, %v285_v56  ;;  %v282_v3 = vrot.slane %v281_v61, 1 }
 0x18b   :  { %v276_v1 = vrot.slane %v275_v62, 1  ;;  %v271_v4 = vadd.f32 %v270_v63, %v269_v59 }
 0x18c   :  { %v288_v7 = vrot.slane %v287_v2, 1  ;;  %v283_v8 = vadd.f32 %v282_v3, %v281_v61 }
 0x18d   :  { %v277_v0 = vadd.f32 %v276_v1, %v275_v62  ;;  %606 = vrcp.f32 %v271_v4 }
 0x18e   :  { %v289_v11 = vadd.f32 %v288_v7, %v287_v2  ;;  %608 = vrcp.f32 %v283_v8 }
 0x18f   :  { %610 = vrcp.f32 %v277_v0 }
 0x190   :  { %612 = vrcp.f32 %v289_v11 }
 0x19a   :  { %v607_v12 = vpop.eup %606 }
 0x19b   :  { %v609_v13 = vpop.eup %608  ;;  %v294_v14 = vmul.f32 %v607_v12, %v599_v43 }
 0x19c   :  { %v611_v15 = vpop.eup %610  ;;  %v296_v16 = vmul.f32 %v609_v13, %v601_v44 }
 0x19d   :  { %v613_v18 = vpop.eup %612  ;;  %v295_v19 = vmul.f32 %v611_v15, %v603_v46  ;;  %539 = vst [vmem:[#allocation2] sm:$0xff] %v294_v14 }
 0x19e   :  { %v297_v20 = vmul.f32 %v613_v18, %v605_v49  ;;  %541 = vst [vmem:[#allocation2 + $0x10] sm:$0xff] %v296_v16 }
 0x19f   :  { %407 = vmatprep.subr.mxu0 %v295_v19  ;;  %540 = vst [vmem:[#allocation2 + $0x8] sm:$0xff] %v295_v19 }
 0x1a0   :  { %484 = vmatprep.subr.mxu1 %v297_v20  ;;  %542 = vst [vmem:[#allocation2 + $0x18] sm:$0xff] %v297_v20  ;;  %408 = vmatpush1.msra.mxu0 %v294_v14 }
 0x1a1   :  { %485 = vmatpush1.msra.mxu1 %v296_v16  ;;  %581 = vmatmul.mubr.msk.f32.vlgmr.msra.gmra.mxu0 %vm370_vm1, %v354_v17 }
 0x1a2   :  { %583 = vmatmul.mubr.msk.f32.vlgmr.msra.gmra.mxu1 %vm370_vm1, %v354_v17  ;;  %447 = vmatprep.mubr.f32.mxu0 %v668_v47 }
 0x1a3   :  { %524 = vmatprep.mubr.f32.mxu1 %v668_v47 }
 0x1a5   :  { %582 = vmatmul.mubr.msk.f32.gmra.mxu0 %vm370_vm1, %v355_v21 }
 0x1a6   :  { %584 = vmatmul.mubr.msk.f32.gmra.mxu1 %vm370_vm1, %v355_v21 }
 0x1f3   :  { %v315_v22 = vpop.xlane.xlu1 %314 }
 0x1f4   :  { %v316_v23 = vsub.f32 %v746_v5, %v315_v22  ;;  %v317_v24 = vsub.f32 %v752_v9, %v315_v22  ;;  %v318_v25 = vsub.f32 %v748_v6, %v315_v22  ;;  %v319_v26 = vsub.f32 %v754_v10, %v315_v22 }
 0x1f6   :  { %v320_v27 = vmul.f32 1.442695, %v316_v23  ;;  %v322_v28 = vmul.f32 1.442695, %v317_v24  ;;  %v324_v29 = vmul.f32 1.442695, %v318_v25 }
 0x1f7   :  { %v326_v30 = vmul.f32 1.442695, %v319_v26 }
 0x1f8   :  { %614 = vpow2.f32 %v320_v27 }
 0x1f9   :  { %616 = vpow2.f32 %v322_v28 }
 0x1fa   :  { %618 = vpow2.f32 %v324_v29 }
 0x1fb   :  { %620 = vpow2.f32 %v326_v30 }
 0x205   :  { %v615_v47 = vpop.eup %614 }
 0x206   :  { %v617_v31 = vpop.eup %616 }
 0x207   :  { %v328_v32 = vadd.f32 %v617_v31, %v615_v47  ;;  %v619_v33 = vpop.eup %618 }
 0x208   :  { %v621_v5 = vpop.eup %620 }
 0x209   :  { %v329_v34 = vadd.f32 %v619_v33, %v328_v32 }
 0x20b   :  { %v330_v35 = vadd.f32 %v621_v5, %v329_v34 }
 0x20d   :  { %331 = vadd.xlane.f32.xlu1 %v330_v35 }
 0x20e   :  { %635 = shalt.err (!%p632_p4)
}
 0x20f   :  { %558 = dma.vmem_to_hbm [thread:$0]  %s556_s6, 512, %s809_s3, [#allocation3]  }
 0x210   :  { %s670_s24 = smov [#allocation4]  }
 0x211   :  { %s565_s25 = sshll.u32 %s670_s24, 4  ;;  %s566_s25 = int_to_ptr.vmem [resolvable:$true] %s565_s25 }
 0x212   :  { %s644_s26 = scalar_lea.vmem %s566_s25, 512  ;;  %p649_p6 = scmp.lt.s32.totalorder %s566_s25, %s566_s25 }
 0x213   :  { %p645_p5 = scmp.ne.s32.totalorder %s566_s25, %s644_s26  ;;  %p650_p7 = scmp.lt.s32.totalorder %s644_s26, %s644_s26 }
 0x215   :  { %p651_p8 = por %p650_p7, %p649_p6 }
 0x217   :  { %p652_p9 = pnand %p651_p8, %p645_p5 }
 0x261   :  { %v443_v6 = vpop.f32.mrf.mxu0 }
 0x262   :  { %531 = vst [vmem:[%s808_s2] sm:$0xff] %v443_v6  ;;  %v520_v9 = vpop.f32.mrf.mxu1 }
 0x263   :  { %533 = vst [vmem:[%s808_s2 + $0x10] sm:$0xff] %v520_v9  ;;  %v445_v10 = vpop.f32.mrf.mxu0 }
 0x264   :  { %532 = vst [vmem:[%s808_s2 + $0x8] sm:$0xff] %v445_v10  ;;  %v522_v36 = vpop.f32.mrf.mxu1 }
 0x265   :  { %534 = vst [vmem:[%s808_s2 + $0x18] sm:$0xff] %v522_v36  ;;  %v449_v37 = vpop.f32.mrf.mxu0 }
 0x266   :  { %535 = vst [vmem:[%s808_s2 + $0x20] sm:$0xff] %v449_v37  ;;  %v526_v38 = vpop.f32.mrf.mxu1 }
 0x267   :  { %537 = vst [vmem:[%s808_s2 + $0x30] sm:$0xff] %v526_v38  ;;  %v451_v39 = vpop.f32.mrf.mxu0 }
 0x268   :  { %536 = vst [vmem:[%s808_s2 + $0x28] sm:$0xff] %v451_v39  ;;  %v528_v40 = vpop.f32.mrf.mxu1 }
 0x269   :  { %538 = vst [vmem:[%s808_s2 + $0x38] sm:$0xff] %v528_v40 }
 0x296   :  { %v332_v41 = vpop.xlane.xlu1 %331 }
 0x297   :  { %622 = vrcp.f32 %v332_v41 }
 0x2a4   :  { %v623_v42 = vpop.eup %622 }
 0x2a5   :  { %v334_v43 = vmul.f32 %v623_v42, %v615_v47  ;;  %v335_v44 = vmul.f32 %v623_v42, %v617_v31  ;;  %v336_v45 = vmul.f32 %v623_v42, %v619_v33  ;;  %v337_v46 = vmul.f32 %v623_v42, %v621_v5 }
 0x2a7   :  { %543 = vst [vmem:[#allocation4] sm:$0xff] %v334_v43  ;;  %544 = vst [vmem:[#allocation4 + $0x8] sm:$0xff] %v335_v44 }
 0x2a8   :  { %545 = vst [vmem:[#allocation4 + $0x10] sm:$0xff] %v336_v45  ;;  %546 = vst [vmem:[#allocation4 + $0x18] sm:$0xff] %v337_v46 }
 0x2a9   :  { %655 = shalt.err (!%p652_p9)
}
 0x2aa   :  { %568 = dma.vmem_to_hbm [thread:$0]  %s566_s25, 512, %s810_s4, [#allocation5]  }
 0x2ab   :  { %664 = dma.done.wait [#allocation3], 512  }
 0x2ac   :  { %665 = vsyncadd [#allocation3], 4294966784 }
 0x2ad   :  { %666 = dma.done.wait [#allocation5], 512  }
 0x2ae   :  { %667 = vsyncadd [#allocation5], 4294966784 }
 0x2af   :  { %577 = vsyncpa [#allocation3], 1 }
 0x2b0   :  { %578 = vsyncpa [#allocation5], 1 }

// kernel: parallel_model_forward.24
= control target key start
LH: loop header
LB: loop body
LE: loop exit
PB: predicated region body
PF: predicated region fallthrough
CT: control target
= control target key end

     0   :  { %v96_v0 = vlaneseq  ;;  %v878_v2 = vmov 0   ;;  %v879_v3 = vmov 1966171168   ;;  %vm486_vm0 = vcmask 261120   ;;  %s1153_s1 = inlined_call_operand.vmem [shape: bf16[288,512], index: 1, kind: input, shape index: {}]   ;;  %s1154_s2 = inlined_call_operand.<no memory space> [shape: f32[1,1], index: 2, kind: input, shape index: {}]   ;;  %s1155_s0 = inlined_call_operand.vmem [shape: bf16[1,288], index: 0, kind: input, shape index: {}]   ;;  %s1156_s3 = inlined_call_operand.vmem [shape: f32[1,512], index: 3, kind: output, shape index: {}]  }
   0x1   :  { %v770_v1 = vld [vmem:[%s1153_s1 + $0xe4] ss:$16 sps:$4 sm:$0xff]   ;;  %563 = vmatprep.mubr.bf16.mxu1 %v878_v2  ;;  %v110_v4 = vunpack.c.l.s4 %v879_v3  ;;  %769 = vset.pattern.permute.xlu0 %v878_v2  ;;  %v8_v5 = vstv %s1154_s2  ;;  %v774_v8 = vld [vmem:[%s1153_s1 + $0xe0] ss:$16 sps:$4 sm:$0xff]   ;;  %v784_v19 = vld [vmem:[%s1153_s1 + $0xe8] ss:$16 sps:$4 sm:$0xff]  }
   0x2   :  { %v772_v6 = vld [vmem:[%s1153_s1 + $0x224] ss:$16 sps:$4 sm:$0xff]   ;;  %v912_v7 = vshrl.u32 %v96_v0, 7  ;;  %9 = vst [vmem:[#allocation2] sm:$0x1] %v8_v5  ;;  %490 = vmatprep.subr.bf16.mxu0 %v770_v1  ;;  %vm685_vm1 = vcmp.lt.s32.totalorder %v96_v0, 512 }
   0x3   :  { %v775_v9 = vld [vmem:[%s1153_s1 + $0x220] ss:$16 sps:$4 sm:$0xff]   ;;  %v111_v10 = vunpack.c.0.s8 %v110_v4  ;;  %543 = vmatprep.subr.bf16.mxu1 %v772_v6  ;;  %v776_v11 = vld [vmem:[%s1153_s1 + $0xc4] ss:$16 sps:$4 sm:$0xff]   ;;  %491 = vmatpush1.bf16.msra.mxu0 %v774_v8  ;;  %v786_v21 = vld [vmem:[%s1153_s1 + $0xec] ss:$16 sps:$4 sm:$0xff]  }
   0x4   :  { %544 = vmatpush1.bf16.msra.mxu1 %v775_v9  ;;  %v778_v12 = vld [vmem:[%s1153_s1 + $0x204] ss:$16 sps:$4 sm:$0xff]   ;;  %v780_v13 = vld [vmem:[%s1153_s1 + $0xc0] ss:$16 sps:$4 sm:$0xff]   ;;  %492 = vmatprep.subr.bf16.mxu0 %v776_v11  ;;  %v792_v26 = vld [vmem:[%s1153_s1 + $0xcc] ss:$16 sps:$4 sm:$0xff]  }
   0x5   :  { %v930_v14 = vsub.s32 %v111_v10, %v912_v7  ;;  %v781_v15 = vld [vmem:[%s1153_s1 + $0x200] ss:$16 sps:$4 sm:$0xff]   ;;  %545 = vmatprep.subr.bf16.mxu1 %v778_v12  ;;  %v782_v16 = vld [vmem:[%s1153_s1 + $0xa4] ss:$16 sps:$4 sm:$0xff]   ;;  %v790_v27 = vld [vmem:[%s1153_s1 + $0xc8] ss:$16 sps:$4 sm:$0xff]  }
   0x6   :  { %v692_v17 = vld.sshfl [vmem:[%s1155_s0] sm:$0x13 pattern:$0x75316420]  ;;  %v788_v24 = vld [vmem:[%s1153_s1 + $0x84] ss:$16 sps:$4 sm:$0xff]  }
   0x7   :  { %v942_v18 = vrot.slane %v692_v17, %v930_v14  ;;  %v108_v20 = vcombine.high %v692_v17, %v692_v17  ;;  %493 = vmatpush1.bf16.msra.mxu0 %v780_v13  ;;  %v787_v22 = vld [vmem:[%s1153_s1 + $0xa0] ss:$16 sps:$4 sm:$0xff]   ;;  %v794_v29 = vld [vmem:[%s1153_s1 + $0x64] ss:$16 sps:$4 sm:$0xff]   ;;  %v798_v30 = vld [vmem:[%s1153_s1 + $0xac] ss:$16 sps:$4 sm:$0xff]  }
   0x8   :  { %546 = vmatpush1.bf16.msra.mxu1 %v781_v15  ;;  %494 = vmatprep.subr.bf16.mxu0 %v782_v16  ;;  %v793_v28 = vld [vmem:[%s1153_s1 + $0x80] ss:$16 sps:$4 sm:$0xff]   ;;  %v796_v31 = vld [vmem:[%s1153_s1 + $0xa8] ss:$16 sps:$4 sm:$0xff]   ;;  %v800_v33 = vld [vmem:[%s1153_s1 + $0x44] ss:$16 sps:$4 sm:$0xff]  }
   0x9   :  { %v955_v23 = vcombine.high %v942_v18, %v942_v18  ;;  %v122_v25 = vrot.slane %v108_v20, %v930_v14  ;;  %572 = vmatprep.subr.bf16.mxu1 %v786_v21  ;;  %v799_v32 = vld [vmem:[%s1153_s1 + $0x60] ss:$16 sps:$4 sm:$0xff]   ;;  %v804_v34 = vld [vmem:[%s1153_s1 + $0x8c] ss:$16 sps:$4 sm:$0xff]   ;;  %v802_v35 = vld [vmem:[%s1153_s1 + $0x88] ss:$16 sps:$4 sm:$0xff]  }
   0xa   :  { %v805_v36 = vld [vmem:[%s1153_s1 + $0x40] ss:$16 sps:$4 sm:$0xff]   ;;  %v806_v37 = vld [vmem:[%s1153_s1 + $0x24] ss:$16 sps:$4 sm:$0xff]   ;;  %v810_v38 = vld [vmem:[%s1153_s1 + $0x6c] ss:$16 sps:$4 sm:$0xff]  }
   0xb   :  { %765 = vmatmul.mubr.msk.bf16.vlgmr.msra.gmra.mxu1 %vm486_vm0, %v955_v23  ;;  %522 = vmatprep.mubr.bf16.mxu0 %v122_v25  ;;  %v808_v39 = vld [vmem:[%s1153_s1 + $0x68] ss:$16 sps:$4 sm:$0xff]   ;;  %v811_v40 = vld [vmem:[%s1153_s1 + $0x20] ss:$16 sps:$4 sm:$0xff]   ;;  %v812_v41 = vld [vmem:[%s1153_s1 + $0x4] ss:$16 sps:$4 sm:$0xff]  }
   0xc   :  { %495 = vmatpush1.bf16.msra.mxu0 %v787_v22  ;;  %573 = vmatpush1.bf16.msra.mxu1 %v784_v19  ;;  %v816_v42 = vld [vmem:[%s1153_s1 + $0x4c] ss:$16 sps:$4 sm:$0xff]   ;;  %v814_v43 = vld [vmem:[%s1153_s1 + $0x48] ss:$16 sps:$4 sm:$0xff]   ;;  %v817_v44 = vld [vmem:[%s1153_s1] ss:$16 sps:$4 sm:$0xff]  }
   0xd   :  { %496 = vmatprep.subr.bf16.mxu0 %v788_v24  ;;  %574 = vmatprep.subr.bf16.mxu1 %v792_v26  ;;  %v818_v45 = vld [vmem:[%s1153_s1 + $0x1e4] ss:$16 sps:$4 sm:$0xff]   ;;  %v822_v46 = vld [vmem:[%s1153_s1 + $0x2c] ss:$16 sps:$4 sm:$0xff]   ;;  %v820_v47 = vld [vmem:[%s1153_s1 + $0x28] ss:$16 sps:$4 sm:$0xff]  }
   0xe   :  { %604 = vmatprep.mubr.bf16.mxu1 %v122_v25  ;;  %v823_v48 = vld [vmem:[%s1153_s1 + $0x1e0] ss:$16 sps:$4 sm:$0xff]   ;;  %v824_v49 = vld [vmem:[%s1153_s1 + $0x1c4] ss:$16 sps:$4 sm:$0xff]   ;;  %v828_v50 = vld [vmem:[%s1153_s1 + $0xc] ss:$16 sps:$4 sm:$0xff]  }
   0xf   :  { %v826_v51 = vld [vmem:[%s1153_s1 + $0x8] ss:$16 sps:$4 sm:$0xff]   ;;  %v829_v52 = vld [vmem:[%s1153_s1 + $0x1c0] ss:$16 sps:$4 sm:$0xff]   ;;  %v830_v53 = vld [vmem:[%s1153_s1 + $0x1a4] ss:$16 sps:$4 sm:$0xff]  }
  0x10   :  { %497 = vmatpush1.bf16.msra.mxu0 %v793_v28  ;;  %575 = vmatpush1.bf16.msra.mxu1 %v790_v27  ;;  %v834_v54 = vld [vmem:[%s1153_s1 + $0x1ec] ss:$16 sps:$4 sm:$0xff]   ;;  %v832_v55 = vld [vmem:[%s1153_s1 + $0x1e8] ss:$16 sps:$4 sm:$0xff]   ;;  %v835_v56 = vld [vmem:[%s1153_s1 + $0x1a0] ss:$16 sps:$4 sm:$0xff]  }
  0x11   :  { %498 = vmatprep.subr.bf16.mxu0 %v794_v29  ;;  %576 = vmatprep.subr.bf16.mxu1 %v798_v30  ;;  %v836_v57 = vld [vmem:[%s1153_s1 + $0x184] ss:$16 sps:$4 sm:$0xff]   ;;  %v840_v58 = vld [vmem:[%s1153_s1 + $0x1cc] ss:$16 sps:$4 sm:$0xff]   ;;  %v838_v59 = vld [vmem:[%s1153_s1 + $0x1c8] ss:$16 sps:$4 sm:$0xff]  }
  0x12   :  { %v841_v60 = vld [vmem:[%s1153_s1 + $0x180] ss:$16 sps:$4 sm:$0xff]   ;;  %v842_v61 = vld [vmem:[%s1153_s1 + $0x164] ss:$16 sps:$4 sm:$0xff]   ;;  %v846_v62 = vld [vmem:[%s1153_s1 + $0x1ac] ss:$16 sps:$4 sm:$0xff]  }
  0x13   :  { %v844_v63 = vld [vmem:[%s1153_s1 + $0x1a8] ss:$16 sps:$4 sm:$0xff]   ;;  %v847_v1 = vld [vmem:[%s1153_s1 + $0x160] ss:$16 sps:$4 sm:$0xff]   ;;  %v848_v4 = vld [vmem:[%s1153_s1 + $0x144] ss:$16 sps:$4 sm:$0xff]  }
  0x14   :  { %499 = vmatpush1.bf16.msra.mxu0 %v799_v32  ;;  %577 = vmatpush1.bf16.msra.mxu1 %v796_v31  ;;  %v90_v3 = vld [vmem:[#allocation2] sm:$0x1]  ;;  %v852_v5 = vld [vmem:[%s1153_s1 + $0x18c] ss:$16 sps:$4 sm:$0xff]   ;;  %v850_v6 = vld [vmem:[%s1153_s1 + $0x188] ss:$16 sps:$4 sm:$0xff]  }
  0x15   :  { %500 = vmatprep.subr.bf16.mxu0 %v800_v33  ;;  %578 = vmatprep.subr.bf16.mxu1 %v804_v34  ;;  %v853_v8 = vld [vmem:[%s1153_s1 + $0x140] ss:$16 sps:$4 sm:$0xff]   ;;  %v854_v9 = vld [vmem:[%s1153_s1 + $0x124] ss:$16 sps:$4 sm:$0xff]   ;;  %v858_v10 = vld [vmem:[%s1153_s1 + $0x16c] ss:$16 sps:$4 sm:$0xff]  }
  0x16   :  { %93 = vperm.xlu0 %769, %v90_v3   ;;  %v856_v11 = vld [vmem:[%s1153_s1 + $0x168] ss:$16 sps:$4 sm:$0xff]   ;;  %v859_v12 = vld [vmem:[%s1153_s1 + $0x120] ss:$16 sps:$4 sm:$0xff]   ;;  %v860_v13 = vld [vmem:[%s1153_s1 + $0x104] ss:$16 sps:$4 sm:$0xff]  }
  0x17   :  { %v864_v15 = vld [vmem:[%s1153_s1 + $0x14c] ss:$16 sps:$4 sm:$0xff]   ;;  %v862_v16 = vld [vmem:[%s1153_s1 + $0x148] ss:$16 sps:$4 sm:$0xff]   ;;  %v865_v17 = vld [vmem:[%s1153_s1 + $0x100] ss:$16 sps:$4 sm:$0xff]  }
  0x18   :  { %501 = vmatpush1.bf16.msra.mxu0 %v805_v36  ;;  %579 = vmatpush1.bf16.msra.mxu1 %v802_v35  ;;  %v868_v19 = vld [vmem:[%s1153_s1 + $0x12c] ss:$16 sps:$4 sm:$0xff]   ;;  %v866_v21 = vld [vmem:[%s1153_s1 + $0x128] ss:$16 sps:$4 sm:$0xff]   ;;  %v98_v32 = vsub.s32 0, %v912_v7 }
  0x19   :  { %502 = vmatprep.subr.bf16.mxu0 %v806_v37  ;;  %580 = vmatprep.subr.bf16.mxu1 %v810_v38  ;;  %v871_v20 = vld [vmem:[%s1153_s1 + $0x22c] ss:$16 sps:$4 sm:$0xff]   ;;  %v869_v22 = vld [vmem:[%s1153_s1 + $0x228] ss:$16 sps:$4 sm:$0xff]  }
  0x1a   :  { %v874_v24 = vld [vmem:[%s1153_s1 + $0x10c] ss:$16 sps:$4 sm:$0xff]   ;;  %v872_v26 = vld [vmem:[%s1153_s1 + $0x108] ss:$16 sps:$4 sm:$0xff]  }
  0x1b   :  { %v877_v25 = vld [vmem:[%s1153_s1 + $0x20c] ss:$16 sps:$4 sm:$0xff]   ;;  %v875_v27 = vld [vmem:[%s1153_s1 + $0x208] ss:$16 sps:$4 sm:$0xff]  }
  0x1c   :  { %503 = vmatpush1.bf16.msra.mxu0 %v811_v40  ;;  %581 = vmatpush1.bf16.msra.mxu1 %v808_v39 }
  0x1d   :  { %504 = vmatprep.subr.bf16.mxu0 %v812_v41  ;;  %582 = vmatprep.subr.bf16.mxu1 %v816_v42 }
  0x20   :  { %505 = vmatpush1.bf16.msra.mxu0 %v817_v44  ;;  %583 = vmatpush1.bf16.msra.mxu1 %v814_v43 }
  0x21   :  { %506 = vmatprep.subr.bf16.mxu0 %v818_v45  ;;  %584 = vmatprep.subr.bf16.mxu1 %v822_v46 }
  0x24   :  { %507 = vmatpush2.bf16.msra.mxu0 %v823_v48  ;;  %585 = vmatpush1.bf16.msra.mxu1 %v820_v47 }
  0x25   :  { %508 = vmatprep.subr.bf16.mxu0 %v824_v49  ;;  %586 = vmatprep.subr.bf16.mxu1 %v828_v50 }
  0x28   :  { %509 = vmatpush2.bf16.msra.mxu0 %v829_v52  ;;  %587 = vmatpush1.bf16.msra.mxu1 %v826_v51 }
  0x29   :  { %510 = vmatprep.subr.bf16.mxu0 %v830_v53  ;;  %588 = vmatprep.subr.bf16.mxu1 %v834_v54 }
  0x2c   :  { %511 = vmatpush2.bf16.msra.mxu0 %v835_v56  ;;  %589 = vmatpush2.bf16.msra.mxu1 %v832_v55 }
  0x2d   :  { %512 = vmatprep.subr.bf16.mxu0 %v836_v57  ;;  %590 = vmatprep.subr.bf16.mxu1 %v840_v58 }
  0x30   :  { %513 = vmatpush2.bf16.msra.mxu0 %v841_v60  ;;  %591 = vmatpush2.bf16.msra.mxu1 %v838_v59 }
  0x31   :  { %514 = vmatprep.subr.bf16.mxu0 %v842_v61  ;;  %592 = vmatprep.subr.bf16.mxu1 %v846_v62 }
  0x34   :  { %515 = vmatpush2.bf16.msra.mxu0 %v847_v1  ;;  %593 = vmatpush2.bf16.msra.mxu1 %v844_v63 }
  0x35   :  { %516 = vmatprep.subr.bf16.mxu0 %v848_v4  ;;  %594 = vmatprep.subr.bf16.mxu1 %v852_v5 }
  0x38   :  { %517 = vmatpush2.bf16.msra.mxu0 %v853_v8  ;;  %595 = vmatpush2.bf16.msra.mxu1 %v850_v6 }
  0x39   :  { %518 = vmatprep.subr.bf16.mxu0 %v854_v9  ;;  %596 = vmatprep.subr.bf16.mxu1 %v858_v10 }
  0x3c   :  { %519 = vmatpush2.bf16.msra.mxu0 %v859_v12  ;;  %597 = vmatpush2.bf16.msra.mxu1 %v856_v11 }
  0x3d   :  { %520 = vmatprep.subr.bf16.mxu0 %v860_v13  ;;  %598 = vmatprep.subr.bf16.mxu1 %v864_v15 }
  0x40   :  { %521 = vmatpush2.bf16.msra.mxu0 %v865_v17  ;;  %599 = vmatpush2.bf16.msra.mxu1 %v862_v16 }
  0x41   :  { %600 = vmatprep.subr.bf16.mxu1 %v868_v19  ;;  %625 = vmatprep.subr.bf16.mxu0 %v871_v20 }
  0x43   :  { %523 = vmatmul.mubr.bf16.vlgmr.msra.gmra.mxu0 %v942_v18 }
  0x44   :  { %601 = vmatpush2.bf16.msra.mxu1 %v866_v21  ;;  %626 = vmatpush1.bf16.msra.mxu0 %v869_v22 }
  0x45   :  { %602 = vmatprep.subr.bf16.mxu1 %v874_v24  ;;  %627 = vmatprep.subr.bf16.mxu0 %v877_v25 }
  0x46   :  { %645 = vmatprep.mubr.bf16.mxu0 %v878_v2 }
  0x48   :  { %603 = vmatpush2.bf16.msra.mxu1 %v872_v26  ;;  %628 = vmatpush1.bf16.msra.mxu0 %v875_v27 }
  0x4b   :  { %605 = vmatmul.mubr.bf16.vlgmr.msra.gmra.mxu1 %v942_v18  ;;  %766 = vmatmul.mubr.msk.bf16.vlgmr.msra.gmra.mxu0 %vm486_vm0, %v955_v23 }
  0x91   :  { %v94_v33 = vpop.permute.xlu0 %93 }
  0x92   :  { %v99_v34 = vrot.slane %v94_v33, %v98_v32 }
  0xcb   :  { %v565_v28 = vpop.f32.mrf.mxu1 }
  0xcd   :  { %v567_v29 = vpop.f32.mrf.mxu1 }
  0xcf   :  { %v569_v30 = vpop.f32.mrf.mxu1 }
  0xd1   :  { %v570_v31 = vpop.f32.mrf.mxu1 }
 0x103   :  { %v524_v35 = vpop.f32.mrf.mxu0 }
 0x104   :  { %v525_v36 = vadd.f32 %v524_v35, %v99_v34 }
 0x105   :  { %v526_v37 = vpop.f32.mrf.mxu0 }
 0x106   :  { %v527_v38 = vadd.f32 %v526_v37, %v99_v34  ;;  %v566_v39 = vadd.f32 %v565_v28, %v525_v36 }
 0x107   :  { %v528_v2 = vpop.f32.mrf.mxu0 }
 0x108   :  { %v568_v40 = vadd.f32 %v567_v29, %v527_v38 }
 0x109   :  { %v529_v41 = vpop.f32.mrf.mxu0 }
 0x10a   :  { %v658_v18 = vcombine.low %v566_v39, %v568_v40 }
 0x10b   :  { %v606_v42 = vpop.f32.mrf.mxu1  ;;  %v647_v43 = vpop.f32.mrf.mxu0 }
 0x10c   :  { %v607_v23 = vadd.f32 %v606_v42, %v99_v34  ;;  %v666_v53 = vrot.slane %v658_v18, %v930_v14 }
 0x10d   :  { %v608_v44 = vpop.f32.mrf.mxu1  ;;  %v649_v45 = vpop.f32.mrf.mxu0 }
 0x10e   :  { %v609_v46 = vadd.f32 %v608_v44, %v99_v34  ;;  %v648_v7 = vadd.f32 %v647_v43, %v607_v23 }
 0x10f   :  { %v610_v47 = vpop.f32.mrf.mxu1  ;;  %v651_v48 = vpop.f32.mrf.mxu0 }
 0x110   :  { %v650_v49 = vadd.f32 %v649_v45, %v609_v46 }
 0x111   :  { %v611_v50 = vpop.f32.mrf.mxu1  ;;  %v652_v51 = vpop.f32.mrf.mxu0 }
 0x112   :  { %v659_v52 = vcombine.low %v648_v7, %v650_v49 }
 0x114   :  { %v673_v54 = vrot.slane %v659_v52, %v930_v14 }
 0x116   :  { %v674_v55 = vcombine.low %v666_v53, %v673_v54 }
 0x118   :  { %v681_v56 = vrot.slane %v674_v55, %v930_v14 }
 0x11a   :  { %687 = vst.msk [vmem:[%s1156_s3] sm:$0xf] %vm685_vm1, %v681_v56 }

// kernel: parallel_model_forward.25
= control target key start
LH: loop header
LB: loop body
LE: loop exit
PB: predicated region body
PF: predicated region fallthrough
CT: control target
= control target key end

     0   :  { %vm56_vm0 = vcmask 1040384   ;;  %v133_v1 = vmov 0   ;;  %vm52_vm1 = vcmask 146432   ;;  %s184_s1 = inlined_call_operand.vmem [shape: bf16[18,256], index: 1, kind: input, shape index: {}]   ;;  %s185_s2 = inlined_call_operand.vmem [shape: f32[16,1], index: 2, kind: input, shape index: {}]   ;;  %s186_s0 = inlined_call_operand.vmem [shape: bf16[16,18], index: 0, kind: input, shape index: {}]   ;;  %s187_s3 = inlined_call_operand.vmem [shape: f32[16,256], index: 3, kind: output, shape index: {}]  }
   0x1   :  { %v19_v0 = vld [vmem:[%s184_s1 + $0x10] sm:$0x11]  ;;  %95 = vmatprep.mubr.bf16.mxu0 %v133_v1  ;;  %126 = vset.pattern.permute.xlu0 %v133_v1  ;;  %v129_v4 = vld [vmem:[%s184_s1 + $0x4] ss:$8 sps:$4 sm:$0xff]   ;;  %v131_v7 = vld [vmem:[%s184_s1] ss:$8 sps:$4 sm:$0xff]  }
   0x2   :  { %v122_v2 = vcombine.high %v19_v0, %v19_v0  ;;  %v121_v3 = vcombine.low %v19_v0, %v19_v0  ;;  %v20_v5 = vld [vmem:[%s185_s2] sm:$0xff]  ;;  %v21_v8 = vld [vmem:[%s185_s2 + $0x8] sm:$0xff] }
   0x3   :  { %24 = vperm.xlu0 %126, %v20_v5   ;;  %v132_v9 = vld [vmem:[%s186_s0] sm:$0xff]  }
   0x4   :  { %123 = vmatprep.subr.msk.bf16.mxu0 %vm56_vm0, %v122_v2  ;;  %v58_v6 = vsel %vm56_vm0, %v121_v3, 0 }
   0x5   :  { %76 = vmatpush1.bf16.msra.mxu0 %v58_v6 }
   0x6   :  { %77 = vmatprep.subr.bf16.mxu0 %v129_v4 }
   0x7   :  { %29 = vperm.xlu0 %126, %v21_v8  }
   0x9   :  { %78 = vmatpush1.bf16.msra.mxu0 %v131_v7 }
   0xc   :  { %124 = vmatmul.mubr.msk.bf16.vlgmr.msra.gmra.mxu0 %vm52_vm1, %v132_v9 }
  0x7e   :  { %v25_v10 = vpop.permute.xlu0 %24 }
  0x82   :  { %v30_v16 = vpop.permute.xlu0 %29 }
  0xcc   :  { %v97_v11 = vpop.f32.mrf.mxu0 }
  0xcd   :  { %v98_v12 = vadd.f32 %v97_v11, %v25_v10 }
  0xce   :  { %v99_v13 = vpop.f32.mrf.mxu0 }
  0xcf   :  { %v106_v14 = vmax.f32 %v98_v12, 0.0  ;;  %v100_v15 = vadd.f32 %v99_v13, %v25_v10 }
  0xd0   :  { %v101_v17 = vpop.f32.mrf.mxu0 }
  0xd1   :  { %110 = vst [vmem:[%s187_s3] sm:$0xff] %v106_v14  ;;  %v107_v18 = vmax.f32 %v100_v15, 0.0  ;;  %v102_v19 = vadd.f32 %v101_v17, %v30_v16 }
  0xd2   :  { %v103_v20 = vpop.f32.mrf.mxu0 }
  0xd3   :  { %111 = vst [vmem:[%s187_s3 + $0x8] sm:$0xff] %v107_v18  ;;  %v108_v21 = vmax.f32 %v102_v19, 0.0  ;;  %v104_v22 = vadd.f32 %v103_v20, %v30_v16 }
  0xd5   :  { %112 = vst [vmem:[%s187_s3 + $0x10] sm:$0xff] %v108_v21  ;;  %v109_v23 = vmax.f32 %v104_v22, 0.0 }
  0xd7   :  { %113 = vst [vmem:[%s187_s3 + $0x18] sm:$0xff] %v109_v23 }

// kernel: parallel_model_forward.26
= control target key start
LH: loop header
LB: loop body
LE: loop exit
PB: predicated region body
PF: predicated region fallthrough
CT: control target
= control target key end

     0   :  { %vm47_vm0 = vcmask 130048   ;;  %s445_s0 = inlined_call_operand.vmem [shape: f32[16,256], index: 0, kind: input, shape index: {}]   ;;  %s446_s1 = inlined_call_operand.vmem [shape: f32[8,16], index: 1, kind: input, shape index: {}]   ;;  %s447_s2 = inlined_call_operand.vmem [shape: f32[16,256], index: 2, kind: output, shape index: {0}]   ;;  %s448_s3 = inlined_call_operand.vmem [shape: f32[8,256], index: 3, kind: output, shape index: {1}]   ;;  %s449_s4 = inlined_call_operand.hbm [shape: f32[8,256], index: 4, kind: output, shape index: {2}]  }
   0x1   :  { %v19_v0 = vld [vmem:[%s446_s1] sm:$0xff]  ;;  %v16_v1 = vld [vmem:[%s445_s0 + $0x8] sm:$0xff]  ;;  %v18_v2 = vld [vmem:[%s445_s0 + $0x18] sm:$0xff] }
   0x2   :  { %v46_v3 = vmul.f32 %v19_v0, %v19_v0  ;;  %v21_v4 = vmul.f32 %v16_v1, %v16_v1  ;;  %v23_v5 = vmul.f32 %v18_v2, %v18_v2  ;;  %v15_v6 = vld [vmem:[%s445_s0] sm:$0xff]  ;;  %v17_v7 = vld [vmem:[%s445_s0 + $0x10] sm:$0xff] }
   0x3   :  { %10 = vsyncpa [#allocation3], 0  ;;  %v20_v8 = vmul.f32 %v15_v6, %v15_v6  ;;  %v22_v9 = vmul.f32 %v17_v7, %v17_v7  ;;  %v377_v26 = vmov 0.0   ;;  %vm216_vm1 = vcmask 64512   ;;  %s378_s8 = smov [#allocation2]  }
   0x4   :  { %v48_v10 = vsel %vm47_vm0, %v46_v3, 0.0  ;;  %v31_v11 = vadd.f32 %v23_v5, %v21_v4  ;;  %121 = vmatprep.mubr.f32.mxu0 %v377_v26  ;;  %287 = vmatprep.mubr.f32.mxu1 %v377_v26  ;;  %s318_s9 = sshll.u32 %s378_s8, 4  ;;  %s319_s9 = int_to_ptr.vmem [resolvable:$true] %s318_s9 }
   0x5   :  { %49 = vadd.xlane.f32.xlu0 %v48_v10  ;;  %v24_v12 = vadd.f32 %v22_v9, %v20_v8  ;;  %s355_s10 = scalar_lea.vmem %s319_s9, 256  ;;  %p360_p1 = scmp.lt.s32.totalorder %s319_s9, %s319_s9 }
   0x6   :  { %v32_v13 = vrot.slane %v31_v11, 4  ;;  %p356_p0 = scmp.ne.s32.totalorder %s319_s9, %s355_s10  ;;  %p361_p2 = scmp.lt.s32.totalorder %s355_s10, %s355_s10 }
   0x7   :  { %v25_v14 = vrot.slane %v24_v12, 4 }
   0x8   :  { %v33_v15 = vadd.f32 %v32_v13, %v31_v11  ;;  %p362_p3 = por %p361_p2, %p360_p1 }
   0x9   :  { %v26_v16 = vadd.f32 %v25_v14, %v24_v12 }
   0xa   :  { %v34_v17 = vrot.slane %v33_v15, 2  ;;  %p363_p4 = pnand %p362_p3, %p356_p0 }
   0xb   :  { %v27_v18 = vrot.slane %v26_v16, 2 }
   0xc   :  { %v35_v19 = vadd.f32 %v34_v17, %v33_v15 }
   0xd   :  { %v28_v20 = vadd.f32 %v27_v18, %v26_v16 }
   0xe   :  { %v36_v21 = vrot.slane %v35_v19, 1 }
   0xf   :  { %v29_v22 = vrot.slane %v28_v20, 1 }
  0x10   :  { %v37_v23 = vadd.f32 %v36_v21, %v35_v19 }
  0x11   :  { %v30_v24 = vadd.f32 %v29_v22, %v28_v20 }
  0x12   :  { %v39_v25 = vadd.f32 1e-12, %v37_v23 }
  0x13   :  { %v38_v27 = vadd.f32 1e-12, %v30_v24 }
  0x14   :  { %335 = vrsqrt.f32 %v39_v25 }
  0x15   :  { %337 = vrsqrt.f32 %v38_v27 }
  0x21   :  { %v336_v28 = vpop.eup %335 }
  0x22   :  { %v338_v29 = vpop.eup %337  ;;  %v45_v30 = vmul.f32 %v336_v28, %v18_v2  ;;  %v43_v31 = vmul.f32 %v336_v28, %v16_v1 }
  0x23   :  { %v44_v32 = vmul.f32 %v338_v29, %v17_v7  ;;  %v42_v33 = vmul.f32 %v338_v29, %v15_v6 }
  0x24   :  { %85 = vmatprep.subr.mxu0 %v45_v30 }
  0x25   :  { %86 = vmatpush1.msra.mxu0 %v44_v32 }
  0x26   :  { %87 = vmatprep.subr.mxu0 %v43_v31 }
  0x27   :  { %88 = vmatpush1.msra.mxu0 %v42_v33 }
  0x32   :  { %184 = vxpose.xlu0.b32.start.end [1/1] (short) (narrow) %v19_v0, 16 }
  0x8e   :  { %v50_v34 = vpop.xlane.xlu0 %49 }
  0x8f   :  { %v51_v35 = vadd.f32 1e-12, %v50_v34 }
  0x91   :  { %339 = vrsqrt.f32 %v51_v35 }
  0x9e   :  { %v340_v36 = vpop.eup %339 }
  0x9f   :  { %v53_v37 = vmul.f32 %v340_v36, %v19_v0 }
  0xa1   :  { %330 = vmatmul.mubr.msk.f32.vlgmr.msra.gmra.mxu0 %vm47_vm0, %v53_v37 }
  0xae   :  { %v200_v10 = vpop.trf.xlu0 }
  0xb2   :  { %v201_v12 = vpop.trf.xlu0 }
 0x161   :  { %v123_v38 = vpop.f32.mrf.mxu0 }
 0x162   :  { %v128_v39 = vrot.slane %v123_v38, 4 }
 0x163   :  { %v125_v40 = vpop.f32.mrf.mxu0 }
 0x164   :  { %v129_v41 = vmax.f32 %v123_v38, %v128_v39  ;;  %v134_v42 = vrot.slane %v125_v40, 4  ;;  %v169_v43 = vmax.f32 %v123_v38, %v125_v40 }
 0x166   :  { %v130_v44 = vrot.slane %v129_v41, 2  ;;  %v135_v45 = vmax.f32 %v125_v40, %v134_v42  ;;  %170 = vmax.xlane.f32.xlu1 %v169_v43 }
 0x168   :  { %v131_v46 = vmax.f32 %v129_v41, %v130_v44  ;;  %v136_v47 = vrot.slane %v135_v45, 2 }
 0x16a   :  { %v132_v48 = vrot.slane %v131_v46, 1  ;;  %v137_v49 = vmax.f32 %v135_v45, %v136_v47 }
 0x16c   :  { %v133_v50 = vmax.f32 %v131_v46, %v132_v48  ;;  %v138_v51 = vrot.slane %v137_v49, 1 }
 0x16e   :  { %v140_v52 = vsub.f32 %v123_v38, %v133_v50  ;;  %v139_v53 = vmax.f32 %v137_v49, %v138_v51 }
 0x170   :  { %v142_v54 = vmul.f32 1.442695, %v140_v52  ;;  %v141_v55 = vsub.f32 %v125_v40, %v139_v53 }
 0x172   :  { %341 = vpow2.f32 %v142_v54  ;;  %v144_v56 = vmul.f32 1.442695, %v141_v55 }
 0x174   :  { %343 = vpow2.f32 %v144_v56 }
 0x17f   :  { %v342_v57 = vpop.eup %341 }
 0x180   :  { %v146_v58 = vrot.slane %v342_v57, 4 }
 0x181   :  { %v344_v59 = vpop.eup %343 }
 0x182   :  { %v152_v60 = vrot.slane %v344_v59, 4  ;;  %v147_v61 = vadd.f32 %v342_v57, %v146_v58 }
 0x184   :  { %v153_v62 = vadd.f32 %v344_v59, %v152_v60  ;;  %v148_v63 = vrot.slane %v147_v61, 2 }
 0x186   :  { %v154_v0 = vrot.slane %v153_v62, 2  ;;  %v149_v1 = vadd.f32 %v148_v63, %v147_v61 }
 0x188   :  { %v155_v2 = vadd.f32 %v154_v0, %v153_v62  ;;  %v150_v3 = vrot.slane %v149_v1, 1 }
 0x18a   :  { %v156_v4 = vrot.slane %v155_v2, 1  ;;  %v151_v5 = vadd.f32 %v150_v3, %v149_v1 }
 0x18c   :  { %v157_v6 = vadd.f32 %v156_v4, %v155_v2  ;;  %345 = vrcp.f32 %v151_v5 }
 0x18e   :  { %347 = vrcp.f32 %v157_v6 }
 0x199   :  { %v346_v7 = vpop.eup %345 }
 0x19a   :  { %v160_v8 = vmul.f32 %v346_v7, %v342_v57 }
 0x19b   :  { %v348_v9 = vpop.eup %347 }
 0x19c   :  { %v161_v11 = vmul.f32 %v348_v9, %v344_v59  ;;  %304 = vst [vmem:[%s448_s3] sm:$0xff] %v160_v8 }
 0x19e   :  { %253 = vmatprep.subr.mxu1 %v161_v11  ;;  %305 = vst [vmem:[%s448_s3 + $0x8] sm:$0xff] %v161_v11 }
 0x19f   :  { %254 = vmatpush1.msra.mxu1 %v160_v8 }
 0x1a0   :  { %331 = vmatmul.mubr.msk.f32.vlgmr.msra.gmra.mxu1 %vm216_vm1, %v200_v10 }
 0x1a1   :  { %293 = vmatprep.mubr.f32.mxu1 %v377_v26 }
 0x1a4   :  { %332 = vmatmul.mubr.msk.f32.gmra.mxu1 %vm216_vm1, %v201_v12 }
 0x1ef   :  { %v171_v13 = vpop.xlane.xlu1 %170 }
 0x1f0   :  { %v172_v14 = vsub.f32 %v123_v38, %v171_v13  ;;  %v173_v15 = vsub.f32 %v125_v40, %v171_v13 }
 0x1f2   :  { %v174_v16 = vmul.f32 1.442695, %v172_v14  ;;  %v176_v17 = vmul.f32 1.442695, %v173_v15 }
 0x1f4   :  { %349 = vpow2.f32 %v174_v16 }
 0x1f5   :  { %351 = vpow2.f32 %v176_v17 }
 0x201   :  { %v350_v18 = vpop.eup %349 }
 0x202   :  { %v352_v19 = vpop.eup %351 }
 0x203   :  { %v178_v20 = vadd.f32 %v352_v19, %v350_v18 }
 0x205   :  { %179 = vadd.xlane.f32.xlu1 %v178_v20 }
 0x260   :  { %v289_v21 = vpop.f32.mrf.mxu1 }
 0x261   :  { %300 = vst [vmem:[%s447_s2] sm:$0xff] %v289_v21 }
 0x262   :  { %v291_v22 = vpop.f32.mrf.mxu1 }
 0x263   :  { %301 = vst [vmem:[%s447_s2 + $0x8] sm:$0xff] %v291_v22 }
 0x264   :  { %v295_v23 = vpop.f32.mrf.mxu1 }
 0x265   :  { %302 = vst [vmem:[%s447_s2 + $0x10] sm:$0xff] %v295_v23 }
 0x266   :  { %v297_v24 = vpop.f32.mrf.mxu1 }
 0x267   :  { %303 = vst [vmem:[%s447_s2 + $0x18] sm:$0xff] %v297_v24 }
 0x28e   :  { %v180_v25 = vpop.xlane.xlu1 %179 }
 0x28f   :  { %353 = vrcp.f32 %v180_v25 }
 0x29c   :  { %v354_v26 = vpop.eup %353 }
 0x29d   :  { %v182_v27 = vmul.f32 %v354_v26, %v350_v18  ;;  %v183_v28 = vmul.f32 %v354_v26, %v352_v19 }
 0x29f   :  { %306 = vst [vmem:[#allocation2] sm:$0xff] %v182_v27  ;;  %307 = vst [vmem:[#allocation2 + $0x8] sm:$0xff] %v183_v28 }
 0x2a0   :  { %366 = shalt.err (!%p363_p4)
}
 0x2a1   :  { %321 = dma.vmem_to_hbm [thread:$0]  %s319_s9, 256, %s449_s4, [#allocation3]  }
 0x2a2   :  { %375 = dma.done.wait [#allocation3], 256  }
 0x2a3   :  { %376 = vsyncadd [#allocation3], 4294967040 }
 0x2a4   :  { %329 = vsyncpa [#allocation3], 1 }

// kernel: parallel_model_forward.28
= control target key start
LH: loop header
LB: loop body
LE: loop exit
PB: predicated region body
PF: predicated region fallthrough
CT: control target
= control target key end

     0   :  { %vm43_vm0 = vcmask 1043456   ;;  %vm44_vm1 = vcmask 1044480   ;;  %v169_v0 = vmov 0.0   ;;  %v170_v2 = vmov 65535   ;;  %s217_s1 = inlined_call_operand.vmem [shape: bf16[9,384], index: 1, kind: input, shape index: {}]   ;;  %s218_s2 = inlined_call_operand.vmem [shape: f32[8,1], index: 2, kind: input, shape index: {}]   ;;  %s219_s0 = inlined_call_operand.vmem [shape: bf16[8,9], index: 0, kind: input, shape index: {}]   ;;  %s220_s3 = inlined_call_operand.vmem [shape: f32[8,384], index: 3, kind: output, shape index: {}]  }
   0x1   :  { %154 = vmatprep.subr.bf16.mxu1 %v169_v0  ;;  %v165_v1 = vld [vmem:[%s217_s1 + $0x4] ss:$12 sps:$4 sm:$0x1f]   ;;  %v45_v3 = vsel %vm43_vm0, 4294967295, %v170_v2  ;;  %vm171_vm2 = vmmov 0   ;;  %v172_v8 = vmov 0  }
   0x2   :  { %v46_v4 = vsel %vm44_vm1, %v45_v3, 0  ;;  %v167_v5 = vld [vmem:[%s217_s1 + $0x8] ss:$12 sps:$4 sm:$0x1f]   ;;  %156 = vmatprep.mubr.msk.bf16.mxu1 %vm171_vm2, %v169_v0  ;;  %88 = vmatprep.mubr.bf16.mxu0 %v172_v8  ;;  %v20_v9 = vld [vmem:[%s218_s2] sm:$0xff]  ;;  %vm39_vm3 = vcmask 72704  }
   0x3   :  { %v51_v6 = vand.u32 %v165_v1, %v46_v4  ;;  %v168_v7 = vld [vmem:[%s217_s1] ss:$12 sps:$4 sm:$0x1f]   ;;  %164 = vset.pattern.permute.xlu0 %v172_v8  ;;  %v54_v10 = vand.u32 %v167_v5, %v46_v4 }
   0x4   :  { %23 = vperm.xlu0 %164, %v20_v9   ;;  %v48_v11 = vand.u32 %v168_v7, %v46_v4  ;;  %v15_v12 = vld [vmem:[%s219_s0] sm:$0xf] }
   0x5   :  { %70 = vmatprep.subr.bf16.mxu0 %v51_v6  ;;  %155 = vmatpush3.bf16.msra.mxu1 %v54_v10 }
   0x6   :  { %71 = vmatpush1.bf16.msra.mxu0 %v48_v11 }
   0x8   :  { %157 = vmatmul.mubr.msk.bf16.vlgmr.msra.gmra.mxu1 %vm39_vm3, %v15_v12 }
   0x9   :  { %150 = vmatmul.mubr.msk.bf16.vlgmr.msra.gmra.mxu0 %vm39_vm3, %v15_v12 }
  0x7f   :  { %v24_v13 = vpop.permute.xlu0 %23 }
  0xc8   :  { %v131_v14 = vpop.f32.mrf.mxu1 }
  0xc9   :  { %v132_v15 = vadd.f32 %v131_v14, %v24_v13  ;;  %v90_v16 = vpop.f32.mrf.mxu0 }
  0xca   :  { %v91_v17 = vadd.f32 %v90_v16, %v24_v13  ;;  %v158_v18 = vpop.f32.mrf.mxu1 }
  0xcb   :  { %v139_v19 = vmax.f32 %v132_v15, 0.0  ;;  %v92_v20 = vpop.f32.mrf.mxu0 }
  0xcc   :  { %v137_v21 = vmax.f32 %v91_v17, 0.0  ;;  %v93_v22 = vadd.f32 %v92_v20, %v24_v13  ;;  %v134_v23 = vpop.f32.mrf.mxu1 }
  0xcd   :  { %142 = vst [vmem:[%s220_s3 + $0x10] sm:$0xff] %v139_v19  ;;  %v94_v24 = vpop.f32.mrf.mxu0 }
  0xce   :  { %140 = vst [vmem:[%s220_s3] sm:$0xff] %v137_v21  ;;  %v138_v25 = vmax.f32 %v93_v22, 0.0  ;;  %v159_v26 = vpop.f32.mrf.mxu1 }
  0xcf   :  { %v95_v27 = vpop.f32.mrf.mxu0 }
  0xd0   :  { %141 = vst [vmem:[%s220_s3 + $0x8] sm:$0xff] %v138_v25 }

// kernel: parallel_model_forward.29
= control target key start
LH: loop header
LB: loop body
LE: loop exit
PB: predicated region body
PF: predicated region fallthrough
CT: control target
= control target key end

     0   :  { %vm116_vm0 = vcmask 1043456   ;;  %v294_v1 = vmov 0.0   ;;  %v295_v3 = vmov 0   ;;  %vm296_vm1 = vmmov 0   ;;  %s369_s1 = inlined_call_operand.vmem [shape: bf16[72,384], index: 1, kind: input, shape index: {}]   ;;  %s370_s2 = inlined_call_operand.vmem [shape: f32[2,1], index: 2, kind: input, shape index: {}]   ;;  %s371_s0 = inlined_call_operand.vmem [shape: bf16[2,72], index: 0, kind: input, shape index: {}]   ;;  %s372_s3 = inlined_call_operand.vmem [shape: f32[2,384], index: 3, kind: output, shape index: {}]  }
   0x1   :  { %v32_v0 = vld [vmem:[%s369_s1 + $0x60] sm:$0xff]  ;;  %256 = vmatprep.subr.bf16.mxu1 %v294_v1  ;;  %v277_v2 = vld [vmem:[%s369_s1 + $0x68] ss:$0 sps:$4 sm:$0xff]   ;;  %158 = vmatprep.mubr.bf16.mxu0 %v295_v3  ;;  %v278_v6 = vld [vmem:[%s369_s1 + $0x4c] ss:$12 sps:$4 sm:$0xff]   ;;  %vm112_vm2 = vcmask 588800   ;;  %v214_v24 = vlaneseq }
   0x2   :  { %v245_v4 = vcombine.high %v32_v0, %v32_v0  ;;  %v244_v5 = vcombine.low %v32_v0, %v32_v0  ;;  %266 = vmatprep.mubr.msk.bf16.mxu1 %vm296_vm1, %v294_v1  ;;  %274 = vset.pattern.permute.xlu0 %v295_v3  ;;  %v124_v7 = vsel %vm116_vm0, %v277_v2, 0  ;;  %v281_v9 = vld [vmem:[%s369_s1 + $0x50] ss:$12 sps:$4 sm:$0xff]   ;;  %v280_v10 = vld [vmem:[%s369_s1 + $0x48] ss:$12 sps:$4 sm:$0xff]  }
   0x3   :  { %257 = vmatpush3.bf16.msra.mxu1 %v124_v7  ;;  %v282_v11 = vld [vmem:[%s369_s1 + $0x34] ss:$12 sps:$4 sm:$0xff]   ;;  %v285_v12 = vld [vmem:[%s369_s1 + $0x38] ss:$12 sps:$4 sm:$0xff]   ;;  %v284_v13 = vld [vmem:[%s369_s1 + $0x30] ss:$12 sps:$4 sm:$0xff]  }
   0x4   :  { %247 = vmatprep.subr.msk.bf16.mxu0 %vm116_vm0, %v245_v4  ;;  %v118_v8 = vsel %vm116_vm0, %v244_v5, 0  ;;  %258 = vmatprep.subr.bf16.mxu1 %v294_v1  ;;  %v286_v14 = vld [vmem:[%s369_s1 + $0x1c] ss:$12 sps:$4 sm:$0xff]   ;;  %v34_v15 = vld [vmem:[%s370_s2] sm:$0x3]  ;;  %v215_v27 = vshrl.u32 %v214_v24, 7 }
   0x5   :  { %133 = vmatpush1.bf16.msra.mxu0 %v118_v8  ;;  %v289_v16 = vld [vmem:[%s369_s1 + $0x20] ss:$12 sps:$4 sm:$0xff]   ;;  %37 = vperm.xlu0 %274, %v34_v15   ;;  %v288_v17 = vld [vmem:[%s369_s1 + $0x18] ss:$12 sps:$4 sm:$0xff]   ;;  %v293_v19 = vld [vmem:[%s369_s1 + $0x8] ss:$12 sps:$4 sm:$0xff]  }
   0x6   :  { %134 = vmatprep.subr.bf16.mxu0 %v278_v6  ;;  %v290_v18 = vld [vmem:[%s369_s1 + $0x4] ss:$12 sps:$4 sm:$0xff]   ;;  %v292_v20 = vld [vmem:[%s369_s1] ss:$12 sps:$4 sm:$0xff]   ;;  %v297_v22 = vmov 1983009808  }
   0x7   :  { %259 = vmatpush3.bf16.msra.mxu1 %v281_v9  ;;  %v15_v21 = vld [vmem:[%s371_s0] sm:$0x1]  ;;  %v212_v23 = vunpack.c.l.s4 %v297_v22 }
   0x8   :  { %260 = vmatprep.subr.bf16.mxu1 %v294_v1 }
   0x9   :  { %135 = vmatpush1.bf16.msra.mxu0 %v280_v10  ;;  %v213_v26 = vunpack.c.0.s8 %v212_v23 }
   0xa   :  { %136 = vmatprep.subr.bf16.mxu0 %v282_v11 }
   0xb   :  { %261 = vmatpush3.bf16.msra.mxu1 %v285_v12  ;;  %v216_v34 = vsub.s32 %v213_v26, %v215_v27 }
   0xc   :  { %262 = vmatprep.subr.bf16.mxu1 %v294_v1 }
   0xd   :  { %137 = vmatpush1.bf16.msra.mxu0 %v284_v13 }
   0xe   :  { %138 = vmatprep.subr.bf16.mxu0 %v286_v14 }
   0xf   :  { %263 = vmatpush3.bf16.msra.mxu1 %v289_v16 }
  0x10   :  { %264 = vmatprep.subr.bf16.mxu1 %v294_v1 }
  0x11   :  { %139 = vmatpush1.bf16.msra.mxu0 %v288_v17 }
  0x12   :  { %140 = vmatprep.subr.bf16.mxu0 %v290_v18 }
  0x13   :  { %265 = vmatpush3.bf16.msra.mxu1 %v293_v19 }
  0x15   :  { %141 = vmatpush1.bf16.msra.mxu0 %v292_v20 }
  0x16   :  { %267 = vmatmul.mubr.msk.bf16.vlgmr.msra.gmra.mxu1 %vm112_vm2, %v15_v21 }
  0x18   :  { %248 = vmatmul.mubr.msk.bf16.vlgmr.msra.gmra.mxu0 %vm112_vm2, %v15_v21 }
  0x80   :  { %v38_v28 = vpop.permute.xlu0 %37 }
  0xd6   :  { %v201_v25 = vpop.f32.mrf.mxu1 }
  0xd7   :  { %v202_v33 = vadd.f32 %v201_v25, %v38_v28 }
  0xd8   :  { %v160_v29 = vpop.f32.mrf.mxu0  ;;  %v268_v30 = vpop.f32.mrf.mxu1 }
  0xd9   :  { %v161_v32 = vadd.f32 %v160_v29, %v38_v28  ;;  %v224_v41 = vrot.slane %v202_v33, %v216_v34 }
  0xda   :  { %v162_v31 = vpop.f32.mrf.mxu0  ;;  %v204_v36 = vpop.f32.mrf.mxu1 }
  0xdb   :  { %v163_v35 = vadd.f32 %v162_v31, %v38_v28 }
  0xdc   :  { %v164_v37 = vpop.f32.mrf.mxu0  ;;  %v269_v39 = vpop.f32.mrf.mxu1 }
  0xdd   :  { %v210_v38 = vcombine.low %v161_v32, %v163_v35 }
  0xde   :  { %v165_v40 = vpop.f32.mrf.mxu0 }
  0xdf   :  { %v217_v42 = vrot.slane %v210_v38, %v216_v34 }
  0xe1   :  { %v225_v43 = vcombine.low %v217_v42, %v224_v41 }
  0xe3   :  { %227 = vst [vmem:[%s372_s3] sm:$0x3f] %v225_v43 }

// kernel: squeeze.18
= control target key start
LH: loop header
LB: loop body
LE: loop exit
PB: predicated region body
PF: predicated region fallthrough
CT: control target
= control target key end

     0   :  { %s569_s8 = smov 123   ;;  %s570_s9 = smov 124   ;;  %vm416_vm0 = vcmask 1022976   ;;  %vm430_vm1 = vcmask 1039360   ;;  %vm8_vm2 = vcmask 39936   ;;  %vm420_vm3 = vcmask 23552   ;;  %s904_s0 = inlined_call_operand.vmem [shape: f32[320], index: 0, kind: input, shape index: {}]   ;;  %s905_s1 = inlined_call_operand.vmem [shape: f32[8,8,5,1], index: 1, kind: output, shape index: {}]  }
   0x1   :  { %v5_v0 = vld [vmem:[%s904_s0] sm:$0xf]  ;;  %s568_s0 = smov 126   ;;  %s571_s10 = smov 121   ;;  %vm434_vm4 = vcmask 7168   ;;  %vm423_vm5 = vcmask 39960  }
   0x2   :  { %6 = vst [vmem:[#allocation0] sm:$0xf] %v5_v0  ;;  %s572_s11 = smov 119   ;;  %s573_s12 = smov 118   ;;  %vm437_vm6 = vcmask 39944  }
   0x3   :  { %s574_s13 = smov 116   ;;  %s575_s14 = smov 114  }
   0x4   :  { %s576_s15 = smov 113   ;;  %s577_s16 = smov 111  }
   0x5   :  { %s578_s17 = smov 109   ;;  %s579_s18 = smov 108  }
   0x6   :  { %s580_s19 = smov 106   ;;  %s581_s20 = smov 104  }
   0x7   :  { %s582_s21 = smov 103   ;;  %s583_s22 = smov 101  }
   0x8   :  { %s584_s23 = smov 99   ;;  %s585_s24 = smov 98  }
   0x9   :  { %v11_v1 = vld [vmem:[#allocation0 + $0x1] sm:$0x1]   ;;  %v24_v2 = vld [vmem:[#allocation0] sm:$0x1]   ;;  %v18_v3 = vld [vmem:[#allocation0 + $0x2] sm:$0x1]  }
   0xa   :  { %12 = vrot.lane.b32.xlu0 %v11_v1, %s568_s0  ;;  %25 = vrot.lane.b32.xlu1 %v24_v2, %s569_s8  ;;  %v31_v4 = vld [vmem:[#allocation0 + $0x1] sm:$0x1]   ;;  %v38_v5 = vld [vmem:[#allocation0 + $0x2] sm:$0x1]   ;;  %v44_v6 = vld [vmem:[#allocation0] sm:$0x1]  }
   0xb   :  { %v51_v7 = vld [vmem:[#allocation0 + $0x1] sm:$0x1]   ;;  %v58_v8 = vld [vmem:[#allocation0 + $0x2] sm:$0x1]   ;;  %v64_v9 = vld [vmem:[#allocation0] sm:$0x1]  }
   0xc   :  { %v71_v10 = vld [vmem:[#allocation0 + $0x1] sm:$0x1]   ;;  %v78_v11 = vld [vmem:[#allocation0 + $0x2] sm:$0x1]   ;;  %v84_v12 = vld [vmem:[#allocation0] sm:$0x1]  }
   0xd   :  { %v91_v13 = vld [vmem:[#allocation0 + $0x1] sm:$0x1]   ;;  %v98_v14 = vld [vmem:[#allocation0 + $0x2] sm:$0x1]   ;;  %v104_v15 = vld [vmem:[#allocation0] sm:$0x1]  }
   0xe   :  { %19 = vrot.lane.b32.xlu0 %v18_v3, %s570_s9  ;;  %32 = vrot.lane.b32.xlu1 %v31_v4, %s571_s10  ;;  %v111_v16 = vld [vmem:[#allocation0 + $0x1] sm:$0x1]   ;;  %v118_v17 = vld [vmem:[#allocation0 + $0x2] sm:$0x1]   ;;  %v124_v18 = vld [vmem:[#allocation0] sm:$0x1]  }
   0xf   :  { %v131_v19 = vld [vmem:[#allocation0 + $0x1] sm:$0x1]   ;;  %v138_v20 = vld [vmem:[#allocation0 + $0x2] sm:$0x1]   ;;  %s586_s25 = smov 96   ;;  %s587_s26 = smov 94  }
  0x10   :  { %v144_v21 = vld [vmem:[#allocation0] sm:$0x1]   ;;  %v151_v22 = vld [vmem:[#allocation0 + $0x1] sm:$0x1]   ;;  %s588_s27 = smov 93   ;;  %s589_s28 = smov 91  }
  0x11   :  { %v158_v23 = vld [vmem:[#allocation0 + $0x2] sm:$0x1]   ;;  %v164_v24 = vld [vmem:[#allocation0] sm:$0x1]   ;;  %s590_s29 = smov 89   ;;  %s591_s30 = smov 88  }
  0x12   :  { %39 = vrot.lane.b32.xlu0 %v38_v5, %s572_s11  ;;  %45 = vrot.lane.b32.xlu1 %v44_v6, %s573_s12  ;;  %v171_v25 = vld [vmem:[#allocation0 + $0x1] sm:$0x1]   ;;  %v178_v26 = vld [vmem:[#allocation0 + $0x2] sm:$0x1]   ;;  %s592_s2 = smov 86   ;;  %s593_s3 = smov 84  }
  0x13   :  { %v184_v27 = vld [vmem:[#allocation0] sm:$0x1]   ;;  %v191_v28 = vld [vmem:[#allocation0 + $0x1] sm:$0x1]   ;;  %s594_s4 = smov 83   ;;  %s595_s5 = smov 81  }
  0x14   :  { %v198_v29 = vld [vmem:[#allocation0 + $0x2] sm:$0x1]   ;;  %v204_v30 = vld [vmem:[#allocation0] sm:$0x1]   ;;  %s596_s6 = smov 79   ;;  %s597_s7 = smov 78  }
  0x15   :  { %v211_v31 = vld [vmem:[#allocation0 + $0x1] sm:$0x1]   ;;  %v218_v32 = vld [vmem:[#allocation0 + $0x2] sm:$0x1]   ;;  %s598_s0 = smov 76   ;;  %s599_s8 = smov 74  }
  0x16   :  { %52 = vrot.lane.b32.xlu0 %v51_v7, %s574_s13  ;;  %59 = vrot.lane.b32.xlu1 %v58_v8, %s575_s14  ;;  %v224_v33 = vld [vmem:[#allocation0] sm:$0x1]   ;;  %v231_v34 = vld [vmem:[#allocation0 + $0x1] sm:$0x1]   ;;  %v429_v38 = vld [vmem:[#allocation0 + $0x2] sm:$0x1]  }
  0x17   :  { %v413_v35 = vld [vmem:[#allocation0] sm:$0x1]   ;;  %v415_v36 = vld [vmem:[#allocation0 + $0x1] sm:$0x1]   ;;  %s600_s9 = smov 73   ;;  %s601_s10 = smov 71  }
  0x18   :  { %v427_v37 = vld [vmem:[#allocation0 + $0x1] sm:$0x1]   ;;  %v417_v39 = vsel %vm416_vm0, %v415_v36, %v413_v35  ;;  %s602_s11 = smov 3   ;;  %s603_s12 = smov 1   ;;  %v238_v41 = vld [vmem:[#allocation0 + $0x2] sm:$0x1]  }
  0x19   :  { %v431_v40 = vsel %vm430_vm1, %v429_v38, %v427_v37  ;;  %v244_v42 = vld [vmem:[#allocation0] sm:$0x1]   ;;  %s604_s13 = smov 69   ;;  %s605_s14 = smov 68   ;;  %v251_v43 = vld [vmem:[#allocation0 + $0x1] sm:$0x1]  }
  0x1a   :  { %65 = vrot.lane.b32.xlu0 %v64_v9, %s576_s15  ;;  %72 = vrot.lane.b32.xlu1 %v71_v10, %s577_s16  ;;  %v257_v44 = vld [vmem:[#allocation0] sm:$0x1]   ;;  %s606_s15 = smov 66   ;;  %s607_s16 = smov 63   ;;  %v264_v45 = vld [vmem:[#allocation0 + $0x1] sm:$0x1]  }
  0x1b   :  { %v270_v46 = vld [vmem:[#allocation0] sm:$0x1]   ;;  %v277_v47 = vld [vmem:[#allocation0 + $0x1] sm:$0x1]  }
  0x1c   :  { %v283_v48 = vld [vmem:[#allocation0] sm:$0x1]   ;;  %v290_v49 = vld [vmem:[#allocation0 + $0x1] sm:$0x1]  }
  0x1d   :  { %v296_v50 = vld [vmem:[#allocation0] sm:$0x1]   ;;  %v303_v51 = vld [vmem:[#allocation0 + $0x1] sm:$0x1]  }
  0x1e   :  { %79 = vrot.lane.b32.xlu0 %v78_v11, %s578_s17  ;;  %85 = vrot.lane.b32.xlu1 %v84_v12, %s579_s18  ;;  %s608_s17 = smov 61   ;;  %s609_s18 = smov 58   ;;  %v309_v52 = vld [vmem:[#allocation0] sm:$0x1]   ;;  %v316_v53 = vld [vmem:[#allocation0 + $0x1] sm:$0x1]  }
  0x1f   :  { %v322_v54 = vld [vmem:[#allocation0] sm:$0x1]   ;;  %v329_v55 = vld [vmem:[#allocation0 + $0x1] sm:$0x1]  }
  0x20   :  { %v335_v56 = vld [vmem:[#allocation0] sm:$0x1]   ;;  %v342_v57 = vld [vmem:[#allocation0 + $0x1] sm:$0x1]  }
  0x21   :  { %v348_v58 = vld [vmem:[#allocation0] sm:$0x1]   ;;  %v355_v59 = vld [vmem:[#allocation0 + $0x1] sm:$0x1]  }
  0x22   :  { %92 = vrot.lane.b32.xlu0 %v91_v13, %s580_s19  ;;  %99 = vrot.lane.b32.xlu1 %v98_v14, %s581_s20  ;;  %s610_s19 = smov 56   ;;  %s611_s20 = smov 53   ;;  %v361_v60 = vld [vmem:[#allocation0] sm:$0x1]   ;;  %v368_v61 = vld [vmem:[#allocation0 + $0x1] sm:$0x1]  }
  0x23   :  { %v374_v62 = vld [vmem:[#allocation0] sm:$0x1]   ;;  %v381_v0 = vld [vmem:[#allocation0 + $0x1] sm:$0x1]  }
  0x24   :  { %v7_v63 = vld [vmem:[#allocation0] sm:$0x1]   ;;  %v394_v4 = vld [vmem:[#allocation0 + $0x1] sm:$0x1]  }
  0x25   :  { %9 = vst.msk [vmem:[%s905_s1] sm:$0x1] %vm8_vm2, %v7_v63   ;;  %v387_v1 = vld [vmem:[#allocation0] sm:$0x1]   ;;  %v407_v8 = vld [vmem:[#allocation0 + $0x1] sm:$0x1]  }
  0x26   :  { %105 = vrot.lane.b32.xlu0 %v104_v15, %s582_s21  ;;  %112 = vrot.lane.b32.xlu1 %v111_v16, %s583_s22  ;;  %s612_s21 = smov 51   ;;  %s613_s22 = smov 48   ;;  %v400_v5 = vld [vmem:[#allocation0] sm:$0x1]  }
  0x2a   :  { %119 = vrot.lane.b32.xlu0 %v118_v17, %s584_s23  ;;  %125 = vrot.lane.b32.xlu1 %v124_v18, %s585_s24  ;;  %s614_s23 = smov 46   ;;  %s615_s24 = smov 43  }
  0x2e   :  { %132 = vrot.lane.b32.xlu0 %v131_v19, %s586_s25  ;;  %139 = vrot.lane.b32.xlu1 %v138_v20, %s587_s26  ;;  %s616_s25 = smov 41   ;;  %s617_s26 = smov 38  }
  0x32   :  { %145 = vrot.lane.b32.xlu0 %v144_v21, %s588_s27  ;;  %152 = vrot.lane.b32.xlu1 %v151_v22, %s589_s28  ;;  %s618_s27 = smov 36   ;;  %s619_s28 = smov 33  }
  0x36   :  { %159 = vrot.lane.b32.xlu0 %v158_v23, %s590_s29  ;;  %165 = vrot.lane.b32.xlu1 %v164_v24, %s591_s30  ;;  %s620_s29 = smov 31   ;;  %s621_s30 = smov 28  }
  0x3a   :  { %172 = vrot.lane.b32.xlu0 %v171_v25, %s592_s2  ;;  %179 = vrot.lane.b32.xlu1 %v178_v26, %s593_s3  ;;  %s622_s2 = smov 26   ;;  %s623_s3 = smov 23  }
  0x3e   :  { %185 = vrot.lane.b32.xlu0 %v184_v27, %s594_s4  ;;  %192 = vrot.lane.b32.xlu1 %v191_v28, %s595_s5 }
  0x42   :  { %199 = vrot.lane.b32.xlu0 %v198_v29, %s596_s6  ;;  %205 = vrot.lane.b32.xlu1 %v204_v30, %s597_s7  ;;  %s624_s6 = smov 21   ;;  %s625_s7 = smov 18  }
  0x46   :  { %212 = vrot.lane.b32.xlu0 %v211_v31, %s598_s0  ;;  %219 = vrot.lane.b32.xlu1 %v218_v32, %s599_s8 }
  0x4a   :  { %225 = vrot.lane.b32.xlu0 %v224_v33, %s600_s9  ;;  %232 = vrot.lane.b32.xlu1 %v231_v34, %s601_s10 }
  0x4e   :  { %418 = vrot.lane.b32.xlu0 %v417_v39, %s602_s11  ;;  %432 = vrot.lane.b32.xlu1 %v431_v40, %s603_s12  ;;  %s626_s11 = smov 16   ;;  %s627_s12 = smov 13  }
  0x52   :  { %239 = vrot.lane.b32.xlu0 %v238_v41, %s604_s13  ;;  %245 = vrot.lane.b32.xlu1 %v244_v42, %s605_s14 }
  0x56   :  { %252 = vrot.lane.b32.xlu0 %v251_v43, %s606_s15  ;;  %258 = vrot.lane.b32.xlu1 %v257_v44, %s607_s16 }
  0x5a   :  { %265 = vrot.lane.b32.xlu0 %v264_v45, %s608_s17  ;;  %271 = vrot.lane.b32.xlu1 %v270_v46, %s609_s18  ;;  %s628_s17 = smov 11   ;;  %s629_s18 = smov 8  }
  0x5e   :  { %278 = vrot.lane.b32.xlu0 %v277_v47, %s610_s19  ;;  %284 = vrot.lane.b32.xlu1 %v283_v48, %s611_s20 }
  0x62   :  { %291 = vrot.lane.b32.xlu0 %v290_v49, %s612_s21  ;;  %297 = vrot.lane.b32.xlu1 %v296_v50, %s613_s22 }
  0x66   :  { %304 = vrot.lane.b32.xlu0 %v303_v51, %s614_s23  ;;  %310 = vrot.lane.b32.xlu1 %v309_v52, %s615_s24  ;;  %s630_s23 = smov 6  }
  0x6a   :  { %317 = vrot.lane.b32.xlu0 %v316_v53, %s616_s25  ;;  %323 = vrot.lane.b32.xlu1 %v322_v54, %s617_s26 }
  0x6e   :  { %330 = vrot.lane.b32.xlu0 %v329_v55, %s618_s27  ;;  %336 = vrot.lane.b32.xlu1 %v335_v56, %s619_s28 }
  0x72   :  { %343 = vrot.lane.b32.xlu0 %v342_v57, %s620_s29  ;;  %349 = vrot.lane.b32.xlu1 %v348_v58, %s621_s30 }
  0x76   :  { %356 = vrot.lane.b32.xlu0 %v355_v59, %s622_s2  ;;  %362 = vrot.lane.b32.xlu1 %v361_v60, %s623_s3 }
  0x7a   :  { %369 = vrot.lane.b32.xlu0 %v368_v61, %s624_s6  ;;  %375 = vrot.lane.b32.xlu1 %v374_v62, %s625_s7 }
  0x7c   :  { %v13_v2 = vpop.permute.xlu0 %12   ;;  %v26_v3 = vpop.permute.xlu1 %25  }
  0x7d   :  { %440 = vst.msk [vmem:[%s905_s1 + $0x1a] sm:$0x1] %vm8_vm2, %v13_v2   ;;  %442 = vst.msk [vmem:[%s905_s1 + $0x1] sm:$0x1] %vm8_vm2, %v26_v3  }
  0x7e   :  { %382 = vrot.lane.b32.xlu0 %v381_v0, %s626_s11  ;;  %388 = vrot.lane.b32.xlu1 %v387_v1, %s627_s12 }
  0x80   :  { %v20_v6 = vpop.permute.xlu0 %19   ;;  %v33_v7 = vpop.permute.xlu1 %32  }
  0x81   :  { %441 = vst.msk [vmem:[%s905_s1 + $0x34] sm:$0x1] %vm8_vm2, %v20_v6   ;;  %443 = vst.msk [vmem:[%s905_s1 + $0x1b] sm:$0x1] %vm8_vm2, %v33_v7  }
  0x82   :  { %395 = vrot.lane.b32.xlu0 %v394_v4, %s628_s17  ;;  %401 = vrot.lane.b32.xlu1 %v400_v5, %s629_s18 }
  0x84   :  { %v40_v9 = vpop.permute.xlu0 %39   ;;  %v46_v10 = vpop.permute.xlu1 %45  }
  0x85   :  { %444 = vst.msk [vmem:[%s905_s1 + $0x35] sm:$0x1] %vm8_vm2, %v40_v9   ;;  %445 = vst.msk [vmem:[%s905_s1 + $0x2] sm:$0x1] %vm8_vm2, %v46_v10  }
  0x86   :  { %408 = vrot.lane.b32.xlu0 %v407_v8, %s630_s23 }
  0x88   :  { %v53_v11 = vpop.permute.xlu0 %52   ;;  %v60_v12 = vpop.permute.xlu1 %59  }
  0x89   :  { %446 = vst.msk [vmem:[%s905_s1 + $0x1c] sm:$0x1] %vm8_vm2, %v53_v11   ;;  %447 = vst.msk [vmem:[%s905_s1 + $0x36] sm:$0x1] %vm8_vm2, %v60_v12  }
  0x8c   :  { %v66_v13 = vpop.permute.xlu0 %65   ;;  %v73_v14 = vpop.permute.xlu1 %72  }
  0x8d   :  { %448 = vst.msk [vmem:[%s905_s1 + $0x3] sm:$0x1] %vm8_vm2, %v66_v13   ;;  %449 = vst.msk [vmem:[%s905_s1 + $0x1d] sm:$0x1] %vm8_vm2, %v73_v14  }
  0x90   :  { %v80_v15 = vpop.permute.xlu0 %79   ;;  %v86_v16 = vpop.permute.xlu1 %85  }
  0x91   :  { %450 = vst.msk [vmem:[%s905_s1 + $0x37] sm:$0x1] %vm8_vm2, %v80_v15   ;;  %451 = vst.msk [vmem:[%s905_s1 + $0x4] sm:$0x1] %vm8_vm2, %v86_v16  }
  0x94   :  { %v93_v17 = vpop.permute.xlu0 %92   ;;  %v100_v18 = vpop.permute.xlu1 %99  }
  0x95   :  { %452 = vst.msk [vmem:[%s905_s1 + $0x1e] sm:$0x1] %vm8_vm2, %v93_v17   ;;  %453 = vst.msk [vmem:[%s905_s1 + $0x38] sm:$0x1] %vm8_vm2, %v100_v18  }
  0x98   :  { %v106_v19 = vpop.permute.xlu0 %105   ;;  %v113_v20 = vpop.permute.xlu1 %112  }
  0x99   :  { %454 = vst.msk [vmem:[%s905_s1 + $0x5] sm:$0x1] %vm8_vm2, %v106_v19   ;;  %455 = vst.msk [vmem:[%s905_s1 + $0x1f] sm:$0x1] %vm8_vm2, %v113_v20  }
  0x9c   :  { %v120_v21 = vpop.permute.xlu0 %119   ;;  %v126_v22 = vpop.permute.xlu1 %125  }
  0x9d   :  { %456 = vst.msk [vmem:[%s905_s1 + $0x39] sm:$0x1] %vm8_vm2, %v120_v21   ;;  %457 = vst.msk [vmem:[%s905_s1 + $0x6] sm:$0x1] %vm8_vm2, %v126_v22  }
  0xa0   :  { %v133_v23 = vpop.permute.xlu0 %132   ;;  %v140_v24 = vpop.permute.xlu1 %139  }
  0xa1   :  { %458 = vst.msk [vmem:[%s905_s1 + $0x20] sm:$0x1] %vm8_vm2, %v133_v23   ;;  %459 = vst.msk [vmem:[%s905_s1 + $0x3a] sm:$0x1] %vm8_vm2, %v140_v24  }
  0xa4   :  { %v146_v25 = vpop.permute.xlu0 %145   ;;  %v153_v26 = vpop.permute.xlu1 %152  }
  0xa5   :  { %460 = vst.msk [vmem:[%s905_s1 + $0x7] sm:$0x1] %vm8_vm2, %v146_v25   ;;  %461 = vst.msk [vmem:[%s905_s1 + $0x21] sm:$0x1] %vm8_vm2, %v153_v26  }
  0xa8   :  { %v160_v27 = vpop.permute.xlu0 %159   ;;  %v166_v28 = vpop.permute.xlu1 %165  }
  0xa9   :  { %462 = vst.msk [vmem:[%s905_s1 + $0x3b] sm:$0x1] %vm8_vm2, %v160_v27   ;;  %463 = vst.msk [vmem:[%s905_s1 + $0x8] sm:$0x1] %vm8_vm2, %v166_v28  }
  0xac   :  { %v173_v29 = vpop.permute.xlu0 %172   ;;  %v180_v30 = vpop.permute.xlu1 %179  }
  0xad   :  { %464 = vst.msk [vmem:[%s905_s1 + $0x22] sm:$0x1] %vm8_vm2, %v173_v29   ;;  %465 = vst.msk [vmem:[%s905_s1 + $0x3c] sm:$0x1] %vm8_vm2, %v180_v30  }
  0xb0   :  { %v186_v31 = vpop.permute.xlu0 %185   ;;  %v193_v32 = vpop.permute.xlu1 %192  }
  0xb1   :  { %466 = vst.msk [vmem:[%s905_s1 + $0x9] sm:$0x1] %vm8_vm2, %v186_v31   ;;  %467 = vst.msk [vmem:[%s905_s1 + $0x23] sm:$0x1] %vm8_vm2, %v193_v32  }
  0xb4   :  { %v200_v33 = vpop.permute.xlu0 %199   ;;  %v206_v34 = vpop.permute.xlu1 %205  }
  0xb5   :  { %468 = vst.msk [vmem:[%s905_s1 + $0x3d] sm:$0x1] %vm8_vm2, %v200_v33   ;;  %469 = vst.msk [vmem:[%s905_s1 + $0xa] sm:$0x1] %vm8_vm2, %v206_v34  }
  0xb8   :  { %v213_v35 = vpop.permute.xlu0 %212   ;;  %v220_v36 = vpop.permute.xlu1 %219  }
  0xb9   :  { %470 = vst.msk [vmem:[%s905_s1 + $0x24] sm:$0x1] %vm8_vm2, %v213_v35   ;;  %471 = vst.msk [vmem:[%s905_s1 + $0x3e] sm:$0x1] %vm8_vm2, %v220_v36  }
  0xbc   :  { %v226_v37 = vpop.permute.xlu0 %225   ;;  %v233_v38 = vpop.permute.xlu1 %232  }
  0xbd   :  { %472 = vst.msk [vmem:[%s905_s1 + $0xb] sm:$0x1] %vm8_vm2, %v226_v37   ;;  %473 = vst.msk [vmem:[%s905_s1 + $0x25] sm:$0x1] %vm8_vm2, %v233_v38  }
  0xc0   :  { %v419_v39 = vpop.permute.xlu0 %418   ;;  %v433_v40 = vpop.permute.xlu1 %432  }
  0xc1   :  { %501 = vst.msk [vmem:[%s905_s1 + $0x19] sm:$0x1] %vm420_vm3, %v419_v39  }
  0xc2   :  { %503 = vst.msk [vmem:[%s905_s1 + $0x33] sm:$0x1] %vm434_vm4, %v433_v40  }
  0xc3   :  { %502 = vst.msk [vmem:[%s905_s1 + $0x19] sm:$0x1] %vm423_vm5, %v419_v39  }
  0xc4   :  { %504 = vst.msk [vmem:[%s905_s1 + $0x33] sm:$0x1] %vm437_vm6, %v433_v40   ;;  %v240_v41 = vpop.permute.xlu0 %239   ;;  %v246_v42 = vpop.permute.xlu1 %245  }
  0xc5   :  { %474 = vst.msk [vmem:[%s905_s1 + $0x3f] sm:$0x1] %vm8_vm2, %v240_v41   ;;  %475 = vst.msk [vmem:[%s905_s1 + $0xc] sm:$0x1] %vm8_vm2, %v246_v42  }
  0xc8   :  { %v253_v43 = vpop.permute.xlu0 %252   ;;  %v259_v44 = vpop.permute.xlu1 %258  }
  0xc9   :  { %476 = vst.msk [vmem:[%s905_s1 + $0x26] sm:$0x1] %vm8_vm2, %v253_v43   ;;  %477 = vst.msk [vmem:[%s905_s1 + $0xd] sm:$0x1] %vm8_vm2, %v259_v44  }
  0xcc   :  { %v266_v45 = vpop.permute.xlu0 %265   ;;  %v272_v46 = vpop.permute.xlu1 %271  }
  0xcd   :  { %478 = vst.msk [vmem:[%s905_s1 + $0x27] sm:$0x1] %vm8_vm2, %v266_v45   ;;  %479 = vst.msk [vmem:[%s905_s1 + $0xe] sm:$0x1] %vm8_vm2, %v272_v46  }
  0xd0   :  { %v279_v47 = vpop.permute.xlu0 %278   ;;  %v285_v48 = vpop.permute.xlu1 %284  }
  0xd1   :  { %480 = vst.msk [vmem:[%s905_s1 + $0x28] sm:$0x1] %vm8_vm2, %v279_v47   ;;  %481 = vst.msk [vmem:[%s905_s1 + $0xf] sm:$0x1] %vm8_vm2, %v285_v48  }
  0xd4   :  { %v292_v49 = vpop.permute.xlu0 %291   ;;  %v298_v50 = vpop.permute.xlu1 %297  }
  0xd5   :  { %482 = vst.msk [vmem:[%s905_s1 + $0x29] sm:$0x1] %vm8_vm2, %v292_v49   ;;  %483 = vst.msk [vmem:[%s905_s1 + $0x10] sm:$0x1] %vm8_vm2, %v298_v50  }
  0xd8   :  { %v305_v51 = vpop.permute.xlu0 %304   ;;  %v311_v52 = vpop.permute.xlu1 %310  }
  0xd9   :  { %484 = vst.msk [vmem:[%s905_s1 + $0x2a] sm:$0x1] %vm8_vm2, %v305_v51   ;;  %485 = vst.msk [vmem:[%s905_s1 + $0x11] sm:$0x1] %vm8_vm2, %v311_v52  }
  0xdc   :  { %v318_v53 = vpop.permute.xlu0 %317   ;;  %v324_v54 = vpop.permute.xlu1 %323  }
  0xdd   :  { %486 = vst.msk [vmem:[%s905_s1 + $0x2b] sm:$0x1] %vm8_vm2, %v318_v53   ;;  %487 = vst.msk [vmem:[%s905_s1 + $0x12] sm:$0x1] %vm8_vm2, %v324_v54  }
  0xe0   :  { %v331_v55 = vpop.permute.xlu0 %330   ;;  %v337_v56 = vpop.permute.xlu1 %336  }
  0xe1   :  { %488 = vst.msk [vmem:[%s905_s1 + $0x2c] sm:$0x1] %vm8_vm2, %v331_v55   ;;  %489 = vst.msk [vmem:[%s905_s1 + $0x13] sm:$0x1] %vm8_vm2, %v337_v56  }
  0xe4   :  { %v344_v57 = vpop.permute.xlu0 %343   ;;  %v350_v58 = vpop.permute.xlu1 %349  }
  0xe5   :  { %490 = vst.msk [vmem:[%s905_s1 + $0x2d] sm:$0x1] %vm8_vm2, %v344_v57   ;;  %491 = vst.msk [vmem:[%s905_s1 + $0x14] sm:$0x1] %vm8_vm2, %v350_v58  }
  0xe8   :  { %v357_v59 = vpop.permute.xlu0 %356   ;;  %v363_v60 = vpop.permute.xlu1 %362  }
  0xe9   :  { %492 = vst.msk [vmem:[%s905_s1 + $0x2e] sm:$0x1] %vm8_vm2, %v357_v59   ;;  %493 = vst.msk [vmem:[%s905_s1 + $0x15] sm:$0x1] %vm8_vm2, %v363_v60  }
  0xec   :  { %v370_v61 = vpop.permute.xlu0 %369   ;;  %v376_v62 = vpop.permute.xlu1 %375  }
  0xed   :  { %494 = vst.msk [vmem:[%s905_s1 + $0x2f] sm:$0x1] %vm8_vm2, %v370_v61   ;;  %495 = vst.msk [vmem:[%s905_s1 + $0x16] sm:$0x1] %vm8_vm2, %v376_v62  }
  0xf0   :  { %v383_v63 = vpop.permute.xlu0 %382   ;;  %v389_v0 = vpop.permute.xlu1 %388  }
  0xf1   :  { %496 = vst.msk [vmem:[%s905_s1 + $0x30] sm:$0x1] %vm8_vm2, %v383_v63   ;;  %497 = vst.msk [vmem:[%s905_s1 + $0x17] sm:$0x1] %vm8_vm2, %v389_v0  }
  0xf4   :  { %v396_v1 = vpop.permute.xlu0 %395   ;;  %v402_v2 = vpop.permute.xlu1 %401  }
  0xf5   :  { %498 = vst.msk [vmem:[%s905_s1 + $0x31] sm:$0x1] %vm8_vm2, %v396_v1   ;;  %499 = vst.msk [vmem:[%s905_s1 + $0x18] sm:$0x1] %vm8_vm2, %v402_v2  }
  0xf8   :  { %v409_v3 = vpop.permute.xlu0 %408  }
  0xf9   :  { %500 = vst.msk [vmem:[%s905_s1 + $0x32] sm:$0x1] %vm8_vm2, %v409_v3  }

// kernel: parallel_model_forward.32
= control target key start
LH: loop header
LB: loop body
LE: loop exit
PB: predicated region body
PF: predicated region fallthrough
CT: control target
= control target key end

     0   :  { %vm53_vm0 = vcmask 1043456   ;;  %vm54_vm1 = vcmask 1044480   ;;  %v236_v1 = vmov 0   ;;  %v237_v2 = vmov 65535   ;;  %s296_s1 = inlined_call_operand.vmem [shape: bf16[9,640], index: 1, kind: input, shape index: {}]   ;;  %s297_s2 = inlined_call_operand.vmem [shape: f32[8,1], index: 2, kind: input, shape index: {}]   ;;  %s298_s0 = inlined_call_operand.vmem [shape: bf16[8,9], index: 0, kind: input, shape index: {}]   ;;  %s299_s3 = inlined_call_operand.vmem [shape: f32[8,640], index: 3, kind: output, shape index: {}]  }
   0x1   :  { %v229_v0 = vld [vmem:[%s296_s1 + $0x4] ss:$20 sps:$4 sm:$0x1f]   ;;  %104 = vmatprep.mubr.bf16.mxu0 %v236_v1  ;;  %145 = vmatprep.mubr.bf16.mxu1 %v236_v1  ;;  %v55_v3 = vsel %vm53_vm0, 4294967295, %v237_v2  ;;  %v15_v14 = vld [vmem:[%s298_s0] sm:$0xf] }
   0x2   :  { %v231_v4 = vld [vmem:[%s296_s1] ss:$20 sps:$4 sm:$0x1f]   ;;  %228 = vset.pattern.permute.xlu0 %v236_v1  ;;  %v56_v5 = vsel %vm54_vm1, %v55_v3, 0  ;;  %vm49_vm2 = vcmask 72704   ;;  %v238_v15 = vmov 0.0  }
   0x3   :  { %v232_v6 = vld [vmem:[%s296_s1 + $0xc] ss:$20 sps:$4 sm:$0x1f]   ;;  %v61_v7 = vand.u32 %v229_v0, %v56_v5  ;;  %v58_v8 = vand.u32 %v231_v4, %v56_v5  ;;  %v234_v9 = vld [vmem:[%s296_s1 + $0x8] ss:$20 sps:$4 sm:$0x1f]  }
   0x4   :  { %v67_v10 = vand.u32 %v232_v6, %v56_v5  ;;  %v22_v11 = vld [vmem:[%s297_s2] sm:$0xff]  ;;  %v64_v12 = vand.u32 %v234_v9, %v56_v5  ;;  %vm239_vm3 = vmmov 0  }
   0x5   :  { %86 = vmatprep.subr.bf16.mxu0 %v61_v7  ;;  %v235_v13 = vld [vmem:[%s296_s1 + $0x10] ss:$20 sps:$4 sm:$0x1f]   ;;  %25 = vperm.xlu0 %228, %v22_v11  }
   0x6   :  { %87 = vmatpush1.bf16.msra.mxu0 %v58_v8  ;;  %127 = vmatprep.subr.bf16.mxu1 %v67_v10  ;;  %v70_v16 = vand.u32 %v235_v13, %v56_v5 }
   0x7   :  { %128 = vmatpush1.bf16.msra.mxu1 %v64_v12  ;;  %218 = vmatprep.subr.bf16.mxu0 %v238_v15 }
   0x9   :  { %213 = vmatmul.mubr.msk.bf16.vlgmr.msra.gmra.mxu0 %vm49_vm2, %v15_v14 }
   0xa   :  { %219 = vmatpush3.bf16.msra.mxu0 %v70_v16  ;;  %214 = vmatmul.mubr.msk.bf16.vlgmr.msra.gmra.mxu1 %vm49_vm2, %v15_v14 }
   0xb   :  { %220 = vmatprep.mubr.msk.bf16.mxu0 %vm239_vm3, %v238_v15 }
  0x11   :  { %221 = vmatmul.mubr.msk.bf16.vlgmr.msra.gmra.mxu0 %vm49_vm2, %v15_v14 }
  0x80   :  { %v26_v17 = vpop.permute.xlu0 %25 }
  0xc9   :  { %v106_v18 = vpop.f32.mrf.mxu0 }
  0xca   :  { %v107_v19 = vadd.f32 %v106_v18, %v26_v17  ;;  %v147_v20 = vpop.f32.mrf.mxu1 }
  0xcb   :  { %v108_v21 = vpop.f32.mrf.mxu0  ;;  %v148_v22 = vadd.f32 %v147_v20, %v26_v17 }
  0xcc   :  { %v194_v23 = vmax.f32 %v107_v19, 0.0  ;;  %v109_v24 = vadd.f32 %v108_v21, %v26_v17  ;;  %v149_v25 = vpop.f32.mrf.mxu1 }
  0xcd   :  { %v196_v26 = vmax.f32 %v148_v22, 0.0  ;;  %v110_v27 = vpop.f32.mrf.mxu0  ;;  %v150_v28 = vadd.f32 %v149_v25, %v26_v17 }
  0xce   :  { %199 = vst [vmem:[%s299_s3] sm:$0xff] %v194_v23  ;;  %v195_v29 = vmax.f32 %v109_v24, 0.0  ;;  %v151_v30 = vpop.f32.mrf.mxu1 }
  0xcf   :  { %201 = vst [vmem:[%s299_s3 + $0x10] sm:$0xff] %v196_v26  ;;  %v197_v31 = vmax.f32 %v150_v28, 0.0  ;;  %v111_v32 = vpop.f32.mrf.mxu0 }
  0xd0   :  { %200 = vst [vmem:[%s299_s3 + $0x8] sm:$0xff] %v195_v29  ;;  %v152_v33 = vpop.f32.mrf.mxu1 }
  0xd1   :  { %202 = vst [vmem:[%s299_s3 + $0x18] sm:$0xff] %v197_v31  ;;  %v188_v34 = vpop.f32.mrf.mxu0 }
  0xd2   :  { %v189_v35 = vadd.f32 %v188_v34, %v26_v17 }
  0xd3   :  { %v222_v36 = vpop.f32.mrf.mxu0 }
  0xd4   :  { %v198_v37 = vmax.f32 %v189_v35, 0.0 }
  0xd5   :  { %v191_v38 = vpop.f32.mrf.mxu0 }
  0xd6   :  { %203 = vst [vmem:[%s299_s3 + $0x20] sm:$0xff] %v198_v37 }
  0xd7   :  { %v223_v39 = vpop.f32.mrf.mxu0 }

// kernel: parallel_model_forward.33
= control target key start
LH: loop header
LB: loop body
LE: loop exit
PB: predicated region body
PF: predicated region fallthrough
CT: control target
= control target key end

     0   :  { %vm170_vm0 = vcmask 1043456   ;;  %v434_v2 = vmov 0   ;;  %vm166_vm1 = vcmask 588800   ;;  %v435_v28 = vmov 0.0   ;;  %s547_s1 = inlined_call_operand.vmem [shape: bf16[72,640], index: 1, kind: input, shape index: {}]   ;;  %s548_s2 = inlined_call_operand.vmem [shape: f32[2,1], index: 2, kind: input, shape index: {}]   ;;  %s549_s0 = inlined_call_operand.vmem [shape: bf16[2,72], index: 0, kind: input, shape index: {}]   ;;  %s550_s3 = inlined_call_operand.vmem [shape: f32[2,640], index: 3, kind: output, shape index: {}]  }
   0x1   :  { %v40_v0 = vld [vmem:[%s547_s1 + $0xa0] sm:$0xff]  ;;  %v41_v1 = vld [vmem:[%s547_s1 + $0xa8] sm:$0xff]  ;;  %218 = vmatprep.mubr.bf16.mxu0 %v434_v2  ;;  %259 = vmatprep.mubr.bf16.mxu1 %v434_v2  ;;  %v405_v7 = vld [vmem:[%s547_s1 + $0x7c] ss:$20 sps:$4 sm:$0xff]   ;;  %vm436_vm2 = vmmov 0   ;;  %v318_v36 = vlaneseq }
   0x2   :  { %v366_v3 = vcombine.high %v40_v0, %v40_v0  ;;  %v368_v4 = vcombine.high %v41_v1, %v41_v1  ;;  %v365_v5 = vcombine.low %v40_v0, %v40_v0  ;;  %v367_v6 = vcombine.low %v41_v1, %v41_v1  ;;  %400 = vset.pattern.permute.xlu0 %v434_v2  ;;  %v407_v8 = vld [vmem:[%s547_s1 + $0x84] ss:$20 sps:$4 sm:$0xff]   ;;  %v410_v12 = vld [vmem:[%s547_s1 + $0x80] ss:$20 sps:$4 sm:$0xff]   ;;  %v413_v14 = vld [vmem:[%s547_s1 + $0x5c] ss:$20 sps:$4 sm:$0xff]  }
   0x3   :  { %v409_v11 = vld [vmem:[%s547_s1 + $0x78] ss:$20 sps:$4 sm:$0xff]   ;;  %v411_v13 = vld [vmem:[%s547_s1 + $0x54] ss:$20 sps:$4 sm:$0xff]   ;;  %v415_v15 = vld [vmem:[%s547_s1 + $0x50] ss:$20 sps:$4 sm:$0xff]  }
   0x4   :  { %370 = vmatprep.subr.msk.bf16.mxu0 %vm170_vm0, %v366_v3  ;;  %372 = vmatprep.subr.msk.bf16.mxu1 %vm170_vm0, %v368_v4  ;;  %v172_v9 = vsel %vm170_vm0, %v365_v5, 0  ;;  %v178_v10 = vsel %vm170_vm0, %v367_v6, 0  ;;  %v416_v16 = vld [vmem:[%s547_s1 + $0x58] ss:$20 sps:$4 sm:$0xff]   ;;  %v419_v18 = vld [vmem:[%s547_s1 + $0x34] ss:$20 sps:$4 sm:$0xff]  }
   0x5   :  { %193 = vmatpush1.bf16.msra.mxu0 %v172_v9  ;;  %234 = vmatpush1.bf16.msra.mxu1 %v178_v10  ;;  %v417_v17 = vld [vmem:[%s547_s1 + $0x2c] ss:$20 sps:$4 sm:$0xff]   ;;  %v421_v19 = vld [vmem:[%s547_s1 + $0x28] ss:$20 sps:$4 sm:$0xff]   ;;  %v422_v20 = vld [vmem:[%s547_s1 + $0x30] ss:$20 sps:$4 sm:$0xff]  }
   0x6   :  { %194 = vmatprep.subr.bf16.mxu0 %v405_v7  ;;  %235 = vmatprep.subr.bf16.mxu1 %v407_v8  ;;  %v423_v21 = vld [vmem:[%s547_s1 + $0x4] ss:$20 sps:$4 sm:$0xff]   ;;  %v425_v22 = vld [vmem:[%s547_s1 + $0xc] ss:$20 sps:$4 sm:$0xff]   ;;  %v428_v24 = vld [vmem:[%s547_s1 + $0x8] ss:$20 sps:$4 sm:$0xff]  }
   0x7   :  { %v427_v23 = vld [vmem:[%s547_s1] ss:$20 sps:$4 sm:$0xff]   ;;  %v429_v26 = vld [vmem:[%s547_s1 + $0xb0] ss:$0 sps:$4 sm:$0xff]   ;;  %v430_v30 = vld [vmem:[%s547_s1 + $0x88] ss:$20 sps:$4 sm:$0xff]  }
   0x8   :  { %v43_v25 = vld [vmem:[%s548_s2] sm:$0x3]  ;;  %v184_v29 = vsel %vm170_vm0, %v429_v26, 0  ;;  %v432_v32 = vld [vmem:[%s547_s1 + $0x38] ss:$20 sps:$4 sm:$0xff]   ;;  %v319_v39 = vshrl.u32 %v318_v36, 7 }
   0x9   :  { %195 = vmatpush1.bf16.msra.mxu0 %v409_v11  ;;  %236 = vmatpush1.bf16.msra.mxu1 %v410_v12  ;;  %v15_v27 = vld [vmem:[%s549_s0] sm:$0x1]  ;;  %v433_v33 = vld [vmem:[%s547_s1 + $0x10] ss:$20 sps:$4 sm:$0xff]   ;;  %v437_v34 = vmov 1983009808  }
   0xa   :  { %196 = vmatprep.subr.bf16.mxu0 %v411_v13  ;;  %237 = vmatprep.subr.bf16.mxu1 %v413_v14  ;;  %v431_v31 = vld [vmem:[%s547_s1 + $0x60] ss:$20 sps:$4 sm:$0xff]   ;;  %v316_v35 = vunpack.c.l.s4 %v437_v34 }
   0xb   :  { %46 = vperm.xlu0 %400, %v43_v25  }
   0xc   :  { %v317_v38 = vunpack.c.0.s8 %v316_v35 }
   0xd   :  { %197 = vmatpush1.bf16.msra.mxu0 %v415_v15  ;;  %238 = vmatpush1.bf16.msra.mxu1 %v416_v16 }
   0xe   :  { %198 = vmatprep.subr.bf16.mxu0 %v417_v17  ;;  %239 = vmatprep.subr.bf16.mxu1 %v419_v18  ;;  %v320_v47 = vsub.s32 %v317_v38, %v319_v39 }
  0x11   :  { %199 = vmatpush1.bf16.msra.mxu0 %v421_v19  ;;  %240 = vmatpush1.bf16.msra.mxu1 %v422_v20 }
  0x12   :  { %200 = vmatprep.subr.bf16.mxu0 %v423_v21  ;;  %241 = vmatprep.subr.bf16.mxu1 %v425_v22 }
  0x15   :  { %201 = vmatpush1.bf16.msra.mxu0 %v427_v23  ;;  %242 = vmatpush1.bf16.msra.mxu1 %v428_v24 }
  0x16   :  { %382 = vmatprep.subr.bf16.mxu0 %v435_v28 }
  0x18   :  { %371 = vmatmul.mubr.msk.bf16.vlgmr.msra.gmra.mxu0 %vm166_vm1, %v15_v27  ;;  %373 = vmatmul.mubr.msk.bf16.vlgmr.msra.gmra.mxu1 %vm166_vm1, %v15_v27 }
  0x19   :  { %383 = vmatpush3.bf16.msra.mxu0 %v184_v29  ;;  %392 = vmatprep.mubr.msk.bf16.mxu0 %vm436_vm2, %v435_v28 }
  0x1a   :  { %384 = vmatprep.subr.bf16.mxu0 %v435_v28 }
  0x1d   :  { %385 = vmatpush3.bf16.msra.mxu0 %v430_v30 }
  0x1e   :  { %386 = vmatprep.subr.bf16.mxu0 %v435_v28 }
  0x21   :  { %387 = vmatpush3.bf16.msra.mxu0 %v431_v31 }
  0x22   :  { %388 = vmatprep.subr.bf16.mxu0 %v435_v28 }
  0x25   :  { %389 = vmatpush3.bf16.msra.mxu0 %v432_v32 }
  0x26   :  { %390 = vmatprep.subr.bf16.mxu0 %v435_v28 }
  0x29   :  { %391 = vmatpush3.bf16.msra.mxu0 %v433_v33 }
  0x2c   :  { %393 = vmatmul.mubr.msk.bf16.vlgmr.msra.gmra.mxu0 %vm166_vm1, %v15_v27 }
  0x86   :  { %v47_v37 = vpop.permute.xlu0 %46 }
  0xd8   :  { %v220_v40 = vpop.f32.mrf.mxu0  ;;  %v261_v41 = vpop.f32.mrf.mxu1 }
  0xd9   :  { %v221_v42 = vadd.f32 %v220_v40, %v47_v37  ;;  %v262_v43 = vadd.f32 %v261_v41, %v47_v37 }
  0xda   :  { %v222_v44 = vpop.f32.mrf.mxu0  ;;  %v263_v45 = vpop.f32.mrf.mxu1 }
  0xdb   :  { %v223_v46 = vadd.f32 %v222_v44, %v47_v37  ;;  %v264_v48 = vadd.f32 %v263_v45, %v47_v37 }
  0xdc   :  { %v224_v49 = vpop.f32.mrf.mxu0  ;;  %v265_v50 = vpop.f32.mrf.mxu1 }
  0xdd   :  { %v313_v51 = vcombine.low %v221_v42, %v223_v46  ;;  %v314_v52 = vcombine.low %v262_v43, %v264_v48 }
  0xde   :  { %v225_v53 = vpop.f32.mrf.mxu0  ;;  %v266_v54 = vpop.f32.mrf.mxu1 }
  0xdf   :  { %v321_v55 = vrot.slane %v313_v51, %v320_v47  ;;  %v328_v56 = vrot.slane %v314_v52, %v320_v47 }
  0xe1   :  { %v329_v57 = vcombine.low %v321_v55, %v328_v56 }
  0xe3   :  { %339 = vst [vmem:[%s550_s3] sm:$0xff] %v329_v57 }
  0xec   :  { %v302_v58 = vpop.f32.mrf.mxu0 }
  0xed   :  { %v303_v59 = vadd.f32 %v302_v58, %v47_v37 }
  0xee   :  { %v394_v60 = vpop.f32.mrf.mxu0 }
  0xef   :  { %375 = vst.sshfl [vmem:[%s550_s3 + $0x8] sm:$0x3 pattern:$0x76325410] %v303_v59 }
  0xf0   :  { %v305_v61 = vpop.f32.mrf.mxu0 }
  0xf2   :  { %v395_v62 = vpop.f32.mrf.mxu0 }

// kernel: squeeze.22
= control target key start
LH: loop header
LB: loop body
LE: loop exit
PB: predicated region body
PF: predicated region fallthrough
CT: control target
= control target key end

     0   :  { %s717_s10 = smov 123   ;;  %s718_s11 = smov 127   ;;  %vm3_vm0 = vcmask 72704   ;;  %vm423_vm1 = vcmask 998400   ;;  %vm409_vm2 = vcmask 982016   ;;  %vm450_vm3 = vcmask 1031168   ;;  %s1102_s0 = inlined_call_operand.vmem [shape: f32[576], index: 0, kind: input, shape index: {}]   ;;  %s1103_s1 = inlined_call_operand.vmem [shape: f32[16,4,9,1], index: 1, kind: output, shape index: {}]  }
   0x1   :  { %v588_v0 = vld [vmem:[%s1102_s0 + $0x2] sm:$0x1]   ;;  %v586_v1 = vld [vmem:[%s1102_s0 + $0x4] sm:$0x1]   ;;  %v589_v2 = vld [vmem:[%s1102_s0 + $0x1] sm:$0x1]  }
   0x2   :  { %21 = vrot.lane.b32.xlu1 %v588_v0, %s717_s10  ;;  %7 = vrot.lane.b32.xlu0 %v586_v1, %s718_s11  ;;  %v587_v3 = vld [vmem:[%s1102_s0 + $0x3] sm:$0x1]   ;;  %s719_s16 = smov 121   ;;  %s720_s17 = smov 125   ;;  %v590_v4 = vld [vmem:[%s1102_s0 + $0x4] sm:$0x1]  }
   0x3   :  { %v33_v5 = vld [vmem:[%s1102_s0] sm:$0x1]   ;;  %s721_s22 = smov 118   ;;  %s722_s23 = smov 119   ;;  %v592_v6 = vld [vmem:[%s1102_s0 + $0x2] sm:$0x1]  }
   0x4   :  { %v591_v7 = vld [vmem:[%s1102_s0 + $0x3] sm:$0x1]   ;;  %s723_s28 = smov 114   ;;  %s724_s29 = smov 116   ;;  %v67_v8 = vld [vmem:[%s1102_s0] sm:$0x1]  }
   0x5   :  { %v593_v9 = vld [vmem:[%s1102_s0 + $0x1] sm:$0x1]   ;;  %s725_s5 = smov 110   ;;  %s726_s6 = smov 112   ;;  %v595_v10 = vld [vmem:[%s1102_s0 + $0x3] sm:$0x1]  }
   0x6   :  { %28 = vrot.lane.b32.xlu1 %v589_v2, %s719_s16  ;;  %14 = vrot.lane.b32.xlu0 %v587_v3, %s720_s17  ;;  %v594_v11 = vld [vmem:[%s1102_s0 + $0x4] sm:$0x1]   ;;  %s727_s11 = smov 107   ;;  %s728_s12 = smov 109   ;;  %v597_v12 = vld [vmem:[%s1102_s0 + $0x1] sm:$0x1]  }
   0x7   :  { %v596_v13 = vld [vmem:[%s1102_s0 + $0x2] sm:$0x1]   ;;  %s729_s17 = smov 103   ;;  %s730_s18 = smov 105   ;;  %v598_v14 = vld [vmem:[%s1102_s0 + $0x4] sm:$0x1]  }
   0x8   :  { %v101_v15 = vld [vmem:[%s1102_s0] sm:$0x1]   ;;  %s732_s24 = smov 101   ;;  %v600_v16 = vld [vmem:[%s1102_s0 + $0x2] sm:$0x1]   ;;  %s734_s30 = smov 98  }
   0x9   :  { %v599_v17 = vld [vmem:[%s1102_s0 + $0x3] sm:$0x1]   ;;  %v2_v18 = vld [vmem:[%s1102_s0] sm:$0x1]   ;;  %v601_v20 = vld [vmem:[%s1102_s0 + $0x1] sm:$0x1]  }
   0xa   :  { %41 = vrot.lane.b32.xlu1 %v590_v4, %s721_s22  ;;  %34 = vrot.lane.b32.xlu0 %v33_v5, %s722_s23  ;;  %s731_s23 = smov 100   ;;  %v135_v19 = vld [vmem:[%s1102_s0] sm:$0x1]   ;;  %4 = vst.msk [vmem:[#allocation0] sm:$0x1] %vm3_vm0, %v2_v18   ;;  %s735_s8 = smov 92  }
   0xb   :  { %s736_s9 = smov 94   ;;  %v603_v21 = vld [vmem:[%s1102_s0 + $0x3] sm:$0x1]   ;;  %v602_v22 = vld [vmem:[%s1102_s0 + $0x4] sm:$0x1]   ;;  %s737_s14 = smov 89  }
   0xc   :  { %s738_s15 = smov 91   ;;  %v605_v23 = vld [vmem:[%s1102_s0 + $0x1] sm:$0x1]   ;;  %v604_v24 = vld [vmem:[%s1102_s0 + $0x2] sm:$0x1]   ;;  %s739_s20 = smov 85  }
   0xd   :  { %s740_s21 = smov 87   ;;  %v606_v25 = vld [vmem:[%s1102_s0 + $0x4] sm:$0x1]   ;;  %v169_v26 = vld [vmem:[%s1102_s0] sm:$0x1]   ;;  %s741_s26 = smov 82  }
   0xe   :  { %55 = vrot.lane.b32.xlu1 %v592_v6, %s723_s28  ;;  %48 = vrot.lane.b32.xlu0 %v591_v7, %s724_s29  ;;  %s733_s29 = smov 96   ;;  %s742_s27 = smov 83   ;;  %v608_v27 = vld [vmem:[%s1102_s0 + $0x2] sm:$0x1]   ;;  %v607_v28 = vld [vmem:[%s1102_s0 + $0x3] sm:$0x1]  }
   0xf   :  { %s743_s3 = smov 78   ;;  %s744_s4 = smov 80   ;;  %v203_v29 = vld [vmem:[%s1102_s0] sm:$0x1]   ;;  %v609_v30 = vld [vmem:[%s1102_s0 + $0x1] sm:$0x1]  }
  0x10   :  { %v634_v31 = vld [vmem:[%s1102_s0 + $0x2] sm:$0x1]   ;;  %v635_v32 = vld [vmem:[%s1102_s0 + $0x3] sm:$0x1]   ;;  %v633_v34 = vld [vmem:[%s1102_s0 + $0x4] sm:$0x1]  }
  0x11   :  { %v632_v33 = vld [vmem:[%s1102_s0 + $0x3] sm:$0x1]   ;;  %v424_v35 = vsel %vm423_vm1, %v635_v32, %v634_v31  ;;  %v447_v37 = vld [vmem:[%s1102_s0] sm:$0x1]   ;;  %v638_v38 = vld [vmem:[%s1102_s0 + $0x1] sm:$0x1]  }
  0x12   :  { %68 = vrot.lane.b32.xlu1 %v67_v8, %s725_s5  ;;  %62 = vrot.lane.b32.xlu0 %v593_v9, %s726_s6  ;;  %v410_v36 = vsel %vm409_vm2, %v633_v34, %v632_v33  ;;  %v636_v39 = vld [vmem:[%s1102_s0 + $0x1] sm:$0x1]   ;;  %v637_v40 = vld [vmem:[%s1102_s0 + $0x2] sm:$0x1]   ;;  %vm437_vm4 = vcmask 1014784   ;;  %s748_s28 = smov 8   ;;  %v451_v41 = vsel %vm450_vm3, %v638_v38, %v447_v37 }
  0x13   :  { %v438_v42 = vsel %vm437_vm4, %v637_v40, %v636_v39  ;;  %v611_v43 = vld [vmem:[%s1102_s0 + $0x3] sm:$0x1]   ;;  %v610_v44 = vld [vmem:[%s1102_s0 + $0x4] sm:$0x1]   ;;  %s751_s6 = smov 71   ;;  %s752_s7 = smov 73  }
  0x14   :  { %v613_v45 = vld [vmem:[%s1102_s0 + $0x1] sm:$0x1]   ;;  %v612_v46 = vld [vmem:[%s1102_s0 + $0x2] sm:$0x1]   ;;  %s754_s13 = smov 69   ;;  %s756_s19 = smov 65  }
  0x15   :  { %v614_v47 = vld [vmem:[%s1102_s0 + $0x3] sm:$0x1]   ;;  %v237_v48 = vld [vmem:[%s1102_s0] sm:$0x1]   ;;  %v616_v49 = vld [vmem:[%s1102_s0 + $0x1] sm:$0x1]  }
  0x16   :  { %82 = vrot.lane.b32.xlu1 %v595_v10, %s727_s11  ;;  %75 = vrot.lane.b32.xlu0 %v594_v11, %s728_s12  ;;  %s753_s12 = smov 67   ;;  %v615_v50 = vld [vmem:[%s1102_s0 + $0x2] sm:$0x1]   ;;  %s758_s25 = smov 60   ;;  %v617_v51 = vld [vmem:[%s1102_s0 + $0x3] sm:$0x1]  }
  0x17   :  { %v264_v52 = vld [vmem:[%s1102_s0] sm:$0x1]   ;;  %s760_s2 = smov 56   ;;  %v619_v53 = vld [vmem:[%s1102_s0 + $0x1] sm:$0x1]   ;;  %vm427_vm5 = vcmask 48128  }
  0x18   :  { %v618_v54 = vld [vmem:[%s1102_s0 + $0x2] sm:$0x1]   ;;  %v620_v55 = vld [vmem:[%s1102_s0 + $0x3] sm:$0x1]   ;;  %v291_v56 = vld [vmem:[%s1102_s0] sm:$0x1]  }
  0x19   :  { %v622_v57 = vld [vmem:[%s1102_s0 + $0x1] sm:$0x1]   ;;  %v621_v58 = vld [vmem:[%s1102_s0 + $0x2] sm:$0x1]   ;;  %v623_v59 = vld [vmem:[%s1102_s0 + $0x3] sm:$0x1]  }
  0x1a   :  { %96 = vrot.lane.b32.xlu1 %v597_v12, %s729_s17  ;;  %89 = vrot.lane.b32.xlu0 %v596_v13, %s730_s18  ;;  %s745_s17 = smov 74   ;;  %s746_s18 = smov 76   ;;  %v318_v60 = vld [vmem:[%s1102_s0] sm:$0x1]   ;;  %v625_v61 = vld [vmem:[%s1102_s0 + $0x1] sm:$0x1]  }
  0x1b   :  { %v624_v62 = vld [vmem:[%s1102_s0 + $0x2] sm:$0x1]   ;;  %v626_v63 = vld [vmem:[%s1102_s0 + $0x3] sm:$0x1]   ;;  %v345_v0 = vld [vmem:[%s1102_s0] sm:$0x1]  }
  0x1c   :  { %v628_v1 = vld [vmem:[%s1102_s0 + $0x1] sm:$0x1]   ;;  %v627_v2 = vld [vmem:[%s1102_s0 + $0x2] sm:$0x1]   ;;  %v629_v3 = vld [vmem:[%s1102_s0 + $0x3] sm:$0x1]  }
  0x1d   :  { %v372_v4 = vld [vmem:[%s1102_s0] sm:$0x1]   ;;  %v631_v7 = vld [vmem:[%s1102_s0 + $0x1] sm:$0x1]   ;;  %v630_v8 = vld [vmem:[%s1102_s0 + $0x2] sm:$0x1]  }
  0x1e   :  { %109 = vrot.lane.b32.xlu1 %v598_v14, %s731_s23  ;;  %102 = vrot.lane.b32.xlu0 %v101_v15, %s732_s24  ;;  %s757_s24 = smov 58   ;;  %v399_v11 = vld [vmem:[%s1102_s0] sm:$0x1]   ;;  %s779_s0 = smov 11   ;;  %vm413_vm6 = vcmask 64512   ;;  %vm430_vm7 = vcmask 72752  }
  0x1f   :  { %vm416_vm8 = vcmask 72768   ;;  %vm454_vm9 = vcmask 15360   ;;  %vm441_vm10 = vcmask 31744   ;;  %vm457_vm11 = vcmask 72720  }
  0x20   :  { %vm444_vm12 = vcmask 72736  }
  0x22   :  { %123 = vrot.lane.b32.xlu1 %v600_v16, %s733_s29  ;;  %116 = vrot.lane.b32.xlu0 %v599_v17, %s734_s30  ;;  %s749_s29 = smov 2   ;;  %s750_s30 = smov 4  }
  0x26   :  { %136 = vrot.lane.b32.xlu1 %v135_v19, %s735_s8  ;;  %130 = vrot.lane.b32.xlu0 %v601_v20, %s736_s9  ;;  %s762_s8 = smov 51   ;;  %s772_s9 = smov 29  }
  0x2a   :  { %150 = vrot.lane.b32.xlu1 %v603_v21, %s737_s14  ;;  %143 = vrot.lane.b32.xlu0 %v602_v22, %s738_s15  ;;  %s764_s14 = smov 47   ;;  %s774_s15 = smov 24  }
  0x2e   :  { %164 = vrot.lane.b32.xlu1 %v605_v23, %s739_s20  ;;  %157 = vrot.lane.b32.xlu0 %v604_v24, %s740_s21  ;;  %s766_s20 = smov 42   ;;  %s776_s21 = smov 20  }
  0x32   :  { %177 = vrot.lane.b32.xlu1 %v606_v25, %s741_s26  ;;  %170 = vrot.lane.b32.xlu0 %v169_v26, %s742_s27  ;;  %s747_s27 = smov 6   ;;  %s768_s26 = smov 38  }
  0x36   :  { %191 = vrot.lane.b32.xlu1 %v608_v27, %s743_s3  ;;  %184 = vrot.lane.b32.xlu0 %v607_v28, %s744_s4  ;;  %s770_s3 = smov 33  }
  0x3a   :  { %204 = vrot.lane.b32.xlu1 %v203_v29, %s745_s17  ;;  %198 = vrot.lane.b32.xlu0 %v609_v30, %s746_s18  ;;  %s755_s18 = smov 62  }
  0x3e   :  { %425 = vrot.lane.b32.xlu1 %v424_v35, %s747_s27  ;;  %411 = vrot.lane.b32.xlu0 %v410_v36, %s748_s28  ;;  %s778_s27 = smov 15  }
  0x42   :  { %452 = vrot.lane.b32.xlu1 %v451_v41, %s749_s29  ;;  %439 = vrot.lane.b32.xlu0 %v438_v42, %s750_s30  ;;  %s759_s30 = smov 53  }
  0x46   :  { %218 = vrot.lane.b32.xlu1 %v611_v43, %s751_s6  ;;  %211 = vrot.lane.b32.xlu0 %v610_v44, %s752_s7  ;;  %s761_s7 = smov 49  }
  0x4a   :  { %232 = vrot.lane.b32.xlu1 %v613_v45, %s753_s12  ;;  %225 = vrot.lane.b32.xlu0 %v612_v46, %s754_s13  ;;  %s763_s13 = smov 44  }
  0x4e   :  { %245 = vrot.lane.b32.xlu1 %v614_v47, %s755_s18  ;;  %238 = vrot.lane.b32.xlu0 %v237_v48, %s756_s19  ;;  %s765_s19 = smov 40  }
  0x52   :  { %259 = vrot.lane.b32.xlu1 %v616_v49, %s757_s24  ;;  %252 = vrot.lane.b32.xlu0 %v615_v50, %s758_s25  ;;  %s767_s25 = smov 35  }
  0x56   :  { %272 = vrot.lane.b32.xlu1 %v617_v51, %s759_s30  ;;  %265 = vrot.lane.b32.xlu0 %v264_v52, %s760_s2  ;;  %s769_s2 = smov 31  }
  0x5a   :  { %286 = vrot.lane.b32.xlu1 %v619_v53, %s761_s7  ;;  %279 = vrot.lane.b32.xlu0 %v618_v54, %s762_s8  ;;  %s771_s8 = smov 26  }
  0x5e   :  { %299 = vrot.lane.b32.xlu1 %v620_v55, %s763_s13  ;;  %292 = vrot.lane.b32.xlu0 %v291_v56, %s764_s14  ;;  %s773_s14 = smov 22  }
  0x62   :  { %313 = vrot.lane.b32.xlu1 %v622_v57, %s765_s19  ;;  %306 = vrot.lane.b32.xlu0 %v621_v58, %s766_s20  ;;  %s775_s20 = smov 17  }
  0x66   :  { %326 = vrot.lane.b32.xlu1 %v623_v59, %s767_s25  ;;  %319 = vrot.lane.b32.xlu0 %v318_v60, %s768_s26  ;;  %s777_s26 = smov 13  }
  0x6a   :  { %340 = vrot.lane.b32.xlu1 %v625_v61, %s769_s2  ;;  %333 = vrot.lane.b32.xlu0 %v624_v62, %s770_s3 }
  0x6e   :  { %353 = vrot.lane.b32.xlu1 %v626_v63, %s771_s8  ;;  %346 = vrot.lane.b32.xlu0 %v345_v0, %s772_s9 }
  0x72   :  { %367 = vrot.lane.b32.xlu1 %v628_v1, %s773_s14  ;;  %360 = vrot.lane.b32.xlu0 %v627_v2, %s774_s15 }
  0x74   :  { %v22_v5 = vpop.permute.xlu1 %21   ;;  %v8_v6 = vpop.permute.xlu0 %7  }
  0x75   :  { %25 = vst.msk [vmem:[#allocation0 + $0x39] sm:$0x1] %vm3_vm0, %v22_v5   ;;  %11 = vst.msk [vmem:[#allocation0 + $0x71] sm:$0x1] %vm3_vm0, %v8_v6  }
  0x76   :  { %380 = vrot.lane.b32.xlu1 %v629_v3, %s775_s20  ;;  %373 = vrot.lane.b32.xlu0 %v372_v4, %s776_s21 }
  0x78   :  { %v29_v9 = vpop.permute.xlu1 %28   ;;  %v15_v10 = vpop.permute.xlu0 %14  }
  0x79   :  { %32 = vst.msk [vmem:[#allocation0 + $0x1b] sm:$0x1] %vm3_vm0, %v29_v9   ;;  %18 = vst.msk [vmem:[#allocation0 + $0x53] sm:$0x1] %vm3_vm0, %v15_v10  }
  0x7a   :  { %394 = vrot.lane.b32.xlu1 %v631_v7, %s777_s26  ;;  %387 = vrot.lane.b32.xlu0 %v630_v8, %s778_s27 }
  0x7c   :  { %v42_v12 = vpop.permute.xlu1 %41   ;;  %v35_v13 = vpop.permute.xlu0 %34  }
  0x7d   :  { %45 = vst.msk [vmem:[#allocation0 + $0x72] sm:$0x1] %vm3_vm0, %v42_v12   ;;  %38 = vst.msk [vmem:[#allocation0 + $0x1] sm:$0x1] %vm3_vm0, %v35_v13  }
  0x7e   :  { %400 = vrot.lane.b32.xlu0 %v399_v11, %s779_s0 }
  0x80   :  { %v56_v14 = vpop.permute.xlu1 %55   ;;  %v49_v15 = vpop.permute.xlu0 %48  }
  0x81   :  { %59 = vst.msk [vmem:[#allocation0 + $0x3a] sm:$0x1] %vm3_vm0, %v56_v14   ;;  %52 = vst.msk [vmem:[#allocation0 + $0x58] sm:$0x1] %vm3_vm0, %v49_v15  }
  0x84   :  { %v69_v16 = vpop.permute.xlu1 %68   ;;  %v63_v17 = vpop.permute.xlu0 %62  }
  0x85   :  { %72 = vst.msk [vmem:[#allocation0 + $0x2] sm:$0x1] %vm3_vm0, %v69_v16   ;;  %66 = vst.msk [vmem:[#allocation0 + $0x20] sm:$0x1] %vm3_vm0, %v63_v17  }
  0x88   :  { %v83_v18 = vpop.permute.xlu1 %82   ;;  %v76_v19 = vpop.permute.xlu0 %75  }
  0x89   :  { %86 = vst.msk [vmem:[#allocation0 + $0x59] sm:$0x1] %vm3_vm0, %v83_v18   ;;  %79 = vst.msk [vmem:[#allocation0 + $0x73] sm:$0x1] %vm3_vm0, %v76_v19  }
  0x8c   :  { %v97_v20 = vpop.permute.xlu1 %96   ;;  %v90_v21 = vpop.permute.xlu0 %89  }
  0x8d   :  { %100 = vst.msk [vmem:[#allocation0 + $0x21] sm:$0x1] %vm3_vm0, %v97_v20   ;;  %93 = vst.msk [vmem:[#allocation0 + $0x3b] sm:$0x1] %vm3_vm0, %v90_v21  }
  0x90   :  { %v110_v22 = vpop.permute.xlu1 %109   ;;  %v103_v23 = vpop.permute.xlu0 %102  }
  0x91   :  { %113 = vst.msk [vmem:[#allocation0 + $0x78] sm:$0x1] %vm3_vm0, %v110_v22   ;;  %106 = vst.msk [vmem:[#allocation0 + $0x3] sm:$0x1] %vm3_vm0, %v103_v23  }
  0x94   :  { %v124_v24 = vpop.permute.xlu1 %123   ;;  %v117_v25 = vpop.permute.xlu0 %116  }
  0x95   :  { %127 = vst.msk [vmem:[#allocation0 + $0x40] sm:$0x1] %vm3_vm0, %v124_v24   ;;  %120 = vst.msk [vmem:[#allocation0 + $0x5a] sm:$0x1] %vm3_vm0, %v117_v25  }
  0x98   :  { %v464_v26 = vld [vmem:[#allocation0] sm:$0xf]  ;;  %v137_v27 = vpop.permute.xlu1 %136   ;;  %v131_v28 = vpop.permute.xlu0 %130  }
  0x99   :  { %467 = vst [vmem:[%s1103_s1] sm:$0xf] %v464_v26  ;;  %140 = vst.msk [vmem:[#allocation0 + $0x8] sm:$0x1] %vm3_vm0, %v137_v27  }
  0x9a   :  { %134 = vst.msk [vmem:[#allocation0 + $0x22] sm:$0x1] %vm3_vm0, %v131_v28  }
  0x9c   :  { %v151_v29 = vpop.permute.xlu1 %150   ;;  %v144_v30 = vpop.permute.xlu0 %143  }
  0x9d   :  { %154 = vst.msk [vmem:[#allocation0 + $0x5b] sm:$0x1] %vm3_vm0, %v151_v29   ;;  %147 = vst.msk [vmem:[#allocation0 + $0x79] sm:$0x1] %vm3_vm0, %v144_v30  }
  0xa0   :  { %v165_v31 = vpop.permute.xlu1 %164   ;;  %v158_v32 = vpop.permute.xlu0 %157  }
  0xa1   :  { %168 = vst.msk [vmem:[#allocation0 + $0x23] sm:$0x1] %vm3_vm0, %v165_v31   ;;  %161 = vst.msk [vmem:[#allocation0 + $0x41] sm:$0x1] %vm3_vm0, %v158_v32  }
  0xa4   :  { %v538_v33 = vld [vmem:[#allocation0 + $0x58] sm:$0xf]  ;;  %v178_v34 = vpop.permute.xlu1 %177   ;;  %v171_v35 = vpop.permute.xlu0 %170  }
  0xa5   :  { %649 = vst [vmem:[%s1103_s1 + $0x2c] sm:$0xf] %v538_v33  ;;  %181 = vst.msk [vmem:[#allocation0 + $0x7a] sm:$0x1] %vm3_vm0, %v178_v34  }
  0xa6   :  { %174 = vst.msk [vmem:[#allocation0 + $0x9] sm:$0x1] %vm3_vm0, %v171_v35  }
  0xa8   :  { %v489_v36 = vld [vmem:[#allocation0 + $0x20] sm:$0xf]  ;;  %v192_v37 = vpop.permute.xlu1 %191   ;;  %v185_v38 = vpop.permute.xlu0 %184  }
  0xa9   :  { %642 = vst [vmem:[%s1103_s1 + $0x10] sm:$0xf] %v489_v36  ;;  %195 = vst.msk [vmem:[#allocation0 + $0x42] sm:$0x1] %vm3_vm0, %v192_v37  }
  0xaa   :  { %188 = vst.msk [vmem:[#allocation0 + $0x60] sm:$0x1] %vm3_vm0, %v185_v38  }
  0xac   :  { %v205_v39 = vpop.permute.xlu1 %204   ;;  %v199_v40 = vpop.permute.xlu0 %198  }
  0xad   :  { %208 = vst.msk [vmem:[#allocation0 + $0xa] sm:$0x1] %vm3_vm0, %v205_v39   ;;  %202 = vst.msk [vmem:[#allocation0 + $0x28] sm:$0x1] %vm3_vm0, %v199_v40  }
  0xb0   :  { %v426_v41 = vpop.permute.xlu1 %425   ;;  %v412_v42 = vpop.permute.xlu0 %411  }
  0xb1   :  { %429 = vst.msk [vmem:[#allocation0 + $0x52] sm:$0x1] %vm427_vm5, %v426_v41  }
  0xb2   :  { %415 = vst.msk [vmem:[#allocation0 + $0x70] sm:$0x1] %vm413_vm6, %v412_v42  }
  0xb3   :  { %432 = vst.msk [vmem:[#allocation0 + $0x52] sm:$0x1] %vm430_vm7, %v426_v41  }
  0xb4   :  { %418 = vst.msk [vmem:[#allocation0 + $0x70] sm:$0x1] %vm416_vm8, %v412_v42   ;;  %v453_v43 = vpop.permute.xlu1 %452   ;;  %v440_v44 = vpop.permute.xlu0 %439  }
  0xb5   :  { %456 = vst.msk [vmem:[#allocation0 + $0x1a] sm:$0x1] %vm454_vm9, %v453_v43  }
  0xb6   :  { %443 = vst.msk [vmem:[#allocation0 + $0x38] sm:$0x1] %vm441_vm10, %v440_v44  }
  0xb7   :  { %459 = vst.msk [vmem:[#allocation0 + $0x1a] sm:$0x1] %vm457_vm11, %v453_v43  }
  0xb8   :  { %446 = vst.msk [vmem:[#allocation0 + $0x38] sm:$0x1] %vm444_vm12, %v440_v44   ;;  %v219_v45 = vpop.permute.xlu1 %218   ;;  %v212_v46 = vpop.permute.xlu0 %211  }
  0xb9   :  { %222 = vst.msk [vmem:[#allocation0 + $0x61] sm:$0x1] %vm3_vm0, %v219_v45   ;;  %215 = vst.msk [vmem:[#allocation0 + $0x7b] sm:$0x1] %vm3_vm0, %v212_v46  }
  0xbb   :  { %v559_v47 = vld [vmem:[#allocation0 + $0x70] sm:$0xf] }
  0xbc   :  { %652 = vst [vmem:[%s1103_s1 + $0x38] sm:$0xf] %v559_v47  ;;  %v233_v48 = vpop.permute.xlu1 %232   ;;  %v226_v49 = vpop.permute.xlu0 %225  }
  0xbd   :  { %236 = vst.msk [vmem:[#allocation0 + $0x29] sm:$0x1] %vm3_vm0, %v233_v48   ;;  %229 = vst.msk [vmem:[#allocation0 + $0x43] sm:$0x1] %vm3_vm0, %v226_v49  }
  0xbf   :  { %v510_v50 = vld [vmem:[#allocation0 + $0x38] sm:$0xf] }
  0xc0   :  { %645 = vst [vmem:[%s1103_s1 + $0x1c] sm:$0xf] %v510_v50  ;;  %v566_v51 = vld [vmem:[#allocation0 + $0x78] sm:$0xf]  ;;  %v246_v52 = vpop.permute.xlu1 %245   ;;  %v239_v53 = vpop.permute.xlu0 %238  }
  0xc1   :  { %653 = vst [vmem:[%s1103_s1 + $0x3c] sm:$0xf] %v566_v51  ;;  %249 = vst.msk [vmem:[#allocation0 + $0x62] sm:$0x1] %vm3_vm0, %v246_v52  }
  0xc2   :  { %242 = vst.msk [vmem:[#allocation0 + $0xb] sm:$0x1] %vm3_vm0, %v239_v53  }
  0xc4   :  { %v517_v54 = vld [vmem:[#allocation0 + $0x40] sm:$0xf]  ;;  %v260_v55 = vpop.permute.xlu1 %259   ;;  %v253_v56 = vpop.permute.xlu0 %252  }
  0xc5   :  { %646 = vst [vmem:[%s1103_s1 + $0x20] sm:$0xf] %v517_v54  ;;  %263 = vst.msk [vmem:[#allocation0 + $0x2a] sm:$0x1] %vm3_vm0, %v260_v55  }
  0xc6   :  { %256 = vst.msk [vmem:[#allocation0 + $0x48] sm:$0x1] %vm3_vm0, %v253_v56  }
  0xc8   :  { %v273_v58 = vpop.permute.xlu1 %272   ;;  %v266_v59 = vpop.permute.xlu0 %265  }
  0xc9   :  { %v469_v57 = vld [vmem:[#allocation0 + $0x8] sm:$0xf]  ;;  %276 = vst.msk [vmem:[#allocation0 + $0x63] sm:$0x1] %vm3_vm0, %v273_v58   ;;  %269 = vst.msk [vmem:[#allocation0 + $0x10] sm:$0x1] %vm3_vm0, %v266_v59  }
  0xca   :  { %639 = vst [vmem:[%s1103_s1 + $0x4] sm:$0xf] %v469_v57 }
  0xcc   :  { %v287_v60 = vpop.permute.xlu1 %286   ;;  %v280_v61 = vpop.permute.xlu0 %279  }
  0xcd   :  { %290 = vst.msk [vmem:[#allocation0 + $0x2b] sm:$0x1] %vm3_vm0, %v287_v60   ;;  %283 = vst.msk [vmem:[#allocation0 + $0x49] sm:$0x1] %vm3_vm0, %v280_v61  }
  0xd0   :  { %v545_v62 = vld [vmem:[#allocation0 + $0x60] sm:$0xf]  ;;  %v300_v63 = vpop.permute.xlu1 %299   ;;  %v293_v0 = vpop.permute.xlu0 %292  }
  0xd1   :  { %650 = vst [vmem:[%s1103_s1 + $0x30] sm:$0xf] %v545_v62  ;;  %303 = vst.msk [vmem:[#allocation0 + $0x68] sm:$0x1] %vm3_vm0, %v300_v63  }
  0xd2   :  { %296 = vst.msk [vmem:[#allocation0 + $0x11] sm:$0x1] %vm3_vm0, %v293_v0  }
  0xd4   :  { %v496_v1 = vld [vmem:[#allocation0 + $0x28] sm:$0xf]  ;;  %v314_v2 = vpop.permute.xlu1 %313   ;;  %v307_v3 = vpop.permute.xlu0 %306  }
  0xd5   :  { %643 = vst [vmem:[%s1103_s1 + $0x14] sm:$0xf] %v496_v1  ;;  %317 = vst.msk [vmem:[#allocation0 + $0x30] sm:$0x1] %vm3_vm0, %v314_v2  }
  0xd6   :  { %310 = vst.msk [vmem:[#allocation0 + $0x4a] sm:$0x1] %vm3_vm0, %v307_v3  }
  0xd8   :  { %v327_v4 = vpop.permute.xlu1 %326   ;;  %v320_v5 = vpop.permute.xlu0 %319  }
  0xd9   :  { %330 = vst.msk [vmem:[#allocation0 + $0x69] sm:$0x1] %vm3_vm0, %v327_v4   ;;  %323 = vst.msk [vmem:[#allocation0 + $0x12] sm:$0x1] %vm3_vm0, %v320_v5  }
  0xdc   :  { %v341_v6 = vpop.permute.xlu1 %340   ;;  %v334_v7 = vpop.permute.xlu0 %333  }
  0xdd   :  { %344 = vst.msk [vmem:[#allocation0 + $0x31] sm:$0x1] %vm3_vm0, %v341_v6   ;;  %337 = vst.msk [vmem:[#allocation0 + $0x4b] sm:$0x1] %vm3_vm0, %v334_v7  }
  0xe0   :  { %v354_v8 = vpop.permute.xlu1 %353   ;;  %v347_v9 = vpop.permute.xlu0 %346  }
  0xe1   :  { %357 = vst.msk [vmem:[#allocation0 + $0x6a] sm:$0x1] %vm3_vm0, %v354_v8   ;;  %350 = vst.msk [vmem:[#allocation0 + $0x13] sm:$0x1] %vm3_vm0, %v347_v9  }
  0xe4   :  { %v524_v10 = vld [vmem:[#allocation0 + $0x48] sm:$0xf]  ;;  %v368_v11 = vpop.permute.xlu1 %367   ;;  %v361_v12 = vpop.permute.xlu0 %360  }
  0xe5   :  { %647 = vst [vmem:[%s1103_s1 + $0x24] sm:$0xf] %v524_v10  ;;  %371 = vst.msk [vmem:[#allocation0 + $0x32] sm:$0x1] %vm3_vm0, %v368_v11  }
  0xe6   :  { %364 = vst.msk [vmem:[#allocation0 + $0x50] sm:$0x1] %vm3_vm0, %v361_v12  }
  0xe8   :  { %v475_v13 = vld [vmem:[#allocation0 + $0x10] sm:$0xf]  ;;  %v381_v14 = vpop.permute.xlu1 %380   ;;  %v374_v15 = vpop.permute.xlu0 %373  }
  0xe9   :  { %640 = vst [vmem:[%s1103_s1 + $0x8] sm:$0xf] %v475_v13  ;;  %384 = vst.msk [vmem:[#allocation0 + $0x6b] sm:$0x1] %vm3_vm0, %v381_v14  }
  0xea   :  { %377 = vst.msk [vmem:[#allocation0 + $0x18] sm:$0x1] %vm3_vm0, %v374_v15  }
  0xec   :  { %v395_v16 = vpop.permute.xlu1 %394   ;;  %v388_v17 = vpop.permute.xlu0 %387  }
  0xed   :  { %398 = vst.msk [vmem:[#allocation0 + $0x33] sm:$0x1] %vm3_vm0, %v395_v16   ;;  %391 = vst.msk [vmem:[#allocation0 + $0x51] sm:$0x1] %vm3_vm0, %v388_v17  }
  0xf0   :  { %v552_v18 = vld [vmem:[#allocation0 + $0x68] sm:$0xf]  ;;  %v401_v19 = vpop.permute.xlu0 %400  }
  0xf1   :  { %651 = vst [vmem:[%s1103_s1 + $0x34] sm:$0xf] %v552_v18  ;;  %404 = vst.msk [vmem:[#allocation0 + $0x19] sm:$0x1] %vm3_vm0, %v401_v19  }
  0xf4   :  { %v503_v20 = vld [vmem:[#allocation0 + $0x30] sm:$0xf] }
  0xf5   :  { %v531_v21 = vld [vmem:[#allocation0 + $0x50] sm:$0xf]  ;;  %644 = vst [vmem:[%s1103_s1 + $0x18] sm:$0xf] %v503_v20 }
  0xf6   :  { %648 = vst [vmem:[%s1103_s1 + $0x28] sm:$0xf] %v531_v21 }
  0xf8   :  { %v482_v22 = vld [vmem:[#allocation0 + $0x18] sm:$0xf] }
  0xf9   :  { %641 = vst [vmem:[%s1103_s1 + $0xc] sm:$0xf] %v482_v22 }

// kernel: parallel_model_forward.36
= control target key start
LH: loop header
LB: loop body
LE: loop exit
PB: predicated region body
PF: predicated region fallthrough
CT: control target
= control target key end

     0   :  { %vm73_vm0 = vcmask 1043456   ;;  %vm74_vm1 = vcmask 1044480   ;;  %v370_v1 = vmov 0   ;;  %v371_v2 = vmov 65535   ;;  %s459_s1 = inlined_call_operand.vmem [shape: bf16[9,1152], index: 1, kind: input, shape index: {}]   ;;  %s460_s0 = inlined_call_operand.vmem [shape: bf16[8,9], index: 0, kind: input, shape index: {}]   ;;  %s461_s2 = inlined_call_operand.vmem [shape: f32[8,1], index: 2, kind: input, shape index: {}]   ;;  %s462_s3 = inlined_call_operand.vmem [shape: f32[8,1152], index: 3, kind: output, shape index: {}]  }
   0x1   :  { %v357_v0 = vld [vmem:[%s459_s1 + $0x4] ss:$36 sps:$4 sm:$0x1f]   ;;  %136 = vmatprep.mubr.bf16.mxu0 %v370_v1  ;;  %177 = vmatprep.mubr.bf16.mxu1 %v370_v1  ;;  %v75_v3 = vsel %vm73_vm0, 4294967295, %v371_v2  ;;  %v15_v11 = vld [vmem:[%s460_s0] sm:$0xf] }
   0x2   :  { %v359_v4 = vld [vmem:[%s459_s1] ss:$36 sps:$4 sm:$0x1f]   ;;  %356 = vset.pattern.permute.xlu0 %v370_v1  ;;  %v76_v5 = vsel %vm74_vm1, %v75_v3, 0  ;;  %vm69_vm2 = vcmask 72704   ;;  %v372_v23 = vmov 0.0  }
   0x3   :  { %v360_v6 = vld [vmem:[%s459_s1 + $0xc] ss:$36 sps:$4 sm:$0x1f]   ;;  %v81_v7 = vand.u32 %v357_v0, %v76_v5  ;;  %v78_v8 = vand.u32 %v359_v4, %v76_v5  ;;  %v365_v14 = vld [vmem:[%s459_s1 + $0x14] ss:$36 sps:$4 sm:$0x1f]  }
   0x4   :  { %v362_v9 = vld [vmem:[%s459_s1 + $0x8] ss:$36 sps:$4 sm:$0x1f]   ;;  %v87_v10 = vand.u32 %v360_v6, %v76_v5  ;;  %v363_v12 = vld [vmem:[%s459_s1 + $0x10] ss:$36 sps:$4 sm:$0x1f]   ;;  %v93_v18 = vand.u32 %v365_v14, %v76_v5 }
   0x5   :  { %118 = vmatprep.subr.bf16.mxu0 %v81_v7  ;;  %v84_v13 = vand.u32 %v362_v9, %v76_v5  ;;  %v90_v15 = vand.u32 %v363_v12, %v76_v5  ;;  %v366_v16 = vld [vmem:[%s459_s1 + $0x18] ss:$36 sps:$4 sm:$0x1f]   ;;  %v26_v19 = vld [vmem:[%s461_s2] sm:$0xff]  ;;  %vm373_vm3 = vmmov 0  }
   0x6   :  { %119 = vmatpush1.bf16.msra.mxu0 %v78_v8  ;;  %159 = vmatprep.subr.bf16.mxu1 %v87_v10  ;;  %v368_v17 = vld [vmem:[%s459_s1 + $0x1c] ss:$36 sps:$4 sm:$0x1f]   ;;  %v96_v21 = vand.u32 %v366_v16, %v76_v5 }
   0x7   :  { %160 = vmatpush1.bf16.msra.mxu1 %v84_v13  ;;  %v99_v20 = vand.u32 %v368_v17, %v76_v5  ;;  %29 = vperm.xlu0 %356, %v26_v19   ;;  %v369_v22 = vld [vmem:[%s459_s1 + $0x20] ss:$36 sps:$4 sm:$0x1f]  }
   0x8   :  { %200 = vmatprep.subr.bf16.mxu0 %v93_v18  ;;  %v102_v24 = vand.u32 %v369_v22, %v76_v5 }
   0x9   :  { %339 = vmatmul.mubr.msk.bf16.vlgmr.msra.gmra.mxu0 %vm69_vm2, %v15_v11  ;;  %241 = vmatprep.subr.bf16.mxu1 %v99_v20 }
   0xa   :  { %201 = vmatpush1.bf16.msra.mxu0 %v90_v15  ;;  %340 = vmatmul.mubr.msk.bf16.vlgmr.msra.gmra.mxu1 %vm69_vm2, %v15_v11 }
   0xb   :  { %218 = vmatprep.mubr.bf16.mxu0 %v370_v1  ;;  %242 = vmatpush1.bf16.msra.mxu1 %v96_v21 }
   0xc   :  { %346 = vmatprep.subr.bf16.mxu0 %v372_v23  ;;  %259 = vmatprep.mubr.bf16.mxu1 %v370_v1 }
  0x11   :  { %341 = vmatmul.mubr.msk.bf16.vlgmr.msra.gmra.mxu0 %vm69_vm2, %v15_v11 }
  0x12   :  { %347 = vmatpush3.bf16.msra.mxu0 %v102_v24  ;;  %342 = vmatmul.mubr.msk.bf16.vlgmr.msra.gmra.mxu1 %vm69_vm2, %v15_v11 }
  0x13   :  { %348 = vmatprep.mubr.msk.bf16.mxu0 %vm373_vm3, %v372_v23 }
  0x19   :  { %349 = vmatmul.mubr.msk.bf16.vlgmr.msra.gmra.mxu0 %vm69_vm2, %v15_v11 }
  0x82   :  { %v30_v25 = vpop.permute.xlu0 %29 }
  0xc9   :  { %v138_v26 = vpop.f32.mrf.mxu0 }
  0xca   :  { %v139_v27 = vadd.f32 %v138_v26, %v30_v25  ;;  %v179_v28 = vpop.f32.mrf.mxu1 }
  0xcb   :  { %v140_v29 = vpop.f32.mrf.mxu0  ;;  %v180_v30 = vadd.f32 %v179_v28, %v30_v25 }
  0xcc   :  { %v308_v31 = vmax.f32 %v139_v27, 0.0  ;;  %v141_v32 = vadd.f32 %v140_v29, %v30_v25  ;;  %v181_v33 = vpop.f32.mrf.mxu1 }
  0xcd   :  { %v310_v34 = vmax.f32 %v180_v30, 0.0  ;;  %v142_v35 = vpop.f32.mrf.mxu0  ;;  %v182_v36 = vadd.f32 %v181_v33, %v30_v25 }
  0xce   :  { %317 = vst [vmem:[%s462_s3] sm:$0xff] %v308_v31  ;;  %v309_v37 = vmax.f32 %v141_v32, 0.0  ;;  %v183_v38 = vpop.f32.mrf.mxu1 }
  0xcf   :  { %319 = vst [vmem:[%s462_s3 + $0x10] sm:$0xff] %v310_v34  ;;  %v311_v39 = vmax.f32 %v182_v36, 0.0  ;;  %v143_v40 = vpop.f32.mrf.mxu0 }
  0xd0   :  { %318 = vst [vmem:[%s462_s3 + $0x8] sm:$0xff] %v309_v37  ;;  %v184_v41 = vpop.f32.mrf.mxu1 }
  0xd1   :  { %320 = vst [vmem:[%s462_s3 + $0x18] sm:$0xff] %v311_v39  ;;  %v220_v42 = vpop.f32.mrf.mxu0 }
  0xd2   :  { %v221_v43 = vadd.f32 %v220_v42, %v30_v25  ;;  %v261_v44 = vpop.f32.mrf.mxu1 }
  0xd3   :  { %v222_v45 = vpop.f32.mrf.mxu0  ;;  %v262_v46 = vadd.f32 %v261_v44, %v30_v25 }
  0xd4   :  { %v312_v47 = vmax.f32 %v221_v43, 0.0  ;;  %v223_v48 = vadd.f32 %v222_v45, %v30_v25  ;;  %v263_v49 = vpop.f32.mrf.mxu1 }
  0xd5   :  { %v314_v50 = vmax.f32 %v262_v46, 0.0  ;;  %v224_v51 = vpop.f32.mrf.mxu0  ;;  %v264_v52 = vadd.f32 %v263_v49, %v30_v25 }
  0xd6   :  { %321 = vst [vmem:[%s462_s3 + $0x20] sm:$0xff] %v312_v47  ;;  %v313_v53 = vmax.f32 %v223_v48, 0.0  ;;  %v265_v54 = vpop.f32.mrf.mxu1 }
  0xd7   :  { %323 = vst [vmem:[%s462_s3 + $0x30] sm:$0xff] %v314_v50  ;;  %v315_v55 = vmax.f32 %v264_v52, 0.0  ;;  %v225_v56 = vpop.f32.mrf.mxu0 }
  0xd8   :  { %322 = vst [vmem:[%s462_s3 + $0x28] sm:$0xff] %v313_v53  ;;  %v266_v57 = vpop.f32.mrf.mxu1 }
  0xd9   :  { %324 = vst [vmem:[%s462_s3 + $0x38] sm:$0xff] %v315_v55  ;;  %v302_v58 = vpop.f32.mrf.mxu0 }
  0xda   :  { %v303_v59 = vadd.f32 %v302_v58, %v30_v25 }
  0xdb   :  { %v350_v60 = vpop.f32.mrf.mxu0 }
  0xdc   :  { %v316_v61 = vmax.f32 %v303_v59, 0.0 }
  0xdd   :  { %v305_v62 = vpop.f32.mrf.mxu0 }
  0xde   :  { %325 = vst [vmem:[%s462_s3 + $0x40] sm:$0xff] %v316_v61 }
  0xdf   :  { %v351_v63 = vpop.f32.mrf.mxu0 }

// kernel: parallel_model_forward.37
= control target key start
LH: loop header
LB: loop body
LE: loop exit
PB: predicated region body
PF: predicated region fallthrough
CT: control target
= control target key end

     0   :  { %vm278_vm0 = vcmask 1043456   ;;  %v711_v2 = vmov 0   ;;  %vm274_vm1 = vcmask 588800   ;;  %v712_v52 = vmov 0.0   ;;  %s899_s1 = inlined_call_operand.vmem [shape: bf16[72,1152], index: 1, kind: input, shape index: {}]   ;;  %s900_s0 = inlined_call_operand.vmem [shape: bf16[2,72], index: 0, kind: input, shape index: {}]   ;;  %s901_s2 = inlined_call_operand.vmem [shape: f32[2,1], index: 2, kind: input, shape index: {}]   ;;  %s902_s3 = inlined_call_operand.vmem [shape: f32[2,1152], index: 3, kind: output, shape index: {}]  }
   0x1   :  { %v56_v0 = vld [vmem:[%s899_s1 + $0x120] sm:$0xff]  ;;  %v57_v1 = vld [vmem:[%s899_s1 + $0x128] sm:$0xff]  ;;  %338 = vmatprep.mubr.bf16.mxu0 %v711_v2  ;;  %379 = vmatprep.mubr.bf16.mxu1 %v711_v2  ;;  %v658_v11 = vld [vmem:[%s899_s1 + $0xd8] ss:$36 sps:$4 sm:$0xff]   ;;  %vm713_vm2 = vmmov 0   ;;  %v524_v60 = vlaneseq }
   0x2   :  { %v607_v3 = vcombine.high %v56_v0, %v56_v0  ;;  %v609_v4 = vcombine.high %v57_v1, %v57_v1  ;;  %v606_v5 = vcombine.low %v56_v0, %v56_v0  ;;  %v608_v6 = vcombine.low %v57_v1, %v57_v1  ;;  %v654_v7 = vld [vmem:[%s899_s1 + $0xdc] ss:$36 sps:$4 sm:$0xff]   ;;  %649 = vset.pattern.permute.xlu0 %v711_v2  ;;  %v656_v8 = vld [vmem:[%s899_s1 + $0xe4] ss:$36 sps:$4 sm:$0xff]   ;;  %v660_v13 = vld [vmem:[%s899_s1 + $0x94] ss:$36 sps:$4 sm:$0xff]  }
   0x3   :  { %v659_v12 = vld [vmem:[%s899_s1 + $0xe0] ss:$36 sps:$4 sm:$0xff]   ;;  %v664_v15 = vld [vmem:[%s899_s1 + $0x90] ss:$36 sps:$4 sm:$0xff]   ;;  %v665_v16 = vld [vmem:[%s899_s1 + $0x98] ss:$36 sps:$4 sm:$0xff]  }
   0x4   :  { %615 = vmatprep.subr.msk.bf16.mxu0 %vm278_vm0, %v607_v3  ;;  %617 = vmatprep.subr.msk.bf16.mxu1 %vm278_vm0, %v609_v4  ;;  %v280_v9 = vsel %vm278_vm0, %v606_v5, 0  ;;  %v286_v10 = vsel %vm278_vm0, %v608_v6, 0  ;;  %v662_v14 = vld [vmem:[%s899_s1 + $0x9c] ss:$36 sps:$4 sm:$0xff]   ;;  %v666_v17 = vld [vmem:[%s899_s1 + $0x4c] ss:$36 sps:$4 sm:$0xff]  }
   0x5   :  { %313 = vmatpush1.bf16.msra.mxu0 %v280_v9  ;;  %354 = vmatpush1.bf16.msra.mxu1 %v286_v10  ;;  %v668_v18 = vld [vmem:[%s899_s1 + $0x54] ss:$36 sps:$4 sm:$0xff]   ;;  %v670_v19 = vld [vmem:[%s899_s1 + $0x48] ss:$36 sps:$4 sm:$0xff]   ;;  %v676_v25 = vld [vmem:[%s899_s1] ss:$36 sps:$4 sm:$0xff]  }
   0x6   :  { %314 = vmatprep.subr.bf16.mxu0 %v654_v7  ;;  %355 = vmatprep.subr.bf16.mxu1 %v656_v8  ;;  %v671_v20 = vld [vmem:[%s899_s1 + $0x50] ss:$36 sps:$4 sm:$0xff]   ;;  %v672_v21 = vld [vmem:[%s899_s1 + $0x4] ss:$36 sps:$4 sm:$0xff]   ;;  %v59_v24 = vld [vmem:[%s899_s1 + $0x138] sm:$0xff]  ;;  %v525_v63 = vshrl.u32 %v524_v60, 7 }
   0x7   :  { %v674_v22 = vld [vmem:[%s899_s1 + $0xc] ss:$36 sps:$4 sm:$0xff]   ;;  %v613_v28 = vcombine.high %v59_v24, %v59_v24  ;;  %v612_v30 = vcombine.low %v59_v24, %v59_v24  ;;  %v805_v31 = vld [vmem:[%s900_s0] sm:$0x1]  ;;  %v687_v35 = vld [vmem:[%s899_s1 + $0xf4] ss:$36 sps:$4 sm:$0xff]  }
   0x8   :  { %v58_v23 = vld [vmem:[%s899_s1 + $0x130] sm:$0xff]  ;;  %v677_v26 = vld [vmem:[%s899_s1 + $0x8] ss:$36 sps:$4 sm:$0xff]   ;;  %v688_v40 = vld [vmem:[%s899_s1 + $0xa0] ss:$36 sps:$4 sm:$0xff]  }
   0x9   :  { %315 = vmatpush1.bf16.msra.mxu0 %v658_v11  ;;  %356 = vmatpush1.bf16.msra.mxu1 %v659_v12  ;;  %v611_v27 = vcombine.high %v58_v23, %v58_v23  ;;  %v610_v29 = vcombine.low %v58_v23, %v58_v23  ;;  %v684_v32 = vld [vmem:[%s899_s1 + $0xec] ss:$36 sps:$4 sm:$0xff]   ;;  %v298_v34 = vsel %vm278_vm0, %v612_v30, 0  ;;  %v690_v38 = vld [vmem:[%s899_s1 + $0xa4] ss:$36 sps:$4 sm:$0xff]  }
   0xa   :  { %316 = vmatprep.subr.bf16.mxu0 %v660_v13  ;;  %357 = vmatprep.subr.bf16.mxu1 %v662_v14  ;;  %v682_v36 = vld [vmem:[%s899_s1 + $0xe8] ss:$36 sps:$4 sm:$0xff]   ;;  %v685_v37 = vld [vmem:[%s899_s1 + $0xf0] ss:$36 sps:$4 sm:$0xff]   ;;  %v61_v42 = vld [vmem:[%s901_s2] sm:$0x3] }
   0xb   :  { %v292_v33 = vsel %vm278_vm0, %v610_v29, 0  ;;  %v693_v39 = vld [vmem:[%s899_s1 + $0xac] ss:$36 sps:$4 sm:$0xff]   ;;  %v696_v43 = vld [vmem:[%s899_s1 + $0x5c] ss:$36 sps:$4 sm:$0xff]   ;;  %64 = vperm.xlu0 %649, %v61_v42  }
   0xc   :  { %v691_v41 = vld [vmem:[%s899_s1 + $0xa8] ss:$36 sps:$4 sm:$0xff]   ;;  %v694_v45 = vld [vmem:[%s899_s1 + $0x58] ss:$36 sps:$4 sm:$0xff]   ;;  %v697_v46 = vld [vmem:[%s899_s1 + $0x60] ss:$36 sps:$4 sm:$0xff]  }
   0xd   :  { %317 = vmatpush1.bf16.msra.mxu0 %v664_v15  ;;  %358 = vmatpush1.bf16.msra.mxu1 %v665_v16  ;;  %v699_v44 = vld [vmem:[%s899_s1 + $0x64] ss:$36 sps:$4 sm:$0xff]   ;;  %v702_v47 = vld [vmem:[%s899_s1 + $0x14] ss:$36 sps:$4 sm:$0xff]   ;;  %v705_v48 = vld [vmem:[%s899_s1 + $0x1c] ss:$36 sps:$4 sm:$0xff]  }
   0xe   :  { %318 = vmatprep.subr.bf16.mxu0 %v666_v17  ;;  %359 = vmatprep.subr.bf16.mxu1 %v668_v18  ;;  %v700_v49 = vld [vmem:[%s899_s1 + $0x10] ss:$36 sps:$4 sm:$0xff]   ;;  %v703_v50 = vld [vmem:[%s899_s1 + $0x18] ss:$36 sps:$4 sm:$0xff]   ;;  %v706_v51 = vld [vmem:[%s899_s1 + $0x140] ss:$0 sps:$4 sm:$0xff]  }
   0xf   :  { %v304_v53 = vsel %vm278_vm0, %v706_v51, 0  ;;  %v707_v54 = vld [vmem:[%s899_s1 + $0xf8] ss:$36 sps:$4 sm:$0xff]   ;;  %v708_v55 = vld [vmem:[%s899_s1 + $0xb0] ss:$36 sps:$4 sm:$0xff]  }
  0x10   :  { %v709_v56 = vld [vmem:[%s899_s1 + $0x68] ss:$36 sps:$4 sm:$0xff]   ;;  %v710_v57 = vld [vmem:[%s899_s1 + $0x20] ss:$36 sps:$4 sm:$0xff]   ;;  %v714_v58 = vmov 1983009808  }
  0x11   :  { %319 = vmatpush1.bf16.msra.mxu0 %v670_v19  ;;  %360 = vmatpush1.bf16.msra.mxu1 %v671_v20  ;;  %v522_v59 = vunpack.c.l.s4 %v714_v58 }
  0x12   :  { %320 = vmatprep.subr.bf16.mxu0 %v672_v21  ;;  %361 = vmatprep.subr.bf16.mxu1 %v674_v22 }
  0x13   :  { %v523_v62 = vunpack.c.0.s8 %v522_v59 }
  0x15   :  { %321 = vmatpush1.bf16.msra.mxu0 %v676_v25  ;;  %362 = vmatpush1.bf16.msra.mxu1 %v677_v26  ;;  %v526_v7 = vsub.s32 %v523_v62, %v525_v63 }
  0x16   :  { %619 = vmatprep.subr.msk.bf16.mxu0 %vm278_vm0, %v611_v27  ;;  %621 = vmatprep.subr.msk.bf16.mxu1 %vm278_vm0, %v613_v28 }
  0x18   :  { %616 = vmatmul.mubr.msk.bf16.vlgmr.msra.gmra.mxu0 %vm274_vm1, %v805_v31  ;;  %618 = vmatmul.mubr.msk.bf16.vlgmr.msra.gmra.mxu1 %vm274_vm1, %v805_v31 }
  0x19   :  { %395 = vmatpush1.bf16.msra.mxu0 %v292_v33  ;;  %436 = vmatpush1.bf16.msra.mxu1 %v298_v34 }
  0x1a   :  { %396 = vmatprep.subr.bf16.mxu0 %v684_v32  ;;  %437 = vmatprep.subr.bf16.mxu1 %v687_v35 }
  0x1b   :  { %420 = vmatprep.mubr.bf16.mxu0 %v711_v2  ;;  %461 = vmatprep.mubr.bf16.mxu1 %v711_v2 }
  0x1d   :  { %397 = vmatpush1.bf16.msra.mxu0 %v682_v36  ;;  %438 = vmatpush1.bf16.msra.mxu1 %v685_v37 }
  0x1e   :  { %398 = vmatprep.subr.bf16.mxu0 %v690_v38  ;;  %439 = vmatprep.subr.bf16.mxu1 %v693_v39 }
  0x21   :  { %399 = vmatpush1.bf16.msra.mxu0 %v688_v40  ;;  %440 = vmatpush1.bf16.msra.mxu1 %v691_v41 }
  0x22   :  { %400 = vmatprep.subr.bf16.mxu0 %v696_v43  ;;  %441 = vmatprep.subr.bf16.mxu1 %v699_v44 }
  0x25   :  { %401 = vmatpush1.bf16.msra.mxu0 %v694_v45  ;;  %442 = vmatpush1.bf16.msra.mxu1 %v697_v46 }
  0x26   :  { %402 = vmatprep.subr.bf16.mxu0 %v702_v47  ;;  %443 = vmatprep.subr.bf16.mxu1 %v705_v48 }
  0x29   :  { %403 = vmatpush1.bf16.msra.mxu0 %v700_v49  ;;  %444 = vmatpush1.bf16.msra.mxu1 %v703_v50 }
  0x2a   :  { %631 = vmatprep.subr.bf16.mxu0 %v712_v52 }
  0x2c   :  { %620 = vmatmul.mubr.msk.bf16.vlgmr.msra.gmra.mxu0 %vm274_vm1, %v805_v31  ;;  %622 = vmatmul.mubr.msk.bf16.vlgmr.msra.gmra.mxu1 %vm274_vm1, %v805_v31 }
  0x2d   :  { %632 = vmatpush3.bf16.msra.mxu0 %v304_v53  ;;  %641 = vmatprep.mubr.msk.bf16.mxu0 %vm713_vm2, %v712_v52 }
  0x2e   :  { %633 = vmatprep.subr.bf16.mxu0 %v712_v52 }
  0x31   :  { %634 = vmatpush3.bf16.msra.mxu0 %v707_v54 }
  0x32   :  { %635 = vmatprep.subr.bf16.mxu0 %v712_v52 }
  0x35   :  { %636 = vmatpush3.bf16.msra.mxu0 %v708_v55 }
  0x36   :  { %637 = vmatprep.subr.bf16.mxu0 %v712_v52 }
  0x39   :  { %638 = vmatpush3.bf16.msra.mxu0 %v709_v56 }
  0x3a   :  { %639 = vmatprep.subr.bf16.mxu0 %v712_v52 }
  0x3d   :  { %640 = vmatpush3.bf16.msra.mxu0 %v710_v57 }
  0x40   :  { %642 = vmatmul.mubr.msk.bf16.vlgmr.msra.gmra.mxu0 %vm274_vm1, %v805_v31 }
  0x86   :  { %v65_v61 = vpop.permute.xlu0 %64 }
  0xd8   :  { %v340_v0 = vpop.f32.mrf.mxu0  ;;  %v381_v1 = vpop.f32.mrf.mxu1 }
  0xd9   :  { %v341_v2 = vadd.f32 %v340_v0, %v65_v61  ;;  %v382_v3 = vadd.f32 %v381_v1, %v65_v61 }
  0xda   :  { %v342_v4 = vpop.f32.mrf.mxu0  ;;  %v383_v5 = vpop.f32.mrf.mxu1 }
  0xdb   :  { %v343_v6 = vadd.f32 %v342_v4, %v65_v61  ;;  %v384_v8 = vadd.f32 %v383_v5, %v65_v61 }
  0xdc   :  { %v344_v9 = vpop.f32.mrf.mxu0  ;;  %v385_v10 = vpop.f32.mrf.mxu1 }
  0xdd   :  { %v519_v11 = vcombine.low %v341_v2, %v343_v6  ;;  %v520_v12 = vcombine.low %v382_v3, %v384_v8 }
  0xde   :  { %v345_v13 = vpop.f32.mrf.mxu0  ;;  %v386_v14 = vpop.f32.mrf.mxu1 }
  0xdf   :  { %v527_v15 = vrot.slane %v519_v11, %v526_v7  ;;  %v534_v16 = vrot.slane %v520_v12, %v526_v7 }
  0xe1   :  { %v535_v17 = vcombine.low %v527_v15, %v534_v16 }
  0xe3   :  { %563 = vst [vmem:[%s902_s3] sm:$0xff] %v535_v17 }
  0xec   :  { %v422_v18 = vpop.f32.mrf.mxu0  ;;  %v463_v19 = vpop.f32.mrf.mxu1 }
  0xed   :  { %v423_v20 = vadd.f32 %v422_v18, %v65_v61  ;;  %v464_v21 = vadd.f32 %v463_v19, %v65_v61 }
  0xee   :  { %v424_v22 = vpop.f32.mrf.mxu0  ;;  %v465_v23 = vpop.f32.mrf.mxu1 }
  0xef   :  { %v425_v24 = vadd.f32 %v424_v22, %v65_v61  ;;  %v466_v25 = vadd.f32 %v465_v23, %v65_v61 }
  0xf0   :  { %v426_v26 = vpop.f32.mrf.mxu0  ;;  %v467_v27 = vpop.f32.mrf.mxu1 }
  0xf1   :  { %v536_v28 = vcombine.low %v423_v20, %v425_v24  ;;  %v537_v29 = vcombine.low %v464_v21, %v466_v25 }
  0xf2   :  { %v427_v30 = vpop.f32.mrf.mxu0  ;;  %v468_v31 = vpop.f32.mrf.mxu1 }
  0xf3   :  { %v544_v32 = vrot.slane %v536_v28, %v526_v7  ;;  %v551_v33 = vrot.slane %v537_v29, %v526_v7 }
  0xf5   :  { %v552_v34 = vcombine.low %v544_v32, %v551_v33 }
  0xf7   :  { %564 = vst [vmem:[%s902_s3 + $0x8] sm:$0xff] %v552_v34 }
 0x100   :  { %v504_v35 = vpop.f32.mrf.mxu0 }
 0x101   :  { %v505_v36 = vadd.f32 %v504_v35, %v65_v61 }
 0x102   :  { %v643_v37 = vpop.f32.mrf.mxu0 }
 0x103   :  { %624 = vst.sshfl [vmem:[%s902_s3 + $0x10] sm:$0x3 pattern:$0x76325410] %v505_v36 }
 0x104   :  { %v507_v38 = vpop.f32.mrf.mxu0 }
 0x106   :  { %v644_v39 = vpop.f32.mrf.mxu0 }

// kernel: squeeze.26
= control target key start
LH: loop header
LB: loop body
LE: loop exit
PB: predicated region body
PF: predicated region fallthrough
CT: control target
= control target key end

     0   :  { %s693_s10 = smov 123   ;;  %s694_s11 = smov 121   ;;  %vm388_vm0 = vcmask 949248   ;;  %vm402_vm1 = vcmask 957440   ;;  %vm416_vm2 = vcmask 965632   ;;  %vm429_vm3 = vcmask 973824   ;;  %s1254_s0 = inlined_call_operand.vmem [shape: f32[1088], index: 0, kind: input, shape index: {}]   ;;  %s1255_s1 = inlined_call_operand.vmem [shape: f32[64,1,17,1], index: 1, kind: output, shape index: {}]  }
   0x1   :  { %v495_v0 = vld [vmem:[%s1254_s0 + $0x7] sm:$0x1]   ;;  %v499_v1 = vld [vmem:[%s1254_s0 + $0x3] sm:$0x1]   ;;  %v497_v2 = vld [vmem:[%s1254_s0 + $0x5] sm:$0x1]  }
   0x2   :  { %7 = vrot.lane.b32.xlu0 %v495_v0, %s693_s10  ;;  %21 = vrot.lane.b32.xlu1 %v499_v1, %s694_s11  ;;  %v501_v3 = vld [vmem:[%s1254_s0 + $0x1] sm:$0x1]   ;;  %s695_s16 = smov 122   ;;  %s696_s17 = smov 120   ;;  %v503_v4 = vld [vmem:[%s1254_s0 + $0x8] sm:$0x1]  }
   0x3   :  { %v505_v5 = vld [vmem:[%s1254_s0 + $0x6] sm:$0x1]   ;;  %s697_s22 = smov 115   ;;  %s698_s23 = smov 114   ;;  %v507_v6 = vld [vmem:[%s1254_s0 + $0x4] sm:$0x1]  }
   0x4   :  { %v509_v7 = vld [vmem:[%s1254_s0 + $0x2] sm:$0x1]   ;;  %s699_s28 = smov 113   ;;  %s700_s29 = smov 112   ;;  %v61_v8 = vld [vmem:[%s1254_s0] sm:$0x1]  }
   0x5   :  { %v512_v9 = vld [vmem:[%s1254_s0 + $0x7] sm:$0x1]   ;;  %s701_s5 = smov 111   ;;  %s702_s6 = smov 106   ;;  %v514_v10 = vld [vmem:[%s1254_s0 + $0x5] sm:$0x1]  }
   0x6   :  { %14 = vrot.lane.b32.xlu0 %v497_v2, %s695_s16  ;;  %28 = vrot.lane.b32.xlu1 %v501_v3, %s696_s17  ;;  %v516_v11 = vld [vmem:[%s1254_s0 + $0x3] sm:$0x1]   ;;  %s703_s11 = smov 105   ;;  %s704_s12 = smov 104   ;;  %v518_v12 = vld [vmem:[%s1254_s0 + $0x1] sm:$0x1]  }
   0x7   :  { %v520_v13 = vld [vmem:[%s1254_s0 + $0x8] sm:$0x1]   ;;  %s705_s17 = smov 103   ;;  %s706_s18 = smov 98   ;;  %v522_v14 = vld [vmem:[%s1254_s0 + $0x6] sm:$0x1]  }
   0x8   :  { %v524_v15 = vld [vmem:[%s1254_s0 + $0x4] sm:$0x1]   ;;  %s708_s24 = smov 96   ;;  %v526_v16 = vld [vmem:[%s1254_s0 + $0x2] sm:$0x1]   ;;  %s710_s30 = smov 94  }
   0x9   :  { %v123_v17 = vld [vmem:[%s1254_s0] sm:$0x1]   ;;  %v529_v18 = vld [vmem:[%s1254_s0 + $0x7] sm:$0x1]   ;;  %v531_v19 = vld [vmem:[%s1254_s0 + $0x5] sm:$0x1]  }
   0xa   :  { %35 = vrot.lane.b32.xlu0 %v503_v4, %s697_s22  ;;  %42 = vrot.lane.b32.xlu1 %v505_v5, %s698_s23  ;;  %s707_s23 = smov 97   ;;  %s712_s7 = smov 88   ;;  %v533_v20 = vld [vmem:[%s1254_s0 + $0x3] sm:$0x1]   ;;  %v535_v21 = vld [vmem:[%s1254_s0 + $0x1] sm:$0x1]  }
   0xb   :  { %s714_s13 = smov 86   ;;  %v537_v22 = vld [vmem:[%s1254_s0 + $0x8] sm:$0x1]   ;;  %v539_v23 = vld [vmem:[%s1254_s0 + $0x6] sm:$0x1]   ;;  %s716_s19 = smov 80  }
   0xc   :  { %v541_v24 = vld [vmem:[%s1254_s0 + $0x4] sm:$0x1]   ;;  %v543_v25 = vld [vmem:[%s1254_s0 + $0x2] sm:$0x1]   ;;  %s718_s25 = smov 78   ;;  %s720_s2 = smov 72  }
   0xd   :  { %v185_v26 = vld [vmem:[%s1254_s0] sm:$0x1]   ;;  %v546_v27 = vld [vmem:[%s1254_s0 + $0x7] sm:$0x1]   ;;  %v548_v28 = vld [vmem:[%s1254_s0 + $0x5] sm:$0x1]  }
   0xe   :  { %49 = vrot.lane.b32.xlu0 %v507_v6, %s699_s28  ;;  %56 = vrot.lane.b32.xlu1 %v509_v7, %s700_s29  ;;  %s709_s29 = smov 95   ;;  %v550_v29 = vld [vmem:[%s1254_s0 + $0x3] sm:$0x1]   ;;  %s722_s8 = smov 70   ;;  %v552_v30 = vld [vmem:[%s1254_s0 + $0x1] sm:$0x1]  }
   0xf   :  { %v554_v31 = vld [vmem:[%s1254_s0 + $0x6] sm:$0x1]   ;;  %s724_s14 = smov 63   ;;  %v556_v32 = vld [vmem:[%s1254_s0 + $0x4] sm:$0x1]   ;;  %s725_s27 = smov 62  }
  0x10   :  { %v558_v33 = vld [vmem:[%s1254_s0 + $0x2] sm:$0x1]   ;;  %v599_v34 = vld [vmem:[%s1254_s0 + $0x6] sm:$0x1]   ;;  %v600_v35 = vld [vmem:[%s1254_s0 + $0x7] sm:$0x1]  }
  0x11   :  { %v603_v36 = vld [vmem:[%s1254_s0 + $0x4] sm:$0x1]   ;;  %v604_v37 = vld [vmem:[%s1254_s0 + $0x5] sm:$0x1]   ;;  %s726_s28 = smov 61   ;;  %v389_v38 = vsel %vm388_vm0, %v600_v35, %v599_v34  ;;  %s728_s9 = smov 11  }
  0x12   :  { %62 = vrot.lane.b32.xlu0 %v61_v8, %s701_s5  ;;  %69 = vrot.lane.b32.xlu1 %v512_v9, %s702_s6  ;;  %s711_s6 = smov 89   ;;  %v403_v39 = vsel %vm402_vm1, %v604_v37, %v603_v36  ;;  %v607_v40 = vld [vmem:[%s1254_s0 + $0x2] sm:$0x1]   ;;  %v608_v41 = vld [vmem:[%s1254_s0 + $0x3] sm:$0x1]   ;;  %vm443_vm4 = vcmask 1014784  }
  0x13   :  { %v426_v42 = vld [vmem:[%s1254_s0] sm:$0x1]   ;;  %v611_v43 = vld [vmem:[%s1254_s0 + $0x1] sm:$0x1]   ;;  %v417_v44 = vsel %vm416_vm2, %v608_v41, %v607_v40  ;;  %v614_v46 = vld [vmem:[%s1254_s0 + $0x7] sm:$0x1]  }
  0x14   :  { %v430_v45 = vsel %vm429_vm3, %v611_v43, %v426_v42  ;;  %v615_v47 = vld [vmem:[%s1254_s0 + $0x8] sm:$0x1]   ;;  %v618_v48 = vld [vmem:[%s1254_s0 + $0x5] sm:$0x1]   ;;  %v619_v49 = vld [vmem:[%s1254_s0 + $0x6] sm:$0x1]  }
  0x15   :  { %vm457_vm5 = vcmask 1022976   ;;  %v444_v50 = vsel %vm443_vm4, %v615_v47, %v614_v46  ;;  %v622_v52 = vld [vmem:[%s1254_s0 + $0x3] sm:$0x1]   ;;  %v623_v53 = vld [vmem:[%s1254_s0 + $0x4] sm:$0x1]   ;;  %vm471_vm6 = vcmask 1031168  }
  0x16   :  { %76 = vrot.lane.b32.xlu0 %v514_v10, %s703_s11  ;;  %83 = vrot.lane.b32.xlu1 %v516_v11, %s704_s12  ;;  %s713_s12 = smov 87   ;;  %v458_v51 = vsel %vm457_vm5, %v619_v49, %v618_v48  ;;  %v626_v54 = vld [vmem:[%s1254_s0 + $0x1] sm:$0x1]   ;;  %v627_v55 = vld [vmem:[%s1254_s0 + $0x2] sm:$0x1]   ;;  %vm485_vm7 = vcmask 1039360   ;;  %v472_v56 = vsel %vm471_vm6, %v623_v53, %v622_v52 }
  0x17   :  { %v486_v57 = vsel %vm485_vm7, %v627_v55, %v626_v54  ;;  %v240_v58 = vld [vmem:[%s1254_s0] sm:$0x1]   ;;  %v561_v59 = vld [vmem:[%s1254_s0 + $0x7] sm:$0x1]   ;;  %v563_v60 = vld [vmem:[%s1254_s0 + $0x5] sm:$0x1]  }
  0x18   :  { %v565_v61 = vld [vmem:[%s1254_s0 + $0x3] sm:$0x1]   ;;  %v567_v62 = vld [vmem:[%s1254_s0 + $0x1] sm:$0x1]   ;;  %v569_v63 = vld [vmem:[%s1254_s0 + $0x6] sm:$0x1]  }
  0x19   :  { %s740_s20 = smov 46   ;;  %v571_v0 = vld [vmem:[%s1254_s0 + $0x4] sm:$0x1]   ;;  %v573_v1 = vld [vmem:[%s1254_s0 + $0x2] sm:$0x1]   ;;  %s742_s26 = smov 44  }
  0x1a   :  { %90 = vrot.lane.b32.xlu0 %v518_v12, %s705_s17  ;;  %97 = vrot.lane.b32.xlu1 %v520_v13, %s706_s18  ;;  %s715_s18 = smov 81   ;;  %v295_v2 = vld [vmem:[%s1254_s0] sm:$0x1]   ;;  %v576_v3 = vld [vmem:[%s1254_s0 + $0x7] sm:$0x1]   ;;  %s744_s3 = smov 38  }
  0x1b   :  { %v578_v4 = vld [vmem:[%s1254_s0 + $0x5] sm:$0x1]   ;;  %v580_v5 = vld [vmem:[%s1254_s0 + $0x3] sm:$0x1]   ;;  %v582_v6 = vld [vmem:[%s1254_s0 + $0x1] sm:$0x1]  }
  0x1c   :  { %v584_v7 = vld [vmem:[%s1254_s0 + $0x6] sm:$0x1]   ;;  %s748_s15 = smov 29   ;;  %v586_v8 = vld [vmem:[%s1254_s0 + $0x4] sm:$0x1]   ;;  %vm3_vm8 = vcmask 138240  }
  0x1d   :  { %v588_v9 = vld [vmem:[%s1254_s0 + $0x2] sm:$0x1]   ;;  %v2_v10 = vld [vmem:[%s1254_s0] sm:$0x1]   ;;  %v591_v12 = vld [vmem:[%s1254_s0 + $0x7] sm:$0x1]  }
  0x1e   :  { %104 = vrot.lane.b32.xlu0 %v522_v14, %s707_s23  ;;  %111 = vrot.lane.b32.xlu1 %v524_v15, %s708_s24  ;;  %s717_s24 = smov 79   ;;  %4 = vst.msk [vmem:[%s1255_s1] sm:$0x1] %vm3_vm8, %v2_v10   ;;  %v350_v11 = vld [vmem:[%s1254_s0] sm:$0x1]   ;;  %s751_s5 = smov 26  }
  0x1f   :  { %v593_v15 = vld [vmem:[%s1254_s0 + $0x5] sm:$0x1]   ;;  %s754_s16 = smov 19   ;;  %s755_s22 = smov 18   ;;  %vm392_vm9 = vcmask 97280   ;;  %vm406_vm10 = vcmask 89088  }
  0x20   :  { %vm395_vm11 = vcmask 138336   ;;  %vm409_vm12 = vcmask 138328   ;;  %vm420_vm13 = vcmask 80896   ;;  %vm433_vm14 = vcmask 72704  }
  0x21   :  { %vm423_vm15 = vcmask 138320   ;;  %vm436_vm0 = vcmask 138312   ;;  %vm447_vm1 = vcmask 31744   ;;  %vm461_vm2 = vcmask 23552  }
  0x22   :  { %118 = vrot.lane.b32.xlu0 %v526_v16, %s709_s29  ;;  %124 = vrot.lane.b32.xlu1 %v123_v17, %s710_s30  ;;  %s719_s30 = smov 77   ;;  %s732_s29 = smov 3   ;;  %v595_v16 = vld [vmem:[%s1254_s0 + $0x3] sm:$0x1]   ;;  %vm450_vm3 = vcmask 138272   ;;  %vm464_vm4 = vcmask 138264  }
  0x23   :  { %vm475_vm5 = vcmask 15360   ;;  %vm489_vm6 = vcmask 7168   ;;  %vm478_vm7 = vcmask 138256  }
  0x26   :  { %131 = vrot.lane.b32.xlu0 %v529_v18, %s711_s6  ;;  %138 = vrot.lane.b32.xlu1 %v531_v19, %s712_s7  ;;  %s721_s7 = smov 71   ;;  %s752_s6 = smov 21   ;;  %v597_v19 = vld [vmem:[%s1254_s0 + $0x1] sm:$0x1]  }
  0x2a   :  { %145 = vrot.lane.b32.xlu0 %v533_v20, %s713_s12  ;;  %152 = vrot.lane.b32.xlu1 %v535_v21, %s714_s13  ;;  %s723_s13 = smov 69  }
  0x2e   :  { %159 = vrot.lane.b32.xlu0 %v537_v22, %s715_s18  ;;  %166 = vrot.lane.b32.xlu1 %v539_v23, %s716_s19  ;;  %s729_s18 = smov 10   ;;  %s730_s19 = smov 9  }
  0x32   :  { %173 = vrot.lane.b32.xlu0 %v541_v24, %s717_s24  ;;  %180 = vrot.lane.b32.xlu1 %v543_v25, %s718_s25  ;;  %s741_s25 = smov 45   ;;  %s749_s24 = smov 28  }
  0x36   :  { %186 = vrot.lane.b32.xlu0 %v185_v26, %s719_s30  ;;  %193 = vrot.lane.b32.xlu1 %v546_v27, %s720_s2  ;;  %s733_s30 = smov 2   ;;  %s734_s2 = smov 1  }
  0x3a   :  { %200 = vrot.lane.b32.xlu0 %v548_v28, %s721_s7  ;;  %207 = vrot.lane.b32.xlu1 %v550_v29, %s722_s8  ;;  %s727_s8 = smov 12   ;;  %s735_s7 = smov 60  }
  0x3e   :  { %214 = vrot.lane.b32.xlu0 %v552_v30, %s723_s13  ;;  %221 = vrot.lane.b32.xlu1 %v554_v31, %s724_s14  ;;  %s737_s13 = smov 54   ;;  %s738_s14 = smov 53  }
  0x42   :  { %228 = vrot.lane.b32.xlu0 %v556_v32, %s725_s27  ;;  %235 = vrot.lane.b32.xlu1 %v558_v33, %s726_s28  ;;  %s731_s28 = smov 4  }
  0x46   :  { %390 = vrot.lane.b32.xlu0 %v389_v38, %s727_s8  ;;  %404 = vrot.lane.b32.xlu1 %v403_v39, %s728_s9  ;;  %s736_s8 = smov 55   ;;  %s746_s9 = smov 36  }
  0x4a   :  { %418 = vrot.lane.b32.xlu0 %v417_v44, %s729_s18  ;;  %431 = vrot.lane.b32.xlu1 %v430_v45, %s730_s19  ;;  %s739_s19 = smov 52  }
  0x4e   :  { %445 = vrot.lane.b32.xlu0 %v444_v50, %s731_s28  ;;  %459 = vrot.lane.b32.xlu1 %v458_v51, %s732_s29 }
  0x52   :  { %473 = vrot.lane.b32.xlu0 %v472_v56, %s733_s30  ;;  %487 = vrot.lane.b32.xlu1 %v486_v57, %s734_s2  ;;  %s743_s2 = smov 43  }
  0x56   :  { %241 = vrot.lane.b32.xlu0 %v240_v58, %s735_s7  ;;  %248 = vrot.lane.b32.xlu1 %v561_v59, %s736_s8  ;;  %s745_s8 = smov 37  }
  0x5a   :  { %255 = vrot.lane.b32.xlu0 %v563_v60, %s737_s13  ;;  %262 = vrot.lane.b32.xlu1 %v565_v61, %s738_s14  ;;  %s747_s14 = smov 35  }
  0x5e   :  { %269 = vrot.lane.b32.xlu0 %v567_v62, %s739_s19  ;;  %276 = vrot.lane.b32.xlu1 %v569_v63, %s740_s20 }
  0x62   :  { %283 = vrot.lane.b32.xlu0 %v571_v0, %s741_s25  ;;  %290 = vrot.lane.b32.xlu1 %v573_v1, %s742_s26  ;;  %s750_s25 = smov 27  }
  0x66   :  { %296 = vrot.lane.b32.xlu0 %v295_v2, %s743_s2  ;;  %303 = vrot.lane.b32.xlu1 %v576_v3, %s744_s3 }
  0x6a   :  { %310 = vrot.lane.b32.xlu0 %v578_v4, %s745_s8  ;;  %317 = vrot.lane.b32.xlu1 %v580_v5, %s746_s9 }
  0x6e   :  { %324 = vrot.lane.b32.xlu0 %v582_v6, %s747_s14  ;;  %331 = vrot.lane.b32.xlu1 %v584_v7, %s748_s15  ;;  %s753_s15 = smov 20  }
  0x72   :  { %338 = vrot.lane.b32.xlu0 %v586_v8, %s749_s24  ;;  %345 = vrot.lane.b32.xlu1 %v588_v9, %s750_s25 }
  0x74   :  { %v8_v13 = vpop.permute.xlu0 %7   ;;  %v22_v14 = vpop.permute.xlu1 %21  }
  0x75   :  { %496 = vst.msk [vmem:[%s1255_s1 + $0x35] sm:$0x1] %vm3_vm8, %v8_v13   ;;  %500 = vst.msk [vmem:[%s1255_s1 + $0x17] sm:$0x1] %vm3_vm8, %v22_v14  }
  0x76   :  { %351 = vrot.lane.b32.xlu0 %v350_v11, %s751_s5  ;;  %358 = vrot.lane.b32.xlu1 %v591_v12, %s752_s6 }
  0x78   :  { %v15_v17 = vpop.permute.xlu0 %14   ;;  %v29_v18 = vpop.permute.xlu1 %28  }
  0x79   :  { %498 = vst.msk [vmem:[%s1255_s1 + $0x26] sm:$0x1] %vm3_vm8, %v15_v17   ;;  %502 = vst.msk [vmem:[%s1255_s1 + $0x8] sm:$0x1] %vm3_vm8, %v29_v18  }
  0x7a   :  { %365 = vrot.lane.b32.xlu0 %v593_v15, %s753_s15  ;;  %372 = vrot.lane.b32.xlu1 %v595_v16, %s754_s16 }
  0x7c   :  { %v36_v20 = vpop.permute.xlu0 %35   ;;  %v43_v21 = vpop.permute.xlu1 %42  }
  0x7d   :  { %504 = vst.msk [vmem:[%s1255_s1 + $0x3d] sm:$0x1] %vm3_vm8, %v36_v20   ;;  %506 = vst.msk [vmem:[%s1255_s1 + $0x2e] sm:$0x1] %vm3_vm8, %v43_v21  }
  0x7e   :  { %379 = vrot.lane.b32.xlu0 %v597_v19, %s755_s22 }
  0x80   :  { %v50_v22 = vpop.permute.xlu0 %49   ;;  %v57_v23 = vpop.permute.xlu1 %56  }
  0x81   :  { %508 = vst.msk [vmem:[%s1255_s1 + $0x1f] sm:$0x1] %vm3_vm8, %v50_v22   ;;  %510 = vst.msk [vmem:[%s1255_s1 + $0x10] sm:$0x1] %vm3_vm8, %v57_v23  }
  0x84   :  { %v63_v24 = vpop.permute.xlu0 %62   ;;  %v70_v25 = vpop.permute.xlu1 %69  }
  0x85   :  { %511 = vst.msk [vmem:[%s1255_s1 + $0x1] sm:$0x1] %vm3_vm8, %v63_v24   ;;  %513 = vst.msk [vmem:[%s1255_s1 + $0x36] sm:$0x1] %vm3_vm8, %v70_v25  }
  0x88   :  { %v77_v26 = vpop.permute.xlu0 %76   ;;  %v84_v27 = vpop.permute.xlu1 %83  }
  0x89   :  { %515 = vst.msk [vmem:[%s1255_s1 + $0x27] sm:$0x1] %vm3_vm8, %v77_v26   ;;  %517 = vst.msk [vmem:[%s1255_s1 + $0x18] sm:$0x1] %vm3_vm8, %v84_v27  }
  0x8c   :  { %v91_v28 = vpop.permute.xlu0 %90   ;;  %v98_v29 = vpop.permute.xlu1 %97  }
  0x8d   :  { %519 = vst.msk [vmem:[%s1255_s1 + $0x9] sm:$0x1] %vm3_vm8, %v91_v28   ;;  %521 = vst.msk [vmem:[%s1255_s1 + $0x3e] sm:$0x1] %vm3_vm8, %v98_v29  }
  0x90   :  { %v105_v30 = vpop.permute.xlu0 %104   ;;  %v112_v31 = vpop.permute.xlu1 %111  }
  0x91   :  { %523 = vst.msk [vmem:[%s1255_s1 + $0x2f] sm:$0x1] %vm3_vm8, %v105_v30   ;;  %525 = vst.msk [vmem:[%s1255_s1 + $0x20] sm:$0x1] %vm3_vm8, %v112_v31  }
  0x94   :  { %v119_v32 = vpop.permute.xlu0 %118   ;;  %v125_v33 = vpop.permute.xlu1 %124  }
  0x95   :  { %527 = vst.msk [vmem:[%s1255_s1 + $0x11] sm:$0x1] %vm3_vm8, %v119_v32   ;;  %528 = vst.msk [vmem:[%s1255_s1 + $0x2] sm:$0x1] %vm3_vm8, %v125_v33  }
  0x98   :  { %v132_v34 = vpop.permute.xlu0 %131   ;;  %v139_v35 = vpop.permute.xlu1 %138  }
  0x99   :  { %530 = vst.msk [vmem:[%s1255_s1 + $0x37] sm:$0x1] %vm3_vm8, %v132_v34   ;;  %532 = vst.msk [vmem:[%s1255_s1 + $0x28] sm:$0x1] %vm3_vm8, %v139_v35  }
  0x9c   :  { %v146_v36 = vpop.permute.xlu0 %145   ;;  %v153_v37 = vpop.permute.xlu1 %152  }
  0x9d   :  { %534 = vst.msk [vmem:[%s1255_s1 + $0x19] sm:$0x1] %vm3_vm8, %v146_v36   ;;  %536 = vst.msk [vmem:[%s1255_s1 + $0xa] sm:$0x1] %vm3_vm8, %v153_v37  }
  0xa0   :  { %v160_v38 = vpop.permute.xlu0 %159   ;;  %v167_v39 = vpop.permute.xlu1 %166  }
  0xa1   :  { %538 = vst.msk [vmem:[%s1255_s1 + $0x3f] sm:$0x1] %vm3_vm8, %v160_v38   ;;  %540 = vst.msk [vmem:[%s1255_s1 + $0x30] sm:$0x1] %vm3_vm8, %v167_v39  }
  0xa4   :  { %v174_v40 = vpop.permute.xlu0 %173   ;;  %v181_v41 = vpop.permute.xlu1 %180  }
  0xa5   :  { %542 = vst.msk [vmem:[%s1255_s1 + $0x21] sm:$0x1] %vm3_vm8, %v174_v40   ;;  %544 = vst.msk [vmem:[%s1255_s1 + $0x12] sm:$0x1] %vm3_vm8, %v181_v41  }
  0xa8   :  { %v187_v42 = vpop.permute.xlu0 %186   ;;  %v194_v43 = vpop.permute.xlu1 %193  }
  0xa9   :  { %545 = vst.msk [vmem:[%s1255_s1 + $0x3] sm:$0x1] %vm3_vm8, %v187_v42   ;;  %547 = vst.msk [vmem:[%s1255_s1 + $0x38] sm:$0x1] %vm3_vm8, %v194_v43  }
  0xac   :  { %v201_v44 = vpop.permute.xlu0 %200   ;;  %v208_v45 = vpop.permute.xlu1 %207  }
  0xad   :  { %549 = vst.msk [vmem:[%s1255_s1 + $0x29] sm:$0x1] %vm3_vm8, %v201_v44   ;;  %551 = vst.msk [vmem:[%s1255_s1 + $0x1a] sm:$0x1] %vm3_vm8, %v208_v45  }
  0xb0   :  { %v215_v46 = vpop.permute.xlu0 %214   ;;  %v222_v47 = vpop.permute.xlu1 %221  }
  0xb1   :  { %553 = vst.msk [vmem:[%s1255_s1 + $0xb] sm:$0x1] %vm3_vm8, %v215_v46   ;;  %555 = vst.msk [vmem:[%s1255_s1 + $0x31] sm:$0x1] %vm3_vm8, %v222_v47  }
  0xb4   :  { %v229_v48 = vpop.permute.xlu0 %228   ;;  %v236_v49 = vpop.permute.xlu1 %235  }
  0xb5   :  { %557 = vst.msk [vmem:[%s1255_s1 + $0x22] sm:$0x1] %vm3_vm8, %v229_v48   ;;  %559 = vst.msk [vmem:[%s1255_s1 + $0x13] sm:$0x1] %vm3_vm8, %v236_v49  }
  0xb8   :  { %v391_v50 = vpop.permute.xlu0 %390   ;;  %v405_v51 = vpop.permute.xlu1 %404  }
  0xb9   :  { %601 = vst.msk [vmem:[%s1255_s1 + $0x34] sm:$0x1] %vm392_vm9, %v391_v50   ;;  %vm492_vm9 = vcmask 138248  }
  0xba   :  { %605 = vst.msk [vmem:[%s1255_s1 + $0x25] sm:$0x1] %vm406_vm10, %v405_v51  }
  0xbb   :  { %602 = vst.msk [vmem:[%s1255_s1 + $0x34] sm:$0x1] %vm395_vm11, %v391_v50  }
  0xbc   :  { %606 = vst.msk [vmem:[%s1255_s1 + $0x25] sm:$0x1] %vm409_vm12, %v405_v51   ;;  %v419_v52 = vpop.permute.xlu0 %418   ;;  %v432_v53 = vpop.permute.xlu1 %431  }
  0xbd   :  { %609 = vst.msk [vmem:[%s1255_s1 + $0x16] sm:$0x1] %vm420_vm13, %v419_v52  }
  0xbe   :  { %612 = vst.msk [vmem:[%s1255_s1 + $0x7] sm:$0x1] %vm433_vm14, %v432_v53  }
  0xbf   :  { %610 = vst.msk [vmem:[%s1255_s1 + $0x16] sm:$0x1] %vm423_vm15, %v419_v52  }
  0xc0   :  { %613 = vst.msk [vmem:[%s1255_s1 + $0x7] sm:$0x1] %vm436_vm0, %v432_v53   ;;  %v446_v54 = vpop.permute.xlu0 %445   ;;  %v460_v55 = vpop.permute.xlu1 %459  }
  0xc1   :  { %616 = vst.msk [vmem:[%s1255_s1 + $0x3c] sm:$0x1] %vm447_vm1, %v446_v54  }
  0xc2   :  { %620 = vst.msk [vmem:[%s1255_s1 + $0x2d] sm:$0x1] %vm461_vm2, %v460_v55  }
  0xc3   :  { %617 = vst.msk [vmem:[%s1255_s1 + $0x3c] sm:$0x1] %vm450_vm3, %v446_v54  }
  0xc4   :  { %621 = vst.msk [vmem:[%s1255_s1 + $0x2d] sm:$0x1] %vm464_vm4, %v460_v55   ;;  %v474_v56 = vpop.permute.xlu0 %473   ;;  %v488_v57 = vpop.permute.xlu1 %487  }
  0xc5   :  { %624 = vst.msk [vmem:[%s1255_s1 + $0x1e] sm:$0x1] %vm475_vm5, %v474_v56  }
  0xc6   :  { %628 = vst.msk [vmem:[%s1255_s1 + $0xf] sm:$0x1] %vm489_vm6, %v488_v57  }
  0xc7   :  { %625 = vst.msk [vmem:[%s1255_s1 + $0x1e] sm:$0x1] %vm478_vm7, %v474_v56  }
  0xc8   :  { %629 = vst.msk [vmem:[%s1255_s1 + $0xf] sm:$0x1] %vm492_vm9, %v488_v57   ;;  %v242_v58 = vpop.permute.xlu0 %241   ;;  %v249_v59 = vpop.permute.xlu1 %248  }
  0xc9   :  { %560 = vst.msk [vmem:[%s1255_s1 + $0x4] sm:$0x1] %vm3_vm8, %v242_v58   ;;  %562 = vst.msk [vmem:[%s1255_s1 + $0x39] sm:$0x1] %vm3_vm8, %v249_v59  }
  0xcc   :  { %v256_v60 = vpop.permute.xlu0 %255   ;;  %v263_v61 = vpop.permute.xlu1 %262  }
  0xcd   :  { %564 = vst.msk [vmem:[%s1255_s1 + $0x2a] sm:$0x1] %vm3_vm8, %v256_v60   ;;  %566 = vst.msk [vmem:[%s1255_s1 + $0x1b] sm:$0x1] %vm3_vm8, %v263_v61  }
  0xd0   :  { %v270_v62 = vpop.permute.xlu0 %269   ;;  %v277_v63 = vpop.permute.xlu1 %276  }
  0xd1   :  { %568 = vst.msk [vmem:[%s1255_s1 + $0xc] sm:$0x1] %vm3_vm8, %v270_v62   ;;  %570 = vst.msk [vmem:[%s1255_s1 + $0x32] sm:$0x1] %vm3_vm8, %v277_v63  }
  0xd4   :  { %v284_v0 = vpop.permute.xlu0 %283   ;;  %v291_v1 = vpop.permute.xlu1 %290  }
  0xd5   :  { %572 = vst.msk [vmem:[%s1255_s1 + $0x23] sm:$0x1] %vm3_vm8, %v284_v0   ;;  %574 = vst.msk [vmem:[%s1255_s1 + $0x14] sm:$0x1] %vm3_vm8, %v291_v1  }
  0xd8   :  { %v297_v2 = vpop.permute.xlu0 %296   ;;  %v304_v3 = vpop.permute.xlu1 %303  }
  0xd9   :  { %575 = vst.msk [vmem:[%s1255_s1 + $0x5] sm:$0x1] %vm3_vm8, %v297_v2   ;;  %577 = vst.msk [vmem:[%s1255_s1 + $0x3a] sm:$0x1] %vm3_vm8, %v304_v3  }
  0xdc   :  { %v311_v4 = vpop.permute.xlu0 %310   ;;  %v318_v5 = vpop.permute.xlu1 %317  }
  0xdd   :  { %579 = vst.msk [vmem:[%s1255_s1 + $0x2b] sm:$0x1] %vm3_vm8, %v311_v4   ;;  %581 = vst.msk [vmem:[%s1255_s1 + $0x1c] sm:$0x1] %vm3_vm8, %v318_v5  }
  0xe0   :  { %v325_v6 = vpop.permute.xlu0 %324   ;;  %v332_v7 = vpop.permute.xlu1 %331  }
  0xe1   :  { %583 = vst.msk [vmem:[%s1255_s1 + $0xd] sm:$0x1] %vm3_vm8, %v325_v6   ;;  %585 = vst.msk [vmem:[%s1255_s1 + $0x33] sm:$0x1] %vm3_vm8, %v332_v7  }
  0xe4   :  { %v339_v8 = vpop.permute.xlu0 %338   ;;  %v346_v9 = vpop.permute.xlu1 %345  }
  0xe5   :  { %587 = vst.msk [vmem:[%s1255_s1 + $0x24] sm:$0x1] %vm3_vm8, %v339_v8   ;;  %589 = vst.msk [vmem:[%s1255_s1 + $0x15] sm:$0x1] %vm3_vm8, %v346_v9  }
  0xe8   :  { %v352_v10 = vpop.permute.xlu0 %351   ;;  %v359_v11 = vpop.permute.xlu1 %358  }
  0xe9   :  { %590 = vst.msk [vmem:[%s1255_s1 + $0x6] sm:$0x1] %vm3_vm8, %v352_v10   ;;  %592 = vst.msk [vmem:[%s1255_s1 + $0x3b] sm:$0x1] %vm3_vm8, %v359_v11  }
  0xec   :  { %v366_v12 = vpop.permute.xlu0 %365   ;;  %v373_v13 = vpop.permute.xlu1 %372  }
  0xed   :  { %594 = vst.msk [vmem:[%s1255_s1 + $0x2c] sm:$0x1] %vm3_vm8, %v366_v12   ;;  %596 = vst.msk [vmem:[%s1255_s1 + $0x1d] sm:$0x1] %vm3_vm8, %v373_v13  }
  0xf0   :  { %v380_v14 = vpop.permute.xlu0 %379  }
  0xf1   :  { %598 = vst.msk [vmem:[%s1255_s1 + $0xe] sm:$0x1] %vm3_vm8, %v380_v14  }

// kernel: squeeze.20
= control target key start
LH: loop header
LB: loop body
LE: loop exit
PB: predicated region body
PF: predicated region fallthrough
CT: control target
= control target key end

     0   :  { %s643_s10 = smov 127   ;;  %s644_s11 = smov 123   ;;  %vm409_vm0 = vcmask 982016   ;;  %vm423_vm1 = vcmask 998400   ;;  %vm437_vm2 = vcmask 1014784   ;;  %vm450_vm3 = vcmask 1031168   ;;  %s1184_s0 = inlined_call_operand.vmem [shape: f32[576], index: 0, kind: input, shape index: {}]   ;;  %s1185_s1 = inlined_call_operand.vmem [shape: f32[8,8,9,1], index: 1, kind: output, shape index: {}]  }
   0x1   :  { %v460_v0 = vld [vmem:[%s1184_s0 + $0x4] sm:$0x1]   ;;  %v464_v1 = vld [vmem:[%s1184_s0 + $0x2] sm:$0x1]   ;;  %v462_v2 = vld [vmem:[%s1184_s0 + $0x3] sm:$0x1]  }
   0x2   :  { %7 = vrot.lane.b32.xlu0 %v460_v0, %s643_s10  ;;  %21 = vrot.lane.b32.xlu1 %v464_v1, %s644_s11  ;;  %v466_v3 = vld [vmem:[%s1184_s0 + $0x1] sm:$0x1]   ;;  %s645_s16 = smov 125   ;;  %s646_s17 = smov 121   ;;  %v33_v4 = vld [vmem:[%s1184_s0] sm:$0x1]  }
   0x3   :  { %v469_v5 = vld [vmem:[%s1184_s0 + $0x4] sm:$0x1]   ;;  %s647_s22 = smov 119   ;;  %s648_s23 = smov 118   ;;  %v471_v6 = vld [vmem:[%s1184_s0 + $0x3] sm:$0x1]  }
   0x4   :  { %v473_v7 = vld [vmem:[%s1184_s0 + $0x2] sm:$0x1]   ;;  %s649_s28 = smov 116   ;;  %s650_s29 = smov 114   ;;  %v475_v8 = vld [vmem:[%s1184_s0 + $0x1] sm:$0x1]  }
   0x5   :  { %v67_v9 = vld [vmem:[%s1184_s0] sm:$0x1]   ;;  %s651_s5 = smov 112   ;;  %s652_s6 = smov 110   ;;  %v478_v10 = vld [vmem:[%s1184_s0 + $0x4] sm:$0x1]  }
   0x6   :  { %14 = vrot.lane.b32.xlu0 %v462_v2, %s645_s16  ;;  %28 = vrot.lane.b32.xlu1 %v466_v3, %s646_s17  ;;  %v480_v11 = vld [vmem:[%s1184_s0 + $0x3] sm:$0x1]   ;;  %s653_s11 = smov 109   ;;  %s654_s12 = smov 107   ;;  %v482_v12 = vld [vmem:[%s1184_s0 + $0x2] sm:$0x1]  }
   0x7   :  { %v484_v13 = vld [vmem:[%s1184_s0 + $0x1] sm:$0x1]   ;;  %s655_s17 = smov 105   ;;  %s656_s18 = smov 103   ;;  %v101_v14 = vld [vmem:[%s1184_s0] sm:$0x1]  }
   0x8   :  { %v487_v15 = vld [vmem:[%s1184_s0 + $0x4] sm:$0x1]   ;;  %s658_s24 = smov 100   ;;  %v489_v16 = vld [vmem:[%s1184_s0 + $0x3] sm:$0x1]   ;;  %s660_s30 = smov 96  }
   0x9   :  { %v491_v17 = vld [vmem:[%s1184_s0 + $0x2] sm:$0x1]   ;;  %v493_v18 = vld [vmem:[%s1184_s0 + $0x1] sm:$0x1]   ;;  %v135_v19 = vld [vmem:[%s1184_s0] sm:$0x1]  }
   0xa   :  { %34 = vrot.lane.b32.xlu0 %v33_v4, %s647_s22  ;;  %41 = vrot.lane.b32.xlu1 %v469_v5, %s648_s23  ;;  %s657_s23 = smov 101   ;;  %s662_s7 = smov 92   ;;  %v496_v20 = vld [vmem:[%s1184_s0 + $0x4] sm:$0x1]   ;;  %v498_v21 = vld [vmem:[%s1184_s0 + $0x3] sm:$0x1]  }
   0xb   :  { %s664_s13 = smov 89   ;;  %v500_v22 = vld [vmem:[%s1184_s0 + $0x2] sm:$0x1]   ;;  %v502_v23 = vld [vmem:[%s1184_s0 + $0x1] sm:$0x1]   ;;  %s666_s19 = smov 85  }
   0xc   :  { %v169_v24 = vld [vmem:[%s1184_s0] sm:$0x1]   ;;  %v505_v25 = vld [vmem:[%s1184_s0 + $0x4] sm:$0x1]   ;;  %s668_s25 = smov 82   ;;  %s670_s2 = smov 78  }
   0xd   :  { %v507_v26 = vld [vmem:[%s1184_s0 + $0x3] sm:$0x1]   ;;  %v509_v27 = vld [vmem:[%s1184_s0 + $0x2] sm:$0x1]   ;;  %v511_v28 = vld [vmem:[%s1184_s0 + $0x1] sm:$0x1]  }
   0xe   :  { %48 = vrot.lane.b32.xlu0 %v471_v6, %s649_s28  ;;  %55 = vrot.lane.b32.xlu1 %v473_v7, %s650_s29  ;;  %s659_s29 = smov 98   ;;  %v203_v29 = vld [vmem:[%s1184_s0] sm:$0x1]   ;;  %s672_s8 = smov 74   ;;  %v514_v30 = vld [vmem:[%s1184_s0 + $0x4] sm:$0x1]  }
   0xf   :  { %v516_v31 = vld [vmem:[%s1184_s0 + $0x3] sm:$0x1]   ;;  %s674_s14 = smov 71   ;;  %v518_v32 = vld [vmem:[%s1184_s0 + $0x2] sm:$0x1]   ;;  %s675_s27 = smov 69  }
  0x10   :  { %v520_v33 = vld [vmem:[%s1184_s0 + $0x1] sm:$0x1]   ;;  %v565_v34 = vld [vmem:[%s1184_s0 + $0x3] sm:$0x1]   ;;  %v566_v35 = vld [vmem:[%s1184_s0 + $0x4] sm:$0x1]  }
  0x11   :  { %v569_v36 = vld [vmem:[%s1184_s0 + $0x2] sm:$0x1]   ;;  %v570_v37 = vld [vmem:[%s1184_s0 + $0x3] sm:$0x1]   ;;  %s676_s28 = smov 67   ;;  %v410_v38 = vsel %vm409_vm0, %v566_v35, %v565_v34  ;;  %s678_s9 = smov 6  }
  0x12   :  { %62 = vrot.lane.b32.xlu0 %v475_v8, %s651_s5  ;;  %68 = vrot.lane.b32.xlu1 %v67_v9, %s652_s6  ;;  %s661_s6 = smov 94   ;;  %v424_v39 = vsel %vm423_vm1, %v570_v37, %v569_v36  ;;  %v573_v40 = vld [vmem:[%s1184_s0 + $0x1] sm:$0x1]   ;;  %v574_v41 = vld [vmem:[%s1184_s0 + $0x2] sm:$0x1]   ;;  %s679_s10 = smov 4  }
  0x13   :  { %v447_v42 = vld [vmem:[%s1184_s0] sm:$0x1]   ;;  %v577_v43 = vld [vmem:[%s1184_s0 + $0x1] sm:$0x1]   ;;  %v438_v44 = vsel %vm437_vm2, %v574_v41, %v573_v40  ;;  %v523_v47 = vld [vmem:[%s1184_s0 + $0x3] sm:$0x1]  }
  0x14   :  { %v451_v45 = vsel %vm450_vm3, %v577_v43, %v447_v42  ;;  %v237_v46 = vld [vmem:[%s1184_s0] sm:$0x1]   ;;  %s681_s16 = smov 65   ;;  %v525_v48 = vld [vmem:[%s1184_s0 + $0x2] sm:$0x1]   ;;  %s683_s22 = smov 60  }
  0x15   :  { %v527_v49 = vld [vmem:[%s1184_s0 + $0x1] sm:$0x1]   ;;  %v264_v50 = vld [vmem:[%s1184_s0] sm:$0x1]   ;;  %v530_v51 = vld [vmem:[%s1184_s0 + $0x3] sm:$0x1]  }
  0x16   :  { %75 = vrot.lane.b32.xlu0 %v478_v10, %s653_s11  ;;  %82 = vrot.lane.b32.xlu1 %v480_v11, %s654_s12  ;;  %s663_s12 = smov 91   ;;  %s680_s11 = smov 2   ;;  %v532_v52 = vld [vmem:[%s1184_s0 + $0x2] sm:$0x1]   ;;  %v534_v53 = vld [vmem:[%s1184_s0 + $0x1] sm:$0x1]  }
  0x17   :  { %s687_s5 = smov 51   ;;  %v291_v54 = vld [vmem:[%s1184_s0] sm:$0x1]   ;;  %v537_v55 = vld [vmem:[%s1184_s0 + $0x3] sm:$0x1]   ;;  %vm3_vm4 = vcmask 72704  }
  0x18   :  { %v539_v56 = vld [vmem:[%s1184_s0 + $0x2] sm:$0x1]   ;;  %v541_v57 = vld [vmem:[%s1184_s0 + $0x1] sm:$0x1]   ;;  %v318_v58 = vld [vmem:[%s1184_s0] sm:$0x1]  }
  0x19   :  { %v544_v59 = vld [vmem:[%s1184_s0 + $0x3] sm:$0x1]   ;;  %v546_v60 = vld [vmem:[%s1184_s0 + $0x2] sm:$0x1]   ;;  %v548_v61 = vld [vmem:[%s1184_s0 + $0x1] sm:$0x1]  }
  0x1a   :  { %89 = vrot.lane.b32.xlu0 %v482_v12, %s655_s17  ;;  %96 = vrot.lane.b32.xlu1 %v484_v13, %s656_s18  ;;  %s665_s18 = smov 87   ;;  %s682_s17 = smov 62   ;;  %v345_v62 = vld [vmem:[%s1184_s0] sm:$0x1]   ;;  %v551_v63 = vld [vmem:[%s1184_s0 + $0x3] sm:$0x1]  }
  0x1b   :  { %v553_v0 = vld [vmem:[%s1184_s0 + $0x2] sm:$0x1]   ;;  %v555_v1 = vld [vmem:[%s1184_s0 + $0x1] sm:$0x1]   ;;  %v2_v2 = vld [vmem:[%s1184_s0] sm:$0x1]  }
  0x1c   :  { %4 = vst.msk [vmem:[%s1185_s1] sm:$0x1] %vm3_vm4, %v2_v2   ;;  %v372_v3 = vld [vmem:[%s1184_s0] sm:$0x1]   ;;  %v558_v4 = vld [vmem:[%s1184_s0 + $0x3] sm:$0x1]  }
  0x1d   :  { %s701_s26 = smov 20   ;;  %v560_v7 = vld [vmem:[%s1184_s0 + $0x2] sm:$0x1]   ;;  %v562_v8 = vld [vmem:[%s1184_s0 + $0x1] sm:$0x1]   ;;  %vm413_vm5 = vcmask 64512  }
  0x1e   :  { %102 = vrot.lane.b32.xlu0 %v101_v14, %s657_s23  ;;  %109 = vrot.lane.b32.xlu1 %v487_v15, %s658_s24  ;;  %s667_s24 = smov 83   ;;  %s684_s23 = smov 58   ;;  %v399_v11 = vld [vmem:[%s1184_s0] sm:$0x1]   ;;  %vm427_vm6 = vcmask 48128   ;;  %vm416_vm7 = vcmask 72768  }
  0x1f   :  { %vm430_vm8 = vcmask 72752   ;;  %vm441_vm9 = vcmask 31744   ;;  %vm454_vm10 = vcmask 15360   ;;  %vm444_vm11 = vcmask 72736  }
  0x20   :  { %vm457_vm12 = vcmask 72720  }
  0x22   :  { %116 = vrot.lane.b32.xlu0 %v489_v16, %s659_s29  ;;  %123 = vrot.lane.b32.xlu1 %v491_v17, %s660_s30  ;;  %s669_s30 = smov 80   ;;  %s686_s29 = smov 53  }
  0x26   :  { %130 = vrot.lane.b32.xlu0 %v493_v18, %s661_s6  ;;  %136 = vrot.lane.b32.xlu1 %v135_v19, %s662_s7  ;;  %s671_s7 = smov 76   ;;  %s688_s6 = smov 49  }
  0x2a   :  { %143 = vrot.lane.b32.xlu0 %v496_v20, %s663_s12  ;;  %150 = vrot.lane.b32.xlu1 %v498_v21, %s664_s13  ;;  %s673_s13 = smov 73   ;;  %s690_s12 = smov 44  }
  0x2e   :  { %157 = vrot.lane.b32.xlu0 %v500_v22, %s665_s18  ;;  %164 = vrot.lane.b32.xlu1 %v502_v23, %s666_s19  ;;  %s692_s18 = smov 40  }
  0x32   :  { %170 = vrot.lane.b32.xlu0 %v169_v24, %s667_s24  ;;  %177 = vrot.lane.b32.xlu1 %v505_v25, %s668_s25  ;;  %s694_s24 = smov 35  }
  0x36   :  { %184 = vrot.lane.b32.xlu0 %v507_v26, %s669_s30  ;;  %191 = vrot.lane.b32.xlu1 %v509_v27, %s670_s2  ;;  %s696_s30 = smov 31  }
  0x3a   :  { %198 = vrot.lane.b32.xlu0 %v511_v28, %s671_s7  ;;  %204 = vrot.lane.b32.xlu1 %v203_v29, %s672_s8  ;;  %s677_s8 = smov 8   ;;  %s698_s7 = smov 26  }
  0x3e   :  { %211 = vrot.lane.b32.xlu0 %v514_v30, %s673_s13  ;;  %218 = vrot.lane.b32.xlu1 %v516_v31, %s674_s14  ;;  %s705_s14 = smov 11  }
  0x42   :  { %225 = vrot.lane.b32.xlu0 %v518_v32, %s675_s27  ;;  %232 = vrot.lane.b32.xlu1 %v520_v33, %s676_s28  ;;  %s685_s28 = smov 56   ;;  %s702_s27 = smov 17  }
  0x46   :  { %411 = vrot.lane.b32.xlu0 %v410_v38, %s677_s8  ;;  %425 = vrot.lane.b32.xlu1 %v424_v39, %s678_s9  ;;  %s704_s8 = smov 13  }
  0x4a   :  { %439 = vrot.lane.b32.xlu0 %v438_v44, %s679_s10  ;;  %452 = vrot.lane.b32.xlu1 %v451_v45, %s680_s11  ;;  %s689_s11 = smov 47  }
  0x4e   :  { %238 = vrot.lane.b32.xlu0 %v237_v46, %s681_s16  ;;  %245 = vrot.lane.b32.xlu1 %v523_v47, %s682_s17  ;;  %s691_s17 = smov 42   ;;  %s699_s16 = smov 24  }
  0x52   :  { %252 = vrot.lane.b32.xlu0 %v525_v48, %s683_s22  ;;  %259 = vrot.lane.b32.xlu1 %v527_v49, %s684_s23  ;;  %s693_s23 = smov 38  }
  0x56   :  { %265 = vrot.lane.b32.xlu0 %v264_v50, %s685_s28  ;;  %272 = vrot.lane.b32.xlu1 %v530_v51, %s686_s29  ;;  %s695_s29 = smov 33  }
  0x5a   :  { %279 = vrot.lane.b32.xlu0 %v532_v52, %s687_s5  ;;  %286 = vrot.lane.b32.xlu1 %v534_v53, %s688_s6  ;;  %s697_s6 = smov 29  }
  0x5e   :  { %292 = vrot.lane.b32.xlu0 %v291_v54, %s689_s11  ;;  %299 = vrot.lane.b32.xlu1 %v537_v55, %s690_s12 }
  0x62   :  { %306 = vrot.lane.b32.xlu0 %v539_v56, %s691_s17  ;;  %313 = vrot.lane.b32.xlu1 %v541_v57, %s692_s18  ;;  %s700_s17 = smov 22  }
  0x66   :  { %319 = vrot.lane.b32.xlu0 %v318_v58, %s693_s23  ;;  %326 = vrot.lane.b32.xlu1 %v544_v59, %s694_s24 }
  0x6a   :  { %333 = vrot.lane.b32.xlu0 %v546_v60, %s695_s29  ;;  %340 = vrot.lane.b32.xlu1 %v548_v61, %s696_s30 }
  0x6e   :  { %346 = vrot.lane.b32.xlu0 %v345_v62, %s697_s6  ;;  %353 = vrot.lane.b32.xlu1 %v551_v63, %s698_s7  ;;  %s703_s7 = smov 15  }
  0x72   :  { %360 = vrot.lane.b32.xlu0 %v553_v0, %s699_s16  ;;  %367 = vrot.lane.b32.xlu1 %v555_v1, %s700_s17 }
  0x74   :  { %v8_v5 = vpop.permute.xlu0 %7   ;;  %v22_v6 = vpop.permute.xlu1 %21  }
  0x75   :  { %461 = vst.msk [vmem:[%s1185_s1 + $0x39] sm:$0x1] %vm3_vm4, %v8_v5   ;;  %465 = vst.msk [vmem:[%s1185_s1 + $0x1d] sm:$0x1] %vm3_vm4, %v22_v6  }
  0x76   :  { %373 = vrot.lane.b32.xlu0 %v372_v3, %s701_s26  ;;  %380 = vrot.lane.b32.xlu1 %v558_v4, %s702_s27 }
  0x78   :  { %v15_v9 = vpop.permute.xlu0 %14   ;;  %v29_v10 = vpop.permute.xlu1 %28  }
  0x79   :  { %463 = vst.msk [vmem:[%s1185_s1 + $0x2b] sm:$0x1] %vm3_vm4, %v15_v9   ;;  %467 = vst.msk [vmem:[%s1185_s1 + $0xf] sm:$0x1] %vm3_vm4, %v29_v10  }
  0x7a   :  { %387 = vrot.lane.b32.xlu0 %v560_v7, %s703_s7  ;;  %394 = vrot.lane.b32.xlu1 %v562_v8, %s704_s8 }
  0x7c   :  { %v35_v12 = vpop.permute.xlu0 %34   ;;  %v42_v13 = vpop.permute.xlu1 %41  }
  0x7d   :  { %468 = vst.msk [vmem:[%s1185_s1 + $0x1] sm:$0x1] %vm3_vm4, %v35_v12   ;;  %470 = vst.msk [vmem:[%s1185_s1 + $0x3a] sm:$0x1] %vm3_vm4, %v42_v13  }
  0x7e   :  { %400 = vrot.lane.b32.xlu0 %v399_v11, %s705_s14 }
  0x80   :  { %v49_v14 = vpop.permute.xlu0 %48   ;;  %v56_v15 = vpop.permute.xlu1 %55  }
  0x81   :  { %472 = vst.msk [vmem:[%s1185_s1 + $0x2c] sm:$0x1] %vm3_vm4, %v49_v14   ;;  %474 = vst.msk [vmem:[%s1185_s1 + $0x1e] sm:$0x1] %vm3_vm4, %v56_v15  }
  0x84   :  { %v63_v16 = vpop.permute.xlu0 %62   ;;  %v69_v17 = vpop.permute.xlu1 %68  }
  0x85   :  { %476 = vst.msk [vmem:[%s1185_s1 + $0x10] sm:$0x1] %vm3_vm4, %v63_v16   ;;  %477 = vst.msk [vmem:[%s1185_s1 + $0x2] sm:$0x1] %vm3_vm4, %v69_v17  }
  0x88   :  { %v76_v18 = vpop.permute.xlu0 %75   ;;  %v83_v19 = vpop.permute.xlu1 %82  }
  0x89   :  { %479 = vst.msk [vmem:[%s1185_s1 + $0x3b] sm:$0x1] %vm3_vm4, %v76_v18   ;;  %481 = vst.msk [vmem:[%s1185_s1 + $0x2d] sm:$0x1] %vm3_vm4, %v83_v19  }
  0x8c   :  { %v90_v20 = vpop.permute.xlu0 %89   ;;  %v97_v21 = vpop.permute.xlu1 %96  }
  0x8d   :  { %483 = vst.msk [vmem:[%s1185_s1 + $0x1f] sm:$0x1] %vm3_vm4, %v90_v20   ;;  %485 = vst.msk [vmem:[%s1185_s1 + $0x11] sm:$0x1] %vm3_vm4, %v97_v21  }
  0x90   :  { %v103_v22 = vpop.permute.xlu0 %102   ;;  %v110_v23 = vpop.permute.xlu1 %109  }
  0x91   :  { %486 = vst.msk [vmem:[%s1185_s1 + $0x3] sm:$0x1] %vm3_vm4, %v103_v22   ;;  %488 = vst.msk [vmem:[%s1185_s1 + $0x3c] sm:$0x1] %vm3_vm4, %v110_v23  }
  0x94   :  { %v117_v24 = vpop.permute.xlu0 %116   ;;  %v124_v25 = vpop.permute.xlu1 %123  }
  0x95   :  { %490 = vst.msk [vmem:[%s1185_s1 + $0x2e] sm:$0x1] %vm3_vm4, %v117_v24   ;;  %492 = vst.msk [vmem:[%s1185_s1 + $0x20] sm:$0x1] %vm3_vm4, %v124_v25  }
  0x98   :  { %v131_v26 = vpop.permute.xlu0 %130   ;;  %v137_v27 = vpop.permute.xlu1 %136  }
  0x99   :  { %494 = vst.msk [vmem:[%s1185_s1 + $0x12] sm:$0x1] %vm3_vm4, %v131_v26   ;;  %495 = vst.msk [vmem:[%s1185_s1 + $0x4] sm:$0x1] %vm3_vm4, %v137_v27  }
  0x9c   :  { %v144_v28 = vpop.permute.xlu0 %143   ;;  %v151_v29 = vpop.permute.xlu1 %150  }
  0x9d   :  { %497 = vst.msk [vmem:[%s1185_s1 + $0x3d] sm:$0x1] %vm3_vm4, %v144_v28   ;;  %499 = vst.msk [vmem:[%s1185_s1 + $0x2f] sm:$0x1] %vm3_vm4, %v151_v29  }
  0xa0   :  { %v158_v30 = vpop.permute.xlu0 %157   ;;  %v165_v31 = vpop.permute.xlu1 %164  }
  0xa1   :  { %501 = vst.msk [vmem:[%s1185_s1 + $0x21] sm:$0x1] %vm3_vm4, %v158_v30   ;;  %503 = vst.msk [vmem:[%s1185_s1 + $0x13] sm:$0x1] %vm3_vm4, %v165_v31  }
  0xa4   :  { %v171_v32 = vpop.permute.xlu0 %170   ;;  %v178_v33 = vpop.permute.xlu1 %177  }
  0xa5   :  { %504 = vst.msk [vmem:[%s1185_s1 + $0x5] sm:$0x1] %vm3_vm4, %v171_v32   ;;  %506 = vst.msk [vmem:[%s1185_s1 + $0x3e] sm:$0x1] %vm3_vm4, %v178_v33  }
  0xa8   :  { %v185_v34 = vpop.permute.xlu0 %184   ;;  %v192_v35 = vpop.permute.xlu1 %191  }
  0xa9   :  { %508 = vst.msk [vmem:[%s1185_s1 + $0x30] sm:$0x1] %vm3_vm4, %v185_v34   ;;  %510 = vst.msk [vmem:[%s1185_s1 + $0x22] sm:$0x1] %vm3_vm4, %v192_v35  }
  0xac   :  { %v199_v36 = vpop.permute.xlu0 %198   ;;  %v205_v37 = vpop.permute.xlu1 %204  }
  0xad   :  { %512 = vst.msk [vmem:[%s1185_s1 + $0x14] sm:$0x1] %vm3_vm4, %v199_v36   ;;  %513 = vst.msk [vmem:[%s1185_s1 + $0x6] sm:$0x1] %vm3_vm4, %v205_v37  }
  0xb0   :  { %v212_v38 = vpop.permute.xlu0 %211   ;;  %v219_v39 = vpop.permute.xlu1 %218  }
  0xb1   :  { %515 = vst.msk [vmem:[%s1185_s1 + $0x3f] sm:$0x1] %vm3_vm4, %v212_v38   ;;  %517 = vst.msk [vmem:[%s1185_s1 + $0x31] sm:$0x1] %vm3_vm4, %v219_v39  }
  0xb4   :  { %v226_v40 = vpop.permute.xlu0 %225   ;;  %v233_v41 = vpop.permute.xlu1 %232  }
  0xb5   :  { %519 = vst.msk [vmem:[%s1185_s1 + $0x23] sm:$0x1] %vm3_vm4, %v226_v40   ;;  %521 = vst.msk [vmem:[%s1185_s1 + $0x15] sm:$0x1] %vm3_vm4, %v233_v41  }
  0xb8   :  { %v412_v42 = vpop.permute.xlu0 %411   ;;  %v426_v43 = vpop.permute.xlu1 %425  }
  0xb9   :  { %567 = vst.msk [vmem:[%s1185_s1 + $0x38] sm:$0x1] %vm413_vm5, %v412_v42  }
  0xba   :  { %571 = vst.msk [vmem:[%s1185_s1 + $0x2a] sm:$0x1] %vm427_vm6, %v426_v43  }
  0xbb   :  { %568 = vst.msk [vmem:[%s1185_s1 + $0x38] sm:$0x1] %vm416_vm7, %v412_v42  }
  0xbc   :  { %572 = vst.msk [vmem:[%s1185_s1 + $0x2a] sm:$0x1] %vm430_vm8, %v426_v43   ;;  %v440_v44 = vpop.permute.xlu0 %439   ;;  %v453_v45 = vpop.permute.xlu1 %452  }
  0xbd   :  { %575 = vst.msk [vmem:[%s1185_s1 + $0x1c] sm:$0x1] %vm441_vm9, %v440_v44  }
  0xbe   :  { %578 = vst.msk [vmem:[%s1185_s1 + $0xe] sm:$0x1] %vm454_vm10, %v453_v45  }
  0xbf   :  { %576 = vst.msk [vmem:[%s1185_s1 + $0x1c] sm:$0x1] %vm444_vm11, %v440_v44  }
  0xc0   :  { %579 = vst.msk [vmem:[%s1185_s1 + $0xe] sm:$0x1] %vm457_vm12, %v453_v45   ;;  %v239_v46 = vpop.permute.xlu0 %238   ;;  %v246_v47 = vpop.permute.xlu1 %245  }
  0xc1   :  { %522 = vst.msk [vmem:[%s1185_s1 + $0x7] sm:$0x1] %vm3_vm4, %v239_v46   ;;  %524 = vst.msk [vmem:[%s1185_s1 + $0x32] sm:$0x1] %vm3_vm4, %v246_v47  }
  0xc4   :  { %v253_v48 = vpop.permute.xlu0 %252   ;;  %v260_v49 = vpop.permute.xlu1 %259  }
  0xc5   :  { %526 = vst.msk [vmem:[%s1185_s1 + $0x24] sm:$0x1] %vm3_vm4, %v253_v48   ;;  %528 = vst.msk [vmem:[%s1185_s1 + $0x16] sm:$0x1] %vm3_vm4, %v260_v49  }
  0xc8   :  { %v266_v50 = vpop.permute.xlu0 %265   ;;  %v273_v51 = vpop.permute.xlu1 %272  }
  0xc9   :  { %529 = vst.msk [vmem:[%s1185_s1 + $0x8] sm:$0x1] %vm3_vm4, %v266_v50   ;;  %531 = vst.msk [vmem:[%s1185_s1 + $0x33] sm:$0x1] %vm3_vm4, %v273_v51  }
  0xcc   :  { %v280_v52 = vpop.permute.xlu0 %279   ;;  %v287_v53 = vpop.permute.xlu1 %286  }
  0xcd   :  { %533 = vst.msk [vmem:[%s1185_s1 + $0x25] sm:$0x1] %vm3_vm4, %v280_v52   ;;  %535 = vst.msk [vmem:[%s1185_s1 + $0x17] sm:$0x1] %vm3_vm4, %v287_v53  }
  0xd0   :  { %v293_v54 = vpop.permute.xlu0 %292   ;;  %v300_v55 = vpop.permute.xlu1 %299  }
  0xd1   :  { %536 = vst.msk [vmem:[%s1185_s1 + $0x9] sm:$0x1] %vm3_vm4, %v293_v54   ;;  %538 = vst.msk [vmem:[%s1185_s1 + $0x34] sm:$0x1] %vm3_vm4, %v300_v55  }
  0xd4   :  { %v307_v56 = vpop.permute.xlu0 %306   ;;  %v314_v57 = vpop.permute.xlu1 %313  }
  0xd5   :  { %540 = vst.msk [vmem:[%s1185_s1 + $0x26] sm:$0x1] %vm3_vm4, %v307_v56   ;;  %542 = vst.msk [vmem:[%s1185_s1 + $0x18] sm:$0x1] %vm3_vm4, %v314_v57  }
  0xd8   :  { %v320_v58 = vpop.permute.xlu0 %319   ;;  %v327_v59 = vpop.permute.xlu1 %326  }
  0xd9   :  { %543 = vst.msk [vmem:[%s1185_s1 + $0xa] sm:$0x1] %vm3_vm4, %v320_v58   ;;  %545 = vst.msk [vmem:[%s1185_s1 + $0x35] sm:$0x1] %vm3_vm4, %v327_v59  }
  0xdc   :  { %v334_v60 = vpop.permute.xlu0 %333   ;;  %v341_v61 = vpop.permute.xlu1 %340  }
  0xdd   :  { %547 = vst.msk [vmem:[%s1185_s1 + $0x27] sm:$0x1] %vm3_vm4, %v334_v60   ;;  %549 = vst.msk [vmem:[%s1185_s1 + $0x19] sm:$0x1] %vm3_vm4, %v341_v61  }
  0xe0   :  { %v347_v62 = vpop.permute.xlu0 %346   ;;  %v354_v63 = vpop.permute.xlu1 %353  }
  0xe1   :  { %550 = vst.msk [vmem:[%s1185_s1 + $0xb] sm:$0x1] %vm3_vm4, %v347_v62   ;;  %552 = vst.msk [vmem:[%s1185_s1 + $0x36] sm:$0x1] %vm3_vm4, %v354_v63  }
  0xe4   :  { %v361_v0 = vpop.permute.xlu0 %360   ;;  %v368_v1 = vpop.permute.xlu1 %367  }
  0xe5   :  { %554 = vst.msk [vmem:[%s1185_s1 + $0x28] sm:$0x1] %vm3_vm4, %v361_v0   ;;  %556 = vst.msk [vmem:[%s1185_s1 + $0x1a] sm:$0x1] %vm3_vm4, %v368_v1  }
  0xe8   :  { %v374_v2 = vpop.permute.xlu0 %373   ;;  %v381_v3 = vpop.permute.xlu1 %380  }
  0xe9   :  { %557 = vst.msk [vmem:[%s1185_s1 + $0xc] sm:$0x1] %vm3_vm4, %v374_v2   ;;  %559 = vst.msk [vmem:[%s1185_s1 + $0x37] sm:$0x1] %vm3_vm4, %v381_v3  }
  0xec   :  { %v388_v4 = vpop.permute.xlu0 %387   ;;  %v395_v5 = vpop.permute.xlu1 %394  }
  0xed   :  { %561 = vst.msk [vmem:[%s1185_s1 + $0x29] sm:$0x1] %vm3_vm4, %v388_v4   ;;  %563 = vst.msk [vmem:[%s1185_s1 + $0x1b] sm:$0x1] %vm3_vm4, %v395_v5  }
  0xf0   :  { %v401_v6 = vpop.permute.xlu0 %400  }
  0xf1   :  { %564 = vst.msk [vmem:[%s1185_s1 + $0xd] sm:$0x1] %vm3_vm4, %v401_v6  }

// kernel: squeeze.24
= control target key start
LH: loop header
LB: loop body
LE: loop exit
PB: predicated region body
PF: predicated region fallthrough
CT: control target
= control target key end

     0   :  { %s693_s10 = smov 123   ;;  %s694_s11 = smov 121   ;;  %vm388_vm0 = vcmask 949248   ;;  %vm402_vm1 = vcmask 957440   ;;  %vm416_vm2 = vcmask 965632   ;;  %vm429_vm3 = vcmask 973824   ;;  %s1254_s0 = inlined_call_operand.vmem [shape: f32[1088], index: 0, kind: input, shape index: {}]   ;;  %s1255_s1 = inlined_call_operand.vmem [shape: f32[8,8,17,1], index: 1, kind: output, shape index: {}]  }
   0x1   :  { %v495_v0 = vld [vmem:[%s1254_s0 + $0x7] sm:$0x1]   ;;  %v499_v1 = vld [vmem:[%s1254_s0 + $0x3] sm:$0x1]   ;;  %v497_v2 = vld [vmem:[%s1254_s0 + $0x5] sm:$0x1]  }
   0x2   :  { %7 = vrot.lane.b32.xlu0 %v495_v0, %s693_s10  ;;  %21 = vrot.lane.b32.xlu1 %v499_v1, %s694_s11  ;;  %v501_v3 = vld [vmem:[%s1254_s0 + $0x1] sm:$0x1]   ;;  %s695_s16 = smov 122   ;;  %s696_s17 = smov 120   ;;  %v503_v4 = vld [vmem:[%s1254_s0 + $0x8] sm:$0x1]  }
   0x3   :  { %v505_v5 = vld [vmem:[%s1254_s0 + $0x6] sm:$0x1]   ;;  %s697_s22 = smov 115   ;;  %s698_s23 = smov 114   ;;  %v507_v6 = vld [vmem:[%s1254_s0 + $0x4] sm:$0x1]  }
   0x4   :  { %v509_v7 = vld [vmem:[%s1254_s0 + $0x2] sm:$0x1]   ;;  %s699_s28 = smov 113   ;;  %s700_s29 = smov 112   ;;  %v61_v8 = vld [vmem:[%s1254_s0] sm:$0x1]  }
   0x5   :  { %v512_v9 = vld [vmem:[%s1254_s0 + $0x7] sm:$0x1]   ;;  %s701_s5 = smov 111   ;;  %s702_s6 = smov 106   ;;  %v514_v10 = vld [vmem:[%s1254_s0 + $0x5] sm:$0x1]  }
   0x6   :  { %14 = vrot.lane.b32.xlu0 %v497_v2, %s695_s16  ;;  %28 = vrot.lane.b32.xlu1 %v501_v3, %s696_s17  ;;  %v516_v11 = vld [vmem:[%s1254_s0 + $0x3] sm:$0x1]   ;;  %s703_s11 = smov 105   ;;  %s704_s12 = smov 104   ;;  %v518_v12 = vld [vmem:[%s1254_s0 + $0x1] sm:$0x1]  }
   0x7   :  { %v520_v13 = vld [vmem:[%s1254_s0 + $0x8] sm:$0x1]   ;;  %s705_s17 = smov 103   ;;  %s706_s18 = smov 98   ;;  %v522_v14 = vld [vmem:[%s1254_s0 + $0x6] sm:$0x1]  }
   0x8   :  { %v524_v15 = vld [vmem:[%s1254_s0 + $0x4] sm:$0x1]   ;;  %s708_s24 = smov 96   ;;  %v526_v16 = vld [vmem:[%s1254_s0 + $0x2] sm:$0x1]   ;;  %s710_s30 = smov 94  }
   0x9   :  { %v123_v17 = vld [vmem:[%s1254_s0] sm:$0x1]   ;;  %v529_v18 = vld [vmem:[%s1254_s0 + $0x7] sm:$0x1]   ;;  %v531_v19 = vld [vmem:[%s1254_s0 + $0x5] sm:$0x1]  }
   0xa   :  { %35 = vrot.lane.b32.xlu0 %v503_v4, %s697_s22  ;;  %42 = vrot.lane.b32.xlu1 %v505_v5, %s698_s23  ;;  %s707_s23 = smov 97   ;;  %s712_s7 = smov 88   ;;  %v533_v20 = vld [vmem:[%s1254_s0 + $0x3] sm:$0x1]   ;;  %v535_v21 = vld [vmem:[%s1254_s0 + $0x1] sm:$0x1]  }
   0xb   :  { %s714_s13 = smov 86   ;;  %v537_v22 = vld [vmem:[%s1254_s0 + $0x8] sm:$0x1]   ;;  %v539_v23 = vld [vmem:[%s1254_s0 + $0x6] sm:$0x1]   ;;  %s716_s19 = smov 80  }
   0xc   :  { %v541_v24 = vld [vmem:[%s1254_s0 + $0x4] sm:$0x1]   ;;  %v543_v25 = vld [vmem:[%s1254_s0 + $0x2] sm:$0x1]   ;;  %s718_s25 = smov 78   ;;  %s720_s2 = smov 72  }
   0xd   :  { %v185_v26 = vld [vmem:[%s1254_s0] sm:$0x1]   ;;  %v546_v27 = vld [vmem:[%s1254_s0 + $0x7] sm:$0x1]   ;;  %v548_v28 = vld [vmem:[%s1254_s0 + $0x5] sm:$0x1]  }
   0xe   :  { %49 = vrot.lane.b32.xlu0 %v507_v6, %s699_s28  ;;  %56 = vrot.lane.b32.xlu1 %v509_v7, %s700_s29  ;;  %s709_s29 = smov 95   ;;  %v550_v29 = vld [vmem:[%s1254_s0 + $0x3] sm:$0x1]   ;;  %s722_s8 = smov 70   ;;  %v552_v30 = vld [vmem:[%s1254_s0 + $0x1] sm:$0x1]  }
   0xf   :  { %v554_v31 = vld [vmem:[%s1254_s0 + $0x6] sm:$0x1]   ;;  %s724_s14 = smov 63   ;;  %v556_v32 = vld [vmem:[%s1254_s0 + $0x4] sm:$0x1]   ;;  %s725_s27 = smov 62  }
  0x10   :  { %v558_v33 = vld [vmem:[%s1254_s0 + $0x2] sm:$0x1]   ;;  %v599_v34 = vld [vmem:[%s1254_s0 + $0x6] sm:$0x1]   ;;  %v600_v35 = vld [vmem:[%s1254_s0 + $0x7] sm:$0x1]  }
  0x11   :  { %v603_v36 = vld [vmem:[%s1254_s0 + $0x4] sm:$0x1]   ;;  %v604_v37 = vld [vmem:[%s1254_s0 + $0x5] sm:$0x1]   ;;  %s726_s28 = smov 61   ;;  %v389_v38 = vsel %vm388_vm0, %v600_v35, %v599_v34  ;;  %s728_s9 = smov 11  }
  0x12   :  { %62 = vrot.lane.b32.xlu0 %v61_v8, %s701_s5  ;;  %69 = vrot.lane.b32.xlu1 %v512_v9, %s702_s6  ;;  %s711_s6 = smov 89   ;;  %v403_v39 = vsel %vm402_vm1, %v604_v37, %v603_v36  ;;  %v607_v40 = vld [vmem:[%s1254_s0 + $0x2] sm:$0x1]   ;;  %v608_v41 = vld [vmem:[%s1254_s0 + $0x3] sm:$0x1]   ;;  %vm443_vm4 = vcmask 1014784  }
  0x13   :  { %v426_v42 = vld [vmem:[%s1254_s0] sm:$0x1]   ;;  %v611_v43 = vld [vmem:[%s1254_s0 + $0x1] sm:$0x1]   ;;  %v417_v44 = vsel %vm416_vm2, %v608_v41, %v607_v40  ;;  %v614_v46 = vld [vmem:[%s1254_s0 + $0x7] sm:$0x1]  }
  0x14   :  { %v430_v45 = vsel %vm429_vm3, %v611_v43, %v426_v42  ;;  %v615_v47 = vld [vmem:[%s1254_s0 + $0x8] sm:$0x1]   ;;  %v618_v48 = vld [vmem:[%s1254_s0 + $0x5] sm:$0x1]   ;;  %v619_v49 = vld [vmem:[%s1254_s0 + $0x6] sm:$0x1]  }
  0x15   :  { %vm457_vm5 = vcmask 1022976   ;;  %v444_v50 = vsel %vm443_vm4, %v615_v47, %v614_v46  ;;  %v622_v52 = vld [vmem:[%s1254_s0 + $0x3] sm:$0x1]   ;;  %v623_v53 = vld [vmem:[%s1254_s0 + $0x4] sm:$0x1]   ;;  %vm471_vm6 = vcmask 1031168  }
  0x16   :  { %76 = vrot.lane.b32.xlu0 %v514_v10, %s703_s11  ;;  %83 = vrot.lane.b32.xlu1 %v516_v11, %s704_s12  ;;  %s713_s12 = smov 87   ;;  %v458_v51 = vsel %vm457_vm5, %v619_v49, %v618_v48  ;;  %v626_v54 = vld [vmem:[%s1254_s0 + $0x1] sm:$0x1]   ;;  %v627_v55 = vld [vmem:[%s1254_s0 + $0x2] sm:$0x1]   ;;  %vm485_vm7 = vcmask 1039360   ;;  %v472_v56 = vsel %vm471_vm6, %v623_v53, %v622_v52 }
  0x17   :  { %v486_v57 = vsel %vm485_vm7, %v627_v55, %v626_v54  ;;  %v240_v58 = vld [vmem:[%s1254_s0] sm:$0x1]   ;;  %v561_v59 = vld [vmem:[%s1254_s0 + $0x7] sm:$0x1]   ;;  %v563_v60 = vld [vmem:[%s1254_s0 + $0x5] sm:$0x1]  }
  0x18   :  { %v565_v61 = vld [vmem:[%s1254_s0 + $0x3] sm:$0x1]   ;;  %v567_v62 = vld [vmem:[%s1254_s0 + $0x1] sm:$0x1]   ;;  %v569_v63 = vld [vmem:[%s1254_s0 + $0x6] sm:$0x1]  }
  0x19   :  { %s740_s20 = smov 46   ;;  %v571_v0 = vld [vmem:[%s1254_s0 + $0x4] sm:$0x1]   ;;  %v573_v1 = vld [vmem:[%s1254_s0 + $0x2] sm:$0x1]   ;;  %s742_s26 = smov 44  }
  0x1a   :  { %90 = vrot.lane.b32.xlu0 %v518_v12, %s705_s17  ;;  %97 = vrot.lane.b32.xlu1 %v520_v13, %s706_s18  ;;  %s715_s18 = smov 81   ;;  %v295_v2 = vld [vmem:[%s1254_s0] sm:$0x1]   ;;  %v576_v3 = vld [vmem:[%s1254_s0 + $0x7] sm:$0x1]   ;;  %s744_s3 = smov 38  }
  0x1b   :  { %v578_v4 = vld [vmem:[%s1254_s0 + $0x5] sm:$0x1]   ;;  %v580_v5 = vld [vmem:[%s1254_s0 + $0x3] sm:$0x1]   ;;  %v582_v6 = vld [vmem:[%s1254_s0 + $0x1] sm:$0x1]  }
  0x1c   :  { %v584_v7 = vld [vmem:[%s1254_s0 + $0x6] sm:$0x1]   ;;  %s748_s15 = smov 29   ;;  %v586_v8 = vld [vmem:[%s1254_s0 + $0x4] sm:$0x1]   ;;  %vm3_vm8 = vcmask 138240  }
  0x1d   :  { %v588_v9 = vld [vmem:[%s1254_s0 + $0x2] sm:$0x1]   ;;  %v2_v10 = vld [vmem:[%s1254_s0] sm:$0x1]   ;;  %v591_v12 = vld [vmem:[%s1254_s0 + $0x7] sm:$0x1]  }
  0x1e   :  { %104 = vrot.lane.b32.xlu0 %v522_v14, %s707_s23  ;;  %111 = vrot.lane.b32.xlu1 %v524_v15, %s708_s24  ;;  %s717_s24 = smov 79   ;;  %4 = vst.msk [vmem:[%s1255_s1] sm:$0x1] %vm3_vm8, %v2_v10   ;;  %v350_v11 = vld [vmem:[%s1254_s0] sm:$0x1]   ;;  %s751_s5 = smov 26  }
  0x1f   :  { %v593_v15 = vld [vmem:[%s1254_s0 + $0x5] sm:$0x1]   ;;  %s754_s16 = smov 19   ;;  %s755_s22 = smov 18   ;;  %vm392_vm9 = vcmask 97280   ;;  %vm406_vm10 = vcmask 89088  }
  0x20   :  { %vm395_vm11 = vcmask 138336   ;;  %vm409_vm12 = vcmask 138328   ;;  %vm420_vm13 = vcmask 80896   ;;  %vm433_vm14 = vcmask 72704  }
  0x21   :  { %vm423_vm15 = vcmask 138320   ;;  %vm436_vm0 = vcmask 138312   ;;  %vm447_vm1 = vcmask 31744   ;;  %vm461_vm2 = vcmask 23552  }
  0x22   :  { %118 = vrot.lane.b32.xlu0 %v526_v16, %s709_s29  ;;  %124 = vrot.lane.b32.xlu1 %v123_v17, %s710_s30  ;;  %s719_s30 = smov 77   ;;  %s732_s29 = smov 3   ;;  %v595_v16 = vld [vmem:[%s1254_s0 + $0x3] sm:$0x1]   ;;  %vm450_vm3 = vcmask 138272   ;;  %vm464_vm4 = vcmask 138264  }
  0x23   :  { %vm475_vm5 = vcmask 15360   ;;  %vm489_vm6 = vcmask 7168   ;;  %vm478_vm7 = vcmask 138256  }
  0x26   :  { %131 = vrot.lane.b32.xlu0 %v529_v18, %s711_s6  ;;  %138 = vrot.lane.b32.xlu1 %v531_v19, %s712_s7  ;;  %s721_s7 = smov 71   ;;  %s752_s6 = smov 21   ;;  %v597_v19 = vld [vmem:[%s1254_s0 + $0x1] sm:$0x1]  }
  0x2a   :  { %145 = vrot.lane.b32.xlu0 %v533_v20, %s713_s12  ;;  %152 = vrot.lane.b32.xlu1 %v535_v21, %s714_s13  ;;  %s723_s13 = smov 69  }
  0x2e   :  { %159 = vrot.lane.b32.xlu0 %v537_v22, %s715_s18  ;;  %166 = vrot.lane.b32.xlu1 %v539_v23, %s716_s19  ;;  %s729_s18 = smov 10   ;;  %s730_s19 = smov 9  }
  0x32   :  { %173 = vrot.lane.b32.xlu0 %v541_v24, %s717_s24  ;;  %180 = vrot.lane.b32.xlu1 %v543_v25, %s718_s25  ;;  %s741_s25 = smov 45   ;;  %s749_s24 = smov 28  }
  0x36   :  { %186 = vrot.lane.b32.xlu0 %v185_v26, %s719_s30  ;;  %193 = vrot.lane.b32.xlu1 %v546_v27, %s720_s2  ;;  %s733_s30 = smov 2   ;;  %s734_s2 = smov 1  }
  0x3a   :  { %200 = vrot.lane.b32.xlu0 %v548_v28, %s721_s7  ;;  %207 = vrot.lane.b32.xlu1 %v550_v29, %s722_s8  ;;  %s727_s8 = smov 12   ;;  %s735_s7 = smov 60  }
  0x3e   :  { %214 = vrot.lane.b32.xlu0 %v552_v30, %s723_s13  ;;  %221 = vrot.lane.b32.xlu1 %v554_v31, %s724_s14  ;;  %s737_s13 = smov 54   ;;  %s738_s14 = smov 53  }
  0x42   :  { %228 = vrot.lane.b32.xlu0 %v556_v32, %s725_s27  ;;  %235 = vrot.lane.b32.xlu1 %v558_v33, %s726_s28  ;;  %s731_s28 = smov 4  }
  0x46   :  { %390 = vrot.lane.b32.xlu0 %v389_v38, %s727_s8  ;;  %404 = vrot.lane.b32.xlu1 %v403_v39, %s728_s9  ;;  %s736_s8 = smov 55   ;;  %s746_s9 = smov 36  }
  0x4a   :  { %418 = vrot.lane.b32.xlu0 %v417_v44, %s729_s18  ;;  %431 = vrot.lane.b32.xlu1 %v430_v45, %s730_s19  ;;  %s739_s19 = smov 52  }
  0x4e   :  { %445 = vrot.lane.b32.xlu0 %v444_v50, %s731_s28  ;;  %459 = vrot.lane.b32.xlu1 %v458_v51, %s732_s29 }
  0x52   :  { %473 = vrot.lane.b32.xlu0 %v472_v56, %s733_s30  ;;  %487 = vrot.lane.b32.xlu1 %v486_v57, %s734_s2  ;;  %s743_s2 = smov 43  }
  0x56   :  { %241 = vrot.lane.b32.xlu0 %v240_v58, %s735_s7  ;;  %248 = vrot.lane.b32.xlu1 %v561_v59, %s736_s8  ;;  %s745_s8 = smov 37  }
  0x5a   :  { %255 = vrot.lane.b32.xlu0 %v563_v60, %s737_s13  ;;  %262 = vrot.lane.b32.xlu1 %v565_v61, %s738_s14  ;;  %s747_s14 = smov 35  }
  0x5e   :  { %269 = vrot.lane.b32.xlu0 %v567_v62, %s739_s19  ;;  %276 = vrot.lane.b32.xlu1 %v569_v63, %s740_s20 }
  0x62   :  { %283 = vrot.lane.b32.xlu0 %v571_v0, %s741_s25  ;;  %290 = vrot.lane.b32.xlu1 %v573_v1, %s742_s26  ;;  %s750_s25 = smov 27  }
  0x66   :  { %296 = vrot.lane.b32.xlu0 %v295_v2, %s743_s2  ;;  %303 = vrot.lane.b32.xlu1 %v576_v3, %s744_s3 }
  0x6a   :  { %310 = vrot.lane.b32.xlu0 %v578_v4, %s745_s8  ;;  %317 = vrot.lane.b32.xlu1 %v580_v5, %s746_s9 }
  0x6e   :  { %324 = vrot.lane.b32.xlu0 %v582_v6, %s747_s14  ;;  %331 = vrot.lane.b32.xlu1 %v584_v7, %s748_s15  ;;  %s753_s15 = smov 20  }
  0x72   :  { %338 = vrot.lane.b32.xlu0 %v586_v8, %s749_s24  ;;  %345 = vrot.lane.b32.xlu1 %v588_v9, %s750_s25 }
  0x74   :  { %v8_v13 = vpop.permute.xlu0 %7   ;;  %v22_v14 = vpop.permute.xlu1 %21  }
  0x75   :  { %496 = vst.msk [vmem:[%s1255_s1 + $0x35] sm:$0x1] %vm3_vm8, %v8_v13   ;;  %500 = vst.msk [vmem:[%s1255_s1 + $0x17] sm:$0x1] %vm3_vm8, %v22_v14  }
  0x76   :  { %351 = vrot.lane.b32.xlu0 %v350_v11, %s751_s5  ;;  %358 = vrot.lane.b32.xlu1 %v591_v12, %s752_s6 }
  0x78   :  { %v15_v17 = vpop.permute.xlu0 %14   ;;  %v29_v18 = vpop.permute.xlu1 %28  }
  0x79   :  { %498 = vst.msk [vmem:[%s1255_s1 + $0x26] sm:$0x1] %vm3_vm8, %v15_v17   ;;  %502 = vst.msk [vmem:[%s1255_s1 + $0x8] sm:$0x1] %vm3_vm8, %v29_v18  }
  0x7a   :  { %365 = vrot.lane.b32.xlu0 %v593_v15, %s753_s15  ;;  %372 = vrot.lane.b32.xlu1 %v595_v16, %s754_s16 }
  0x7c   :  { %v36_v20 = vpop.permute.xlu0 %35   ;;  %v43_v21 = vpop.permute.xlu1 %42  }
  0x7d   :  { %504 = vst.msk [vmem:[%s1255_s1 + $0x3d] sm:$0x1] %vm3_vm8, %v36_v20   ;;  %506 = vst.msk [vmem:[%s1255_s1 + $0x2e] sm:$0x1] %vm3_vm8, %v43_v21  }
  0x7e   :  { %379 = vrot.lane.b32.xlu0 %v597_v19, %s755_s22 }
  0x80   :  { %v50_v22 = vpop.permute.xlu0 %49   ;;  %v57_v23 = vpop.permute.xlu1 %56  }
  0x81   :  { %508 = vst.msk [vmem:[%s1255_s1 + $0x1f] sm:$0x1] %vm3_vm8, %v50_v22   ;;  %510 = vst.msk [vmem:[%s1255_s1 + $0x10] sm:$0x1] %vm3_vm8, %v57_v23  }
  0x84   :  { %v63_v24 = vpop.permute.xlu0 %62   ;;  %v70_v25 = vpop.permute.xlu1 %69  }
  0x85   :  { %511 = vst.msk [vmem:[%s1255_s1 + $0x1] sm:$0x1] %vm3_vm8, %v63_v24   ;;  %513 = vst.msk [vmem:[%s1255_s1 + $0x36] sm:$0x1] %vm3_vm8, %v70_v25  }
  0x88   :  { %v77_v26 = vpop.permute.xlu0 %76   ;;  %v84_v27 = vpop.permute.xlu1 %83  }
  0x89   :  { %515 = vst.msk [vmem:[%s1255_s1 + $0x27] sm:$0x1] %vm3_vm8, %v77_v26   ;;  %517 = vst.msk [vmem:[%s1255_s1 + $0x18] sm:$0x1] %vm3_vm8, %v84_v27  }
  0x8c   :  { %v91_v28 = vpop.permute.xlu0 %90   ;;  %v98_v29 = vpop.permute.xlu1 %97  }
  0x8d   :  { %519 = vst.msk [vmem:[%s1255_s1 + $0x9] sm:$0x1] %vm3_vm8, %v91_v28   ;;  %521 = vst.msk [vmem:[%s1255_s1 + $0x3e] sm:$0x1] %vm3_vm8, %v98_v29  }
  0x90   :  { %v105_v30 = vpop.permute.xlu0 %104   ;;  %v112_v31 = vpop.permute.xlu1 %111  }
  0x91   :  { %523 = vst.msk [vmem:[%s1255_s1 + $0x2f] sm:$0x1] %vm3_vm8, %v105_v30   ;;  %525 = vst.msk [vmem:[%s1255_s1 + $0x20] sm:$0x1] %vm3_vm8, %v112_v31  }
  0x94   :  { %v119_v32 = vpop.permute.xlu0 %118   ;;  %v125_v33 = vpop.permute.xlu1 %124  }
  0x95   :  { %527 = vst.msk [vmem:[%s1255_s1 + $0x11] sm:$0x1] %vm3_vm8, %v119_v32   ;;  %528 = vst.msk [vmem:[%s1255_s1 + $0x2] sm:$0x1] %vm3_vm8, %v125_v33  }
  0x98   :  { %v132_v34 = vpop.permute.xlu0 %131   ;;  %v139_v35 = vpop.permute.xlu1 %138  }
  0x99   :  { %530 = vst.msk [vmem:[%s1255_s1 + $0x37] sm:$0x1] %vm3_vm8, %v132_v34   ;;  %532 = vst.msk [vmem:[%s1255_s1 + $0x28] sm:$0x1] %vm3_vm8, %v139_v35  }
  0x9c   :  { %v146_v36 = vpop.permute.xlu0 %145   ;;  %v153_v37 = vpop.permute.xlu1 %152  }
  0x9d   :  { %534 = vst.msk [vmem:[%s1255_s1 + $0x19] sm:$0x1] %vm3_vm8, %v146_v36   ;;  %536 = vst.msk [vmem:[%s1255_s1 + $0xa] sm:$0x1] %vm3_vm8, %v153_v37  }
  0xa0   :  { %v160_v38 = vpop.permute.xlu0 %159   ;;  %v167_v39 = vpop.permute.xlu1 %166  }
  0xa1   :  { %538 = vst.msk [vmem:[%s1255_s1 + $0x3f] sm:$0x1] %vm3_vm8, %v160_v38   ;;  %540 = vst.msk [vmem:[%s1255_s1 + $0x30] sm:$0x1] %vm3_vm8, %v167_v39  }
  0xa4   :  { %v174_v40 = vpop.permute.xlu0 %173   ;;  %v181_v41 = vpop.permute.xlu1 %180  }
  0xa5   :  { %542 = vst.msk [vmem:[%s1255_s1 + $0x21] sm:$0x1] %vm3_vm8, %v174_v40   ;;  %544 = vst.msk [vmem:[%s1255_s1 + $0x12] sm:$0x1] %vm3_vm8, %v181_v41  }
  0xa8   :  { %v187_v42 = vpop.permute.xlu0 %186   ;;  %v194_v43 = vpop.permute.xlu1 %193  }
  0xa9   :  { %545 = vst.msk [vmem:[%s1255_s1 + $0x3] sm:$0x1] %vm3_vm8, %v187_v42   ;;  %547 = vst.msk [vmem:[%s1255_s1 + $0x38] sm:$0x1] %vm3_vm8, %v194_v43  }
  0xac   :  { %v201_v44 = vpop.permute.xlu0 %200   ;;  %v208_v45 = vpop.permute.xlu1 %207  }
  0xad   :  { %549 = vst.msk [vmem:[%s1255_s1 + $0x29] sm:$0x1] %vm3_vm8, %v201_v44   ;;  %551 = vst.msk [vmem:[%s1255_s1 + $0x1a] sm:$0x1] %vm3_vm8, %v208_v45  }
  0xb0   :  { %v215_v46 = vpop.permute.xlu0 %214   ;;  %v222_v47 = vpop.permute.xlu1 %221  }
  0xb1   :  { %553 = vst.msk [vmem:[%s1255_s1 + $0xb] sm:$0x1] %vm3_vm8, %v215_v46   ;;  %555 = vst.msk [vmem:[%s1255_s1 + $0x31] sm:$0x1] %vm3_vm8, %v222_v47  }
  0xb4   :  { %v229_v48 = vpop.permute.xlu0 %228   ;;  %v236_v49 = vpop.permute.xlu1 %235  }
  0xb5   :  { %557 = vst.msk [vmem:[%s1255_s1 + $0x22] sm:$0x1] %vm3_vm8, %v229_v48   ;;  %559 = vst.msk [vmem:[%s1255_s1 + $0x13] sm:$0x1] %vm3_vm8, %v236_v49  }
  0xb8   :  { %v391_v50 = vpop.permute.xlu0 %390   ;;  %v405_v51 = vpop.permute.xlu1 %404  }
  0xb9   :  { %601 = vst.msk [vmem:[%s1255_s1 + $0x34] sm:$0x1] %vm392_vm9, %v391_v50   ;;  %vm492_vm9 = vcmask 138248  }
  0xba   :  { %605 = vst.msk [vmem:[%s1255_s1 + $0x25] sm:$0x1] %vm406_vm10, %v405_v51  }
  0xbb   :  { %602 = vst.msk [vmem:[%s1255_s1 + $0x34] sm:$0x1] %vm395_vm11, %v391_v50  }
  0xbc   :  { %606 = vst.msk [vmem:[%s1255_s1 + $0x25] sm:$0x1] %vm409_vm12, %v405_v51   ;;  %v419_v52 = vpop.permute.xlu0 %418   ;;  %v432_v53 = vpop.permute.xlu1 %431  }
  0xbd   :  { %609 = vst.msk [vmem:[%s1255_s1 + $0x16] sm:$0x1] %vm420_vm13, %v419_v52  }
  0xbe   :  { %612 = vst.msk [vmem:[%s1255_s1 + $0x7] sm:$0x1] %vm433_vm14, %v432_v53  }
  0xbf   :  { %610 = vst.msk [vmem:[%s1255_s1 + $0x16] sm:$0x1] %vm423_vm15, %v419_v52  }
  0xc0   :  { %613 = vst.msk [vmem:[%s1255_s1 + $0x7] sm:$0x1] %vm436_vm0, %v432_v53   ;;  %v446_v54 = vpop.permute.xlu0 %445   ;;  %v460_v55 = vpop.permute.xlu1 %459  }
  0xc1   :  { %616 = vst.msk [vmem:[%s1255_s1 + $0x3c] sm:$0x1] %vm447_vm1, %v446_v54  }
  0xc2   :  { %620 = vst.msk [vmem:[%s1255_s1 + $0x2d] sm:$0x1] %vm461_vm2, %v460_v55  }
  0xc3   :  { %617 = vst.msk [vmem:[%s1255_s1 + $0x3c] sm:$0x1] %vm450_vm3, %v446_v54  }
  0xc4   :  { %621 = vst.msk [vmem:[%s1255_s1 + $0x2d] sm:$0x1] %vm464_vm4, %v460_v55   ;;  %v474_v56 = vpop.permute.xlu0 %473   ;;  %v488_v57 = vpop.permute.xlu1 %487  }
  0xc5   :  { %624 = vst.msk [vmem:[%s1255_s1 + $0x1e] sm:$0x1] %vm475_vm5, %v474_v56  }
  0xc6   :  { %628 = vst.msk [vmem:[%s1255_s1 + $0xf] sm:$0x1] %vm489_vm6, %v488_v57  }
  0xc7   :  { %625 = vst.msk [vmem:[%s1255_s1 + $0x1e] sm:$0x1] %vm478_vm7, %v474_v56  }
  0xc8   :  { %629 = vst.msk [vmem:[%s1255_s1 + $0xf] sm:$0x1] %vm492_vm9, %v488_v57   ;;  %v242_v58 = vpop.permute.xlu0 %241   ;;  %v249_v59 = vpop.permute.xlu1 %248  }
  0xc9   :  { %560 = vst.msk [vmem:[%s1255_s1 + $0x4] sm:$0x1] %vm3_vm8, %v242_v58   ;;  %562 = vst.msk [vmem:[%s1255_s1 + $0x39] sm:$0x1] %vm3_vm8, %v249_v59  }
  0xcc   :  { %v256_v60 = vpop.permute.xlu0 %255   ;;  %v263_v61 = vpop.permute.xlu1 %262  }
  0xcd   :  { %564 = vst.msk [vmem:[%s1255_s1 + $0x2a] sm:$0x1] %vm3_vm8, %v256_v60   ;;  %566 = vst.msk [vmem:[%s1255_s1 + $0x1b] sm:$0x1] %vm3_vm8, %v263_v61  }
  0xd0   :  { %v270_v62 = vpop.permute.xlu0 %269   ;;  %v277_v63 = vpop.permute.xlu1 %276  }
  0xd1   :  { %568 = vst.msk [vmem:[%s1255_s1 + $0xc] sm:$0x1] %vm3_vm8, %v270_v62   ;;  %570 = vst.msk [vmem:[%s1255_s1 + $0x32] sm:$0x1] %vm3_vm8, %v277_v63  }
  0xd4   :  { %v284_v0 = vpop.permute.xlu0 %283   ;;  %v291_v1 = vpop.permute.xlu1 %290  }
  0xd5   :  { %572 = vst.msk [vmem:[%s1255_s1 + $0x23] sm:$0x1] %vm3_vm8, %v284_v0   ;;  %574 = vst.msk [vmem:[%s1255_s1 + $0x14] sm:$0x1] %vm3_vm8, %v291_v1  }
  0xd8   :  { %v297_v2 = vpop.permute.xlu0 %296   ;;  %v304_v3 = vpop.permute.xlu1 %303  }
  0xd9   :  { %575 = vst.msk [vmem:[%s1255_s1 + $0x5] sm:$0x1] %vm3_vm8, %v297_v2   ;;  %577 = vst.msk [vmem:[%s1255_s1 + $0x3a] sm:$0x1] %vm3_vm8, %v304_v3  }
  0xdc   :  { %v311_v4 = vpop.permute.xlu0 %310   ;;  %v318_v5 = vpop.permute.xlu1 %317  }
  0xdd   :  { %579 = vst.msk [vmem:[%s1255_s1 + $0x2b] sm:$0x1] %vm3_vm8, %v311_v4   ;;  %581 = vst.msk [vmem:[%s1255_s1 + $0x1c] sm:$0x1] %vm3_vm8, %v318_v5  }
  0xe0   :  { %v325_v6 = vpop.permute.xlu0 %324   ;;  %v332_v7 = vpop.permute.xlu1 %331  }
  0xe1   :  { %583 = vst.msk [vmem:[%s1255_s1 + $0xd] sm:$0x1] %vm3_vm8, %v325_v6   ;;  %585 = vst.msk [vmem:[%s1255_s1 + $0x33] sm:$0x1] %vm3_vm8, %v332_v7  }
  0xe4   :  { %v339_v8 = vpop.permute.xlu0 %338   ;;  %v346_v9 = vpop.permute.xlu1 %345  }
  0xe5   :  { %587 = vst.msk [vmem:[%s1255_s1 + $0x24] sm:$0x1] %vm3_vm8, %v339_v8   ;;  %589 = vst.msk [vmem:[%s1255_s1 + $0x15] sm:$0x1] %vm3_vm8, %v346_v9  }
  0xe8   :  { %v352_v10 = vpop.permute.xlu0 %351   ;;  %v359_v11 = vpop.permute.xlu1 %358  }
  0xe9   :  { %590 = vst.msk [vmem:[%s1255_s1 + $0x6] sm:$0x1] %vm3_vm8, %v352_v10   ;;  %592 = vst.msk [vmem:[%s1255_s1 + $0x3b] sm:$0x1] %vm3_vm8, %v359_v11  }
  0xec   :  { %v366_v12 = vpop.permute.xlu0 %365   ;;  %v373_v13 = vpop.permute.xlu1 %372  }
  0xed   :  { %594 = vst.msk [vmem:[%s1255_s1 + $0x2c] sm:$0x1] %vm3_vm8, %v366_v12   ;;  %596 = vst.msk [vmem:[%s1255_s1 + $0x1d] sm:$0x1] %vm3_vm8, %v373_v13  }
  0xf0   :  { %v380_v14 = vpop.permute.xlu0 %379  }
  0xf1   :  { %598 = vst.msk [vmem:[%s1255_s1 + $0xe] sm:$0x1] %vm3_vm8, %v380_v14  }

// kernel: squeeze.16
= control target key start
LH: loop header
LB: loop body
LE: loop exit
PB: predicated region body
PF: predicated region fallthrough
CT: control target
= control target key end

     0   :  { %s217_s8 = smov 104   ;;  %s218_s9 = smov 112   ;;  %vm8_vm0 = vcmask 64512   ;;  %s300_s0 = inlined_call_operand.vmem [shape: f32[256], index: 0, kind: input, shape index: {}]   ;;  %s301_s1 = inlined_call_operand.vmem [shape: f32[4,1,2,4,8], index: 1, kind: output, shape index: {}]  }
   0x1   :  { %v5_v0 = vld [vmem:[%s300_s0] sm:$0x3]  ;;  %s216_s0 = smov 120   ;;  %s219_s10 = smov 96  }
   0x2   :  { %6 = vst [vmem:[#allocation1] sm:$0x3] %v5_v0  ;;  %s220_s11 = smov 88   ;;  %s221_s12 = smov 80  }
   0x3   :  { %s222_s13 = smov 72   ;;  %s223_s14 = smov 64  }
   0x4   :  { %s224_s15 = smov 56   ;;  %s225_s16 = smov 48  }
   0x5   :  { %s226_s17 = smov 40   ;;  %s227_s18 = smov 32  }
   0x6   :  { %s228_s19 = smov 24   ;;  %s229_s20 = smov 16  }
   0x7   :  { %s230_s21 = smov 8  }
   0x9   :  { %v12_v1 = vld [vmem:[#allocation1] sm:$0x3]  }
   0xa   :  { %v28_v2 = vld [vmem:[#allocation1] sm:$0x3]   ;;  %13 = vrot.lane.b32.xlu0 %v12_v1, %s216_s0 }
   0xb   :  { %29 = vrot.lane.b32.xlu1 %v28_v2, %s217_s8  ;;  %v20_v3 = vld [vmem:[#allocation1] sm:$0x3]  }
   0xc   :  { %v36_v4 = vld [vmem:[#allocation1] sm:$0x3]  }
   0xd   :  { %v7_v5 = vld [vmem:[#allocation1] sm:$0x3]  }
   0xe   :  { %21 = vrot.lane.b32.xlu0 %v20_v3, %s218_s9  ;;  %v44_v6 = vld [vmem:[#allocation1] sm:$0x3]   ;;  %9 = vst.msk [vmem:[#allocation0] sm:$0x1] %vm8_vm0, %v7_v5   ;;  %11 = vst.msk [vmem:[#allocation0 + $0x1f] sm:$0x2] %vm8_vm0, %v7_v5  }
   0xf   :  { %37 = vrot.lane.b32.xlu1 %v36_v4, %s219_s10  ;;  %v52_v7 = vld [vmem:[#allocation1] sm:$0x3]  }
  0x10   :  { %v60_v8 = vld [vmem:[#allocation1] sm:$0x3]  }
  0x11   :  { %v68_v9 = vld [vmem:[#allocation1] sm:$0x3]  }
  0x12   :  { %45 = vrot.lane.b32.xlu0 %v44_v6, %s220_s11  ;;  %v76_v10 = vld [vmem:[#allocation1] sm:$0x3]  }
  0x13   :  { %53 = vrot.lane.b32.xlu1 %v52_v7, %s221_s12  ;;  %v84_v11 = vld [vmem:[#allocation1] sm:$0x3]  }
  0x14   :  { %v92_v12 = vld [vmem:[#allocation1] sm:$0x3]  }
  0x15   :  { %v100_v13 = vld [vmem:[#allocation1] sm:$0x3]  }
  0x16   :  { %61 = vrot.lane.b32.xlu0 %v60_v8, %s222_s13  ;;  %v108_v14 = vld [vmem:[#allocation1] sm:$0x3]  }
  0x17   :  { %69 = vrot.lane.b32.xlu1 %v68_v9, %s223_s14  ;;  %v116_v15 = vld [vmem:[#allocation1] sm:$0x3]  }
  0x18   :  { %v124_v16 = vld [vmem:[#allocation1] sm:$0x3]  }
  0x1a   :  { %77 = vrot.lane.b32.xlu0 %v76_v10, %s224_s15 }
  0x1b   :  { %85 = vrot.lane.b32.xlu1 %v84_v11, %s225_s16 }
  0x1e   :  { %93 = vrot.lane.b32.xlu0 %v92_v12, %s226_s17 }
  0x1f   :  { %101 = vrot.lane.b32.xlu1 %v100_v13, %s227_s18 }
  0x22   :  { %109 = vrot.lane.b32.xlu0 %v108_v14, %s228_s19 }
  0x23   :  { %117 = vrot.lane.b32.xlu1 %v116_v15, %s229_s20 }
  0x26   :  { %125 = vrot.lane.b32.xlu0 %v124_v16, %s230_s21 }
  0x7c   :  { %v14_v17 = vpop.permute.xlu0 %13  }
  0x7d   :  { %v30_v18 = vpop.permute.xlu1 %29   ;;  %17 = vst.msk [vmem:[#allocation0 + $0x1] sm:$0x1] %vm8_vm0, %v14_v17   ;;  %19 = vst.msk [vmem:[#allocation0 + $0x20] sm:$0x2] %vm8_vm0, %v14_v17  }
  0x7e   :  { %33 = vst.msk [vmem:[#allocation0 + $0x3] sm:$0x1] %vm8_vm0, %v30_v18   ;;  %35 = vst.msk [vmem:[#allocation0 + $0x22] sm:$0x2] %vm8_vm0, %v30_v18  }
  0x80   :  { %v22_v19 = vpop.permute.xlu0 %21  }
  0x81   :  { %v38_v20 = vpop.permute.xlu1 %37   ;;  %25 = vst.msk [vmem:[#allocation0 + $0x2] sm:$0x1] %vm8_vm0, %v22_v19   ;;  %27 = vst.msk [vmem:[#allocation0 + $0x21] sm:$0x2] %vm8_vm0, %v22_v19  }
  0x82   :  { %41 = vst.msk [vmem:[#allocation0 + $0x8] sm:$0x1] %vm8_vm0, %v38_v20   ;;  %43 = vst.msk [vmem:[#allocation0 + $0x27] sm:$0x2] %vm8_vm0, %v38_v20  }
  0x84   :  { %v46_v21 = vpop.permute.xlu0 %45  }
  0x85   :  { %v54_v22 = vpop.permute.xlu1 %53   ;;  %49 = vst.msk [vmem:[#allocation0 + $0x9] sm:$0x1] %vm8_vm0, %v46_v21   ;;  %51 = vst.msk [vmem:[#allocation0 + $0x28] sm:$0x2] %vm8_vm0, %v46_v21  }
  0x86   :  { %57 = vst.msk [vmem:[#allocation0 + $0xa] sm:$0x1] %vm8_vm0, %v54_v22   ;;  %59 = vst.msk [vmem:[#allocation0 + $0x29] sm:$0x2] %vm8_vm0, %v54_v22  }
  0x88   :  { %v136_v23 = vld [vmem:[#allocation0] sm:$0xf]  ;;  %v62_v25 = vpop.permute.xlu0 %61  }
  0x89   :  { %v161_v24 = vld [vmem:[#allocation0 + $0x20] sm:$0xf]  ;;  %v70_v26 = vpop.permute.xlu1 %69   ;;  %139 = vst [vmem:[%s301_s1] sm:$0xf] %v136_v23  ;;  %65 = vst.msk [vmem:[#allocation0 + $0xb] sm:$0x1] %vm8_vm0, %v62_v25  }
  0x8a   :  { %197 = vst [vmem:[%s301_s1 + $0x10] sm:$0xf] %v161_v24  ;;  %67 = vst.msk [vmem:[#allocation0 + $0x2a] sm:$0x2] %vm8_vm0, %v62_v25  }
  0x8b   :  { %73 = vst.msk [vmem:[#allocation0 + $0x10] sm:$0x1] %vm8_vm0, %v70_v26   ;;  %75 = vst.msk [vmem:[#allocation0 + $0x2f] sm:$0x2] %vm8_vm0, %v70_v26  }
  0x8c   :  { %v78_v27 = vpop.permute.xlu0 %77  }
  0x8d   :  { %v86_v28 = vpop.permute.xlu1 %85   ;;  %81 = vst.msk [vmem:[#allocation0 + $0x11] sm:$0x1] %vm8_vm0, %v78_v27   ;;  %83 = vst.msk [vmem:[#allocation0 + $0x30] sm:$0x2] %vm8_vm0, %v78_v27  }
  0x8e   :  { %89 = vst.msk [vmem:[#allocation0 + $0x12] sm:$0x1] %vm8_vm0, %v86_v28   ;;  %91 = vst.msk [vmem:[#allocation0 + $0x31] sm:$0x2] %vm8_vm0, %v86_v28  }
  0x90   :  { %v141_v29 = vld [vmem:[#allocation0 + $0x8] sm:$0xf]  ;;  %v94_v31 = vpop.permute.xlu0 %93  }
  0x91   :  { %v168_v30 = vld [vmem:[#allocation0 + $0x28] sm:$0xf]  ;;  %v102_v32 = vpop.permute.xlu1 %101   ;;  %194 = vst [vmem:[%s301_s1 + $0x4] sm:$0xf] %v141_v29  ;;  %97 = vst.msk [vmem:[#allocation0 + $0x13] sm:$0x1] %vm8_vm0, %v94_v31  }
  0x92   :  { %198 = vst [vmem:[%s301_s1 + $0x14] sm:$0xf] %v168_v30  ;;  %99 = vst.msk [vmem:[#allocation0 + $0x32] sm:$0x2] %vm8_vm0, %v94_v31  }
  0x93   :  { %105 = vst.msk [vmem:[#allocation0 + $0x18] sm:$0x1] %vm8_vm0, %v102_v32   ;;  %107 = vst.msk [vmem:[#allocation0 + $0x37] sm:$0x2] %vm8_vm0, %v102_v32  }
  0x94   :  { %v110_v33 = vpop.permute.xlu0 %109  }
  0x95   :  { %v118_v34 = vpop.permute.xlu1 %117   ;;  %113 = vst.msk [vmem:[#allocation0 + $0x19] sm:$0x1] %vm8_vm0, %v110_v33   ;;  %115 = vst.msk [vmem:[#allocation0 + $0x38] sm:$0x2] %vm8_vm0, %v110_v33  }
  0x96   :  { %121 = vst.msk [vmem:[#allocation0 + $0x1a] sm:$0x1] %vm8_vm0, %v118_v34   ;;  %123 = vst.msk [vmem:[#allocation0 + $0x39] sm:$0x2] %vm8_vm0, %v118_v34  }
  0x98   :  { %v147_v35 = vld [vmem:[#allocation0 + $0x10] sm:$0xf]  ;;  %v126_v37 = vpop.permute.xlu0 %125  }
  0x99   :  { %v175_v36 = vld [vmem:[#allocation0 + $0x30] sm:$0xf]  ;;  %195 = vst [vmem:[%s301_s1 + $0x8] sm:$0xf] %v147_v35  ;;  %129 = vst.msk [vmem:[#allocation0 + $0x1b] sm:$0x1] %vm8_vm0, %v126_v37  }
  0x9a   :  { %199 = vst [vmem:[%s301_s1 + $0x18] sm:$0xf] %v175_v36  ;;  %131 = vst.msk [vmem:[#allocation0 + $0x3a] sm:$0x2] %vm8_vm0, %v126_v37  }
  0xa0   :  { %v154_v38 = vld [vmem:[#allocation0 + $0x18] sm:$0xf] }
  0xa1   :  { %v182_v39 = vld [vmem:[#allocation0 + $0x38] sm:$0xf]  ;;  %196 = vst [vmem:[%s301_s1 + $0xc] sm:$0xf] %v154_v38 }
  0xa2   :  { %200 = vst [vmem:[%s301_s1 + $0x1c] sm:$0xf] %v182_v39 }

</bundles_post_ra>
